<compile_context>
chip_gen: v7x
topology: tpu7x:2x2x1
jax: 0.10.0
libtpu: 0.0.40
codegen_flags: <defaults>
</compile_context>

<pallas_src>
import functools

import jax
import jax.numpy as jnp
from jax import lax
from jax.experimental import pallas as pl
from jax.experimental.pallas import tpu as pltpu

_ROWS = 512    # sublane rows per chunk (power of two, multiple of 8)
_LANE = 256    # lane width per chunk (multiple of 128; <= 256 so bf16 row sums are exact)
_CHUNK = _ROWS * _LANE

assert _ROWS >= 8 and (_ROWS & (_ROWS - 1)) == 0
assert _LANE % 128 == 0 and _LANE <= 256   # bf16-exactness bound for per-row sums


def _lovasz_kernel(gts_ref, off_ref, nkey_ref, gt_ref, tri_ref, ltri_ref,
                   out_ref, *, n_valid):
    k = pl.program_id(0)
    rows, lane = nkey_ref.shape

    gt_bf = gt_ref[...]                       # (rows, lane) bf16 in {0,1}, sorted by err desc
    gt = gt_bf.astype(jnp.float32)
    err = -nkey_ref[...]                      # hinge errors (descending)
    gts = gts_ref[0]                          # total number of positive labels (f32)
    base = off_ref[k]                         # positives in earlier chunks (f32, exact)

    # ---- global inclusive cumsum of gt_sorted over this chunk --------------------
    # within-row inclusive cumsum: one bf16 MXU matmul (0/1 values, f32 accumulation)
    rowcum = jnp.dot(gt_bf, tri_ref[...], preferred_element_type=jnp.float32)
    # cross-row carry: exclusive prefix of the per-row sums (= last column of rowcum)
    # via a tiny strict-lower-tri matmul; row sums <= _LANE = 256 are exact in bf16.
    row_sum = rowcum[:, lane - 1:lane].astype(jnp.bfloat16)           # (rows, 1)
    excl_rows = jnp.dot(ltri_ref[...], row_sum,
                        preferred_element_type=jnp.float32)           # (rows, 1)
    cum = base + excl_rows + rowcum           # inclusive cumsum of gt_sorted (global)

    # ---- global 0-based index (exact in f32 for n < 2**24) -----------------------
    r_idx = lax.broadcasted_iota(jnp.int32, (rows, lane), 0)
    l_idx = lax.broadcasted_iota(jnp.int32, (rows, lane), 1)
    idx_i = k * (rows * lane) + r_idx * lane + l_idx
    idx = idx_i.astype(jnp.float32)

    # ---- lovasz_grad as a single rational expression ------------------------------
    #   u = union[i] = gts + (i+1) - cum[i],  a = intersection[i] = gts - cum[i]
    #   grad[i] = (gt*u + (1-gt)*a) / (u * (u - 1 + gt))    (also holds at i == 0)
    u = gts + (idx + 1.0) - cum
    a = gts - cum
    den = u * (u - 1.0 + gt)
    den = jnp.where(den == 0.0, 1.0, den)     # denominator is 0 only when gts==0 at i==0
    grad = (gt * u + (1.0 - gt) * a) / den
    grad = jnp.where((idx_i == 0) & (gts == 0.0), 1.0, grad)

    # ---- ELU(err) + 1 (exp on EUP), explicit mask over the padded tail ------------
    act = jnp.where(err > 0.0, err + 1.0, jnp.exp(err))
    act = jnp.where(idx_i < n_valid, act, 0.0)

    # ---- partial dot product: tree-fold sublanes to a lane-dense (8, lane) block --
    v = act * grad
    while v.shape[0] > 8:
        h = v.shape[0] // 2
        v = v[:h, :] + v[h:, :]
    out_ref[...] = v


def lovasz_loss(preds, labels):
    p = preds.reshape(-1).astype(jnp.float32)
    l = labels.reshape(-1).astype(jnp.float32)
    n = p.shape[0]

    # Hinge fused into the (negated) sort key: ascending sort of p*(2l-1)-1 gives
    # the hinge errors 1 - p*(2l-1) in descending order, labels carried along.
    neg_err = p * (2.0 * l - 1.0) - 1.0
    # TODO(synk): the descending sort has no Pallas TPU primitive; lax.sort_key_val in JAX.
    nkey_sorted, gt_sorted = lax.sort_key_val(neg_err, l)

    nc = (n + _CHUNK - 1) // _CHUNK
    n_pad = nc * _CHUNK
    pad = n_pad - n
    # Padded tail: gt = 0 keeps the cumsum exact; err contributions are masked
    # in-kernel by idx < n (no reliance on exp underflow).
    nkey_p = jnp.pad(nkey_sorted, (0, pad))
    gt_p = jnp.pad(gt_sorted, (0, pad))

    nkey2d = nkey_p.reshape(nc * _ROWS, _LANE)
    gt2d = gt_p.reshape(nc * _ROWS, _LANE).astype(jnp.bfloat16)   # 0/1 exact, halves traffic

    gts = jnp.sum(l).reshape(1)                                   # (1,) f32 -> SMEM

    # Per-chunk exclusive prefix of positive counts: removes the sequential in-kernel
    # carry so the single grid axis can be "parallel" (sharded across TCs on v7x).
    chunk_sums = gt_p.reshape(nc, _CHUNK).sum(axis=1)
    chunk_off = jnp.concatenate(
        [jnp.zeros((1,), jnp.float32), jnp.cumsum(chunk_sums)[:-1]])

    # Constant matmul operands; constant index_map -> DMA'd once per core, reused.
    li = jnp.arange(_LANE, dtype=jnp.int32)
    tri = (li[:, None] <= li[None, :]).astype(jnp.bfloat16)       # (LANE,LANE) incl. upper
    ri = jnp.arange(_ROWS, dtype=jnp.int32)
    ltri = (ri[None, :] < ri[:, None]).astype(jnp.bfloat16)       # (ROWS,ROWS) strict lower

    grid_spec = pltpu.PrefetchScalarGridSpec(
        num_scalar_prefetch=0,
        grid=(nc,),
        in_specs=[
            pl.BlockSpec(memory_space=pltpu.MemorySpace.SMEM),    # gts (scalar)
            pl.BlockSpec(memory_space=pltpu.MemorySpace.SMEM),    # per-chunk gt offsets
            pl.BlockSpec((_ROWS, _LANE), lambda k: (k, 0)),       # sorted -err chunk
            pl.BlockSpec((_ROWS, _LANE), lambda k: (k, 0)),       # sorted gt chunk (bf16)
            pl.BlockSpec((_LANE, _LANE), lambda k: (0, 0)),       # inclusive upper tri
            pl.BlockSpec((_ROWS, _ROWS), lambda k: (0, 0)),       # strict lower tri
        ],
        out_specs=pl.BlockSpec((8, _LANE), lambda k: (k, 0)),     # lane-dense partials
    )
    partial = pl.pallas_call(
        functools.partial(_lovasz_kernel, n_valid=n),
        out_shape=jax.ShapeDtypeStruct((nc * 8, _LANE), jnp.float32),
        grid_spec=grid_spec,
        compiler_params=pltpu.CompilerParams(
            dimension_semantics=("parallel",),      # no cross-step carry -> megacore OK
            vmem_limit_bytes=32 * 1024 * 1024),
    )(gts, chunk_off, nkey2d, gt2d, tri, ltri)
    # Final (nc*8, LANE) -> scalar reduction is tiny; done in plain JAX.
    return jnp.sum(partial)


def _ref_lovasz(preds, labels):
    # Pure-JAX reference mirroring the PyTorch module (for correctness check).
    p = preds.reshape(-1).astype(jnp.float32)
    l = labels.reshape(-1).astype(jnp.float32)
    errors = 1.0 - p * (2.0 * l - 1.0)
    order = jnp.argsort(-errors)
    es = errors[order]
    gs = l[order]
    gts = gs.sum()
    inter = gts - jnp.cumsum(gs)
    union = gts + jnp.cumsum(1.0 - gs)
    jac = 1.0 - inter / union
    grad = jnp.concatenate([jac[:1], jac[1:] - jac[:-1]])
    return jnp.dot(jax.nn.elu(es) + 1.0, grad)


if __name__ == "__main__":
    key = jax.random.PRNGKey(0)
    kp, kl = jax.random.split(key)
    # small NCHW shapes consistent with a binary segmentation loss: N = 2*1*16*16 = 512
    preds = jax.random.normal(kp, (2, 1, 16, 16), dtype=jnp.float32)
    labels = jax.random.bernoulli(kl, 0.5, (2, 1, 16, 16)).astype(jnp.float32)

    loss_fn = jax.jit(lovasz_loss)
    loss = jax.block_until_ready(loss_fn(preds, labels))
    ref = jax.block_until_ready(_ref_lovasz(preds, labels))
    assert jnp.allclose(loss, ref, rtol=1e-4, atol=1e-4), (loss, ref)
    print("KERNEL_OK")
</pallas_src>

<mosaic_0001>
module attributes {stable_mosaic.version = 11 : i64} {
  func.func @_lovasz_kernel(%arg0: i32, %arg1: memref<1xf32, #tpu.memory_space<smem>>, %arg2: memref<1xf32, #tpu.memory_space<smem>>, %arg3: memref<512x256xf32, #tpu.memory_space<vmem>>, %arg4: memref<512x256xbf16, #tpu.memory_space<vmem>>, %arg5: memref<256x256xbf16, #tpu.memory_space<vmem>>, %arg6: memref<512x512xbf16, #tpu.memory_space<vmem>>, %arg7: memref<8x256xf32, #tpu.memory_space<vmem>>) attributes {dimension_semantics = [#tpu.dimension_semantics<parallel>], iteration_bounds = array<i64: 1>, scalar_prefetch = 0 : i64, scratch_operands = 0 : i64, tpu.core_type = #tpu.core_type<tc>, window_params = [{transform_indices = @transform_0, window_bounds = array<i64: 1>}, {transform_indices = @transform_1, window_bounds = array<i64: 1>}, {transform_indices = @transform_2, window_bounds = array<i64: 512, 256>}, {transform_indices = @transform_3, window_bounds = array<i64: 512, 256>}, {pipeline_mode = #tpu.pipeline_mode<synchronous>, transform_indices = @transform_4, window_bounds = array<i64: 256, 256>}, {pipeline_mode = #tpu.pipeline_mode<synchronous>, transform_indices = @transform_5, window_bounds = array<i64: 512, 512>}, {transform_indices = @transform_6, window_bounds = array<i64: 8, 256>}]} {
    %c0 = arith.constant 0 : index
    %c0_0 = arith.constant 0 : index
    %0 = vector.load %arg4[%c0, %c0_0] : memref<512x256xbf16, #tpu.memory_space<vmem>>, vector<512x256xbf16>
    %1 = arith.extf %0 : vector<512x256xbf16> to vector<512x256xf32>
    %c0_1 = arith.constant 0 : index
    %c0_2 = arith.constant 0 : index
    %2 = vector.load %arg3[%c0_1, %c0_2] : memref<512x256xf32, #tpu.memory_space<vmem>>, vector<512x256xf32>
    %cst = arith.constant 0.000000e+00 : f32
    %3 = vector.broadcast %cst : f32 to vector<512x256xf32>
    %4 = arith.subf %3, %2 : vector<512x256xf32>
    %c0_3 = arith.constant 0 : index
    %5 = memref.load %arg1[%c0_3] : memref<1xf32, #tpu.memory_space<smem>>
    %6 = arith.index_cast %arg0 : i32 to index
    %7 = memref.load %arg2[%6] : memref<1xf32, #tpu.memory_space<smem>>
    %c0_4 = arith.constant 0 : index
    %c0_5 = arith.constant 0 : index
    %8 = vector.load %arg5[%c0_4, %c0_5] : memref<256x256xbf16, #tpu.memory_space<vmem>>, vector<256x256xbf16>
    %cst_6 = arith.constant dense<0.000000e+00> : vector<512x256xf32>
    %9 = tpu.matmul %0, %8, %cst_6 {dimension_numbers = #tpu.dot_dimension_numbers<[1], [0], [0], [1], [0, 0, 1, 1], [], []>} : vector<512x256xbf16>, vector<256x256xbf16>, vector<512x256xf32> -> vector<512x256xf32>
    %10 = vector.extract_strided_slice %9 {offsets = [0, 255], sizes = [512, 1], strides = [1, 1]} : vector<512x256xf32> to vector<512x1xf32>
    %11 = arith.truncf %10 : vector<512x1xf32> to vector<512x1xbf16>
    %c0_7 = arith.constant 0 : index
    %c0_8 = arith.constant 0 : index
    %12 = vector.load %arg6[%c0_7, %c0_8] : memref<512x512xbf16, #tpu.memory_space<vmem>>, vector<512x512xbf16>
    %cst_9 = arith.constant dense<0.000000e+00> : vector<512x1xf32>
    %13 = tpu.matmul %12, %11, %cst_9 {dimension_numbers = #tpu.dot_dimension_numbers<[1], [0], [0], [1], [0, 0, 1, 1], [], []>} : vector<512x512xbf16>, vector<512x1xbf16>, vector<512x1xf32> -> vector<512x1xf32>
    %14 = vector.broadcast %7 : f32 to vector<512x1xf32>
    %15 = arith.addf %14, %13 : vector<512x1xf32>
    %16 = vector.broadcast %15 : vector<512x1xf32> to vector<512x256xf32>
    %17 = arith.addf %16, %9 : vector<512x256xf32>
    %18 = tpu.iota {dimensions = array<i32: 0>} : vector<512x256xi32>
    %19 = tpu.iota {dimensions = array<i32: 1>} : vector<512x256xi32>
    %c131072_i32 = arith.constant 131072 : i32
    %20 = arith.muli %arg0, %c131072_i32 : i32
    %c256_i32 = arith.constant 256 : i32
    %21 = vector.broadcast %c256_i32 : i32 to vector<512x256xi32>
    %22 = arith.muli %18, %21 : vector<512x256xi32>
    %23 = vector.broadcast %20 : i32 to vector<512x256xi32>
    %24 = arith.addi %23, %22 : vector<512x256xi32>
    %25 = arith.addi %24, %19 : vector<512x256xi32>
    %26 = arith.sitofp %25 : vector<512x256xi32> to vector<512x256xf32>
    %cst_10 = arith.constant 1.000000e+00 : f32
    %27 = vector.broadcast %cst_10 : f32 to vector<512x256xf32>
    %28 = arith.addf %26, %27 : vector<512x256xf32>
    %29 = vector.broadcast %5 : f32 to vector<512x256xf32>
    %30 = arith.addf %29, %28 : vector<512x256xf32>
    %31 = arith.subf %30, %17 : vector<512x256xf32>
    %32 = vector.broadcast %5 : f32 to vector<512x256xf32>
    %33 = arith.subf %32, %17 : vector<512x256xf32>
    %cst_11 = arith.constant 1.000000e+00 : f32
    %34 = vector.broadcast %cst_11 : f32 to vector<512x256xf32>
    %35 = arith.subf %31, %34 : vector<512x256xf32>
    %36 = arith.addf %35, %1 : vector<512x256xf32>
    %37 = arith.mulf %31, %36 : vector<512x256xf32>
    %cst_12 = arith.constant 0.000000e+00 : f32
    %38 = vector.broadcast %cst_12 : f32 to vector<512x256xf32>
    %39 = arith.cmpf oeq, %37, %38 : vector<512x256xf32>
    %cst_13 = arith.constant 1.000000e+00 : f32
    %40 = vector.broadcast %cst_13 : f32 to vector<512x256xf32>
    %41 = arith.select %39, %40, %37 : vector<512x256xi1>, vector<512x256xf32>
    %42 = arith.mulf %1, %31 : vector<512x256xf32>
    %cst_14 = arith.constant 1.000000e+00 : f32
    %43 = vector.broadcast %cst_14 : f32 to vector<512x256xf32>
    %44 = arith.subf %43, %1 : vector<512x256xf32>
    %45 = arith.mulf %44, %33 : vector<512x256xf32>
    %46 = arith.addf %42, %45 : vector<512x256xf32>
    %47 = arith.divf %46, %41 : vector<512x256xf32>
    %c0_i32 = arith.constant 0 : i32
    %48 = vector.broadcast %c0_i32 : i32 to vector<512x256xi32>
    %49 = arith.cmpi eq, %25, %48 : vector<512x256xi32>
    %cst_15 = arith.constant 0.000000e+00 : f32
    %50 = arith.cmpf oeq, %5, %cst_15 : f32
    %51 = vector.broadcast %50 : i1 to vector<512x256xi1>
    %52 = arith.andi %49, %51 : vector<512x256xi1>
    %cst_16 = arith.constant 1.000000e+00 : f32
    %53 = vector.broadcast %cst_16 : f32 to vector<512x256xf32>
    %54 = arith.select %52, %53, %47 : vector<512x256xi1>, vector<512x256xf32>
    %cst_17 = arith.constant 0.000000e+00 : f32
    %55 = vector.broadcast %cst_17 : f32 to vector<512x256xf32>
    %56 = arith.cmpf ogt, %4, %55 : vector<512x256xf32>
    %cst_18 = arith.constant 1.000000e+00 : f32
    %57 = vector.broadcast %cst_18 : f32 to vector<512x256xf32>
    %58 = arith.addf %4, %57 : vector<512x256xf32>
    %59 = math.exp %4 : vector<512x256xf32>
    %60 = arith.select %56, %58, %59 : vector<512x256xi1>, vector<512x256xf32>
    %c512_i32 = arith.constant 512 : i32
    %61 = vector.broadcast %c512_i32 : i32 to vector<512x256xi32>
    %62 = arith.cmpi slt, %25, %61 : vector<512x256xi32>
    %cst_19 = arith.constant 0.000000e+00 : f32
    %63 = vector.broadcast %cst_19 : f32 to vector<512x256xf32>
    %64 = arith.select %62, %60, %63 : vector<512x256xi1>, vector<512x256xf32>
    %65 = arith.mulf %64, %54 : vector<512x256xf32>
    %66 = vector.extract_strided_slice %65 {offsets = [0, 0], sizes = [256, 256], strides = [1, 1]} : vector<512x256xf32> to vector<256x256xf32>
    %67 = vector.extract_strided_slice %65 {offsets = [256, 0], sizes = [256, 256], strides = [1, 1]} : vector<512x256xf32> to vector<256x256xf32>
    %68 = arith.addf %66, %67 : vector<256x256xf32>
    %69 = vector.extract_strided_slice %68 {offsets = [0, 0], sizes = [128, 256], strides = [1, 1]} : vector<256x256xf32> to vector<128x256xf32>
    %70 = vector.extract_strided_slice %68 {offsets = [128, 0], sizes = [128, 256], strides = [1, 1]} : vector<256x256xf32> to vector<128x256xf32>
    %71 = arith.addf %69, %70 : vector<128x256xf32>
    %72 = vector.extract_strided_slice %71 {offsets = [0, 0], sizes = [64, 256], strides = [1, 1]} : vector<128x256xf32> to vector<64x256xf32>
    %73 = vector.extract_strided_slice %71 {offsets = [64, 0], sizes = [64, 256], strides = [1, 1]} : vector<128x256xf32> to vector<64x256xf32>
    %74 = arith.addf %72, %73 : vector<64x256xf32>
    %75 = vector.extract_strided_slice %74 {offsets = [0, 0], sizes = [32, 256], strides = [1, 1]} : vector<64x256xf32> to vector<32x256xf32>
    %76 = vector.extract_strided_slice %74 {offsets = [32, 0], sizes = [32, 256], strides = [1, 1]} : vector<64x256xf32> to vector<32x256xf32>
    %77 = arith.addf %75, %76 : vector<32x256xf32>
    %78 = vector.extract_strided_slice %77 {offsets = [0, 0], sizes = [16, 256], strides = [1, 1]} : vector<32x256xf32> to vector<16x256xf32>
    %79 = vector.extract_strided_slice %77 {offsets = [16, 0], sizes = [16, 256], strides = [1, 1]} : vector<32x256xf32> to vector<16x256xf32>
    %80 = arith.addf %78, %79 : vector<16x256xf32>
    %81 = vector.extract_strided_slice %80 {offsets = [0, 0], sizes = [8, 256], strides = [1, 1]} : vector<16x256xf32> to vector<8x256xf32>
    %82 = vector.extract_strided_slice %80 {offsets = [8, 0], sizes = [8, 256], strides = [1, 1]} : vector<16x256xf32> to vector<8x256xf32>
    %83 = arith.addf %81, %82 : vector<8x256xf32>
    %c0_20 = arith.constant 0 : index
    %c0_21 = arith.constant 0 : index
    %84 = vector.load %arg7[%c0_20, %c0_21] : memref<8x256xf32, #tpu.memory_space<vmem>>, vector<8x256xf32>
    tpu.vector_store %arg7[%c0_20, %c0_21], %83 {strides = array<i32>} : memref<8x256xf32, #tpu.memory_space<vmem>>, vector<8x256xf32>,
    return
  }
  func.func @transform_0(%arg0: i32) -> i32 {
    %c0_i32 = arith.constant 0 : i32
    %c0_i32_0 = arith.constant 0 : i32
    return %c0_i32 : i32
  }
  func.func @transform_1(%arg0: i32) -> i32 {
    %c0_i32 = arith.constant 0 : i32
    %c0_i32_0 = arith.constant 0 : i32
    return %c0_i32 : i32
  }
  func.func @transform_2(%arg0: i32) -> (i32, i32) {
    %c0_i32 = arith.constant 0 : i32
    %c0_i32_0 = arith.constant 0 : i32
    return %arg0, %c0_i32 : i32, i32
  }
  func.func @transform_3(%arg0: i32) -> (i32, i32) {
    %c0_i32 = arith.constant 0 : i32
    %c0_i32_0 = arith.constant 0 : i32
    return %arg0, %c0_i32 : i32, i32
  }
  func.func @transform_4(%arg0: i32) -> (i32, i32) {
    %c0_i32 = arith.constant 0 : i32
    %c0_i32_0 = arith.constant 0 : i32
    %c0_i32_1 = arith.constant 0 : i32
    return %c0_i32, %c0_i32_0 : i32, i32
  }
  func.func @transform_5(%arg0: i32) -> (i32, i32) {
    %c0_i32 = arith.constant 0 : i32
    %c0_i32_0 = arith.constant 0 : i32
    %c0_i32_1 = arith.constant 0 : i32
    return %c0_i32, %c0_i32_0 : i32, i32
  }
  func.func @transform_6(%arg0: i32) -> (i32, i32) {
    %c0_i32 = arith.constant 0 : i32
    %c0_i32_0 = arith.constant 0 : i32
    return %arg0, %c0_i32 : i32, i32
  }
}

</mosaic_0001>

<bundles_post_ra>
// kernel: lovasz_loss.1
= control target key start
LH: loop header
LB: loop body
LE: loop exit
PB: predicated region body
PF: predicated region fallthrough
CT: control target
= control target key end

     0   :  { %s8548_s16 = smov 1   ;;  %s16201_s4 = inlined_call_operand.vmem [shape: bf16[256,256], index: 4, kind: input, shape index: {}]   ;;  %s16202_s3 = inlined_call_operand.vmem [shape: bf16[512,256], index: 3, kind: input, shape index: {}]   ;;  %s16203_s5 = inlined_call_operand.vmem [shape: bf16[512,512], index: 5, kind: input, shape index: {}]   ;;  %s16204_s1 = inlined_call_operand.<no memory space> [shape: f32[1], index: 1, kind: input, shape index: {}]   ;;  %s16205_s2 = inlined_call_operand.vmem [shape: f32[512,256], index: 2, kind: input, shape index: {}]   ;;  %s16206_s0 = inlined_call_operand.<no memory space> [shape: f32[1], index: 0, kind: input, shape index: {}]   ;;  %s16207_s6 = inlined_call_operand.vmem [shape: f32[8,256], index: 6, kind: output, shape index: {}]  }
   0x1   :  { %v7667_v0 = vld [vmem:[%s16201_s4 + $0x4] ss:$8 sps:$4 sm:$0xff]   ;;  %v7669_v1 = vld [vmem:[%s16201_s4] ss:$8 sps:$4 sm:$0xff]   ;;  %v7670_v2 = vld [vmem:[%s16201_s4 + $0x14] ss:$8 sps:$4 sm:$0xff]  }
   0x2   :  { %988 = vmatprep.subr.bf16.mxu0 %v7667_v0  ;;  %7631 = vmatprep.subr.bf16.mxu1 %v7667_v0  ;;  %v7672_v3 = vld [vmem:[%s16201_s4 + $0x10] ss:$8 sps:$4 sm:$0xff]   ;;  %v7673_v4 = vld [vmem:[%s16201_s4 + $0x24] ss:$8 sps:$4 sm:$0xff]   ;;  %v7675_v5 = vld [vmem:[%s16201_s4 + $0x20] ss:$8 sps:$4 sm:$0xff]  }
   0x3   :  { %989 = vmatpush1.bf16.msra.mxu0 %v7669_v1  ;;  %7647 = vmatpush1.bf16.msra.mxu1 %v7669_v1  ;;  %v7676_v6 = vld [vmem:[%s16201_s4 + $0x34] ss:$8 sps:$4 sm:$0xff]   ;;  %v7678_v7 = vld [vmem:[%s16201_s4 + $0x30] ss:$8 sps:$4 sm:$0xff]   ;;  %v7679_v8 = vld [vmem:[%s16201_s4 + $0x44] ss:$8 sps:$4 sm:$0xff]  }
   0x4   :  { %990 = vmatprep.subr.bf16.mxu0 %v7670_v2  ;;  %7632 = vmatprep.subr.bf16.mxu1 %v7670_v2  ;;  %v7681_v9 = vld [vmem:[%s16201_s4 + $0x40] ss:$8 sps:$4 sm:$0xff]   ;;  %v7682_v10 = vld [vmem:[%s16201_s4 + $0x54] ss:$8 sps:$4 sm:$0xff]   ;;  %v7684_v11 = vld [vmem:[%s16201_s4 + $0x50] ss:$8 sps:$4 sm:$0xff]  }
   0x5   :  { %v7685_v12 = vld [vmem:[%s16201_s4 + $0x64] ss:$8 sps:$4 sm:$0xff]   ;;  %v7687_v17 = vld [vmem:[%s16201_s4 + $0x60] ss:$8 sps:$4 sm:$0xff]   ;;  %v7688_v19 = vld [vmem:[%s16201_s4 + $0x74] ss:$8 sps:$4 sm:$0xff]  }
   0x6   :  { %v8626_v13 = vld [vmem:[%s16202_s3] sm:$0xff]  ;;  %v8631_v14 = vld [vmem:[%s16202_s3 + $0x8] sm:$0xff]  ;;  %v7690_v21 = vld [vmem:[%s16201_s4 + $0x70] ss:$8 sps:$4 sm:$0xff]   ;;  %p5863_p0 = scmp.eq.f32.partialorder %s16206_s0, 0.0 }
   0x7   :  { %991 = vmatpush1.bf16.msra.mxu0 %v7672_v3  ;;  %7648 = vmatpush1.bf16.msra.mxu1 %v7672_v3  ;;  %v8636_v15 = vld [vmem:[%s16202_s3 + $0x100] sm:$0xff]  ;;  %v8641_v16 = vld [vmem:[%s16202_s3 + $0x108] sm:$0xff]  ;;  %v7280_v18 = vcombine.high %v8626_v13, %v8631_v14  ;;  %v7694_v24 = vld [vmem:[%s16201_s4 + $0x94] ss:$8 sps:$4 sm:$0xff]   ;;  %v7279_v42 = vcombine.low %v8626_v13, %v8631_v14 }
   0x8   :  { %992 = vmatprep.subr.bf16.mxu0 %v7673_v4  ;;  %7633 = vmatprep.subr.bf16.mxu1 %v7673_v4  ;;  %v7312_v20 = vcombine.high %v8636_v15, %v8641_v16  ;;  %v7691_v22 = vld [vmem:[%s16201_s4 + $0x84] ss:$8 sps:$4 sm:$0xff]   ;;  %v7693_v23 = vld [vmem:[%s16201_s4 + $0x80] ss:$8 sps:$4 sm:$0xff]   ;;  %v7696_v25 = vld [vmem:[%s16201_s4 + $0x90] ss:$8 sps:$4 sm:$0xff]   ;;  %v7311_v43 = vcombine.low %v8636_v15, %v8641_v16 }
   0x9   :  { %1020 = vmatprep.mubr.bf16.mxu0 %v7280_v18  ;;  %v7697_v26 = vld [vmem:[%s16201_s4 + $0xa4] ss:$8 sps:$4 sm:$0xff]   ;;  %v7699_v27 = vld [vmem:[%s16201_s4 + $0xa0] ss:$8 sps:$4 sm:$0xff]   ;;  %v7700_v28 = vld [vmem:[%s16201_s4 + $0xb4] ss:$8 sps:$4 sm:$0xff]  }
   0xa   :  { %1180 = vmatprep.mubr.bf16.mxu1 %v7312_v20  ;;  %v7702_v29 = vld [vmem:[%s16201_s4 + $0xb0] ss:$8 sps:$4 sm:$0xff]   ;;  %v7703_v30 = vld [vmem:[%s16201_s4 + $0xc4] ss:$8 sps:$4 sm:$0xff]   ;;  %v7705_v31 = vld [vmem:[%s16201_s4 + $0xc0] ss:$8 sps:$4 sm:$0xff]  }
   0xb   :  { %993 = vmatpush1.bf16.msra.mxu0 %v7675_v5  ;;  %7649 = vmatpush1.bf16.msra.mxu1 %v7675_v5  ;;  %v7706_v32 = vld [vmem:[%s16201_s4 + $0xd4] ss:$8 sps:$4 sm:$0xff]   ;;  %v7708_v33 = vld [vmem:[%s16201_s4 + $0xd0] ss:$8 sps:$4 sm:$0xff]   ;;  %v7709_v34 = vld [vmem:[%s16201_s4 + $0xe4] ss:$8 sps:$4 sm:$0xff]  }
   0xc   :  { %994 = vmatprep.subr.bf16.mxu0 %v7676_v6  ;;  %7634 = vmatprep.subr.bf16.mxu1 %v7676_v6  ;;  %v7711_v35 = vld [vmem:[%s16201_s4 + $0xe0] ss:$8 sps:$4 sm:$0xff]   ;;  %v7712_v36 = vld [vmem:[%s16201_s4 + $0xf4] ss:$8 sps:$4 sm:$0xff]   ;;  %v7714_v37 = vld [vmem:[%s16201_s4 + $0xf0] ss:$8 sps:$4 sm:$0xff]  }
   0xd   :  { %v28_v38 = vld [vmem:[%s16202_s3 + $0x10] sm:$0xff]  ;;  %v29_v39 = vld [vmem:[%s16202_s3 + $0x18] sm:$0xff]  ;;  %v30_v46 = vld [vmem:[%s16202_s3 + $0x20] sm:$0xff]  ;;  %s10263_s9 = scalar_select %p5863_p0, 1, 0 }
   0xe   :  { %v60_v40 = vld [vmem:[%s16202_s3 + $0x110] sm:$0xff]  ;;  %v61_v41 = vld [vmem:[%s16202_s3 + $0x118] sm:$0xff]  ;;  %v7282_v44 = vcombine.high %v28_v38, %v29_v39  ;;  %v31_v47 = vld [vmem:[%s16202_s3 + $0x28] sm:$0xff]  ;;  %v7281_v50 = vcombine.low %v28_v38, %v29_v39 }
   0xf   :  { %995 = vmatpush1.bf16.msra.mxu0 %v7678_v7  ;;  %7650 = vmatpush1.bf16.msra.mxu1 %v7678_v7  ;;  %v7314_v45 = vcombine.high %v60_v40, %v61_v41  ;;  %v62_v48 = vld [vmem:[%s16202_s3 + $0x120] sm:$0xff]  ;;  %v63_v49 = vld [vmem:[%s16202_s3 + $0x128] sm:$0xff]  ;;  %v7313_v51 = vcombine.low %v60_v40, %v61_v41  ;;  %v7284_v52 = vcombine.high %v30_v46, %v31_v47  ;;  %v32_v54 = vld [vmem:[%s16202_s3 + $0x30] sm:$0xff] }
  0x10   :  { %996 = vmatprep.subr.bf16.mxu0 %v7679_v8  ;;  %7635 = vmatprep.subr.bf16.mxu1 %v7679_v8  ;;  %v7316_v53 = vcombine.high %v62_v48, %v63_v49  ;;  %v33_v55 = vld [vmem:[%s16202_s3 + $0x38] sm:$0xff]  ;;  %v64_v56 = vld [vmem:[%s16202_s3 + $0x130] sm:$0xff]  ;;  %v7283_v58 = vcombine.low %v30_v46, %v31_v47  ;;  %v7315_v59 = vcombine.low %v62_v48, %v63_v49  ;;  %v34_v62 = vld [vmem:[%s16202_s3 + $0x40] sm:$0xff] }
  0x11   :  { %v65_v57 = vld [vmem:[%s16202_s3 + $0x138] sm:$0xff]  ;;  %v7286_v60 = vcombine.high %v32_v54, %v33_v55  ;;  %v35_v63 = vld [vmem:[%s16202_s3 + $0x48] sm:$0xff]  ;;  %v66_v0 = vld [vmem:[%s16202_s3 + $0x140] sm:$0xff]  ;;  %v7285_v2 = vcombine.low %v32_v54, %v33_v55 }
  0x12   :  { %v7318_v61 = vcombine.high %v64_v56, %v65_v57  ;;  %v67_v1 = vld [vmem:[%s16202_s3 + $0x148] sm:$0xff]  ;;  %v7317_v3 = vcombine.low %v64_v56, %v65_v57  ;;  %v7288_v4 = vcombine.high %v34_v62, %v35_v63  ;;  %v36_v6 = vld [vmem:[%s16202_s3 + $0x50] sm:$0xff]  ;;  %v37_v7 = vld [vmem:[%s16202_s3 + $0x58] sm:$0xff] }
  0x13   :  { %997 = vmatpush1.bf16.msra.mxu0 %v7681_v9  ;;  %7651 = vmatpush1.bf16.msra.mxu1 %v7681_v9  ;;  %v7320_v5 = vcombine.high %v66_v0, %v67_v1  ;;  %v68_v8 = vld [vmem:[%s16202_s3 + $0x150] sm:$0xff]  ;;  %v69_v9 = vld [vmem:[%s16202_s3 + $0x158] sm:$0xff]  ;;  %v38_v14 = vld [vmem:[%s16202_s3 + $0x60] sm:$0xff]  ;;  %v7289_v18 = vcombine.low %v36_v6, %v37_v7 }
  0x14   :  { %998 = vmatprep.subr.bf16.mxu0 %v7682_v10  ;;  %7636 = vmatprep.subr.bf16.mxu1 %v7682_v10  ;;  %v7287_v10 = vcombine.low %v34_v62, %v35_v63  ;;  %v7322_v13 = vcombine.high %v68_v8, %v69_v9  ;;  %v39_v15 = vld [vmem:[%s16202_s3 + $0x68] sm:$0xff]  ;;  %v70_v16 = vld [vmem:[%s16202_s3 + $0x160] sm:$0xff]  ;;  %v44_v38 = vld [vmem:[%s16202_s3 + $0x90] sm:$0xff] }
  0x15   :  { %v7292_v20 = vcombine.high %v38_v14, %v39_v15  ;;  %v45_v39 = vld [vmem:[%s16202_s3 + $0x98] sm:$0xff]  ;;  %v76_v40 = vld [vmem:[%s16202_s3 + $0x190] sm:$0xff]  ;;  %v46_v46 = vld [vmem:[%s16202_s3 + $0xa0] sm:$0xff] }
  0x16   :  { %v77_v41 = vld [vmem:[%s16202_s3 + $0x198] sm:$0xff]  ;;  %v47_v47 = vld [vmem:[%s16202_s3 + $0xa8] sm:$0xff]  ;;  %v78_v48 = vld [vmem:[%s16202_s3 + $0x1a0] sm:$0xff] }
  0x17   :  { %999 = vmatpush1.bf16.msra.mxu0 %v7684_v11  ;;  %7652 = vmatpush1.bf16.msra.mxu1 %v7684_v11  ;;  %v7319_v11 = vcombine.low %v66_v0, %v67_v1  ;;  %v79_v49 = vld [vmem:[%s16202_s3 + $0x1a8] sm:$0xff]  ;;  %v48_v54 = vld [vmem:[%s16202_s3 + $0xb0] sm:$0xff]  ;;  %v49_v55 = vld [vmem:[%s16202_s3 + $0xb8] sm:$0xff] }
  0x18   :  { %1000 = vmatprep.subr.bf16.mxu0 %v7685_v12  ;;  %7637 = vmatprep.subr.bf16.mxu1 %v7685_v12  ;;  %v7290_v12 = vcombine.high %v36_v6, %v37_v7  ;;  %v80_v56 = vld [vmem:[%s16202_s3 + $0x1b0] sm:$0xff]  ;;  %v81_v57 = vld [vmem:[%s16202_s3 + $0x1b8] sm:$0xff]  ;;  %v50_v62 = vld [vmem:[%s16202_s3 + $0xc0] sm:$0xff] }
  0x19   :  { %v51_v63 = vld [vmem:[%s16202_s3 + $0xc8] sm:$0xff]  ;;  %v82_v0 = vld [vmem:[%s16202_s3 + $0x1c0] sm:$0xff]  ;;  %v52_v6 = vld [vmem:[%s16202_s3 + $0xd0] sm:$0xff] }
  0x1a   :  { %v83_v1 = vld [vmem:[%s16202_s3 + $0x1c8] sm:$0xff]  ;;  %v53_v7 = vld [vmem:[%s16202_s3 + $0xd8] sm:$0xff] }
  0x1b   :  { %1001 = vmatpush1.bf16.msra.mxu0 %v7687_v17  ;;  %7653 = vmatpush1.bf16.msra.mxu1 %v7687_v17  ;;  %v71_v17 = vld [vmem:[%s16202_s3 + $0x168] sm:$0xff] }
  0x1c   :  { %1002 = vmatprep.subr.bf16.mxu0 %v7688_v19  ;;  %7638 = vmatprep.subr.bf16.mxu1 %v7688_v19  ;;  %v7321_v19 = vcombine.low %v68_v8, %v69_v9  ;;  %v84_v8 = vld [vmem:[%s16202_s3 + $0x1d0] sm:$0xff]  ;;  %v85_v9 = vld [vmem:[%s16202_s3 + $0x1d8] sm:$0xff] }
  0x1f   :  { %1003 = vmatpush1.bf16.msra.mxu0 %v7690_v21  ;;  %7654 = vmatpush1.bf16.msra.mxu1 %v7690_v21  ;;  %v7324_v21 = vcombine.high %v70_v16, %v71_v17 }
  0x20   :  { %1004 = vmatprep.subr.bf16.mxu0 %v7691_v22  ;;  %7639 = vmatprep.subr.bf16.mxu1 %v7691_v22  ;;  %v40_v22 = vld [vmem:[%s16202_s3 + $0x70] sm:$0xff] }
  0x23   :  { %1005 = vmatpush1.bf16.msra.mxu0 %v7693_v23  ;;  %7655 = vmatpush1.bf16.msra.mxu1 %v7693_v23  ;;  %v41_v23 = vld [vmem:[%s16202_s3 + $0x78] sm:$0xff] }
  0x24   :  { %1006 = vmatprep.subr.bf16.mxu0 %v7694_v24  ;;  %7640 = vmatprep.subr.bf16.mxu1 %v7694_v24  ;;  %v72_v24 = vld [vmem:[%s16202_s3 + $0x170] sm:$0xff] }
  0x27   :  { %1007 = vmatpush1.bf16.msra.mxu0 %v7696_v25  ;;  %7656 = vmatpush1.bf16.msra.mxu1 %v7696_v25  ;;  %v73_v25 = vld [vmem:[%s16202_s3 + $0x178] sm:$0xff] }
  0x28   :  { %1008 = vmatprep.subr.bf16.mxu0 %v7697_v26  ;;  %7641 = vmatprep.subr.bf16.mxu1 %v7697_v26  ;;  %v7291_v26 = vcombine.low %v38_v14, %v39_v15  ;;  %v54_v14 = vld [vmem:[%s16202_s3 + $0xe0] sm:$0xff]  ;;  %v55_v15 = vld [vmem:[%s16202_s3 + $0xe8] sm:$0xff] }
  0x2b   :  { %1009 = vmatpush1.bf16.msra.mxu0 %v7699_v27  ;;  %7657 = vmatpush1.bf16.msra.mxu1 %v7699_v27  ;;  %v7323_v27 = vcombine.low %v70_v16, %v71_v17  ;;  %v86_v16 = vld [vmem:[%s16202_s3 + $0x1e0] sm:$0xff]  ;;  %v87_v17 = vld [vmem:[%s16202_s3 + $0x1e8] sm:$0xff] }
  0x2c   :  { %1010 = vmatprep.subr.bf16.mxu0 %v7700_v28  ;;  %7642 = vmatprep.subr.bf16.mxu1 %v7700_v28  ;;  %v7294_v28 = vcombine.high %v40_v22, %v41_v23 }
  0x2f   :  { %1011 = vmatpush1.bf16.msra.mxu0 %v7702_v29  ;;  %7658 = vmatpush1.bf16.msra.mxu1 %v7702_v29  ;;  %v7326_v29 = vcombine.high %v72_v24, %v73_v25 }
  0x30   :  { %1012 = vmatprep.subr.bf16.mxu0 %v7703_v30  ;;  %7643 = vmatprep.subr.bf16.mxu1 %v7703_v30  ;;  %v42_v30 = vld [vmem:[%s16202_s3 + $0x80] sm:$0xff] }
  0x33   :  { %1013 = vmatpush1.bf16.msra.mxu0 %v7705_v31  ;;  %7659 = vmatpush1.bf16.msra.mxu1 %v7705_v31  ;;  %v43_v31 = vld [vmem:[%s16202_s3 + $0x88] sm:$0xff] }
  0x34   :  { %1014 = vmatprep.subr.bf16.mxu0 %v7706_v32  ;;  %7644 = vmatprep.subr.bf16.mxu1 %v7706_v32  ;;  %v74_v32 = vld [vmem:[%s16202_s3 + $0x180] sm:$0xff] }
  0x37   :  { %1015 = vmatpush1.bf16.msra.mxu0 %v7708_v33  ;;  %7660 = vmatpush1.bf16.msra.mxu1 %v7708_v33  ;;  %v75_v33 = vld [vmem:[%s16202_s3 + $0x188] sm:$0xff] }
  0x38   :  { %1016 = vmatprep.subr.bf16.mxu0 %v7709_v34  ;;  %7645 = vmatprep.subr.bf16.mxu1 %v7709_v34  ;;  %v7293_v34 = vcombine.low %v40_v22, %v41_v23  ;;  %v56_v22 = vld [vmem:[%s16202_s3 + $0xf0] sm:$0xff]  ;;  %v57_v23 = vld [vmem:[%s16202_s3 + $0xf8] sm:$0xff] }
  0x3b   :  { %1017 = vmatpush1.bf16.msra.mxu0 %v7711_v35  ;;  %7661 = vmatpush1.bf16.msra.mxu1 %v7711_v35  ;;  %v7325_v35 = vcombine.low %v72_v24, %v73_v25  ;;  %v88_v24 = vld [vmem:[%s16202_s3 + $0x1f0] sm:$0xff]  ;;  %v89_v25 = vld [vmem:[%s16202_s3 + $0x1f8] sm:$0xff] }
  0x3c   :  { %1018 = vmatprep.subr.bf16.mxu0 %v7712_v36  ;;  %7646 = vmatprep.subr.bf16.mxu1 %v7712_v36  ;;  %v7296_v36 = vcombine.high %v42_v30, %v43_v31 }
  0x3f   :  { %1019 = vmatpush1.bf16.msra.mxu0 %v7714_v37  ;;  %7662 = vmatpush1.bf16.msra.mxu1 %v7714_v37  ;;  %v7328_v37 = vcombine.high %v74_v32, %v75_v33 }
  0x42   :  { %1021 = vmatmul.mubr.bf16.vlgmr.msra.gmra.mrb[0].mxu0 %v7279_v42  ;;  %1181 = vmatmul.mubr.bf16.vlgmr.msra.gmra.mrb[0].mxu1 %v7311_v43  ;;  %v7295_v42 = vcombine.low %v42_v30, %v43_v31  ;;  %v7327_v43 = vcombine.low %v74_v32, %v75_v33  ;;  %v7309_v30 = vcombine.low %v56_v22, %v57_v23  ;;  %v16208_v32 = vmov 0  }
  0x43   :  { %1030 = vmatprep.mubr.bf16.mxu0 %v7282_v44  ;;  %1190 = vmatprep.mubr.bf16.mxu1 %v7314_v45  ;;  %v7298_v44 = vcombine.high %v44_v38, %v45_v39  ;;  %v7330_v45 = vcombine.high %v76_v40, %v77_v41  ;;  %v7341_v31 = vcombine.low %v88_v24, %v89_v25 }
  0x44   :  { %2269 = vmatprep.subr.bf16.mxu1 %v16208_v32  ;;  %2558 = vmatprep.subr.bf16.mxu0 %v16208_v32 }
  0x45   :  { %7665 = vset.pattern.permute.xlu0 %v16208_v32  ;;  %7666 = vset.pattern.permute.xlu1 %v16208_v32 }
  0x4a   :  { %1031 = vmatmul.mubr.bf16.gmra.mrb[4].mxu0 %v7281_v50  ;;  %1191 = vmatmul.mubr.bf16.gmra.mrb[4].mxu1 %v7313_v51  ;;  %v7297_v50 = vcombine.low %v44_v38, %v45_v39  ;;  %v7329_v51 = vcombine.low %v76_v40, %v77_v41 }
  0x4b   :  { %1040 = vmatprep.mubr.bf16.mxu0 %v7284_v52  ;;  %1200 = vmatprep.mubr.bf16.mxu1 %v7316_v53  ;;  %v7300_v52 = vcombine.high %v46_v46, %v47_v47  ;;  %v7332_v53 = vcombine.high %v78_v48, %v79_v49 }
  0x52   :  { %1041 = vmatmul.mubr.bf16.gmra.mrb[8].mxu0 %v7283_v58  ;;  %1201 = vmatmul.mubr.bf16.gmra.mrb[8].mxu1 %v7315_v59  ;;  %v7299_v58 = vcombine.low %v46_v46, %v47_v47  ;;  %v7331_v59 = vcombine.low %v78_v48, %v79_v49 }
  0x53   :  { %1050 = vmatprep.mubr.bf16.mxu0 %v7286_v60  ;;  %1210 = vmatprep.mubr.bf16.mxu1 %v7318_v61  ;;  %v7302_v60 = vcombine.high %v48_v54, %v49_v55  ;;  %v7334_v61 = vcombine.high %v80_v56, %v81_v57 }
  0x5a   :  { %1051 = vmatmul.mubr.bf16.gmra.mrb[12].mxu0 %v7285_v2  ;;  %1211 = vmatmul.mubr.bf16.gmra.mrb[12].mxu1 %v7317_v3  ;;  %v7301_v2 = vcombine.low %v48_v54, %v49_v55  ;;  %v7333_v3 = vcombine.low %v80_v56, %v81_v57 }
  0x5b   :  { %1060 = vmatprep.mubr.bf16.mxu0 %v7288_v4  ;;  %1220 = vmatprep.mubr.bf16.mxu1 %v7320_v5  ;;  %v7304_v4 = vcombine.high %v50_v62, %v51_v63  ;;  %v7336_v5 = vcombine.high %v82_v0, %v83_v1 }
  0x62   :  { %1061 = vmatmul.mubr.bf16.gmra.mrb[16].mxu0 %v7287_v10  ;;  %1221 = vmatmul.mubr.bf16.gmra.mrb[16].mxu1 %v7319_v11  ;;  %v7303_v10 = vcombine.low %v50_v62, %v51_v63  ;;  %v7335_v11 = vcombine.low %v82_v0, %v83_v1 }
  0x63   :  { %1070 = vmatprep.mubr.bf16.mxu0 %v7290_v12  ;;  %1230 = vmatprep.mubr.bf16.mxu1 %v7322_v13  ;;  %v7306_v12 = vcombine.high %v52_v6, %v53_v7  ;;  %v7338_v13 = vcombine.high %v84_v8, %v85_v9 }
  0x6a   :  { %1071 = vmatmul.mubr.bf16.gmra.mrb[20].mxu0 %v7289_v18  ;;  %1231 = vmatmul.mubr.bf16.gmra.mrb[20].mxu1 %v7321_v19  ;;  %v7305_v18 = vcombine.low %v52_v6, %v53_v7  ;;  %v7337_v19 = vcombine.low %v84_v8, %v85_v9 }
  0x6b   :  { %1080 = vmatprep.mubr.bf16.mxu0 %v7292_v20  ;;  %1240 = vmatprep.mubr.bf16.mxu1 %v7324_v21  ;;  %v7308_v20 = vcombine.high %v54_v14, %v55_v15  ;;  %v7340_v21 = vcombine.high %v86_v16, %v87_v17 }
  0x72   :  { %1081 = vmatmul.mubr.bf16.gmra.mrb[24].mxu0 %v7291_v26  ;;  %1241 = vmatmul.mubr.bf16.gmra.mrb[24].mxu1 %v7323_v27  ;;  %v7307_v26 = vcombine.low %v54_v14, %v55_v15  ;;  %v7339_v27 = vcombine.low %v86_v16, %v87_v17 }
  0x73   :  { %1090 = vmatprep.mubr.bf16.mxu0 %v7294_v28  ;;  %1250 = vmatprep.mubr.bf16.mxu1 %v7326_v29  ;;  %v7310_v28 = vcombine.high %v56_v22, %v57_v23  ;;  %v7342_v29 = vcombine.high %v88_v24, %v89_v25 }
  0x7a   :  { %1091 = vmatmul.mubr.bf16.gmra.mrb[28].mxu0 %v7293_v34  ;;  %1251 = vmatmul.mubr.bf16.gmra.mrb[28].mxu1 %v7325_v35 }
  0x7b   :  { %1100 = vmatprep.mubr.bf16.mxu0 %v7296_v36  ;;  %1260 = vmatprep.mubr.bf16.mxu1 %v7328_v37 }
  0x82   :  { %1101 = vmatmul.mubr.bf16.gmra.mrb[32].mxu0 %v7295_v42  ;;  %1261 = vmatmul.mubr.bf16.gmra.mrb[32].mxu1 %v7327_v43 }
  0x83   :  { %1110 = vmatprep.mubr.bf16.mxu0 %v7298_v44  ;;  %1270 = vmatprep.mubr.bf16.mxu1 %v7330_v45 }
  0x8a   :  { %1111 = vmatmul.mubr.bf16.gmra.mrb[36].mxu0 %v7297_v50  ;;  %1271 = vmatmul.mubr.bf16.gmra.mrb[36].mxu1 %v7329_v51 }
  0x8b   :  { %1120 = vmatprep.mubr.bf16.mxu0 %v7300_v52  ;;  %1280 = vmatprep.mubr.bf16.mxu1 %v7332_v53 }
  0x92   :  { %1121 = vmatmul.mubr.bf16.gmra.mrb[40].mxu0 %v7299_v58  ;;  %1281 = vmatmul.mubr.bf16.gmra.mrb[40].mxu1 %v7331_v59 }
  0x93   :  { %1130 = vmatprep.mubr.bf16.mxu0 %v7302_v60  ;;  %1290 = vmatprep.mubr.bf16.mxu1 %v7334_v61 }
  0x9a   :  { %1131 = vmatmul.mubr.bf16.gmra.mrb[44].mxu0 %v7301_v2  ;;  %1291 = vmatmul.mubr.bf16.gmra.mrb[44].mxu1 %v7333_v3 }
  0x9b   :  { %1140 = vmatprep.mubr.bf16.mxu0 %v7304_v4  ;;  %1300 = vmatprep.mubr.bf16.mxu1 %v7336_v5 }
  0xa2   :  { %1141 = vmatmul.mubr.bf16.gmra.mrb[48].mxu0 %v7303_v10  ;;  %1301 = vmatmul.mubr.bf16.gmra.mrb[48].mxu1 %v7335_v11 }
  0xa3   :  { %1150 = vmatprep.mubr.bf16.mxu0 %v7306_v12  ;;  %1310 = vmatprep.mubr.bf16.mxu1 %v7338_v13 }
  0xaa   :  { %1151 = vmatmul.mubr.bf16.gmra.mrb[52].mxu0 %v7305_v18  ;;  %1311 = vmatmul.mubr.bf16.gmra.mrb[52].mxu1 %v7337_v19 }
  0xab   :  { %1160 = vmatprep.mubr.bf16.mxu0 %v7308_v20  ;;  %1320 = vmatprep.mubr.bf16.mxu1 %v7340_v21 }
  0xb2   :  { %1161 = vmatmul.mubr.bf16.gmra.mrb[56].mxu0 %v7307_v26  ;;  %1321 = vmatmul.mubr.bf16.gmra.mrb[56].mxu1 %v7339_v27 }
  0xb3   :  { %1170 = vmatprep.mubr.bf16.mxu0 %v7310_v28  ;;  %1330 = vmatprep.mubr.bf16.mxu1 %v7342_v29 }
  0xba   :  { %1171 = vmatmul.mubr.bf16.gmra.mrb[60].mxu0 %v7309_v30  ;;  %1331 = vmatmul.mubr.bf16.gmra.mrb[60].mxu1 %v7341_v31 }
 0x115   :  { %v8892_v33 = vpop.f32.mrb[0].mxu0  ;;  %v8894_v34 = vpop.f32.mrb[0].mxu1 }
 0x116   :  { %16505 = vst [vmem:[#allocation4_spill] sm:$0xff] %v8894_v34  ;;  %v8896_v35 = vpop.f32.mrb[1].mxu0  ;;  %v8898_v36 = vpop.f32.mrb[1].mxu1 }
 0x117   :  { %16506 = vst [vmem:[#allocation5_spill] sm:$0xff] %v8898_v36  ;;  %v8900_v37 = vpop.f32.mrb[2].mxu0  ;;  %v8902_v38 = vpop.f32.mrb[2].mxu1 }
 0x118   :  { %16507 = vst [vmem:[#allocation6_spill] sm:$0xff] %v8900_v37  ;;  %16508 = vst [vmem:[#allocation7_spill] sm:$0xff] %v8902_v38  ;;  %v8904_v39 = vpop.f32.mrb[3].mxu0  ;;  %v8906_v40 = vpop.f32.mrb[3].mxu1 }
 0x119   :  { %16509 = vst [vmem:[#allocation8_spill] sm:$0xff] %v8904_v39  ;;  %16510 = vst [vmem:[#allocation9_spill] sm:$0xff] %v8906_v40  ;;  %v1357_v41 = vpack.c.bf16 %v8906_v40, %v8898_v36  ;;  %v1341_v42 = vpack.c.bf16 %v8904_v39, %v8896_v35 }
 0x11b   :  { %2173 = vrot.lane.b32.xlu0 %v1341_v42, %s8548_s16 }
 0x11d   :  { %v8913_v43 = vpop.f32.mrb[4].mxu0  ;;  %v8915_v44 = vpop.f32.mrb[4].mxu1 }
 0x11e   :  { %16511 = vst [vmem:[#allocation10_spill] sm:$0xff] %v8913_v43  ;;  %16512 = vst [vmem:[#allocation11_spill] sm:$0xff] %v8915_v44  ;;  %v8917_v45 = vpop.f32.mrb[5].mxu0  ;;  %v8919_v46 = vpop.f32.mrb[5].mxu1 }
 0x11f   :  { %16513 = vst [vmem:[#allocation12_spill] sm:$0xff] %v8917_v45  ;;  %16514 = vst [vmem:[#allocation13_spill] sm:$0xff] %v8919_v46  ;;  %2205 = vrot.lane.b32.xlu0 %v1357_v41, %s8548_s16  ;;  %v8922_v47 = vpop.f32.mrb[6].mxu0  ;;  %v8924_v48 = vpop.f32.mrb[6].mxu1 }
 0x120   :  { %16515 = vst [vmem:[#allocation14_spill] sm:$0xff] %v8922_v47  ;;  %16516 = vst [vmem:[#allocation15_spill] sm:$0xff] %v8924_v48  ;;  %v8926_v49 = vpop.f32.mrb[7].mxu0  ;;  %v8928_v50 = vpop.f32.mrb[7].mxu1 }
 0x121   :  { %16517 = vst [vmem:[#allocation16_spill] sm:$0xff] %v8926_v49  ;;  %16518 = vst [vmem:[#allocation17_spill] sm:$0xff] %v8928_v50  ;;  %v1358_v51 = vpack.c.bf16 %v8928_v50, %v8919_v46  ;;  %v1342_v52 = vpack.c.bf16 %v8926_v49, %v8917_v45 }
 0x123   :  { %2175 = vrot.lane.b32.xlu1 %v1342_v52, %s8548_s16 }
 0x125   :  { %v8935_v53 = vpop.f32.mrb[8].mxu0  ;;  %v8937_v54 = vpop.f32.mrb[8].mxu1 }
 0x126   :  { %16519 = vst [vmem:[#allocation18_spill] sm:$0xff] %v8935_v53  ;;  %16520 = vst [vmem:[#allocation19_spill] sm:$0xff] %v8937_v54  ;;  %v8939_v55 = vpop.f32.mrb[9].mxu1  ;;  %v8941_v56 = vpop.f32.mrb[9].mxu0  ;;  %v223_v53 = vld [vmem:[%s16205_s2 + $0x28] sm:$0xff] }
 0x127   :  { %16521 = vst [vmem:[#allocation20_spill] sm:$0xff] %v8939_v55  ;;  %16522 = vst [vmem:[#allocation21_spill] sm:$0xff] %v8941_v56  ;;  %2207 = vrot.lane.b32.xlu1 %v1358_v51, %s8548_s16  ;;  %v8944_v57 = vpop.f32.mrb[10].mxu0  ;;  %v8946_v58 = vpop.f32.mrb[10].mxu1 }
 0x128   :  { %16523 = vst [vmem:[#allocation22_spill] sm:$0xff] %v8944_v57  ;;  %16524 = vst [vmem:[#allocation23_spill] sm:$0xff] %v8946_v58  ;;  %v8948_v59 = vpop.f32.mrb[11].mxu0  ;;  %v8950_v60 = vpop.f32.mrb[11].mxu1 }
 0x129   :  { %16525 = vst [vmem:[#allocation24_spill] sm:$0xff] %v8948_v59  ;;  %16526 = vst [vmem:[#allocation25_spill] sm:$0xff] %v8950_v60  ;;  %v1343_v61 = vpack.c.bf16 %v8948_v59, %v8941_v56  ;;  %v1359_v62 = vpack.c.bf16 %v8950_v60, %v8939_v55 }
 0x12b   :  { %2209 = vrot.lane.b32.xlu1 %v1359_v62, %s8548_s16  ;;  %2177 = vrot.lane.b32.xlu0 %v1343_v61, %s8548_s16 }
 0x12d   :  { %v8958_v63 = vpop.f32.mrb[12].mxu0  ;;  %v8960_v0 = vpop.f32.mrb[12].mxu1 }
 0x12e   :  { %16527 = vst [vmem:[#allocation26_spill] sm:$0xff] %v8958_v63  ;;  %16528 = vst [vmem:[#allocation27_spill] sm:$0xff] %v8960_v0  ;;  %v8962_v1 = vpop.f32.mrb[13].mxu0  ;;  %v8964_v2 = vpop.f32.mrb[13].mxu1 }
 0x12f   :  { %16529 = vst [vmem:[#allocation28_spill] sm:$0xff] %v8962_v1  ;;  %16530 = vst [vmem:[#allocation29_spill] sm:$0xff] %v8964_v2  ;;  %v8966_v3 = vpop.f32.mrb[14].mxu0  ;;  %v8968_v4 = vpop.f32.mrb[14].mxu1 }
 0x130   :  { %16531 = vst [vmem:[#allocation30_spill] sm:$0xff] %v8966_v3  ;;  %16532 = vst [vmem:[#allocation31_spill] sm:$0xff] %v8968_v4  ;;  %v8970_v5 = vpop.f32.mrb[15].mxu0  ;;  %v8972_v6 = vpop.f32.mrb[15].mxu1 }
 0x131   :  { %16533 = vst [vmem:[#allocation32_spill] sm:$0xff] %v8970_v5  ;;  %16534 = vst [vmem:[#allocation33_spill] sm:$0xff] %v8972_v6  ;;  %v1344_v7 = vpack.c.bf16 %v8970_v5, %v8962_v1  ;;  %v1360_v8 = vpack.c.bf16 %v8972_v6, %v8964_v2 }
 0x133   :  { %2211 = vrot.lane.b32.xlu1 %v1360_v8, %s8548_s16  ;;  %2179 = vrot.lane.b32.xlu0 %v1344_v7, %s8548_s16 }
 0x135   :  { %v8980_v9 = vpop.f32.mrb[16].mxu0  ;;  %v8982_v10 = vpop.f32.mrb[16].mxu1 }
 0x136   :  { %16535 = vst [vmem:[#allocation34_spill] sm:$0xff] %v8980_v9  ;;  %16536 = vst [vmem:[#allocation35_spill] sm:$0xff] %v8982_v10  ;;  %v8984_v11 = vpop.f32.mrb[17].mxu0  ;;  %v8986_v12 = vpop.f32.mrb[17].mxu1  ;;  %v8542_v9 = vld [vmem:[%s16202_s3 + $0x1e8] sm:$0xff] }
 0x137   :  { %16537 = vst [vmem:[#allocation36_spill] sm:$0xff] %v8984_v11  ;;  %16538 = vst [vmem:[#allocation37_spill] sm:$0xff] %v8986_v12  ;;  %v8988_v13 = vpop.f32.mrb[18].mxu0  ;;  %v8990_v14 = vpop.f32.mrb[18].mxu1  ;;  %v10126_v5 = vunpack.c.l.bf16 %v8542_v9  ;;  %v10128_v3 = vunpack.c.h.bf16 %v8542_v9 }
 0x138   :  { %16539 = vst [vmem:[#allocation38_spill] sm:$0xff] %v8988_v13  ;;  %16540 = vst [vmem:[#allocation39_spill] sm:$0xff] %v8990_v14  ;;  %v8992_v15 = vpop.f32.mrb[19].mxu0  ;;  %v8994_v16 = vpop.f32.mrb[19].mxu1 }
 0x139   :  { %16541 = vst [vmem:[#allocation40_spill] sm:$0xff] %v8992_v15  ;;  %16542 = vst [vmem:[#allocation41_spill] sm:$0xff] %v8994_v16  ;;  %v1345_v17 = vpack.c.bf16 %v8992_v15, %v8984_v11  ;;  %v1361_v18 = vpack.c.bf16 %v8994_v16, %v8986_v12 }
 0x13a   :  { %16748 = vst [vmem:[#allocation246_spill] sm:$0xff] %v10126_v5  ;;  %16749 = vst [vmem:[#allocation247_spill] sm:$0xff] %v10128_v3 }
 0x13b   :  { %2213 = vrot.lane.b32.xlu1 %v1361_v18, %s8548_s16  ;;  %2181 = vrot.lane.b32.xlu0 %v1345_v17, %s8548_s16 }
 0x13d   :  { %v9002_v19 = vpop.f32.mrb[20].mxu0  ;;  %v9004_v20 = vpop.f32.mrb[20].mxu1 }
 0x13e   :  { %16543 = vst [vmem:[#allocation42_spill] sm:$0xff] %v9002_v19  ;;  %16544 = vst [vmem:[#allocation43_spill] sm:$0xff] %v9004_v20  ;;  %v9006_v21 = vpop.f32.mrb[21].mxu0  ;;  %v9008_v22 = vpop.f32.mrb[21].mxu1 }
 0x13f   :  { %16545 = vst [vmem:[#allocation44_spill] sm:$0xff] %v9006_v21  ;;  %16546 = vst [vmem:[#allocation45_spill] sm:$0xff] %v9008_v22  ;;  %v9010_v23 = vpop.f32.mrb[22].mxu0  ;;  %v9012_v24 = vpop.f32.mrb[22].mxu1 }
 0x140   :  { %16547 = vst [vmem:[#allocation46_spill] sm:$0xff] %v9010_v23  ;;  %16548 = vst [vmem:[#allocation47_spill] sm:$0xff] %v9012_v24  ;;  %v9014_v25 = vpop.f32.mrb[23].mxu0  ;;  %v9016_v26 = vpop.f32.mrb[23].mxu1 }
 0x141   :  { %16549 = vst [vmem:[#allocation48_spill] sm:$0xff] %v9014_v25  ;;  %16550 = vst [vmem:[#allocation49_spill] sm:$0xff] %v9016_v26  ;;  %v1346_v27 = vpack.c.bf16 %v9014_v25, %v9006_v21  ;;  %v1362_v28 = vpack.c.bf16 %v9016_v26, %v9008_v22 }
 0x143   :  { %2215 = vrot.lane.b32.xlu1 %v1362_v28, %s8548_s16  ;;  %2183 = vrot.lane.b32.xlu0 %v1346_v27, %s8548_s16 }
 0x145   :  { %v9024_v29 = vpop.f32.mrb[24].mxu0  ;;  %v9026_v30 = vpop.f32.mrb[24].mxu1 }
 0x146   :  { %16551 = vst [vmem:[#allocation50_spill] sm:$0xff] %v9024_v29  ;;  %16552 = vst [vmem:[#allocation51_spill] sm:$0xff] %v9026_v30  ;;  %v9028_v31 = vpop.f32.mrb[25].mxu0  ;;  %v9030_v41 = vpop.f32.mrb[25].mxu1 }
 0x147   :  { %16553 = vst [vmem:[#allocation52_spill] sm:$0xff] %v9028_v31  ;;  %16554 = vst [vmem:[#allocation53_spill] sm:$0xff] %v9030_v41  ;;  %v9032_v42 = vpop.f32.mrb[26].mxu0  ;;  %v9034_v51 = vpop.f32.mrb[26].mxu1 }
 0x148   :  { %16555 = vst [vmem:[#allocation54_spill] sm:$0xff] %v9032_v42  ;;  %16556 = vst [vmem:[#allocation55_spill] sm:$0xff] %v9034_v51  ;;  %v9036_v52 = vpop.f32.mrb[27].mxu0  ;;  %v9038_v61 = vpop.f32.mrb[27].mxu1 }
 0x149   :  { %16557 = vst [vmem:[#allocation56_spill] sm:$0xff] %v9036_v52  ;;  %16558 = vst [vmem:[#allocation57_spill] sm:$0xff] %v9038_v61  ;;  %v1347_v62 = vpack.c.bf16 %v9036_v52, %v9028_v31  ;;  %v1363_v7 = vpack.c.bf16 %v9038_v61, %v9030_v41 }
 0x14b   :  { %2217 = vrot.lane.b32.xlu1 %v1363_v7, %s8548_s16  ;;  %2185 = vrot.lane.b32.xlu0 %v1347_v62, %s8548_s16 }
 0x14d   :  { %v9046_v8 = vpop.f32.mrb[28].mxu0  ;;  %v9048_v17 = vpop.f32.mrb[28].mxu1 }
 0x14e   :  { %16559 = vst [vmem:[#allocation58_spill] sm:$0xff] %v9046_v8  ;;  %16560 = vst [vmem:[#allocation59_spill] sm:$0xff] %v9048_v17  ;;  %v9050_v18 = vpop.f32.mrb[29].mxu0  ;;  %v9052_v27 = vpop.f32.mrb[29].mxu1 }
 0x14f   :  { %16561 = vst [vmem:[#allocation60_spill] sm:$0xff] %v9050_v18  ;;  %16562 = vst [vmem:[#allocation61_spill] sm:$0xff] %v9052_v27  ;;  %v9054_v28 = vpop.f32.mrb[30].mxu0  ;;  %v9056_v32 = vpop.f32.mrb[30].mxu1 }
 0x150   :  { %16563 = vst [vmem:[#allocation62_spill] sm:$0xff] %v9054_v28  ;;  %16564 = vst [vmem:[#allocation63_spill] sm:$0xff] %v9056_v32  ;;  %v9058_v51 = vpop.f32.mrb[31].mxu0  ;;  %v9060_v30 = vpop.f32.mrb[31].mxu1 }
 0x151   :  { %16565 = vst [vmem:[#allocation64_spill] sm:$0xff] %v9058_v51  ;;  %16566 = vst [vmem:[#allocation65_spill] sm:$0xff] %v9060_v30  ;;  %v1348_v7 = vpack.c.bf16 %v9058_v51, %v9050_v18  ;;  %v1364_v62 = vpack.c.bf16 %v9060_v30, %v9052_v27 }
 0x153   :  { %2219 = vrot.lane.b32.xlu1 %v1364_v62, %s8548_s16  ;;  %2187 = vrot.lane.b32.xlu0 %v1348_v7, %s8548_s16 }
 0x155   :  { %v9068_v17 = vpop.f32.mrb[32].mxu0  ;;  %v9070_v61 = vpop.f32.mrb[32].mxu1 }
 0x156   :  { %16567 = vst [vmem:[#allocation66_spill] sm:$0xff] %v9068_v17  ;;  %16568 = vst [vmem:[#allocation67_spill] sm:$0xff] %v9070_v61  ;;  %v9072_v41 = vpop.f32.mrb[33].mxu0  ;;  %v9074_v32 = vpop.f32.mrb[33].mxu1 }
 0x157   :  { %16569 = vst [vmem:[#allocation68_spill] sm:$0xff] %v9072_v41  ;;  %16570 = vst [vmem:[#allocation69_spill] sm:$0xff] %v9074_v32  ;;  %v9076_v26 = vpop.f32.mrb[34].mxu0  ;;  %v9078_v24 = vpop.f32.mrb[34].mxu1 }
 0x158   :  { %16571 = vst [vmem:[#allocation70_spill] sm:$0xff] %v9076_v26  ;;  %16572 = vst [vmem:[#allocation71_spill] sm:$0xff] %v9078_v24  ;;  %v9080_v22 = vpop.f32.mrb[35].mxu0  ;;  %v9082_v20 = vpop.f32.mrb[35].mxu1 }
 0x159   :  { %16573 = vst [vmem:[#allocation72_spill] sm:$0xff] %v9080_v22  ;;  %16574 = vst [vmem:[#allocation73_spill] sm:$0xff] %v9082_v20  ;;  %v1349_v62 = vpack.c.bf16 %v9080_v22, %v9072_v41  ;;  %v1365_v7 = vpack.c.bf16 %v9082_v20, %v9074_v32  ;;  %v8497_v22 = vld [vmem:[%s16202_s3 + $0x130] sm:$0xff] }
 0x15a   :  { %v9773_v26 = vunpack.c.l.bf16 %v8497_v22 }
 0x15b   :  { %2221 = vrot.lane.b32.xlu1 %v1365_v7, %s8548_s16  ;;  %2189 = vrot.lane.b32.xlu0 %v1349_v62, %s8548_s16 }
 0x15c   :  { %16657 = vst [vmem:[#allocation155_spill] sm:$0xff] %v9773_v26 }
 0x15d   :  { %v9090_v61 = vpop.f32.mrb[36].mxu0  ;;  %v9092_v30 = vpop.f32.mrb[36].mxu1 }
 0x15e   :  { %16575 = vst [vmem:[#allocation74_spill] sm:$0xff] %v9090_v61  ;;  %16576 = vst [vmem:[#allocation75_spill] sm:$0xff] %v9092_v30  ;;  %v9094_v27 = vpop.f32.mrb[37].mxu0  ;;  %v9096_v24 = vpop.f32.mrb[37].mxu1 }
 0x15f   :  { %16577 = vst [vmem:[#allocation76_spill] sm:$0xff] %v9094_v27  ;;  %16578 = vst [vmem:[#allocation77_spill] sm:$0xff] %v9096_v24  ;;  %v9098_v16 = vpop.f32.mrb[38].mxu0  ;;  %v9100_v14 = vpop.f32.mrb[38].mxu1 }
 0x160   :  { %16579 = vst [vmem:[#allocation78_spill] sm:$0xff] %v9098_v16  ;;  %16580 = vst [vmem:[#allocation79_spill] sm:$0xff] %v9100_v14  ;;  %v9102_v12 = vpop.f32.mrb[39].mxu0  ;;  %v9104_v10 = vpop.f32.mrb[39].mxu1 }
 0x161   :  { %16581 = vst [vmem:[#allocation80_spill] sm:$0xff] %v9102_v12  ;;  %16582 = vst [vmem:[#allocation81_spill] sm:$0xff] %v9104_v10  ;;  %v1350_v7 = vpack.c.bf16 %v9102_v12, %v9094_v27  ;;  %v1366_v62 = vpack.c.bf16 %v9104_v10, %v9096_v24 }
 0x163   :  { %2223 = vrot.lane.b32.xlu1 %v1366_v62, %s8548_s16  ;;  %2191 = vrot.lane.b32.xlu0 %v1350_v7, %s8548_s16 }
 0x165   :  { %v9112_v30 = vpop.f32.mrb[40].mxu0  ;;  %v9114_v20 = vpop.f32.mrb[40].mxu1 }
 0x166   :  { %16583 = vst [vmem:[#allocation82_spill] sm:$0xff] %v9112_v30  ;;  %16584 = vst [vmem:[#allocation83_spill] sm:$0xff] %v9114_v20  ;;  %v9116_v32 = vpop.f32.mrb[41].mxu0  ;;  %v9118_v14 = vpop.f32.mrb[41].mxu1 }
 0x167   :  { %16585 = vst [vmem:[#allocation84_spill] sm:$0xff] %v9116_v32  ;;  %16586 = vst [vmem:[#allocation85_spill] sm:$0xff] %v9118_v14  ;;  %v9120_v6 = vpop.f32.mrb[42].mxu0  ;;  %v9122_v4 = vpop.f32.mrb[42].mxu1 }
 0x168   :  { %16587 = vst [vmem:[#allocation86_spill] sm:$0xff] %v9120_v6  ;;  %16588 = vst [vmem:[#allocation87_spill] sm:$0xff] %v9122_v4  ;;  %v9124_v2 = vpop.f32.mrb[43].mxu0  ;;  %v9126_v0 = vpop.f32.mrb[43].mxu1 }
 0x169   :  { %16589 = vst [vmem:[#allocation88_spill] sm:$0xff] %v9124_v2  ;;  %16590 = vst [vmem:[#allocation89_spill] sm:$0xff] %v9126_v0  ;;  %v1351_v62 = vpack.c.bf16 %v9124_v2, %v9116_v32  ;;  %v1367_v7 = vpack.c.bf16 %v9126_v0, %v9118_v14  ;;  %v7969_v32 = vld [vmem:[%s16203_s5 + $0x3e0] ss:$16 sps:$4 sm:$0xff]  }
 0x16b   :  { %2225 = vrot.lane.b32.xlu1 %v1367_v7, %s8548_s16  ;;  %2193 = vrot.lane.b32.xlu0 %v1351_v62, %s8548_s16 }
 0x16d   :  { %v9134_v20 = vpop.f32.mrb[44].mxu0  ;;  %v9136_v10 = vpop.f32.mrb[44].mxu1 }
 0x16e   :  { %16591 = vst [vmem:[#allocation90_spill] sm:$0xff] %v9134_v20  ;;  %16592 = vst [vmem:[#allocation91_spill] sm:$0xff] %v9136_v10  ;;  %v9138_v24 = vpop.f32.mrb[45].mxu0  ;;  %v9140_v4 = vpop.f32.mrb[45].mxu1 }
 0x16f   :  { %16593 = vst [vmem:[#allocation92_spill] sm:$0xff] %v9138_v24  ;;  %16594 = vst [vmem:[#allocation93_spill] sm:$0xff] %v9140_v4  ;;  %v9142_v60 = vpop.f32.mrb[46].mxu0  ;;  %v9144_v58 = vpop.f32.mrb[46].mxu1 }
 0x170   :  { %16595 = vst [vmem:[#allocation94_spill] sm:$0xff] %v9142_v60  ;;  %16596 = vst [vmem:[#allocation95_spill] sm:$0xff] %v9144_v58  ;;  %v9146_v55 = vpop.f32.mrb[47].mxu0  ;;  %v9148_v54 = vpop.f32.mrb[47].mxu1 }
 0x171   :  { %16597 = vst [vmem:[#allocation96_spill] sm:$0xff] %v9146_v55  ;;  %16598 = vst [vmem:[#allocation97_spill] sm:$0xff] %v9148_v54  ;;  %v1352_v7 = vpack.c.bf16 %v9146_v55, %v9138_v24  ;;  %v1368_v62 = vpack.c.bf16 %v9148_v54, %v9140_v4 }
 0x173   :  { %2227 = vrot.lane.b32.xlu1 %v1368_v62, %s8548_s16  ;;  %2195 = vrot.lane.b32.xlu0 %v1352_v7, %s8548_s16 }
 0x175   :  { %v9156_v10 = vpop.f32.mrb[48].mxu0  ;;  %v9158_v0 = vpop.f32.mrb[48].mxu1 }
 0x176   :  { %16599 = vst [vmem:[#allocation98_spill] sm:$0xff] %v9156_v10  ;;  %16600 = vst [vmem:[#allocation99_spill] sm:$0xff] %v9158_v0  ;;  %v9160_v14 = vpop.f32.mrb[49].mxu0  ;;  %v9162_v58 = vpop.f32.mrb[49].mxu1  ;;  %v7952_v10 = vld [vmem:[%s16203_s5 + $0x388] ss:$16 sps:$4 sm:$0xff]  }
 0x177   :  { %16601 = vst [vmem:[#allocation100_spill] sm:$0xff] %v9160_v14  ;;  %16602 = vst [vmem:[#allocation101_spill] sm:$0xff] %v9162_v58  ;;  %v9164_v50 = vpop.f32.mrb[50].mxu0  ;;  %v9166_v48 = vpop.f32.mrb[50].mxu1 }
 0x178   :  { %16603 = vst [vmem:[#allocation102_spill] sm:$0xff] %v9164_v50  ;;  %16604 = vst [vmem:[#allocation103_spill] sm:$0xff] %v9166_v48  ;;  %v9168_v46 = vpop.f32.mrb[51].mxu0  ;;  %v9170_v44 = vpop.f32.mrb[51].mxu1 }
 0x179   :  { %16605 = vst [vmem:[#allocation104_spill] sm:$0xff] %v9168_v46  ;;  %16606 = vst [vmem:[#allocation105_spill] sm:$0xff] %v9170_v44  ;;  %v1353_v62 = vpack.c.bf16 %v9168_v46, %v9160_v14  ;;  %v1369_v7 = vpack.c.bf16 %v9170_v44, %v9162_v58 }
 0x17b   :  { %2229 = vrot.lane.b32.xlu1 %v1369_v7, %s8548_s16  ;;  %2197 = vrot.lane.b32.xlu0 %v1353_v62, %s8548_s16 }
 0x17d   :  { %v9178_v0 = vpop.f32.mrb[52].mxu0  ;;  %v9180_v54 = vpop.f32.mrb[52].mxu1 }
 0x17e   :  { %16607 = vst [vmem:[#allocation106_spill] sm:$0xff] %v9178_v0  ;;  %16608 = vst [vmem:[#allocation107_spill] sm:$0xff] %v9180_v54  ;;  %v9182_v4 = vpop.f32.mrb[53].mxu0  ;;  %v9184_v48 = vpop.f32.mrb[53].mxu1 }
 0x17f   :  { %16609 = vst [vmem:[#allocation108_spill] sm:$0xff] %v9182_v4  ;;  %16610 = vst [vmem:[#allocation109_spill] sm:$0xff] %v9184_v48  ;;  %v9186_v40 = vpop.f32.mrb[54].mxu0  ;;  %v9188_v38 = vpop.f32.mrb[54].mxu1 }
 0x180   :  { %16611 = vst [vmem:[#allocation110_spill] sm:$0xff] %v9186_v40  ;;  %16612 = vst [vmem:[#allocation111_spill] sm:$0xff] %v9188_v38  ;;  %v9190_v36 = vpop.f32.mrb[55].mxu0  ;;  %v9192_v34 = vpop.f32.mrb[55].mxu1 }
 0x181   :  { %16613 = vst [vmem:[#allocation112_spill] sm:$0xff] %v9190_v36  ;;  %16614 = vst [vmem:[#allocation113_spill] sm:$0xff] %v9192_v34  ;;  %v1354_v7 = vpack.c.bf16 %v9190_v36, %v9182_v4  ;;  %v1370_v62 = vpack.c.bf16 %v9192_v34, %v9184_v48  ;;  %v7784_v34 = vld [vmem:[%s16203_s5 + $0xc] ss:$16 sps:$4 sm:$0xff]  }
 0x182   :  { %2590 = vmatprep.mubr.bf16.mxu0 %v7784_v34 }
 0x183   :  { %2231 = vrot.lane.b32.xlu1 %v1370_v62, %s8548_s16  ;;  %2199 = vrot.lane.b32.xlu0 %v1354_v7, %s8548_s16  ;;  %v7781_v7 = vld [vmem:[%s16203_s5 + $0x4] ss:$16 sps:$4 sm:$0xff]  }
 0x184   :  { %2301 = vmatprep.mubr.bf16.mxu1 %v7781_v7 }
 0x185   :  { %v9200_v54 = vpop.f32.mrb[56].mxu0  ;;  %v9202_v44 = vpop.f32.mrb[56].mxu1 }
 0x186   :  { %16615 = vst [vmem:[#allocation114_spill] sm:$0xff] %v9200_v54  ;;  %16616 = vst [vmem:[#allocation115_spill] sm:$0xff] %v9202_v44  ;;  %v9204_v58 = vpop.f32.mrb[57].mxu0  ;;  %v9206_v38 = vpop.f32.mrb[57].mxu1 }
 0x187   :  { %16617 = vst [vmem:[#allocation116_spill] sm:$0xff] %v9204_v58  ;;  %16618 = vst [vmem:[#allocation117_spill] sm:$0xff] %v9206_v38  ;;  %v9208_v40 = vpop.f32.mrb[58].mxu0  ;;  %v9210_v0 = vpop.f32.mrb[58].mxu1 }
 0x188   :  { %16619 = vst [vmem:[#allocation118_spill] sm:$0xff] %v9208_v40  ;;  %16620 = vst [vmem:[#allocation119_spill] sm:$0xff] %v9210_v0  ;;  %v9212_v36 = vpop.f32.mrb[59].mxu0  ;;  %v9214_v4 = vpop.f32.mrb[59].mxu1 }
 0x189   :  { %16621 = vst [vmem:[#allocation120_spill] sm:$0xff] %v9212_v36  ;;  %16622 = vst [vmem:[#allocation121_spill] sm:$0xff] %v9214_v4  ;;  %v1355_v62 = vpack.c.bf16 %v9212_v36, %v9204_v58  ;;  %v1371_v44 = vpack.c.bf16 %v9214_v4, %v9206_v38  ;;  %v16628_v38 = vmov 0  }
 0x18b   :  { %2233 = vrot.lane.b32.xlu1 %v1371_v44, %s8548_s16  ;;  %2201 = vrot.lane.b32.xlu0 %v1355_v62, %s8548_s16 }
 0x18d   :  { %v9228_v0 = vpop.f32.mrb[60].mxu1  ;;  %v2174_v48 = vpop.permute.xlu0 %2173 }
 0x18e   :  { %16623 = vst [vmem:[#allocation122_spill] sm:$0xff] %v9228_v0  ;;  %v9230_v40 = vpop.f32.mrb[60].mxu0  ;;  %v9232_v54 = vpop.f32.mrb[61].mxu1  ;;  %2270 = vmatpush1.bf16.msra.mxu1 %v2174_v48 }
 0x18f   :  { %16624 = vst [vmem:[#allocation123_spill] sm:$0xff] %v9230_v40  ;;  %16625 = vst [vmem:[#allocation124_spill] sm:$0xff] %v9232_v54  ;;  %v9234_v36 = vpop.f32.mrb[61].mxu0  ;;  %v9236_v4 = vpop.f32.mrb[62].mxu1  ;;  %2271 = vmatprep.subr.bf16.mxu1 %v16628_v38 }
 0x190   :  { %16626 = vst [vmem:[#allocation125_spill] sm:$0xff] %v9234_v36  ;;  %16627 = vst [vmem:[#allocation126_spill] sm:$0xff] %v9236_v4  ;;  %v9239_v7 = vpop.f32.mrb[62].mxu0  ;;  %v9241_v44 = vpop.f32.mrb[63].mxu1 }
 0x191   :  { %16629 = vst [vmem:[#allocation127_spill] sm:$0xff] %v9239_v7  ;;  %16630 = vst [vmem:[#allocation128_spill] sm:$0xff] %v9241_v44  ;;  %v9243_v62 = vpop.f32.mrb[63].mxu0  ;;  %v1372_v34 = vpack.c.bf16 %v9241_v44, %v9232_v54  ;;  %v2206_v0 = vpop.permute.xlu0 %2205 }
 0x192   :  { %16631 = vst [vmem:[#allocation129_spill] sm:$0xff] %v9243_v62  ;;  %v1356_v40 = vpack.c.bf16 %v9243_v62, %v9234_v36  ;;  %2559 = vmatpush1.bf16.msra.mxu0 %v2206_v0  ;;  %v7946_v62 = vld [vmem:[%s16203_s5 + $0x368] ss:$16 sps:$4 sm:$0xff]  }
 0x193   :  { %2235 = vrot.lane.b32.xlu1 %v1372_v34, %s8548_s16  ;;  %2560 = vmatprep.subr.bf16.mxu0 %v16628_v38 }
 0x194   :  { %2203 = vrot.lane.b32.xlu0 %v1356_v40, %s8548_s16 }
 0x195   :  { %v2176_v48 = vpop.permute.xlu1 %2175 }
 0x196   :  { %2272 = vmatpush1.bf16.msra.mxu1 %v2176_v48 }
 0x197   :  { %2273 = vmatprep.subr.bf16.mxu1 %v16628_v38 }
 0x199   :  { %v2208_v4 = vpop.permute.xlu1 %2207 }
 0x19a   :  { %2561 = vmatpush1.bf16.msra.mxu0 %v2208_v4 }
 0x19b   :  { %2562 = vmatprep.subr.bf16.mxu0 %v16628_v38 }
 0x19d   :  { %v2210_v44 = vpop.permute.xlu1 %2209  ;;  %v2178_v54 = vpop.permute.xlu0 %2177 }
 0x19e   :  { %2274 = vmatpush1.bf16.msra.mxu1 %v2178_v54  ;;  %2563 = vmatpush1.bf16.msra.mxu0 %v2210_v44 }
 0x19f   :  { %2564 = vmatprep.subr.bf16.mxu0 %v16628_v38  ;;  %2275 = vmatprep.subr.bf16.mxu1 %v16628_v38 }
 0x1a5   :  { %v2212_v0 = vpop.permute.xlu1 %2211  ;;  %v2180_v34 = vpop.permute.xlu0 %2179 }
 0x1a6   :  { %2276 = vmatpush1.bf16.msra.mxu1 %v2180_v34  ;;  %2565 = vmatpush1.bf16.msra.mxu0 %v2212_v0 }
 0x1a7   :  { %2566 = vmatprep.subr.bf16.mxu0 %v16628_v38  ;;  %2277 = vmatprep.subr.bf16.mxu1 %v16628_v38 }
 0x1ad   :  { %v2214_v40 = vpop.permute.xlu1 %2213  ;;  %v2182_v4 = vpop.permute.xlu0 %2181 }
 0x1ae   :  { %2278 = vmatpush1.bf16.msra.mxu1 %v2182_v4  ;;  %2567 = vmatpush1.bf16.msra.mxu0 %v2214_v40 }
 0x1af   :  { %2568 = vmatprep.subr.bf16.mxu0 %v16628_v38  ;;  %2279 = vmatprep.subr.bf16.mxu1 %v16628_v38 }
 0x1b5   :  { %v2216_v54 = vpop.permute.xlu1 %2215  ;;  %v2184_v44 = vpop.permute.xlu0 %2183 }
 0x1b6   :  { %2280 = vmatpush1.bf16.msra.mxu1 %v2184_v44  ;;  %2569 = vmatpush1.bf16.msra.mxu0 %v2216_v54 }
 0x1b7   :  { %2570 = vmatprep.subr.bf16.mxu0 %v16628_v38  ;;  %2281 = vmatprep.subr.bf16.mxu1 %v16628_v38 }
 0x1bd   :  { %v2218_v48 = vpop.permute.xlu1 %2217  ;;  %v2186_v0 = vpop.permute.xlu0 %2185 }
 0x1be   :  { %2282 = vmatpush1.bf16.msra.mxu1 %v2186_v0  ;;  %2571 = vmatpush1.bf16.msra.mxu0 %v2218_v48 }
 0x1bf   :  { %2572 = vmatprep.subr.bf16.mxu0 %v16628_v38  ;;  %2283 = vmatprep.subr.bf16.mxu1 %v16628_v38 }
 0x1c5   :  { %v2220_v34 = vpop.permute.xlu1 %2219  ;;  %v2188_v40 = vpop.permute.xlu0 %2187 }
 0x1c6   :  { %2284 = vmatpush1.bf16.msra.mxu1 %v2188_v40  ;;  %2573 = vmatpush1.bf16.msra.mxu0 %v2220_v34 }
 0x1c7   :  { %2574 = vmatprep.subr.bf16.mxu0 %v16628_v38  ;;  %2285 = vmatprep.subr.bf16.mxu1 %v16628_v38 }
 0x1cd   :  { %v2222_v4 = vpop.permute.xlu1 %2221  ;;  %v2190_v54 = vpop.permute.xlu0 %2189 }
 0x1ce   :  { %2286 = vmatpush1.bf16.msra.mxu1 %v2190_v54  ;;  %2575 = vmatpush1.bf16.msra.mxu0 %v2222_v4 }
 0x1cf   :  { %2576 = vmatprep.subr.bf16.mxu0 %v16628_v38  ;;  %2287 = vmatprep.subr.bf16.mxu1 %v16628_v38 }
 0x1d5   :  { %v2224_v44 = vpop.permute.xlu1 %2223  ;;  %v2192_v48 = vpop.permute.xlu0 %2191 }
 0x1d6   :  { %2288 = vmatpush1.bf16.msra.mxu1 %v2192_v48  ;;  %2577 = vmatpush1.bf16.msra.mxu0 %v2224_v44 }
 0x1d7   :  { %2578 = vmatprep.subr.bf16.mxu0 %v16628_v38  ;;  %2289 = vmatprep.subr.bf16.mxu1 %v16628_v38 }
 0x1dd   :  { %v2226_v0 = vpop.permute.xlu1 %2225  ;;  %v2194_v34 = vpop.permute.xlu0 %2193 }
 0x1de   :  { %2290 = vmatpush1.bf16.msra.mxu1 %v2194_v34  ;;  %2579 = vmatpush1.bf16.msra.mxu0 %v2226_v0 }
 0x1df   :  { %2580 = vmatprep.subr.bf16.mxu0 %v16628_v38  ;;  %2291 = vmatprep.subr.bf16.mxu1 %v16628_v38 }
 0x1e5   :  { %v2228_v40 = vpop.permute.xlu1 %2227  ;;  %v2196_v4 = vpop.permute.xlu0 %2195 }
 0x1e6   :  { %2292 = vmatpush1.bf16.msra.mxu1 %v2196_v4  ;;  %2581 = vmatpush1.bf16.msra.mxu0 %v2228_v40 }
 0x1e7   :  { %2582 = vmatprep.subr.bf16.mxu0 %v16628_v38  ;;  %2293 = vmatprep.subr.bf16.mxu1 %v16628_v38 }
 0x1ed   :  { %v2230_v54 = vpop.permute.xlu1 %2229  ;;  %v2198_v44 = vpop.permute.xlu0 %2197 }
 0x1ee   :  { %2294 = vmatpush1.bf16.msra.mxu1 %v2198_v44  ;;  %2583 = vmatpush1.bf16.msra.mxu0 %v2230_v54  ;;  %v7782_v54 = vld [vmem:[%s16203_s5 + $0x8] ss:$16 sps:$4 sm:$0xff]  }
 0x1ef   :  { %2584 = vmatprep.subr.bf16.mxu0 %v16628_v38  ;;  %2295 = vmatprep.subr.bf16.mxu1 %v16628_v38 }
 0x1f5   :  { %v2232_v48 = vpop.permute.xlu1 %2231  ;;  %v2200_v0 = vpop.permute.xlu0 %2199 }
 0x1f6   :  { %2296 = vmatpush1.bf16.msra.mxu1 %v2200_v0  ;;  %2585 = vmatpush1.bf16.msra.mxu0 %v2232_v48  ;;  %v7779_v48 = vld [vmem:[%s16203_s5] ss:$16 sps:$4 sm:$0xff]   ;;  %v7787_v0 = vld [vmem:[%s16203_s5 + $0x2c] ss:$16 sps:$4 sm:$0xff]  }
 0x1f7   :  { %2586 = vmatprep.subr.bf16.mxu0 %v16628_v38  ;;  %2297 = vmatprep.subr.bf16.mxu1 %v16628_v38 }
 0x1fd   :  { %v2234_v34 = vpop.permute.xlu1 %2233  ;;  %v2202_v40 = vpop.permute.xlu0 %2201 }
 0x1fe   :  { %2298 = vmatpush1.bf16.msra.mxu1 %v2202_v40  ;;  %2587 = vmatpush1.bf16.msra.mxu0 %v2234_v34  ;;  %v7790_v34 = vld [vmem:[%s16203_s5 + $0x28] ss:$16 sps:$4 sm:$0xff]   ;;  %v7789_v40 = vld [vmem:[%s16203_s5 + $0x20] ss:$16 sps:$4 sm:$0xff]  }
 0x1ff   :  { %2588 = vmatprep.subr.bf16.mxu0 %v16628_v38  ;;  %2299 = vmatprep.subr.bf16.mxu1 %v16628_v38  ;;  %v7785_v38 = vld [vmem:[%s16203_s5 + $0x24] ss:$16 sps:$4 sm:$0xff]  }
 0x205   :  { %v2236_v4 = vpop.permute.xlu1 %2235 }
 0x206   :  { %v2204_v44 = vpop.permute.xlu0 %2203  ;;  %2589 = vmatpush1.bf16.msra.mxu0 %v2236_v4  ;;  %v7793_v4 = vld [vmem:[%s16203_s5 + $0x4c] ss:$16 sps:$4 sm:$0xff]  }
 0x207   :  { %2300 = vmatpush1.bf16.msra.mxu1 %v2204_v44  ;;  %v7791_v44 = vld [vmem:[%s16203_s5 + $0x44] ss:$16 sps:$4 sm:$0xff]  }
 0x209   :  { %2591 = vmatmul.mubr.bf16.vlgmr.msra.gmra.mrb[64].mxu0 %v7782_v54  ;;  %v7796_v54 = vld [vmem:[%s16203_s5 + $0x48] ss:$16 sps:$4 sm:$0xff]  }
 0x20a   :  { %2302 = vmatmul.mubr.bf16.vlgmr.msra.gmra.mrb[64].mxu1 %v7779_v48  ;;  %2598 = vmatprep.mubr.bf16.mxu0 %v7787_v0  ;;  %v7795_v48 = vld [vmem:[%s16203_s5 + $0x40] ss:$16 sps:$4 sm:$0xff]   ;;  %v7799_v0 = vld [vmem:[%s16203_s5 + $0x6c] ss:$16 sps:$4 sm:$0xff]  }
 0x20b   :  { %2309 = vmatprep.mubr.bf16.mxu1 %v7785_v38  ;;  %v7797_v38 = vld [vmem:[%s16203_s5 + $0x64] ss:$16 sps:$4 sm:$0xff]  }
 0x211   :  { %2599 = vmatmul.mubr.bf16.gmra.mrb[68].mxu0 %v7790_v34  ;;  %v7802_v34 = vld [vmem:[%s16203_s5 + $0x68] ss:$16 sps:$4 sm:$0xff]  }
 0x212   :  { %2310 = vmatmul.mubr.bf16.gmra.mrb[68].mxu1 %v7789_v40  ;;  %2606 = vmatprep.mubr.bf16.mxu0 %v7793_v4  ;;  %v7801_v40 = vld [vmem:[%s16203_s5 + $0x60] ss:$16 sps:$4 sm:$0xff]   ;;  %v7805_v4 = vld [vmem:[%s16203_s5 + $0x8c] ss:$16 sps:$4 sm:$0xff]  }
 0x213   :  { %2317 = vmatprep.mubr.bf16.mxu1 %v7791_v44  ;;  %v7803_v44 = vld [vmem:[%s16203_s5 + $0x84] ss:$16 sps:$4 sm:$0xff]  }
 0x219   :  { %2607 = vmatmul.mubr.bf16.gmra.mrb[72].mxu0 %v7796_v54  ;;  %v7808_v54 = vld [vmem:[%s16203_s5 + $0x88] ss:$16 sps:$4 sm:$0xff]  }
 0x21a   :  { %2318 = vmatmul.mubr.bf16.gmra.mrb[72].mxu1 %v7795_v48  ;;  %2614 = vmatprep.mubr.bf16.mxu0 %v7799_v0  ;;  %v7807_v48 = vld [vmem:[%s16203_s5 + $0x80] ss:$16 sps:$4 sm:$0xff]   ;;  %v7811_v0 = vld [vmem:[%s16203_s5 + $0xac] ss:$16 sps:$4 sm:$0xff]  }
 0x21b   :  { %2325 = vmatprep.mubr.bf16.mxu1 %v7797_v38  ;;  %v7809_v38 = vld [vmem:[%s16203_s5 + $0xa4] ss:$16 sps:$4 sm:$0xff]  }
 0x221   :  { %2615 = vmatmul.mubr.bf16.gmra.mrb[76].mxu0 %v7802_v34  ;;  %v7814_v34 = vld [vmem:[%s16203_s5 + $0xa8] ss:$16 sps:$4 sm:$0xff]  }
 0x222   :  { %2326 = vmatmul.mubr.bf16.gmra.mrb[76].mxu1 %v7801_v40  ;;  %2622 = vmatprep.mubr.bf16.mxu0 %v7805_v4  ;;  %v7813_v40 = vld [vmem:[%s16203_s5 + $0xa0] ss:$16 sps:$4 sm:$0xff]   ;;  %v7817_v4 = vld [vmem:[%s16203_s5 + $0xcc] ss:$16 sps:$4 sm:$0xff]  }
 0x223   :  { %2333 = vmatprep.mubr.bf16.mxu1 %v7803_v44  ;;  %v7815_v44 = vld [vmem:[%s16203_s5 + $0xc4] ss:$16 sps:$4 sm:$0xff]  }
 0x229   :  { %2623 = vmatmul.mubr.bf16.gmra.mrb[80].mxu0 %v7808_v54  ;;  %v7820_v54 = vld [vmem:[%s16203_s5 + $0xc8] ss:$16 sps:$4 sm:$0xff]  }
 0x22a   :  { %2334 = vmatmul.mubr.bf16.gmra.mrb[80].mxu1 %v7807_v48  ;;  %2630 = vmatprep.mubr.bf16.mxu0 %v7811_v0  ;;  %v7819_v48 = vld [vmem:[%s16203_s5 + $0xc0] ss:$16 sps:$4 sm:$0xff]   ;;  %v7823_v0 = vld [vmem:[%s16203_s5 + $0xec] ss:$16 sps:$4 sm:$0xff]  }
 0x22b   :  { %2341 = vmatprep.mubr.bf16.mxu1 %v7809_v38  ;;  %v7821_v38 = vld [vmem:[%s16203_s5 + $0xe4] ss:$16 sps:$4 sm:$0xff]  }
 0x231   :  { %2631 = vmatmul.mubr.bf16.gmra.mrb[84].mxu0 %v7814_v34  ;;  %v7826_v34 = vld [vmem:[%s16203_s5 + $0xe8] ss:$16 sps:$4 sm:$0xff]  }
 0x232   :  { %2342 = vmatmul.mubr.bf16.gmra.mrb[84].mxu1 %v7813_v40  ;;  %2638 = vmatprep.mubr.bf16.mxu0 %v7817_v4  ;;  %v7825_v40 = vld [vmem:[%s16203_s5 + $0xe0] ss:$16 sps:$4 sm:$0xff]   ;;  %v7829_v4 = vld [vmem:[%s16203_s5 + $0x10c] ss:$16 sps:$4 sm:$0xff]  }
 0x233   :  { %2349 = vmatprep.mubr.bf16.mxu1 %v7815_v44  ;;  %v7827_v44 = vld [vmem:[%s16203_s5 + $0x104] ss:$16 sps:$4 sm:$0xff]  }
 0x239   :  { %2639 = vmatmul.mubr.bf16.gmra.mrb[88].mxu0 %v7820_v54  ;;  %v7832_v54 = vld [vmem:[%s16203_s5 + $0x108] ss:$16 sps:$4 sm:$0xff]  }
 0x23a   :  { %2350 = vmatmul.mubr.bf16.gmra.mrb[88].mxu1 %v7819_v48  ;;  %2646 = vmatprep.mubr.bf16.mxu0 %v7823_v0  ;;  %v7831_v48 = vld [vmem:[%s16203_s5 + $0x100] ss:$16 sps:$4 sm:$0xff]   ;;  %v7835_v0 = vld [vmem:[%s16203_s5 + $0x12c] ss:$16 sps:$4 sm:$0xff]  }
 0x23b   :  { %2357 = vmatprep.mubr.bf16.mxu1 %v7821_v38  ;;  %v7833_v38 = vld [vmem:[%s16203_s5 + $0x124] ss:$16 sps:$4 sm:$0xff]  }
 0x241   :  { %2647 = vmatmul.mubr.bf16.gmra.mrb[92].mxu0 %v7826_v34  ;;  %v7838_v34 = vld [vmem:[%s16203_s5 + $0x128] ss:$16 sps:$4 sm:$0xff]  }
 0x242   :  { %2358 = vmatmul.mubr.bf16.gmra.mrb[92].mxu1 %v7825_v40  ;;  %2654 = vmatprep.mubr.bf16.mxu0 %v7829_v4  ;;  %v7837_v40 = vld [vmem:[%s16203_s5 + $0x120] ss:$16 sps:$4 sm:$0xff]   ;;  %v7841_v4 = vld [vmem:[%s16203_s5 + $0x14c] ss:$16 sps:$4 sm:$0xff]  }
 0x243   :  { %2365 = vmatprep.mubr.bf16.mxu1 %v7827_v44  ;;  %v7839_v44 = vld [vmem:[%s16203_s5 + $0x144] ss:$16 sps:$4 sm:$0xff]  }
 0x249   :  { %2655 = vmatmul.mubr.bf16.gmra.mrb[96].mxu0 %v7832_v54  ;;  %v7844_v54 = vld [vmem:[%s16203_s5 + $0x148] ss:$16 sps:$4 sm:$0xff]  }
 0x24a   :  { %2366 = vmatmul.mubr.bf16.gmra.mrb[96].mxu1 %v7831_v48  ;;  %2662 = vmatprep.mubr.bf16.mxu0 %v7835_v0  ;;  %v7843_v48 = vld [vmem:[%s16203_s5 + $0x140] ss:$16 sps:$4 sm:$0xff]   ;;  %v7847_v0 = vld [vmem:[%s16203_s5 + $0x16c] ss:$16 sps:$4 sm:$0xff]  }
 0x24b   :  { %2373 = vmatprep.mubr.bf16.mxu1 %v7833_v38  ;;  %v7845_v38 = vld [vmem:[%s16203_s5 + $0x164] ss:$16 sps:$4 sm:$0xff]  }
 0x251   :  { %2663 = vmatmul.mubr.bf16.gmra.mrb[100].mxu0 %v7838_v34  ;;  %v7850_v34 = vld [vmem:[%s16203_s5 + $0x168] ss:$16 sps:$4 sm:$0xff]  }
 0x252   :  { %2374 = vmatmul.mubr.bf16.gmra.mrb[100].mxu1 %v7837_v40  ;;  %2670 = vmatprep.mubr.bf16.mxu0 %v7841_v4  ;;  %v7849_v40 = vld [vmem:[%s16203_s5 + $0x160] ss:$16 sps:$4 sm:$0xff]   ;;  %v7853_v4 = vld [vmem:[%s16203_s5 + $0x18c] ss:$16 sps:$4 sm:$0xff]  }
 0x253   :  { %2381 = vmatprep.mubr.bf16.mxu1 %v7839_v44  ;;  %v7851_v44 = vld [vmem:[%s16203_s5 + $0x184] ss:$16 sps:$4 sm:$0xff]  }
 0x259   :  { %2671 = vmatmul.mubr.bf16.gmra.mrb[104].mxu0 %v7844_v54  ;;  %v7856_v54 = vld [vmem:[%s16203_s5 + $0x188] ss:$16 sps:$4 sm:$0xff]  }
 0x25a   :  { %2382 = vmatmul.mubr.bf16.gmra.mrb[104].mxu1 %v7843_v48  ;;  %2678 = vmatprep.mubr.bf16.mxu0 %v7847_v0  ;;  %v7855_v48 = vld [vmem:[%s16203_s5 + $0x180] ss:$16 sps:$4 sm:$0xff]   ;;  %v7859_v0 = vld [vmem:[%s16203_s5 + $0x1ac] ss:$16 sps:$4 sm:$0xff]  }
 0x25b   :  { %2389 = vmatprep.mubr.bf16.mxu1 %v7845_v38  ;;  %v7857_v38 = vld [vmem:[%s16203_s5 + $0x1a4] ss:$16 sps:$4 sm:$0xff]  }
 0x261   :  { %2679 = vmatmul.mubr.bf16.gmra.mrb[108].mxu0 %v7850_v34  ;;  %v7862_v34 = vld [vmem:[%s16203_s5 + $0x1a8] ss:$16 sps:$4 sm:$0xff]  }
 0x262   :  { %2390 = vmatmul.mubr.bf16.gmra.mrb[108].mxu1 %v7849_v40  ;;  %2686 = vmatprep.mubr.bf16.mxu0 %v7853_v4  ;;  %v7861_v40 = vld [vmem:[%s16203_s5 + $0x1a0] ss:$16 sps:$4 sm:$0xff]   ;;  %v7865_v4 = vld [vmem:[%s16203_s5 + $0x1cc] ss:$16 sps:$4 sm:$0xff]  }
 0x263   :  { %2397 = vmatprep.mubr.bf16.mxu1 %v7851_v44  ;;  %v7863_v44 = vld [vmem:[%s16203_s5 + $0x1c4] ss:$16 sps:$4 sm:$0xff]  }
 0x269   :  { %2687 = vmatmul.mubr.bf16.gmra.mrb[112].mxu0 %v7856_v54  ;;  %v7868_v54 = vld [vmem:[%s16203_s5 + $0x1c8] ss:$16 sps:$4 sm:$0xff]  }
 0x26a   :  { %2398 = vmatmul.mubr.bf16.gmra.mrb[112].mxu1 %v7855_v48  ;;  %2694 = vmatprep.mubr.bf16.mxu0 %v7859_v0  ;;  %v7867_v48 = vld [vmem:[%s16203_s5 + $0x1c0] ss:$16 sps:$4 sm:$0xff]   ;;  %v7871_v0 = vld [vmem:[%s16203_s5 + $0x1ec] ss:$16 sps:$4 sm:$0xff]  }
 0x26b   :  { %2405 = vmatprep.mubr.bf16.mxu1 %v7857_v38  ;;  %v7869_v38 = vld [vmem:[%s16203_s5 + $0x1e4] ss:$16 sps:$4 sm:$0xff]  }
 0x271   :  { %2695 = vmatmul.mubr.bf16.gmra.mrb[116].mxu0 %v7862_v34  ;;  %v7874_v34 = vld [vmem:[%s16203_s5 + $0x1e8] ss:$16 sps:$4 sm:$0xff]  }
 0x272   :  { %2406 = vmatmul.mubr.bf16.gmra.mrb[116].mxu1 %v7861_v40  ;;  %2702 = vmatprep.mubr.bf16.mxu0 %v7865_v4  ;;  %v7873_v40 = vld [vmem:[%s16203_s5 + $0x1e0] ss:$16 sps:$4 sm:$0xff]   ;;  %v7877_v4 = vld [vmem:[%s16203_s5 + $0x20c] ss:$16 sps:$4 sm:$0xff]  }
 0x273   :  { %2413 = vmatprep.mubr.bf16.mxu1 %v7863_v44  ;;  %v7875_v44 = vld [vmem:[%s16203_s5 + $0x204] ss:$16 sps:$4 sm:$0xff]  }
 0x279   :  { %2703 = vmatmul.mubr.bf16.gmra.mrb[120].mxu0 %v7868_v54  ;;  %v7880_v54 = vld [vmem:[%s16203_s5 + $0x208] ss:$16 sps:$4 sm:$0xff]  }
 0x27a   :  { %2414 = vmatmul.mubr.bf16.gmra.mrb[120].mxu1 %v7867_v48  ;;  %2710 = vmatprep.mubr.bf16.mxu0 %v7871_v0  ;;  %v7879_v48 = vld [vmem:[%s16203_s5 + $0x200] ss:$16 sps:$4 sm:$0xff]   ;;  %v7883_v0 = vld [vmem:[%s16203_s5 + $0x22c] ss:$16 sps:$4 sm:$0xff]  }
 0x27b   :  { %2421 = vmatprep.mubr.bf16.mxu1 %v7869_v38  ;;  %v7881_v38 = vld [vmem:[%s16203_s5 + $0x224] ss:$16 sps:$4 sm:$0xff]  }
 0x281   :  { %2711 = vmatmul.mubr.bf16.gmra.mrb[124].mxu0 %v7874_v34  ;;  %v7886_v34 = vld [vmem:[%s16203_s5 + $0x228] ss:$16 sps:$4 sm:$0xff]  }
 0x282   :  { %2422 = vmatmul.mubr.bf16.gmra.mrb[124].mxu1 %v7873_v40  ;;  %2718 = vmatprep.mubr.bf16.mxu0 %v7877_v4  ;;  %v7885_v40 = vld [vmem:[%s16203_s5 + $0x220] ss:$16 sps:$4 sm:$0xff]   ;;  %v7889_v4 = vld [vmem:[%s16203_s5 + $0x24c] ss:$16 sps:$4 sm:$0xff]  }
 0x283   :  { %2429 = vmatprep.mubr.bf16.mxu1 %v7875_v44  ;;  %v7887_v44 = vld [vmem:[%s16203_s5 + $0x244] ss:$16 sps:$4 sm:$0xff]  }
 0x289   :  { %2719 = vmatmul.mubr.bf16.gmra.mrb[128].mxu0 %v7880_v54  ;;  %v7892_v54 = vld [vmem:[%s16203_s5 + $0x248] ss:$16 sps:$4 sm:$0xff]  }
 0x28a   :  { %2430 = vmatmul.mubr.bf16.gmra.mrb[128].mxu1 %v7879_v48  ;;  %2726 = vmatprep.mubr.bf16.mxu0 %v7883_v0  ;;  %v7891_v48 = vld [vmem:[%s16203_s5 + $0x240] ss:$16 sps:$4 sm:$0xff]   ;;  %v7895_v0 = vld [vmem:[%s16203_s5 + $0x26c] ss:$16 sps:$4 sm:$0xff]  }
 0x28b   :  { %2437 = vmatprep.mubr.bf16.mxu1 %v7881_v38  ;;  %v7893_v38 = vld [vmem:[%s16203_s5 + $0x264] ss:$16 sps:$4 sm:$0xff]  }
 0x291   :  { %2727 = vmatmul.mubr.bf16.gmra.mrb[132].mxu0 %v7886_v34  ;;  %v7898_v34 = vld [vmem:[%s16203_s5 + $0x268] ss:$16 sps:$4 sm:$0xff]  }
 0x292   :  { %2438 = vmatmul.mubr.bf16.gmra.mrb[132].mxu1 %v7885_v40  ;;  %2734 = vmatprep.mubr.bf16.mxu0 %v7889_v4  ;;  %v7897_v40 = vld [vmem:[%s16203_s5 + $0x260] ss:$16 sps:$4 sm:$0xff]   ;;  %v7901_v4 = vld [vmem:[%s16203_s5 + $0x28c] ss:$16 sps:$4 sm:$0xff]  }
 0x293   :  { %2445 = vmatprep.mubr.bf16.mxu1 %v7887_v44  ;;  %v7899_v44 = vld [vmem:[%s16203_s5 + $0x284] ss:$16 sps:$4 sm:$0xff]  }
 0x299   :  { %2735 = vmatmul.mubr.bf16.gmra.mrb[136].mxu0 %v7892_v54  ;;  %v7904_v54 = vld [vmem:[%s16203_s5 + $0x288] ss:$16 sps:$4 sm:$0xff]  }
 0x29a   :  { %2446 = vmatmul.mubr.bf16.gmra.mrb[136].mxu1 %v7891_v48  ;;  %2742 = vmatprep.mubr.bf16.mxu0 %v7895_v0  ;;  %v7903_v48 = vld [vmem:[%s16203_s5 + $0x280] ss:$16 sps:$4 sm:$0xff]   ;;  %v7907_v0 = vld [vmem:[%s16203_s5 + $0x2ac] ss:$16 sps:$4 sm:$0xff]  }
 0x29b   :  { %2453 = vmatprep.mubr.bf16.mxu1 %v7893_v38  ;;  %v7905_v38 = vld [vmem:[%s16203_s5 + $0x2a4] ss:$16 sps:$4 sm:$0xff]  }
 0x2a1   :  { %2743 = vmatmul.mubr.bf16.gmra.mrb[140].mxu0 %v7898_v34  ;;  %v7910_v34 = vld [vmem:[%s16203_s5 + $0x2a8] ss:$16 sps:$4 sm:$0xff]  }
 0x2a2   :  { %2454 = vmatmul.mubr.bf16.gmra.mrb[140].mxu1 %v7897_v40  ;;  %2750 = vmatprep.mubr.bf16.mxu0 %v7901_v4  ;;  %v7909_v40 = vld [vmem:[%s16203_s5 + $0x2a0] ss:$16 sps:$4 sm:$0xff]   ;;  %v7913_v4 = vld [vmem:[%s16203_s5 + $0x2cc] ss:$16 sps:$4 sm:$0xff]  }
 0x2a3   :  { %2461 = vmatprep.mubr.bf16.mxu1 %v7899_v44  ;;  %v7911_v44 = vld [vmem:[%s16203_s5 + $0x2c4] ss:$16 sps:$4 sm:$0xff]  }
 0x2a9   :  { %2751 = vmatmul.mubr.bf16.gmra.mrb[144].mxu0 %v7904_v54  ;;  %v7916_v54 = vld [vmem:[%s16203_s5 + $0x2c8] ss:$16 sps:$4 sm:$0xff]  }
 0x2aa   :  { %2462 = vmatmul.mubr.bf16.gmra.mrb[144].mxu1 %v7903_v48  ;;  %2758 = vmatprep.mubr.bf16.mxu0 %v7907_v0  ;;  %v7915_v48 = vld [vmem:[%s16203_s5 + $0x2c0] ss:$16 sps:$4 sm:$0xff]   ;;  %v7919_v0 = vld [vmem:[%s16203_s5 + $0x2ec] ss:$16 sps:$4 sm:$0xff]  }
 0x2ab   :  { %2469 = vmatprep.mubr.bf16.mxu1 %v7905_v38  ;;  %v7917_v38 = vld [vmem:[%s16203_s5 + $0x2e4] ss:$16 sps:$4 sm:$0xff]  }
 0x2b1   :  { %2759 = vmatmul.mubr.bf16.gmra.mrb[148].mxu0 %v7910_v34  ;;  %v7922_v34 = vld [vmem:[%s16203_s5 + $0x2e8] ss:$16 sps:$4 sm:$0xff]  }
 0x2b2   :  { %2470 = vmatmul.mubr.bf16.gmra.mrb[148].mxu1 %v7909_v40  ;;  %2766 = vmatprep.mubr.bf16.mxu0 %v7913_v4  ;;  %v7921_v40 = vld [vmem:[%s16203_s5 + $0x2e0] ss:$16 sps:$4 sm:$0xff]   ;;  %v7925_v4 = vld [vmem:[%s16203_s5 + $0x30c] ss:$16 sps:$4 sm:$0xff]  }
 0x2b3   :  { %2477 = vmatprep.mubr.bf16.mxu1 %v7911_v44  ;;  %v7923_v44 = vld [vmem:[%s16203_s5 + $0x304] ss:$16 sps:$4 sm:$0xff]  }
 0x2b9   :  { %2767 = vmatmul.mubr.bf16.gmra.mrb[152].mxu0 %v7916_v54  ;;  %v7928_v54 = vld [vmem:[%s16203_s5 + $0x308] ss:$16 sps:$4 sm:$0xff]  }
 0x2ba   :  { %2478 = vmatmul.mubr.bf16.gmra.mrb[152].mxu1 %v7915_v48  ;;  %2774 = vmatprep.mubr.bf16.mxu0 %v7919_v0  ;;  %v7927_v48 = vld [vmem:[%s16203_s5 + $0x300] ss:$16 sps:$4 sm:$0xff]   ;;  %v7931_v0 = vld [vmem:[%s16203_s5 + $0x32c] ss:$16 sps:$4 sm:$0xff]  }
 0x2bb   :  { %2485 = vmatprep.mubr.bf16.mxu1 %v7917_v38  ;;  %v7929_v38 = vld [vmem:[%s16203_s5 + $0x324] ss:$16 sps:$4 sm:$0xff]  }
 0x2c1   :  { %2775 = vmatmul.mubr.bf16.gmra.mrb[156].mxu0 %v7922_v34  ;;  %v7934_v34 = vld [vmem:[%s16203_s5 + $0x328] ss:$16 sps:$4 sm:$0xff]  }
 0x2c2   :  { %2486 = vmatmul.mubr.bf16.gmra.mrb[156].mxu1 %v7921_v40  ;;  %2782 = vmatprep.mubr.bf16.mxu0 %v7925_v4  ;;  %v7933_v40 = vld [vmem:[%s16203_s5 + $0x320] ss:$16 sps:$4 sm:$0xff]   ;;  %v7937_v4 = vld [vmem:[%s16203_s5 + $0x34c] ss:$16 sps:$4 sm:$0xff]  }
 0x2c3   :  { %2493 = vmatprep.mubr.bf16.mxu1 %v7923_v44  ;;  %v7935_v44 = vld [vmem:[%s16203_s5 + $0x344] ss:$16 sps:$4 sm:$0xff]  }
 0x2c9   :  { %2783 = vmatmul.mubr.bf16.gmra.mrb[160].mxu0 %v7928_v54  ;;  %v7940_v54 = vld [vmem:[%s16203_s5 + $0x348] ss:$16 sps:$4 sm:$0xff]  }
 0x2ca   :  { %2494 = vmatmul.mubr.bf16.gmra.mrb[160].mxu1 %v7927_v48  ;;  %2790 = vmatprep.mubr.bf16.mxu0 %v7931_v0  ;;  %v7939_v48 = vld [vmem:[%s16203_s5 + $0x340] ss:$16 sps:$4 sm:$0xff]   ;;  %v7943_v0 = vld [vmem:[%s16203_s5 + $0x36c] ss:$16 sps:$4 sm:$0xff]  }
 0x2cb   :  { %2501 = vmatprep.mubr.bf16.mxu1 %v7929_v38  ;;  %v7941_v38 = vld [vmem:[%s16203_s5 + $0x364] ss:$16 sps:$4 sm:$0xff]  }
 0x2d1   :  { %2791 = vmatmul.mubr.bf16.gmra.mrb[164].mxu0 %v7934_v34 }
 0x2d2   :  { %2502 = vmatmul.mubr.bf16.gmra.mrb[164].mxu1 %v7933_v40  ;;  %2798 = vmatprep.mubr.bf16.mxu0 %v7937_v4  ;;  %v9607_v4 = vstv %s16204_s1 }
 0x2d3   :  { %2509 = vmatprep.mubr.bf16.mxu1 %v7935_v44  ;;  %16632 = vst [vmem:[#allocation130_spill] sm:$0xff] %v9607_v4 }
 0x2d9   :  { %2799 = vmatmul.mubr.bf16.gmra.mrb[168].mxu0 %v7940_v54  ;;  %v7945_v54 = vld [vmem:[%s16203_s5 + $0x360] ss:$16 sps:$4 sm:$0xff]  }
 0x2da   :  { %2510 = vmatmul.mubr.bf16.gmra.mrb[168].mxu1 %v7939_v48  ;;  %2806 = vmatprep.mubr.bf16.mxu0 %v7943_v0 }
 0x2db   :  { %2517 = vmatprep.mubr.bf16.mxu1 %v7941_v38  ;;  %v7947_v38 = vld [vmem:[%s16203_s5 + $0x384] ss:$16 sps:$4 sm:$0xff]  }
 0x2dc   :  { %v2592_v34 = vpop.f32.mrb[64].mxu0 }
 0x2dd   :  { %v2303_v40 = vpop.f32.mrb[64].mxu1  ;;  %v2594_v44 = vpop.f32.mrb[65].mxu0 }
 0x2de   :  { %v2593_v7 = vadd.f32 %v2592_v34, %v2303_v40  ;;  %v2305_v36 = vpop.f32.mrb[65].mxu1  ;;  %v2595_v58 = vpop.f32.mrb[66].mxu0  ;;  %v7949_v44 = vld [vmem:[%s16203_s5 + $0x38c] ss:$16 sps:$4 sm:$0xff]  }
 0x2df   :  { %v2306_v48 = vpop.f32.mrb[66].mxu1  ;;  %v2597_v0 = vpop.f32.mrb[67].mxu0 }
 0x2e0   :  { %v2848_v46 = vadd.f32 %v9607_v4, %v2593_v7  ;;  %v2596_v50 = vadd.f32 %v2595_v58, %v2306_v48  ;;  %v2308_v34 = vpop.f32.mrb[67].mxu1  ;;  %v7951_v58 = vld [vmem:[%s16203_s5 + $0x380] ss:$16 sps:$4 sm:$0xff]  }
 0x2e1   :  { %2807 = vmatmul.mubr.bf16.gmra.mrb[172].mxu0 %v7946_v62 }
 0x2e2   :  { %v2849_v36 = vadd.f32 %v9607_v4, %v2596_v50  ;;  %2518 = vmatmul.mubr.bf16.gmra.mrb[172].mxu1 %v7945_v54  ;;  %2914 = vperm.xlu0 %7665, %v2848_v46   ;;  %v7953_v46 = vld [vmem:[%s16203_s5 + $0x3a4] ss:$16 sps:$4 sm:$0xff]  }
 0x2e3   :  { %2525 = vmatprep.mubr.bf16.mxu1 %v7947_v38  ;;  %2814 = vmatprep.mubr.bf16.mxu0 %v7949_v44 }
 0x2e4   :  { %2919 = vperm.xlu1 %7666, %v2849_v36   ;;  %v2600_v40 = vpop.f32.mrb[68].mxu0 }
 0x2e5   :  { %v2311_v0 = vpop.f32.mrb[68].mxu1  ;;  %v2602_v14 = vpop.f32.mrb[69].mxu0 }
 0x2e6   :  { %v2601_v55 = vadd.f32 %v2600_v40, %v2311_v0  ;;  %v2313_v60 = vpop.f32.mrb[69].mxu1  ;;  %v2603_v7 = vpop.f32.mrb[70].mxu0  ;;  %v7955_v14 = vld [vmem:[%s16203_s5 + $0x3ac] ss:$16 sps:$4 sm:$0xff]   ;;  %v7958_v40 = vld [vmem:[%s16203_s5 + $0x3a8] ss:$16 sps:$4 sm:$0xff]  }
 0x2e7   :  { %v2314_v50 = vpop.f32.mrb[70].mxu1  ;;  %v2605_v62 = vpop.f32.mrb[71].mxu0 }
 0x2e8   :  { %v2850_v54 = vadd.f32 %v9607_v4, %v2601_v55  ;;  %v2604_v48 = vadd.f32 %v2603_v7, %v2314_v50  ;;  %v2316_v38 = vpop.f32.mrb[71].mxu1  ;;  %v7959_v50 = vld [vmem:[%s16203_s5 + $0x3c4] ss:$16 sps:$4 sm:$0xff]  }
 0x2e9   :  { %2815 = vmatmul.mubr.bf16.gmra.mrb[176].mxu0 %v7952_v10  ;;  %v7957_v10 = vld [vmem:[%s16203_s5 + $0x3a0] ss:$16 sps:$4 sm:$0xff]  }
 0x2ea   :  { %v2851_v60 = vadd.f32 %v9607_v4, %v2604_v48  ;;  %2526 = vmatmul.mubr.bf16.gmra.mrb[176].mxu1 %v7951_v58  ;;  %2924 = vperm.xlu1 %7666, %v2850_v54  }
 0x2eb   :  { %2533 = vmatprep.mubr.bf16.mxu1 %v7953_v46  ;;  %2822 = vmatprep.mubr.bf16.mxu0 %v7955_v14  ;;  %v7961_v46 = vld [vmem:[%s16203_s5 + $0x3cc] ss:$16 sps:$4 sm:$0xff]  }
 0x2ec   :  { %2929 = vperm.xlu0 %7665, %v2851_v60   ;;  %v2608_v44 = vpop.f32.mrb[72].mxu0 }
 0x2ed   :  { %v2319_v34 = vpop.f32.mrb[72].mxu1  ;;  %v2610_v36 = vpop.f32.mrb[73].mxu0 }
 0x2ee   :  { %v2609_v0 = vadd.f32 %v2608_v44, %v2319_v34  ;;  %v2321_v62 = vpop.f32.mrb[73].mxu1  ;;  %v2611_v55 = vpop.f32.mrb[74].mxu0  ;;  %v7964_v36 = vld [vmem:[%s16203_s5 + $0x3c8] ss:$16 sps:$4 sm:$0xff]  }
 0x2ef   :  { %v2322_v7 = vpop.f32.mrb[74].mxu1  ;;  %v2613_v58 = vpop.f32.mrb[75].mxu0 }
 0x2f0   :  { %v2852_v14 = vadd.f32 %v9607_v4, %v2609_v0  ;;  %v2612_v54 = vadd.f32 %v2611_v55, %v2322_v7  ;;  %v2324_v48 = vpop.f32.mrb[75].mxu1  ;;  %v7965_v7 = vld [vmem:[%s16203_s5 + $0x3e4] ss:$16 sps:$4 sm:$0xff]  }
 0x2f1   :  { %2823 = vmatmul.mubr.bf16.gmra.mrb[180].mxu0 %v7958_v40  ;;  %v7963_v40 = vld [vmem:[%s16203_s5 + $0x3c0] ss:$16 sps:$4 sm:$0xff]  }
 0x2f2   :  { %v2853_v38 = vadd.f32 %v9607_v4, %v2612_v54  ;;  %2534 = vmatmul.mubr.bf16.gmra.mrb[180].mxu1 %v7957_v10  ;;  %2934 = vperm.xlu1 %7666, %v2852_v14   ;;  %v8483_v48 = vld [vmem:[%s16202_s3] sm:$0xff] }
 0x2f3   :  { %2541 = vmatprep.mubr.bf16.mxu1 %v7959_v50  ;;  %2830 = vmatprep.mubr.bf16.mxu0 %v7961_v46  ;;  %v7967_v50 = vld [vmem:[%s16203_s5 + $0x3ec] ss:$16 sps:$4 sm:$0xff]  }
 0x2f4   :  { %2939 = vperm.xlu0 %7665, %v2853_v38   ;;  %v2616_v60 = vpop.f32.mrb[76].mxu0  ;;  %v9667_v38 = vunpack.c.l.bf16 %v8483_v48 }
 0x2f5   :  { %v2327_v44 = vpop.f32.mrb[76].mxu1  ;;  %v2618_v34 = vpop.f32.mrb[77].mxu0 }
 0x2f6   :  { %v2617_v62 = vadd.f32 %v2616_v60, %v2327_v44  ;;  %v2329_v58 = vpop.f32.mrb[77].mxu1  ;;  %v2619_v0 = vpop.f32.mrb[78].mxu0  ;;  %16633 = vst [vmem:[#allocation131_spill] sm:$0xff] %v9667_v38  ;;  %v9669_v60 = vunpack.c.h.bf16 %v8483_v48  ;;  %v8484_v44 = vld [vmem:[%s16202_s3 + $0x8] sm:$0xff] }
 0x2f7   :  { %v2330_v55 = vpop.f32.mrb[78].mxu1  ;;  %v2621_v10 = vpop.f32.mrb[79].mxu0  ;;  %v9674_v34 = vunpack.c.l.bf16 %v8484_v44  ;;  %v9676_v58 = vunpack.c.h.bf16 %v8484_v44  ;;  %v8487_v44 = vld [vmem:[%s16202_s3 + $0x10] sm:$0xff] }
 0x2f8   :  { %v2854_v46 = vadd.f32 %v9607_v4, %v2617_v62  ;;  %v2620_v14 = vadd.f32 %v2619_v0, %v2330_v55  ;;  %v2332_v54 = vpop.f32.mrb[79].mxu1  ;;  %16634 = vst [vmem:[#allocation132_spill] sm:$0xff] %v9669_v60  ;;  %v8485_v62 = vld [vmem:[%s16202_s3 + $0x100] sm:$0xff]  ;;  %v9696_v24 = vunpack.c.l.bf16 %v8487_v44 }
 0x2f9   :  { %2831 = vmatmul.mubr.bf16.gmra.mrb[184].mxu0 %v7964_v36  ;;  %16635 = vst [vmem:[#allocation133_spill] sm:$0xff] %v9676_v58  ;;  %v9681_v0 = vunpack.c.l.bf16 %v8485_v62  ;;  %v9683_v55 = vunpack.c.h.bf16 %v8485_v62  ;;  %v8486_v54 = vld [vmem:[%s16202_s3 + $0x108] sm:$0xff]  ;;  %v9698_v62 = vunpack.c.h.bf16 %v8487_v44 }
 0x2fa   :  { %v2855_v10 = vadd.f32 %v9607_v4, %v2620_v14  ;;  %2542 = vmatmul.mubr.bf16.gmra.mrb[184].mxu1 %v7963_v40  ;;  %2944 = vperm.xlu1 %7666, %v2854_v46   ;;  %v9689_v48 = vunpack.c.l.bf16 %v8486_v54  ;;  %v9691_v36 = vunpack.c.h.bf16 %v8486_v54  ;;  %16640 = vst [vmem:[#allocation138_spill] sm:$0xff] %v9696_v24  ;;  %v8488_v40 = vld [vmem:[%s16202_s3 + $0x18] sm:$0xff]  ;;  %v8489_v54 = vld [vmem:[%s16202_s3 + $0x110] sm:$0xff] }
 0x2fb   :  { %16636 = vst [vmem:[#allocation134_spill] sm:$0xff] %v9681_v0  ;;  %16637 = vst [vmem:[#allocation135_spill] sm:$0xff] %v9683_v55  ;;  %2549 = vmatprep.mubr.bf16.mxu1 %v7965_v7  ;;  %2838 = vmatprep.mubr.bf16.mxu0 %v7967_v50  ;;  %v9703_v46 = vunpack.c.l.bf16 %v8488_v40  ;;  %v9705_v14 = vunpack.c.h.bf16 %v8488_v40  ;;  %v8490_v7 = vld [vmem:[%s16202_s3 + $0x118] sm:$0xff]  ;;  %v8491_v40 = vld [vmem:[%s16202_s3 + $0x20] sm:$0xff] }
 0x2fc   :  { %16638 = vst [vmem:[#allocation136_spill] sm:$0xff] %v9689_v48  ;;  %16639 = vst [vmem:[#allocation137_spill] sm:$0xff] %v9691_v36  ;;  %v9710_v36 = vunpack.c.l.bf16 %v8489_v54  ;;  %v9712_v48 = vunpack.c.h.bf16 %v8489_v54  ;;  %2949 = vperm.xlu0 %7665, %v2855_v10   ;;  %v2624_v44 = vpop.f32.mrb[80].mxu0  ;;  %v9717_v50 = vunpack.c.l.bf16 %v8490_v7  ;;  %v9719_v55 = vunpack.c.h.bf16 %v8490_v7  ;;  %v7970_v10 = vld [vmem:[%s16203_s5 + $0x3e8] ss:$16 sps:$4 sm:$0xff]  }
 0x2fd   :  { %16641 = vst [vmem:[#allocation139_spill] sm:$0xff] %v9698_v62  ;;  %16642 = vst [vmem:[#allocation140_spill] sm:$0xff] %v9705_v14  ;;  %v9724_v0 = vunpack.c.l.bf16 %v8491_v40  ;;  %v9726_v20 = vunpack.c.h.bf16 %v8491_v40  ;;  %v2335_v54 = vpop.f32.mrb[80].mxu1 }
 0x2fe   :  { %16643 = vst [vmem:[#allocation141_spill] sm:$0xff] %v9710_v36  ;;  %16644 = vst [vmem:[#allocation142_spill] sm:$0xff] %v9712_v48  ;;  %v2626_v48 = vpop.f32.mrb[81].mxu0  ;;  %v8493_v36 = vld [vmem:[%s16202_s3 + $0x120] sm:$0xff]  ;;  %v2625_v2 = vadd.f32 %v2624_v44, %v2335_v54  ;;  %v8495_v44 = vld [vmem:[%s16202_s3 + $0x30] sm:$0xff] }
 0x2ff   :  { %16645 = vst [vmem:[#allocation143_spill] sm:$0xff] %v9717_v50  ;;  %16646 = vst [vmem:[#allocation144_spill] sm:$0xff] %v9719_v55  ;;  %v8492_v50 = vld [vmem:[%s16202_s3 + $0x28] sm:$0xff]  ;;  %v9741_v40 = vunpack.c.l.bf16 %v8493_v36  ;;  %v2337_v48 = vpop.f32.mrb[81].mxu1  ;;  %v2627_v6 = vpop.f32.mrb[82].mxu0  ;;  %v9746_v30 = vunpack.c.h.bf16 %v8493_v36  ;;  %v9758_v54 = vunpack.c.l.bf16 %v8495_v44  ;;  %v9760_v27 = vunpack.c.h.bf16 %v8495_v44  ;;  %v8496_v36 = vld [vmem:[%s16202_s3 + $0x38] sm:$0xff] }
 0x300   :  { %16647 = vst [vmem:[#allocation145_spill] sm:$0xff] %v9724_v0  ;;  %16648 = vst [vmem:[#allocation146_spill] sm:$0xff] %v9726_v20  ;;  %v9734_v7 = vunpack.c.l.bf16 %v8492_v50  ;;  %v9736_v55 = vunpack.c.h.bf16 %v8492_v50  ;;  %v8494_v50 = vld [vmem:[%s16202_s3 + $0x128] sm:$0xff]  ;;  %v2338_v48 = vpop.f32.mrb[82].mxu1  ;;  %v9768_v61 = vunpack.c.h.bf16 %v8496_v36  ;;  %v8498_v44 = vld [vmem:[%s16202_s3 + $0x138] sm:$0xff] }
 0x301   :  { %16651 = vst [vmem:[#allocation149_spill] sm:$0xff] %v9741_v40  ;;  %16652 = vst [vmem:[#allocation150_spill] sm:$0xff] %v9746_v30  ;;  %v9751_v12 = vunpack.c.l.bf16 %v8494_v50  ;;  %v9753_v16 = vunpack.c.h.bf16 %v8494_v50  ;;  %v2629_v40 = vpop.f32.mrb[83].mxu0  ;;  %v9765_v30 = vunpack.c.l.bf16 %v8496_v36  ;;  %v2628_v50 = vadd.f32 %v2627_v6, %v2338_v48  ;;  %2839 = vmatmul.mubr.bf16.gmra.mrb[188].mxu0 %v7970_v10  ;;  %v8499_v6 = vld [vmem:[%s16202_s3 + $0x40] sm:$0xff]  ;;  %v8500_v36 = vld [vmem:[%s16202_s3 + $0x48] sm:$0xff] }
 0x302   :  { %16649 = vst [vmem:[#allocation147_spill] sm:$0xff] %v9734_v7  ;;  %16650 = vst [vmem:[#allocation148_spill] sm:$0xff] %v9736_v55  ;;  %v9775_v40 = vunpack.c.h.bf16 %v8497_v22  ;;  %v9780_v41 = vunpack.c.l.bf16 %v8498_v44  ;;  %v9789_v48 = vunpack.c.h.bf16 %v8499_v6  ;;  %2550 = vmatmul.mubr.bf16.gmra.mrb[188].mxu1 %v7969_v32  ;;  %v9797_v10 = vunpack.c.h.bf16 %v8500_v36  ;;  %v8502_v32 = vld [vmem:[%s16202_s3 + $0x148] sm:$0xff] }
 0x303   :  { %16653 = vst [vmem:[#allocation151_spill] sm:$0xff] %v9751_v12  ;;  %16654 = vst [vmem:[#allocation152_spill] sm:$0xff] %v9753_v16  ;;  %v2856_v12 = vadd.f32 %v9607_v4, %v2625_v2  ;;  %v2340_v16 = vpop.f32.mrb[83].mxu1  ;;  %v9782_v2 = vunpack.c.h.bf16 %v8498_v44  ;;  %v2857_v22 = vadd.f32 %v9607_v4, %v2628_v50  ;;  %v8501_v44 = vld [vmem:[%s16202_s3 + $0x140] sm:$0xff]  ;;  %v9811_v50 = vunpack.c.h.bf16 %v8502_v32 }
 0x304   :  { %16655 = vst [vmem:[#allocation153_spill] sm:$0xff] %v9765_v30  ;;  %16656 = vst [vmem:[#allocation154_spill] sm:$0xff] %v9768_v61  ;;  %v9787_v16 = vunpack.c.l.bf16 %v8499_v6  ;;  %v9804_v6 = vunpack.c.h.bf16 %v8501_v44 }
 0x305   :  { %16658 = vst [vmem:[#allocation156_spill] sm:$0xff] %v9775_v40  ;;  %16659 = vst [vmem:[#allocation157_spill] sm:$0xff] %v9780_v41  ;;  %2954 = vperm.xlu1 %7666, %v2856_v12   ;;  %v9795_v41 = vunpack.c.l.bf16 %v8500_v36  ;;  %v9809_v12 = vunpack.c.l.bf16 %v8502_v32  ;;  %v8503_v36 = vld [vmem:[%s16202_s3 + $0x50] sm:$0xff]  ;;  %2959 = vperm.xlu0 %7665, %v2857_v22   ;;  %v8506_v22 = vld [vmem:[%s16202_s3 + $0x158] sm:$0xff] }
 0x306   :  { %16660 = vst [vmem:[#allocation158_spill] sm:$0xff] %v9782_v2  ;;  %16661 = vst [vmem:[#allocation159_spill] sm:$0xff] %v9789_v48  ;;  %v9802_v2 = vunpack.c.l.bf16 %v8501_v44  ;;  %v9816_v40 = vunpack.c.l.bf16 %v8503_v36  ;;  %v9818_v26 = vunpack.c.h.bf16 %v8503_v36  ;;  %v8504_v44 = vld [vmem:[%s16202_s3 + $0x58] sm:$0xff]  ;;  %v8505_v32 = vld [vmem:[%s16202_s3 + $0x150] sm:$0xff]  ;;  %v2343_v36 = vpop.f32.mrb[84].mxu1  ;;  %v9837_v28 = vunpack.c.l.bf16 %v8506_v22 }
 0x307   :  { %16662 = vst [vmem:[#allocation160_spill] sm:$0xff] %v9795_v41  ;;  %16663 = vst [vmem:[#allocation161_spill] sm:$0xff] %v9797_v10  ;;  %v9825_v17 = vunpack.c.h.bf16 %v8504_v44  ;;  %v9839_v18 = vunpack.c.h.bf16 %v8506_v22  ;;  %v8509_v22 = vld [vmem:[%s16202_s3 + $0x160] sm:$0xff] }
 0x308   :  { %16664 = vst [vmem:[#allocation162_spill] sm:$0xff] %v9802_v2  ;;  %16665 = vst [vmem:[#allocation163_spill] sm:$0xff] %v9804_v6  ;;  %v2632_v2 = vpop.f32.mrb[84].mxu0  ;;  %v9823_v6 = vunpack.c.l.bf16 %v8504_v44  ;;  %v8507_v44 = vld [vmem:[%s16202_s3 + $0x60] sm:$0xff] }
 0x309   :  { %16666 = vst [vmem:[#allocation164_spill] sm:$0xff] %v9809_v12  ;;  %16667 = vst [vmem:[#allocation165_spill] sm:$0xff] %v9811_v50  ;;  %v9830_v50 = vunpack.c.l.bf16 %v8505_v32  ;;  %v9832_v12 = vunpack.c.h.bf16 %v8505_v32  ;;  %v2634_v51 = vpop.f32.mrb[85].mxu0  ;;  %v9844_v8 = vunpack.c.l.bf16 %v8507_v44  ;;  %v2633_v52 = vadd.f32 %v2632_v2, %v2343_v36  ;;  %v8510_v36 = vld [vmem:[%s16202_s3 + $0x168] sm:$0xff] }
 0x30a   :  { %16668 = vst [vmem:[#allocation166_spill] sm:$0xff] %v9816_v40  ;;  %16669 = vst [vmem:[#allocation167_spill] sm:$0xff] %v9818_v26  ;;  %v2635_v32 = vpop.f32.mrb[86].mxu0  ;;  %v8508_v51 = vld [vmem:[%s16202_s3 + $0x68] sm:$0xff]  ;;  %v9868_v25 = vunpack.c.h.bf16 %v8510_v36 }
 0x30b   :  { %16670 = vst [vmem:[#allocation168_spill] sm:$0xff] %v9823_v6  ;;  %16671 = vst [vmem:[#allocation169_spill] sm:$0xff] %v9825_v17  ;;  %v9851_v42 = vunpack.c.l.bf16 %v8508_v51  ;;  %v2637_v2 = vpop.f32.mrb[87].mxu0  ;;  %v2858_v29 = vadd.f32 %v9607_v4, %v2633_v52 }
 0x30c   :  { %16672 = vst [vmem:[#allocation170_spill] sm:$0xff] %v9830_v50  ;;  %16673 = vst [vmem:[#allocation171_spill] sm:$0xff] %v9832_v12  ;;  %v2345_v50 = vpop.f32.mrb[85].mxu1  ;;  %v9846_v12 = vunpack.c.h.bf16 %v8507_v44  ;;  %v9865_v44 = vunpack.c.l.bf16 %v8510_v36  ;;  %v8512_v2 = vld [vmem:[%s16202_s3 + $0x78] sm:$0xff] }
 0x30d   :  { %16674 = vst [vmem:[#allocation172_spill] sm:$0xff] %v9837_v28  ;;  %16675 = vst [vmem:[#allocation173_spill] sm:$0xff] %v9839_v18  ;;  %v9853_v28 = vunpack.c.h.bf16 %v8508_v51  ;;  %v9858_v18 = vunpack.c.l.bf16 %v8509_v22  ;;  %v2346_v31 = vpop.f32.mrb[86].mxu1  ;;  %v9860_v50 = vunpack.c.h.bf16 %v8509_v22  ;;  %2964 = vperm.xlu1 %7666, %v2858_v29   ;;  %v8516_v29 = vld [vmem:[%s16202_s3 + $0x88] sm:$0xff] }
 0x30e   :  { %16676 = vst [vmem:[#allocation174_spill] sm:$0xff] %v9844_v8  ;;  %16677 = vst [vmem:[#allocation175_spill] sm:$0xff] %v9846_v12  ;;  %v2636_v51 = vadd.f32 %v2635_v32, %v2346_v31  ;;  %v8513_v31 = vld [vmem:[%s16202_s3 + $0x170] sm:$0xff] }
 0x30f   :  { %16678 = vst [vmem:[#allocation176_spill] sm:$0xff] %v9851_v42  ;;  %16679 = vst [vmem:[#allocation177_spill] sm:$0xff] %v9853_v28  ;;  %v2348_v28 = vpop.f32.mrb[87].mxu1  ;;  %v9887_v52 = vunpack.c.l.bf16 %v8513_v31 }
 0x310   :  { %16680 = vst [vmem:[#allocation178_spill] sm:$0xff] %v9858_v18  ;;  %16681 = vst [vmem:[#allocation179_spill] sm:$0xff] %v9860_v50  ;;  %v8511_v18 = vld [vmem:[%s16202_s3 + $0x70] sm:$0xff]  ;;  %v9880_v50 = vunpack.c.l.bf16 %v8512_v2  ;;  %v9889_v28 = vunpack.c.h.bf16 %v8513_v31  ;;  %v2859_v32 = vadd.f32 %v9607_v4, %v2636_v51  ;;  %v9909_v51 = vunpack.c.l.bf16 %v8516_v29 }
 0x311   :  { %16682 = vst [vmem:[#allocation180_spill] sm:$0xff] %v9865_v44  ;;  %16683 = vst [vmem:[#allocation181_spill] sm:$0xff] %v9868_v25  ;;  %v9873_v23 = vunpack.c.l.bf16 %v8511_v18  ;;  %v9875_v22 = vunpack.c.h.bf16 %v8511_v18  ;;  %v9882_v44 = vunpack.c.h.bf16 %v8512_v2  ;;  %v8514_v18 = vld [vmem:[%s16202_s3 + $0x178] sm:$0xff]  ;;  %v8515_v2 = vld [vmem:[%s16202_s3 + $0x80] sm:$0xff]  ;;  %v9911_v31 = vunpack.c.h.bf16 %v8516_v29 }
 0x312   :  { %16686 = vst [vmem:[#allocation184_spill] sm:$0xff] %v9880_v50  ;;  %16688 = vst [vmem:[#allocation186_spill] sm:$0xff] %v9887_v52  ;;  %v9895_v36 = vunpack.c.l.bf16 %v8514_v18  ;;  %v9897_v25 = vunpack.c.h.bf16 %v8514_v18  ;;  %v9904_v52 = vunpack.c.h.bf16 %v8515_v2  ;;  %v8517_v18 = vld [vmem:[%s16202_s3 + $0x180] sm:$0xff]  ;;  %2969 = vperm.xlu0 %7665, %v2859_v32   ;;  %v8519_v29 = vld [vmem:[%s16202_s3 + $0x90] sm:$0xff] }
 0x313   :  { %16684 = vst [vmem:[#allocation182_spill] sm:$0xff] %v9873_v23  ;;  %16685 = vst [vmem:[#allocation183_spill] sm:$0xff] %v9875_v22  ;;  %v8520_v32 = vld [vmem:[%s16202_s3 + $0x98] sm:$0xff]  ;;  %v3360_v23 = vlaneseq }
 0x314   :  { %16687 = vst [vmem:[#allocation185_spill] sm:$0xff] %v9882_v44  ;;  %16689 = vst [vmem:[#allocation187_spill] sm:$0xff] %v9889_v28  ;;  %v9902_v44 = vunpack.c.l.bf16 %v8515_v2  ;;  %v2640_v28 = vpop.f32.mrb[88].mxu0  ;;  %v8518_v2 = vld [vmem:[%s16202_s3 + $0x188] sm:$0xff]  ;;  %v9939_v50 = vunpack.c.h.bf16 %v8520_v32 }
 0x315   :  { %16690 = vst [vmem:[#allocation188_spill] sm:$0xff] %v9895_v36  ;;  %16691 = vst [vmem:[#allocation189_spill] sm:$0xff] %v9897_v25  ;;  %v9916_v25 = vunpack.c.l.bf16 %v8517_v18  ;;  %v9918_v36 = vunpack.c.h.bf16 %v8517_v18  ;;  %v2351_v18 = vpop.f32.mrb[88].mxu1 }
 0x316   :  { %16692 = vst [vmem:[#allocation190_spill] sm:$0xff] %v9902_v44  ;;  %16693 = vst [vmem:[#allocation191_spill] sm:$0xff] %v9904_v52  ;;  %v9923_v52 = vunpack.c.l.bf16 %v8518_v2  ;;  %v9925_v44 = vunpack.c.h.bf16 %v8518_v2  ;;  %v8521_v2 = vld [vmem:[%s16202_s3 + $0x190] sm:$0xff] }
 0x317   :  { %16694 = vst [vmem:[#allocation192_spill] sm:$0xff] %v9909_v51  ;;  %16695 = vst [vmem:[#allocation193_spill] sm:$0xff] %v9911_v31  ;;  %v9930_v31 = vunpack.c.l.bf16 %v8519_v29  ;;  %v9932_v51 = vunpack.c.h.bf16 %v8519_v29 }
 0x318   :  { %16696 = vst [vmem:[#allocation194_spill] sm:$0xff] %v9916_v25  ;;  %16697 = vst [vmem:[#allocation195_spill] sm:$0xff] %v9918_v36  ;;  %v2642_v36 = vpop.f32.mrb[89].mxu0  ;;  %v9937_v25 = vunpack.c.l.bf16 %v8520_v32 }
 0x319   :  { %16698 = vst [vmem:[#allocation196_spill] sm:$0xff] %v9923_v52  ;;  %16699 = vst [vmem:[#allocation197_spill] sm:$0xff] %v9925_v44  ;;  %v9944_v44 = vunpack.c.l.bf16 %v8521_v2  ;;  %v2641_v52 = vadd.f32 %v2640_v28, %v2351_v18  ;;  %v2643_v29 = vpop.f32.mrb[90].mxu0  ;;  %v8522_v36 = vld [vmem:[%s16202_s3 + $0x198] sm:$0xff] }
 0x31a   :  { %16700 = vst [vmem:[#allocation198_spill] sm:$0xff] %v9930_v31  ;;  %16701 = vst [vmem:[#allocation199_spill] sm:$0xff] %v9932_v51  ;;  %v2353_v31 = vpop.f32.mrb[89].mxu1  ;;  %v9946_v51 = vunpack.c.h.bf16 %v8521_v2  ;;  %v9951_v22 = vunpack.c.l.bf16 %v8522_v36 }
 0x31b   :  { %16702 = vst [vmem:[#allocation200_spill] sm:$0xff] %v9937_v25  ;;  %16703 = vst [vmem:[#allocation201_spill] sm:$0xff] %v9939_v50  ;;  %v9953_v25 = vunpack.c.h.bf16 %v8522_v36  ;;  %v2354_v32 = vpop.f32.mrb[90].mxu1  ;;  %v2645_v50 = vpop.f32.mrb[91].mxu0  ;;  %v2860_v18 = vadd.f32 %v9607_v4, %v2641_v52  ;;  %v8524_v36 = vld [vmem:[%s16202_s3 + $0xa8] sm:$0xff] }
 0x31c   :  { %16704 = vst [vmem:[#allocation202_spill] sm:$0xff] %v9944_v44  ;;  %16705 = vst [vmem:[#allocation203_spill] sm:$0xff] %v9946_v51  ;;  %v8523_v44 = vld [vmem:[%s16202_s3 + $0xa0] sm:$0xff]  ;;  %v2644_v2 = vadd.f32 %v2643_v29, %v2354_v32  ;;  %v2356_v51 = vpop.f32.mrb[91].mxu1  ;;  %v9968_v50 = vunpack.c.h.bf16 %v8524_v36  ;;  %v8526_v52 = vld [vmem:[%s16202_s3 + $0x1a8] sm:$0xff] }
 0x31d   :  { %16706 = vst [vmem:[#allocation204_spill] sm:$0xff] %v9951_v22  ;;  %16707 = vst [vmem:[#allocation205_spill] sm:$0xff] %v9953_v25  ;;  %v9958_v28 = vunpack.c.l.bf16 %v8523_v44  ;;  %v9960_v31 = vunpack.c.h.bf16 %v8523_v44  ;;  %v9966_v25 = vunpack.c.l.bf16 %v8524_v36  ;;  %v8525_v22 = vld [vmem:[%s16202_s3 + $0x1a0] sm:$0xff]  ;;  %v9980_v51 = vunpack.c.l.bf16 %v8526_v52  ;;  %v8527_v32 = vld [vmem:[%s16202_s3 + $0xb0] sm:$0xff]  ;;  %2974 = vperm.xlu1 %7666, %v2860_v18  }
 0x31e   :  { %16711 = vst [vmem:[#allocation209_spill] sm:$0xff] %v9968_v50  ;;  %v9973_v21 = vunpack.c.l.bf16 %v8525_v22  ;;  %v9975_v44 = vunpack.c.h.bf16 %v8525_v22  ;;  %v9982_v29 = vunpack.c.h.bf16 %v8526_v52  ;;  %v9987_v36 = vunpack.c.l.bf16 %v8527_v32  ;;  %v8528_v22 = vld [vmem:[%s16202_s3 + $0xb8] sm:$0xff] }
 0x31f   :  { %16708 = vst [vmem:[#allocation206_spill] sm:$0xff] %v9958_v28  ;;  %16709 = vst [vmem:[#allocation207_spill] sm:$0xff] %v9960_v31  ;;  %v2861_v50 = vadd.f32 %v9607_v4, %v2644_v2  ;;  %v9999_v52 = vshrl.u32 %v3360_v23, 7  ;;  %v8530_v18 = vld [vmem:[%s16202_s3 + $0x1b8] sm:$0xff] }
 0x320   :  { %16710 = vst [vmem:[#allocation208_spill] sm:$0xff] %v9966_v25  ;;  %16712 = vst [vmem:[#allocation210_spill] sm:$0xff] %v9973_v21  ;;  %v9990_v21 = vunpack.c.h.bf16 %v8527_v32  ;;  %v10011_v32 = vunpack.c.l.bf16 %v8530_v18 }
 0x321   :  { %16713 = vst [vmem:[#allocation211_spill] sm:$0xff] %v9975_v44  ;;  %16714 = vst [vmem:[#allocation212_spill] sm:$0xff] %v9980_v51  ;;  %v9995_v44 = vunpack.c.l.bf16 %v8528_v22  ;;  %v9997_v51 = vunpack.c.h.bf16 %v8528_v22  ;;  %2979 = vperm.xlu0 %7665, %v2861_v50   ;;  %v2648_v22 = vpop.f32.mrb[92].mxu0  ;;  %v3364_v15 = vadd.s32 24, %v9999_v52 }
 0x322   :  { %16715 = vst [vmem:[#allocation213_spill] sm:$0xff] %v9982_v29  ;;  %16716 = vst [vmem:[#allocation214_spill] sm:$0xff] %v9987_v36  ;;  %v8529_v29 = vld [vmem:[%s16202_s3 + $0x1b0] sm:$0xff] }
 0x323   :  { %16717 = vst [vmem:[#allocation215_spill] sm:$0xff] %v9990_v21  ;;  %16718 = vst [vmem:[#allocation216_spill] sm:$0xff] %v9995_v44  ;;  %v10004_v36 = vunpack.c.l.bf16 %v8529_v29  ;;  %v10006_v2 = vunpack.c.h.bf16 %v8529_v29  ;;  %v10013_v21 = vunpack.c.h.bf16 %v8530_v18  ;;  %v8532_v29 = vld [vmem:[%s16202_s3 + $0xc8] sm:$0xff]  ;;  %v10027_v18 = vand.u32 127, %v3360_v23 }
 0x324   :  { %16719 = vst [vmem:[#allocation217_spill] sm:$0xff] %v9997_v51  ;;  %16722 = vst [vmem:[#allocation220_spill] sm:$0xff] %v10011_v32  ;;  %v8531_v51 = vld [vmem:[%s16202_s3 + $0xc0] sm:$0xff]  ;;  %v2650_v32 = vpop.f32.mrb[93].mxu0  ;;  %v10029_v50 = vunpack.c.h.bf16 %v8532_v29 }
 0x325   :  { %16720 = vst [vmem:[#allocation218_spill] sm:$0xff] %v10004_v36  ;;  %16721 = vst [vmem:[#allocation219_spill] sm:$0xff] %v10006_v2  ;;  %v10018_v44 = vunpack.c.l.bf16 %v8531_v51  ;;  %v10020_v25 = vunpack.c.h.bf16 %v8531_v51  ;;  %v10025_v2 = vunpack.c.l.bf16 %v8532_v29  ;;  %v2359_v36 = vpop.f32.mrb[92].mxu1  ;;  %v2651_v28 = vpop.f32.mrb[94].mxu0  ;;  %v8535_v29 = vld [vmem:[%s16202_s3 + $0xd0] sm:$0xff] }
 0x326   :  { %16723 = vst [vmem:[#allocation221_spill] sm:$0xff] %v10013_v21  ;;  %16727 = vst [vmem:[#allocation225_spill] sm:$0xff] %v10029_v50  ;;  %v8533_v21 = vld [vmem:[%s16202_s3 + $0x1c0] sm:$0xff]  ;;  %v10048_v50 = vunpack.c.l.bf16 %v8535_v29 }
 0x327   :  { %16724 = vst [vmem:[#allocation222_spill] sm:$0xff] %v10018_v44  ;;  %16725 = vst [vmem:[#allocation223_spill] sm:$0xff] %v10020_v25  ;;  %v10034_v31 = vunpack.c.l.bf16 %v8533_v21  ;;  %v10036_v51 = vunpack.c.h.bf16 %v8533_v21  ;;  %v2649_v25 = vadd.f32 %v2648_v22, %v2359_v36  ;;  %v2361_v44 = vpop.f32.mrb[93].mxu1  ;;  %v2653_v21 = vpop.f32.mrb[95].mxu0  ;;  %v3429_v36 = vmul.u32 256, %v9999_v52  ;;  %v8536_v22 = vld [vmem:[%s16202_s3 + $0xd8] sm:$0xff] }
 0x328   :  { %16726 = vst [vmem:[#allocation224_spill] sm:$0xff] %v10025_v2  ;;  %v8534_v2 = vld [vmem:[%s16202_s3 + $0x1c8] sm:$0xff]  ;;  %16732 = vst [vmem:[#allocation230_spill] sm:$0xff] %v10048_v50  ;;  %v10051_v44 = vunpack.c.h.bf16 %v8535_v29  ;;  %v218_v50 = vld [vmem:[%s16205_s2] sm:$0xff]  ;;  %v10062_v19 = vunpack.c.h.bf16 %v8536_v22 }
 0x329   :  { %16728 = vst [vmem:[#allocation226_spill] sm:$0xff] %v10034_v31  ;;  %16729 = vst [vmem:[#allocation227_spill] sm:$0xff] %v10036_v51  ;;  %v10041_v32 = vunpack.c.l.bf16 %v8534_v2  ;;  %v10043_v23 = vunpack.c.h.bf16 %v8534_v2  ;;  %v2362_v31 = vpop.f32.mrb[94].mxu1  ;;  %v10056_v51 = vunpack.c.l.bf16 %v8536_v22  ;;  %v2862_v2 = vadd.f32 %v9607_v4, %v2649_v25  ;;  %v8537_v29 = vld [vmem:[%s16202_s3 + $0x1d0] sm:$0xff] }
 0x32a   :  { %16733 = vst [vmem:[#allocation231_spill] sm:$0xff] %v10051_v44  ;;  %16735 = vst [vmem:[#allocation233_spill] sm:$0xff] %v10062_v19  ;;  %v10067_v21 = vunpack.c.l.bf16 %v8537_v29  ;;  %v10070_v44 = vadd.s32 128, %v10027_v18  ;;  %v10073_v25 = vunpack.c.h.bf16 %v8537_v29  ;;  %v219_v29 = vld [vmem:[%s16205_s2 + $0x8] sm:$0xff]  ;;  %v10094_v42 = vadd.s32 %v3429_v36, %v10027_v18 }
 0x32b   :  { %16730 = vst [vmem:[#allocation228_spill] sm:$0xff] %v10041_v32  ;;  %16731 = vst [vmem:[#allocation229_spill] sm:$0xff] %v10043_v23  ;;  %v2652_v23 = vadd.f32 %v2651_v28, %v2362_v31  ;;  %v2364_v32 = vpop.f32.mrb[95].mxu1  ;;  %v8538_v28 = vld [vmem:[%s16202_s3 + $0x1d8] sm:$0xff]  ;;  %2984 = vperm.xlu1 %7666, %v2862_v2  }
 0x32c   :  { %16734 = vst [vmem:[#allocation232_spill] sm:$0xff] %v10056_v51  ;;  %16736 = vst [vmem:[#allocation234_spill] sm:$0xff] %v10067_v21  ;;  %v3362_v51 = vadd.s32 8, %v9999_v52  ;;  %v10078_v31 = vunpack.c.l.bf16 %v8538_v28  ;;  %v10080_v32 = vunpack.c.h.bf16 %v8538_v28  ;;  %v8539_v21 = vld [vmem:[%s16202_s3 + $0xe0] sm:$0xff]  ;;  %v3363_v28 = vadd.s32 16, %v9999_v52  ;;  %v2367_v11 = vpop.f32.mrb[96].mxu1 }
 0x32d   :  { %16737 = vst [vmem:[#allocation235_spill] sm:$0xff] %v10073_v25  ;;  %v2863_v22 = vadd.f32 %v9607_v4, %v2652_v23  ;;  %v10086_v19 = vunpack.c.l.bf16 %v8539_v21  ;;  %v10091_v25 = vsub.f32 0.0, %v218_v50  ;;  %16741 = vst [vmem:[#allocation239_spill] sm:$0xff] %v10094_v42  ;;  %v8540_v23 = vld [vmem:[%s16202_s3 + $0xe8] sm:$0xff]  ;;  %v220_v50 = vld [vmem:[%s16205_s2 + $0x10] sm:$0xff]  ;;  %v3686_v63 = vcvt.s32.f32 %v10094_v42 }
 0x32e   :  { %16738 = vst [vmem:[#allocation236_spill] sm:$0xff] %v10078_v31  ;;  %16739 = vst [vmem:[#allocation237_spill] sm:$0xff] %v10080_v32  ;;  %v10097_v32 = vunpack.c.h.bf16 %v8539_v21  ;;  %v10102_v2 = vunpack.c.l.bf16 %v8540_v23  ;;  %v10104_v31 = vunpack.c.h.bf16 %v8540_v23  ;;  %v8541_v21 = vld [vmem:[%s16202_s3 + $0x1e0] sm:$0xff]  ;;  %v10118_v23 = vadd.s32 %v3429_v36, %v10070_v44 }
 0x32f   :  { %16740 = vst [vmem:[#allocation238_spill] sm:$0xff] %v10086_v19  ;;  %2989 = vperm.xlu0 %7665, %v2863_v22   ;;  %v2656_v19 = vpop.f32.mrb[96].mxu0  ;;  %v10115_v13 = vunpack.c.h.bf16 %v8541_v21  ;;  %v221_v22 = vld [vmem:[%s16205_s2 + $0x18] sm:$0xff]  ;;  %v6379_v12 = vmul.f32 1.442695, %v10091_v25  ;;  %v3431_v8 = vmul.u32 256, %v3363_v28 }
 0x330   :  { %16742 = vst [vmem:[#allocation240_spill] sm:$0xff] %v10097_v32  ;;  %16743 = vst [vmem:[#allocation241_spill] sm:$0xff] %v10102_v2  ;;  %v10113_v32 = vunpack.c.l.bf16 %v8541_v21  ;;  %v2658_v2 = vpop.f32.mrb[97].mxu0  ;;  %v2657_v21 = vadd.f32 %v2656_v19, %v2367_v11  ;;  %v10137_v9 = vsub.f32 0.0, %v221_v22  ;;  %v3432_v11 = vmul.u32 256, %v3364_v15 }
 0x331   :  { %16744 = vst [vmem:[#allocation242_spill] sm:$0xff] %v10104_v31  ;;  %16746 = vst [vmem:[#allocation244_spill] sm:$0xff] %v10115_v13  ;;  %v3430_v31 = vmul.u32 256, %v3362_v51  ;;  %v2369_v13 = vpop.f32.mrb[97].mxu1  ;;  %v10130_v2 = vsub.f32 0.0, %v219_v29  ;;  %v10134_v51 = vsub.f32 0.0, %v220_v50  ;;  %7971 = vpow2.f32 %v6379_v12 }
 0x332   :  { %16745 = vst [vmem:[#allocation243_spill] sm:$0xff] %v10113_v32  ;;  %16747 = vst [vmem:[#allocation245_spill] sm:$0xff] %v10118_v23  ;;  %v2659_v32 = vpop.f32.mrb[98].mxu0  ;;  %v2370_v36 = vpop.f32.mrb[98].mxu1  ;;  %v2864_v59 = vadd.f32 %v9607_v4, %v2657_v21  ;;  %v8543_v13 = vld [vmem:[%s16202_s3 + $0xf0] sm:$0xff]  ;;  %vm6763_vm0 = vcmp.lt.s32.totalorder %v10094_v42, 512 }
 0x333   :  { %v2661_v1 = vpop.f32.mrb[99].mxu0  ;;  %v2660_v57 = vadd.f32 %v2659_v32, %v2370_v36  ;;  %v2372_v5 = vpop.f32.mrb[99].mxu1  ;;  %v10142_v19 = vunpack.c.l.bf16 %v8543_v13  ;;  %v10146_v29 = vadd.s32 %v3430_v31, %v10027_v18  ;;  %v10149_v28 = vadd.s32 %v3430_v31, %v10070_v44 }
 0x334   :  { %v3687_v1 = vcvt.s32.f32 %v10118_v23  ;;  %v10151_v50 = vunpack.c.h.bf16 %v8543_v13  ;;  %v8544_v5 = vld [vmem:[%s16202_s3 + $0xf8] sm:$0xff]  ;;  %2994 = vperm.xlu1 %7666, %v2864_v59   ;;  %v6381_v22 = vmul.f32 1.442695, %v10130_v2  ;;  %v6383_v36 = vmul.f32 1.442695, %v10134_v51  ;;  %v2664_v3 = vpop.f32.mrb[100].mxu0 }
 0x335   :  { %16750 = vst [vmem:[#allocation248_spill] sm:$0xff] %v10142_v19  ;;  %16751 = vst [vmem:[#allocation249_spill] sm:$0xff] %v10146_v29  ;;  %v10156_v15 = vunpack.c.l.bf16 %v8544_v5  ;;  %v2865_v32 = vadd.f32 %v9607_v4, %v2660_v57  ;;  %v10160_v21 = vunpack.c.h.bf16 %v8544_v5  ;;  %v10164_v31 = vadd.s32 %v3431_v8, %v10027_v18  ;;  %v2375_v59 = vpop.f32.mrb[100].mxu1  ;;  %v2666_v5 = vpop.f32.mrb[101].mxu0 }
 0x336   :  { %16752 = vst [vmem:[#allocation250_spill] sm:$0xff] %v10149_v28  ;;  %16753 = vst [vmem:[#allocation251_spill] sm:$0xff] %v10151_v50  ;;  %v10167_v13 = vadd.s32 %v3431_v8, %v10070_v44  ;;  %v3814_v50 = vadd.f32 1.0, %v3686_v63  ;;  %v10171_v57 = vadd.s32 %v3432_v11, %v10027_v18  ;;  %v10176_v19 = vstv %s16206_s0  ;;  %v2377_v63 = vpop.f32.mrb[101].mxu1  ;;  %v2667_v12 = vpop.f32.mrb[102].mxu0  ;;  %v222_v5 = vld [vmem:[%s16205_s2 + $0x20] sm:$0xff] }
 0x337   :  { %16754 = vst [vmem:[#allocation252_spill] sm:$0xff] %v10156_v15  ;;  %16755 = vst [vmem:[#allocation253_spill] sm:$0xff] %v10160_v21  ;;  %2999 = vperm.xlu0 %7665, %v2865_v32   ;;  %v6385_v15 = vmul.f32 1.442695, %v10137_v9  ;;  %v3815_v21 = vadd.f32 1.0, %v3687_v1  ;;  %v3688_v8 = vcvt.s32.f32 %v10146_v29  ;;  %v3689_v32 = vcvt.s32.f32 %v10149_v28  ;;  %v2378_v17 = vpop.f32.mrb[102].mxu1 }
 0x338   :  { %16756 = vst [vmem:[#allocation254_spill] sm:$0xff] %v10164_v31  ;;  %16757 = vst [vmem:[#allocation255_spill] sm:$0xff] %v10167_v13  ;;  %v2665_v56 = vadd.f32 %v2664_v3, %v2375_v59  ;;  %7973 = vpow2.f32 %v6381_v22  ;;  %v10185_v1 = vadd.s32 %v3432_v11, %v10070_v44  ;;  %v2669_v6 = vpop.f32.mrb[103].mxu0  ;;  %v3690_v47 = vcvt.s32.f32 %v10164_v31  ;;  %v2380_v22 = vpop.f32.mrb[103].mxu1 }
 0x339   :  { %16758 = vst [vmem:[#allocation256_spill] sm:$0xff] %v10171_v57  ;;  %7975 = vpow2.f32 %v6383_v36  ;;  %v3691_v3 = vcvt.s32.f32 %v10167_v13  ;;  %v2668_v63 = vadd.f32 %v2667_v12, %v2378_v17  ;;  %v3692_v11 = vcvt.s32.f32 %v10171_v57  ;;  %v2383_v22 = vpop.f32.mrb[104].mxu1 }
 0x33a   :  { %16759 = vst [vmem:[#allocation257_spill] sm:$0xff] %v10185_v1  ;;  %v2866_v59 = vadd.f32 %v9607_v4, %v2665_v56  ;;  %7977 = vpow2.f32 %v6385_v15  ;;  %v10197_v6 = vadd.f32 %v10176_v19, %v3814_v50  ;;  %v10200_v36 = vadd.f32 %v10176_v19, %v3815_v21  ;;  %v2385_v37 = vpop.f32.mrb[105].mxu1 }
 0x33b   :  { %v3816_v49 = vadd.f32 1.0, %v3688_v8  ;;  %v10202_v45 = vsub.f32 0.0, %v222_v5  ;;  %v2867_v56 = vadd.f32 %v9607_v4, %v2668_v63  ;;  %vm6123_vm1 = vcmp.gt.f32.partialorder %v10091_v25, 0.0  ;;  %v2672_v8 = vpop.f32.mrb[104].mxu0  ;;  %v7972_v39 = vpop.eup %7971  ;;  %v224_v37 = vld [vmem:[%s16205_s2 + $0x30] sm:$0xff] }
 0x33c   :  { %16760 = vst [vmem:[#allocation258_spill] sm:$0xff] %v10200_v36  ;;  %3004 = vperm.xlu1 %7666, %v2866_v59   ;;  %v3817_v17 = vadd.f32 1.0, %v3689_v32  ;;  %v3693_v15 = vcvt.s32.f32 %v10185_v1  ;;  %vm6124_vm2 = vcmp.gt.f32.partialorder %v10130_v2, 0.0  ;;  %vm6764_vm3 = vcmp.lt.s32.totalorder %v10118_v23, 512  ;;  %v2674_v43 = vpop.f32.mrb[105].mxu0  ;;  %v2386_v60 = vpop.f32.mrb[106].mxu1 }
 0x33d   :  { %v10209_v50 = vsub.f32 0.0, %v223_v53  ;;  %v3818_v12 = vadd.f32 1.0, %v3690_v47  ;;  %v10212_v21 = vadd.s32 32, %v9999_v52  ;;  %3009 = vperm.xlu0 %7665, %v2867_v56   ;;  %v6251_v5 = vadd.f32 1.0, %v10091_v25  ;;  %v2675_v36 = vpop.f32.mrb[106].mxu0  ;;  %v2388_v62 = vpop.f32.mrb[107].mxu1 }
 0x33e   :  { %v6252_v59 = vadd.f32 1.0, %v10130_v2  ;;  %v3819_v63 = vadd.f32 1.0, %v3691_v3  ;;  %v3820_v32 = vadd.f32 1.0, %v3692_v11  ;;  %v10219_v53 = vadd.f32 %v10176_v19, %v3816_v49  ;;  %v2677_v38 = vpop.f32.mrb[107].mxu0 }
 0x33f   :  { %v6387_v47 = vmul.f32 1.442695, %v10202_v45  ;;  %v2673_v56 = vadd.f32 %v2672_v8, %v2383_v22  ;;  %v3821_v11 = vadd.f32 1.0, %v3693_v15  ;;  %v10228_v49 = vadd.f32 %v10176_v19, %v3817_v17  ;;  %v225_v17 = vld [vmem:[%s16205_s2 + $0x38] sm:$0xff] }
 0x340   :  { %v6389_v58 = vmul.f32 1.442695, %v10209_v50  ;;  %v10232_v8 = vadd.f32 %v10176_v19, %v3818_v12  ;;  %v3433_v22 = vmul.u32 256, %v10212_v21  ;;  %v2676_v15 = vadd.f32 %v2675_v36, %v2386_v60 }
 0x341   :  { %v2868_v43 = vadd.f32 %v9607_v4, %v2673_v56  ;;  %v10240_v38 = vadd.f32 %v10176_v19, %v3819_v63  ;;  %v10246_v12 = vadd.f32 %v10176_v19, %v3820_v32  ;;  %v6253_v21 = vadd.f32 1.0, %v10134_v51 }
 0x342   :  { %16761 = vst [vmem:[#allocation259_spill] sm:$0xff] %v10232_v8  ;;  %v7974_v3 = vpop.eup %7973  ;;  %v6635_v8 = vsel %vm6123_vm1, %v6251_v5, %v7972_v39  ;;  %v6254_v56 = vadd.f32 1.0, %v10137_v9  ;;  %7979 = vpow2.f32 %v6387_v47  ;;  %v2869_v62 = vadd.f32 %v9607_v4, %v2676_v15  ;;  %v2680_v5 = vpop.f32.mrb[108].mxu0 }
 0x343   :  { %v7976_v24 = vpop.eup %7975  ;;  %3014 = vperm.xlu1 %7666, %v2868_v43   ;;  %vm6125_vm4 = vcmp.gt.f32.partialorder %v10134_v51, 0.0  ;;  %vm6126_vm5 = vcmp.gt.f32.partialorder %v10137_v9, 0.0  ;;  %v10255_v36 = vsub.f32 0.0, %v224_v37  ;;  %v6636_v63 = vsel %vm6124_vm2, %v6252_v59, %v7974_v3  ;;  %v2682_v3 = vpop.f32.mrb[109].mxu0 }
 0x344   :  { %v7978_v60 = vpop.eup %7977  ;;  %7981 = vpow2.f32 %v6389_v58  ;;  %v10265_v39 = vsub.f32 0.0, %v225_v17  ;;  %v10268_v25 = vadd.s32 %v3433_v22, %v10027_v18  ;;  %3019 = vperm.xlu0 %7665, %v2869_v62   ;;  %v10272_v32 = vsel %vm6763_vm0, %v6635_v8, 0.0  ;;  %v2391_v58 = vpop.f32.mrb[108].mxu1 }
 0x345   :  { %16763 = vst [vmem:[#allocation261_spill] sm:$0xff] %v10272_v32  ;;  %v10276_v59 = vadd.f32 %v10176_v19, %v3821_v11  ;;  %v3366_v47 = vadd.s32 40, %v9999_v52  ;;  %v6637_v43 = vsel %vm6125_vm4, %v6253_v21, %v7976_v24  ;;  %v6638_v37 = vsel %vm6126_vm5, %v6254_v56, %v7978_v60  ;;  %v2393_v15 = vpop.f32.mrb[109].mxu1  ;;  %v2683_v17 = vpop.f32.mrb[110].mxu0 }
 0x346   :  { %16762 = vst [vmem:[#allocation260_spill] sm:$0xff] %v10268_v25  ;;  %vm6765_vm6 = vcmp.lt.s32.totalorder %v10146_v29, 512  ;;  %vm6766_vm7 = vcmp.lt.s32.totalorder %v10149_v28, 512  ;;  %v2681_v8 = vadd.f32 %v2680_v5, %v2391_v58  ;;  %v10287_v11 = vsel %vm6764_vm3, %v6636_v63, 0.0  ;;  %v2394_v51 = vpop.f32.mrb[110].mxu1  ;;  %v2685_v24 = vpop.f32.mrb[111].mxu0 }
 0x347   :  { %16764 = vst [vmem:[#allocation262_spill] sm:$0xff] %v10287_v11  ;;  %v6391_v3 = vmul.f32 1.442695, %v10255_v36  ;;  %v6393_v9 = vmul.f32 1.442695, %v10265_v39  ;;  %v10294_v56 = vadd.s32 %v3433_v22, %v10070_v44  ;;  %v3694_v60 = vcvt.s32.f32 %v10268_v25  ;;  %v2396_v15 = vpop.f32.mrb[111].mxu1 }
 0x348   :  { %v2870_v5 = vadd.f32 %v9607_v4, %v2681_v8  ;;  %v2684_v58 = vadd.f32 %v2683_v17, %v2394_v51  ;;  %v10300_v63 = vsel %vm6765_vm6, %v6637_v43, 0.0  ;;  %v10304_v62 = vsel %vm6766_vm7, %v6638_v37, 0.0  ;;  %v226_v8 = vld [vmem:[%s16205_s2 + $0x40] sm:$0xff]  ;;  %v227_v37 = vld [vmem:[%s16205_s2 + $0x48] sm:$0xff] }
 0x349   :  { %16765 = vst [vmem:[#allocation263_spill] sm:$0xff] %v10294_v56  ;;  %16766 = vst [vmem:[#allocation264_spill] sm:$0xff] %v10300_v63  ;;  %vm6127_vm8 = vcmp.gt.f32.partialorder %v10202_v45, 0.0  ;;  %vm6128_vm9 = vcmp.gt.f32.partialorder %v10209_v50, 0.0  ;;  %v6255_v22 = vadd.f32 1.0, %v10202_v45  ;;  %v3434_v17 = vmul.u32 256, %v3366_v47 }
 0x34a   :  { %16767 = vst [vmem:[#allocation265_spill] sm:$0xff] %v10304_v62  ;;  %v2871_v51 = vadd.f32 %v9607_v4, %v2684_v58  ;;  %3024 = vperm.xlu1 %7666, %v2870_v5   ;;  %v6256_v43 = vadd.f32 1.0, %v10209_v50  ;;  %7983 = vpow2.f32 %v6391_v3  ;;  %v10318_v24 = vadd.s32 48, %v9999_v52  ;;  %v228_v5 = vld [vmem:[%s16205_s2 + $0x50] sm:$0xff]  ;;  %v2688_v3 = vpop.f32.mrb[112].mxu0 }
 0x34b   :  { %vm6767_vm10 = vcmp.lt.s32.totalorder %v10164_v31, 512  ;;  %7985 = vpow2.f32 %v6393_v9  ;;  %v3695_v21 = vcvt.s32.f32 %v10294_v56  ;;  %v3822_v47 = vadd.f32 1.0, %v3694_v60  ;;  %v229_v9 = vld [vmem:[%s16205_s2 + $0x58] sm:$0xff]  ;;  %v2399_v60 = vpop.f32.mrb[112].mxu1  ;;  %v2690_v11 = vpop.f32.mrb[113].mxu0 }
 0x34c   :  { %v7980_v15 = vpop.eup %7979  ;;  %3029 = vperm.xlu0 %7665, %v2871_v51   ;;  %vm6768_vm11 = vcmp.lt.s32.totalorder %v10167_v13, 512  ;;  %v10326_v58 = vsub.f32 0.0, %v226_v8  ;;  %v10333_v32 = vsub.f32 0.0, %v227_v37  ;;  %v10336_v51 = vadd.s32 %v3434_v17, %v10027_v18  ;;  %v2401_v29 = vpop.f32.mrb[113].mxu1 }
 0x34d   :  { %v10339_v28 = vadd.s32 %v3434_v17, %v10070_v44  ;;  %v2689_v2 = vadd.f32 %v2688_v3, %v2399_v60  ;;  %v2691_v62 = vpop.f32.mrb[114].mxu0  ;;  %v6639_v23 = vsel %vm6127_vm8, %v6255_v22, %v7980_v15  ;;  %v10344_v42 = vsub.f32 0.0, %v228_v5  ;;  %v2402_v37 = vpop.f32.mrb[114].mxu1 }
 0x34e   :  { %v7982_v63 = vpop.eup %7981  ;;  %16768 = vst [vmem:[#allocation266_spill] sm:$0xff] %v10336_v51  ;;  %v3435_v11 = vmul.u32 256, %v10318_v24  ;;  %v2693_v20 = vpop.f32.mrb[115].mxu0  ;;  %v3823_v0 = vadd.f32 1.0, %v3695_v21  ;;  %v10348_v14 = vadd.f32 %v10176_v19, %v3822_v47  ;;  %v10350_v17 = vsub.f32 0.0, %v229_v9 }
 0x34f   :  { %16769 = vst [vmem:[#allocation267_spill] sm:$0xff] %v10339_v28  ;;  %v2872_v29 = vadd.f32 %v9607_v4, %v2689_v2  ;;  %v2692_v3 = vadd.f32 %v2691_v62, %v2402_v37  ;;  %v2404_v60 = vpop.f32.mrb[115].mxu1  ;;  %v6640_v45 = vsel %vm6128_vm9, %v6256_v43, %v7982_v63  ;;  %v6395_v22 = vmul.f32 1.442695, %v10326_v58  ;;  %v2696_v9 = vpop.f32.mrb[116].mxu0  ;;  %v230_v37 = vld [vmem:[%s16205_s2 + $0x60] sm:$0xff] }
 0x350   :  { %v10359_v20 = vsel %vm6767_vm10, %v6639_v23, 0.0  ;;  %v6397_v21 = vmul.f32 1.442695, %v10333_v32  ;;  %v3696_v24 = vcvt.s32.f32 %v10336_v51  ;;  %v3697_v15 = vcvt.s32.f32 %v10339_v28  ;;  %v2698_v60 = vpop.f32.mrb[117].mxu0 }
 0x351   :  { %16770 = vst [vmem:[#allocation268_spill] sm:$0xff] %v10359_v20  ;;  %v2873_v47 = vadd.f32 %v9607_v4, %v2692_v3  ;;  %3034 = vperm.xlu1 %7666, %v2872_v29   ;;  %v6257_v2 = vadd.f32 1.0, %v10255_v36  ;;  %v6399_v50 = vmul.f32 1.442695, %v10344_v42  ;;  %v10368_v62 = vadd.s32 %v3435_v11, %v10027_v18  ;;  %v2407_v3 = vpop.f32.mrb[116].mxu1  ;;  %v2699_v13 = vpop.f32.mrb[118].mxu0 }
 0x352   :  { %v10372_v23 = vsel %vm6768_vm11, %v6640_v45, 0.0  ;;  %vm6129_vm12 = vcmp.gt.f32.partialorder %v10255_v36, 0.0  ;;  %v6258_v63 = vadd.f32 1.0, %v10265_v39  ;;  %v6401_v43 = vmul.f32 1.442695, %v10350_v17  ;;  %v2409_v20 = vpop.f32.mrb[117].mxu1 }
 0x353   :  { %16771 = vst [vmem:[#allocation269_spill] sm:$0xff] %v10368_v62  ;;  %16772 = vst [vmem:[#allocation270_spill] sm:$0xff] %v10372_v23  ;;  %3039 = vperm.xlu0 %7665, %v2873_v47   ;;  %vm6130_vm13 = vcmp.gt.f32.partialorder %v10265_v39, 0.0  ;;  %vm6769_vm14 = vcmp.lt.s32.totalorder %v10171_v57, 512  ;;  %vm6770_vm15 = vcmp.lt.s32.totalorder %v10185_v1, 512  ;;  %7987 = vpow2.f32 %v6395_v22  ;;  %v2410_v55 = vpop.f32.mrb[118].mxu1 }
 0x354   :  { %v7984_v5 = vpop.eup %7983  ;;  %7989 = vpow2.f32 %v6397_v21  ;;  %v10384_v45 = vadd.f32 %v10176_v19, %v3823_v0  ;;  %v3824_v47 = vadd.f32 1.0, %v3696_v24  ;;  %v10387_v8 = vadd.s32 %v3435_v11, %v10070_v44  ;;  %v2701_v7 = vpop.f32.mrb[119].mxu0 }
 0x355   :  { %v7986_v29 = vpop.eup %7985  ;;  %v2697_v23 = vadd.f32 %v2696_v9, %v2407_v3  ;;  %7991 = vpow2.f32 %v6399_v50  ;;  %v3698_v22 = vcvt.s32.f32 %v10368_v62  ;;  %v10391_v31 = vadd.s32 56, %v9999_v52  ;;  %v2412_v20 = vpop.f32.mrb[119].mxu1 }
 0x356   :  { %16773 = vst [vmem:[#allocation271_spill] sm:$0xff] %v10387_v8  ;;  %v6641_v21 = vsel %vm6129_vm12, %v6257_v2, %v7984_v5  ;;  %v3825_v0 = vadd.f32 1.0, %v3697_v15  ;;  %7993 = vpow2.f32 %v6401_v43  ;;  %v10395_v24 = vsub.f32 0.0, %v230_v37  ;;  %v2704_v43 = vpop.f32.mrb[120].mxu0  ;;  %v2415_v3 = vpop.f32.mrb[120].mxu1 }
 0x357   :  { %v2874_v11 = vadd.f32 %v9607_v4, %v2697_v23  ;;  %v2700_v9 = vadd.f32 %v2699_v13, %v2410_v55  ;;  %v6642_v50 = vsel %vm6130_vm13, %v6258_v63, %v7986_v29  ;;  %vm6131_vm0 = vcmp.gt.f32.partialorder %v10326_v58, 0.0  ;;  %v2706_v60 = vpop.f32.mrb[121].mxu0 }
 0x358   :  { %vm6132_vm1 = vcmp.gt.f32.partialorder %v10333_v32, 0.0  ;;  %v6259_v7 = vadd.f32 1.0, %v10326_v58  ;;  %v6260_v36 = vadd.f32 1.0, %v10333_v32  ;;  %v3699_v15 = vcvt.s32.f32 %v10387_v8  ;;  %v2707_v29 = vpop.f32.mrb[122].mxu0 }
 0x359   :  { %v2875_v2 = vadd.f32 %v9607_v4, %v2700_v9  ;;  %3044 = vperm.xlu1 %7666, %v2874_v11   ;;  %v10408_v55 = vsel %vm6769_vm14, %v6641_v21, 0.0  ;;  %v3826_v13 = vadd.f32 1.0, %v3698_v22  ;;  %v3436_v39 = vmul.u32 256, %v10391_v31  ;;  %v231_v21 = vld [vmem:[%s16205_s2 + $0x68] sm:$0xff]  ;;  %v2709_v1 = vpop.f32.mrb[123].mxu0 }
 0x35a   :  { %16774 = vst [vmem:[#allocation272_spill] sm:$0xff] %v10408_v55  ;;  %v10413_v23 = vsel %vm6770_vm15, %v6642_v50, 0.0  ;;  %vm6771_vm2 = vcmp.lt.s32.totalorder %v10268_v25, 512  ;;  %vm6772_vm3 = vcmp.lt.s32.totalorder %v10294_v56, 512  ;;  %v6403_v63 = vmul.f32 1.442695, %v10395_v24 }
 0x35b   :  { %16775 = vst [vmem:[#allocation273_spill] sm:$0xff] %v10413_v23  ;;  %3049 = vperm.xlu0 %7665, %v2875_v2   ;;  %v10419_v5 = vadd.f32 %v10176_v19, %v3824_v47  ;;  %v3369_v31 = vadd.s32 64, %v9999_v52  ;;  %v10425_v22 = vadd.f32 %v10176_v19, %v3825_v0  ;;  %v3827_v11 = vadd.f32 1.0, %v3699_v15  ;;  %v2417_v2 = vpop.f32.mrb[121].mxu1 }
 0x35c   :  { %v2705_v50 = vadd.f32 %v2704_v43, %v2415_v3  ;;  %v6261_v37 = vadd.f32 1.0, %v10344_v42  ;;  %v10434_v60 = vadd.f32 %v10176_v19, %v3826_v13  ;;  %v10437_v0 = vadd.s32 %v3436_v39, %v10027_v18  ;;  %v2418_v55 = vpop.f32.mrb[122].mxu1  ;;  %v232_v43 = vld [vmem:[%s16205_s2 + $0x70] sm:$0xff] }
 0x35d   :  { %v7988_v20 = vpop.eup %7987  ;;  %vm6133_vm4 = vcmp.gt.f32.partialorder %v10344_v42, 0.0  ;;  %v6262_v15 = vadd.f32 1.0, %v10350_v17  ;;  %7995 = vpow2.f32 %v6403_v63  ;;  %v3370_v3 = vadd.s32 72, %v9999_v52  ;;  %v2420_v9 = vpop.f32.mrb[123].mxu1  ;;  %v233_v63 = vld [vmem:[%s16205_s2 + $0x78] sm:$0xff] }
 0x35e   :  { %16776 = vst [vmem:[#allocation274_spill] sm:$0xff] %v10437_v0  ;;  %v7990_v23 = vpop.eup %7989  ;;  %v2876_v13 = vadd.f32 %v9607_v4, %v2705_v50  ;;  %v2708_v47 = vadd.f32 %v2707_v29, %v2418_v55  ;;  %v10446_v57 = vsub.f32 0.0, %v231_v21  ;;  %v3437_v8 = vmul.u32 256, %v3369_v31  ;;  %v2423_v32 = vpop.f32.mrb[124].mxu1 }
 0x35f   :  { %v7992_v2 = vpop.eup %7991  ;;  %vm6134_vm5 = vcmp.gt.f32.partialorder %v10350_v17, 0.0  ;;  %vm6773_vm6 = vcmp.lt.s32.totalorder %v10336_v51, 512  ;;  %vm6774_vm7 = vcmp.lt.s32.totalorder %v10339_v28, 512  ;;  %v10455_v61 = vadd.s32 %v3436_v39, %v10070_v44 }
 0x360   :  { %16777 = vst [vmem:[#allocation275_spill] sm:$0xff] %v10446_v57  ;;  %v7994_v1 = vpop.eup %7993  ;;  %v2877_v55 = vadd.f32 %v9607_v4, %v2708_v47  ;;  %3054 = vperm.xlu1 %7666, %v2876_v13   ;;  %v6643_v29 = vsel %vm6131_vm0, %v6259_v7, %v7988_v20  ;;  %v10461_v31 = vadd.f32 %v10176_v19, %v3827_v11  ;;  %v10463_v21 = vsub.f32 0.0, %v232_v43  ;;  %v2712_v47 = vpop.f32.mrb[124].mxu0 }
 0x361   :  { %16778 = vst [vmem:[#allocation276_spill] sm:$0xff] %v10455_v61  ;;  %v6644_v9 = vsel %vm6132_vm1, %v6260_v36, %v7990_v23  ;;  %v6645_v50 = vsel %vm6133_vm4, %v6261_v37, %v7992_v2  ;;  %v3700_v39 = vcvt.s32.f32 %v10437_v0  ;;  %v3438_v30 = vmul.u32 256, %v3370_v3  ;;  %v2714_v36 = vpop.f32.mrb[125].mxu0  ;;  %v2425_v43 = vpop.f32.mrb[125].mxu1 }
 0x362   :  { %16779 = vst [vmem:[#allocation277_spill] sm:$0xff] %v10463_v21  ;;  %3059 = vperm.xlu0 %7665, %v2877_v55   ;;  %v6646_v58 = vsel %vm6134_vm5, %v6262_v15, %v7994_v1  ;;  %v6405_v7 = vmul.f32 1.442695, %v10446_v57  ;;  %v10473_v11 = vsub.f32 0.0, %v233_v63  ;;  %v10476_v20 = vadd.s32 %v3437_v8, %v10027_v18  ;;  %v2715_v3 = vpop.f32.mrb[126].mxu0  ;;  %v2426_v1 = vpop.f32.mrb[126].mxu1 }
 0x363   :  { %v10480_v42 = vsel %vm6771_vm2, %v6643_v29, 0.0  ;;  %v3701_v23 = vcvt.s32.f32 %v10455_v61  ;;  %v10484_v37 = vadd.s32 %v3437_v8, %v10070_v44  ;;  %v10487_v17 = vadd.s32 80, %v9999_v52  ;;  %v2717_v63 = vpop.f32.mrb[127].mxu0  ;;  %v2428_v36 = vpop.f32.mrb[127].mxu1  ;;  %v16802_v61 = vld [vmem:[#allocation132_spill] sm:$0xff] }
 0x364   :  { %16780 = vst [vmem:[#allocation278_spill] sm:$0xff] %v10473_v11  ;;  %16781 = vst [vmem:[#allocation279_spill] sm:$0xff] %v10476_v20  ;;  %v2713_v15 = vadd.f32 %v2712_v47, %v2423_v32  ;;  %v10491_v2 = vsel %vm6772_vm3, %v6644_v9, 0.0  ;;  %v10495_v13 = vsel %vm6773_vm6, %v6645_v50, 0.0  ;;  %vm6135_vm8 = vcmp.gt.f32.partialorder %v10395_v24, 0.0 }
 0x365   :  { %16782 = vst [vmem:[#allocation280_spill] sm:$0xff] %v10480_v42  ;;  %16783 = vst [vmem:[#allocation281_spill] sm:$0xff] %v10484_v37  ;;  %v10500_v8 = vsel %vm6774_vm7, %v6646_v58, 0.0  ;;  %v6263_v55 = vadd.f32 1.0, %v10395_v24  ;;  %v3828_v29 = vadd.f32 1.0, %v3700_v39  ;;  %v10504_v47 = vadd.s32 %v3438_v30, %v10027_v18 }
 0x366   :  { %16784 = vst [vmem:[#allocation282_spill] sm:$0xff] %v10491_v2  ;;  %16785 = vst [vmem:[#allocation283_spill] sm:$0xff] %v10495_v13  ;;  %v2878_v9 = vadd.f32 %v9607_v4, %v2713_v15  ;;  %v2716_v32 = vadd.f32 %v2715_v3, %v2426_v1  ;;  %v6407_v50 = vmul.f32 1.442695, %v10463_v21  ;;  %v3702_v43 = vcvt.s32.f32 %v10476_v20  ;;  %v234_v3 = vld [vmem:[%s16205_s2 + $0x80] sm:$0xff] }
 0x367   :  { %16786 = vst [vmem:[#allocation284_spill] sm:$0xff] %v10500_v8  ;;  %16787 = vst [vmem:[#allocation285_spill] sm:$0xff] %v10504_v47  ;;  %v7996_v13 = vpop.eup %7995  ;;  %v3829_v63 = vadd.f32 1.0, %v3701_v23  ;;  %v6409_v2 = vmul.f32 1.442695, %v10473_v11  ;;  %v3703_v58 = vcvt.s32.f32 %v10484_v37  ;;  %v3439_v8 = vmul.u32 256, %v10487_v17 }
 0x368   :  { %v2879_v39 = vadd.f32 %v9607_v4, %v2716_v32  ;;  %3064 = vperm.xlu1 %7666, %v2878_v9   ;;  %v10514_v42 = vadd.f32 1.0, %v10446_v57  ;;  %7997 = vpow2.f32 %v6405_v7  ;;  %v10517_v15 = vadd.s32 %v3438_v30, %v10070_v44  ;;  %v2720_v17 = vpop.f32.mrb[128].mxu0  ;;  %v2431_v30 = vpop.f32.mrb[128].mxu1 }
 0x369   :  { %vm6775_vm9 = vcmp.lt.s32.totalorder %v10368_v62, 512  ;;  %v3704_v1 = vcvt.s32.f32 %v10504_v47  ;;  %v6647_v9 = vsel %vm6135_vm8, %v6263_v55, %v7996_v13  ;;  %7999 = vpow2.f32 %v6407_v50  ;;  %v2722_v36 = vpop.f32.mrb[129].mxu0  ;;  %v2433_v13 = vpop.f32.mrb[129].mxu1  ;;  %v16799_v47 = vld [vmem:[#allocation8_spill] sm:$0xff] }
 0x36a   :  { %16788 = vst [vmem:[#allocation286_spill] sm:$0xff] %v10514_v42  ;;  %16789 = vst [vmem:[#allocation287_spill] sm:$0xff] %v10517_v15  ;;  %3069 = vperm.xlu0 %7665, %v2879_v39   ;;  %v10526_v32 = vadd.f32 %v10176_v19, %v3828_v29  ;;  %v3830_v7 = vadd.f32 1.0, %v3702_v43  ;;  %8001 = vpow2.f32 %v6409_v2  ;;  %v10529_v28 = vadd.f32 %v10176_v19, %v3829_v63  ;;  %v2723_v55 = vpop.f32.mrb[130].mxu0  ;;  %v2434_v43 = vpop.f32.mrb[130].mxu1 }
 0x36b   :  { %v3831_v39 = vadd.f32 1.0, %v3703_v58  ;;  %v10535_v23 = vadd.s32 %v3439_v8, %v10027_v18  ;;  %v2721_v24 = vadd.f32 %v2720_v17, %v2431_v30  ;;  %v10538_v29 = vadd.f32 1.0, %v10463_v21  ;;  %v2725_v63 = vpop.f32.mrb[131].mxu0  ;;  %v2436_v56 = vpop.f32.mrb[131].mxu1 }
 0x36c   :  { %v3705_v50 = vcvt.s32.f32 %v10517_v15  ;;  %v10544_v36 = vsel %vm6775_vm9, %v6647_v9, 0.0  ;;  %v10547_v58 = vadd.f32 1.0, %v10473_v11  ;;  %v3832_v51 = vadd.f32 1.0, %v3704_v1  ;;  %v2915_v63 = vpop.permute.xlu0 %2914  ;;  %v2439_v37 = vpop.f32.mrb[132].mxu1 }
 0x36d   :  { %16790 = vst [vmem:[#allocation288_spill] sm:$0xff] %v10535_v23  ;;  %16791 = vst [vmem:[#allocation289_spill] sm:$0xff] %v10538_v29  ;;  %v10550_v17 = vadd.s32 88, %v9999_v52  ;;  %v2880_v30 = vadd.f32 %v9607_v4, %v2721_v24  ;;  %v2724_v13 = vadd.f32 %v2723_v55, %v2434_v43  ;;  %v10553_v25 = vsub.f32 0.0, %v234_v3  ;;  %v2920_v55 = vpop.permute.xlu1 %2919  ;;  %v16801_v29 = vld [vmem:[#allocation131_spill] sm:$0xff] }
 0x36e   :  { %16792 = vst [vmem:[#allocation290_spill] sm:$0xff] %v10544_v36  ;;  %16793 = vst [vmem:[#allocation291_spill] sm:$0xff] %v10547_v58  ;;  %v10556_v2 = vadd.f32 %v10176_v19, %v3830_v7  ;;  %v10559_v9 = vadd.f32 %v10176_v19, %v3831_v39  ;;  %v10563_v1 = vadd.s32 %v3439_v8, %v10070_v44  ;;  %v3706_v62 = vcvt.s32.f32 %v10535_v23 }
 0x36f   :  { %16794 = vst [vmem:[#allocation292_spill] sm:$0xff] %v10553_v25  ;;  %v2881_v24 = vadd.f32 %v9607_v4, %v2724_v13  ;;  %v3232_v56 = vadd.f32 %v2915_v63, %v8892_v33  ;;  %v3233_v3 = vadd.f32 %v2915_v63, %v8896_v35  ;;  %3074 = vperm.xlu1 %7666, %v2880_v30   ;;  %v10569_v7 = vadd.f32 1.0, %v3705_v50  ;;  %v16797_v33 = vld [vmem:[#allocation258_spill] sm:$0xff]  ;;  %v2728_v30 = vpop.f32.mrb[132].mxu0 }
 0x370   :  { %16795 = vst [vmem:[#allocation293_spill] sm:$0xff] %v10563_v1  ;;  %v10572_v39 = vadd.f32 %v10176_v19, %v3832_v51  ;;  %v16798_v51 = vld [vmem:[#allocation6_spill] sm:$0xff]  ;;  %v3235_v43 = vadd.f32 %v2920_v55, %v16799_v47  ;;  %v2730_v8 = vpop.f32.mrb[133].mxu0  ;;  %v10586_v20 = vadd.f32 1.0, %v3706_v62  ;;  %v16804_v47 = vsub.f32 1.0, %v16801_v29 }
 0x371   :  { %v4071_v13 = vsub.f32 %v10197_v6, %v3232_v56  ;;  %v4072_v15 = vsub.f32 %v16797_v33, %v3233_v3  ;;  %v4199_v35 = vsub.f32 %v10176_v19, %v3232_v56  ;;  %v4200_v50 = vsub.f32 %v10176_v19, %v3233_v3  ;;  %3079 = vperm.xlu0 %7665, %v2881_v24   ;;  %v2441_v24 = vpop.f32.mrb[133].mxu1  ;;  %v2731_v0 = vpop.f32.mrb[134].mxu0 }
 0x372   :  { %v10577_v23 = vpop.eup %7997  ;;  %v3234_v63 = vadd.f32 %v2920_v55, %v16798_v51  ;;  %v16805_v8 = vsub.f32 1.0, %v16802_v61  ;;  %v4074_v36 = vsub.f32 %v10228_v49, %v3235_v43  ;;  %v2733_v42 = vpop.f32.mrb[135].mxu0 }
 0x373   :  { %16796 = vst [vmem:[#allocation294_spill] sm:$0xff] %v10577_v23  ;;  %v10588_v58 = vpop.eup %7999  ;;  %v7503_v6 = vadd.f32 -1.0, %v4071_v13  ;;  %v7504_v33 = vadd.f32 -1.0, %v4072_v15  ;;  %v4967_v56 = vmul.f32 %v4071_v13, %v16801_v29  ;;  %v4968_v3 = vmul.f32 %v4072_v15, %v16802_v61  ;;  %v16806_v42 = vld [vmem:[#allocation133_spill] sm:$0xff] }
 0x374   :  { %16800 = vst [vmem:[#allocation258_spill] sm:$0xff] %v10588_v58  ;;  %v10592_v11 = vpop.eup %8001  ;;  %v5223_v55 = vmul.f32 %v16804_v47, %v4199_v35  ;;  %v5224_v51 = vmul.f32 %v16805_v8, %v4200_v50  ;;  %v4073_v62 = vsub.f32 %v10219_v53, %v3234_v63  ;;  %v2442_v58 = vpop.f32.mrb[134].mxu1  ;;  %v4201_v24 = vsub.f32 %v10176_v19, %v3234_v63 }
 0x375   :  { %16803 = vst [vmem:[#allocation6_spill] sm:$0xff] %v10592_v11  ;;  %v4455_v23 = vadd.f32 %v7503_v6, %v16801_v29  ;;  %v4456_v25 = vadd.f32 %v7504_v33, %v16802_v61  ;;  %v4202_v11 = vsub.f32 %v10176_v19, %v3235_v43  ;;  %v2444_v21 = vpop.f32.mrb[135].mxu1  ;;  %v7506_v47 = vadd.f32 -1.0, %v4074_v36  ;;  %v2925_v33 = vpop.permute.xlu1 %2924 }
 0x376   :  { %v10604_v57 = vadd.f32 %v5223_v55, %v4967_v56  ;;  %v10606_v35 = vadd.f32 %v5224_v51, %v4968_v3  ;;  %v7505_v50 = vadd.f32 -1.0, %v4073_v62  ;;  %v4969_v49 = vmul.f32 %v4073_v62, %v9674_v34 }
 0x377   :  { %v4583_v53 = vmul.f32 %v4455_v23, %v4071_v13  ;;  %v4584_v8 = vmul.f32 %v4456_v25, %v4072_v15  ;;  %v4970_v26 = vmul.f32 %v4074_v36, %v16806_v42  ;;  %v4458_v61 = vadd.f32 %v7506_v47, %v16806_v42  ;;  %v2930_v25 = vpop.permute.xlu0 %2929  ;;  %v2736_v15 = vpop.f32.mrb[136].mxu0 }
 0x378   :  { %v4457_v29 = vadd.f32 %v7505_v50, %v9674_v34  ;;  %v16807_v63 = vsub.f32 1.0, %v9674_v34  ;;  %v16808_v21 = vsub.f32 1.0, %v16806_v42  ;;  %v2729_v56 = vadd.f32 %v2728_v30, %v2439_v37  ;;  %v2447_v50 = vpop.f32.mrb[136].mxu1  ;;  %v2738_v40 = vpop.f32.mrb[137].mxu0  ;;  %v16809_v30 = vld [vmem:[#allocation10_spill] sm:$0xff] }
 0x379   :  { %vm4711_vm10 = vcmp.eq.f32.partialorder %v4583_v53, 0.0  ;;  %vm4712_vm11 = vcmp.eq.f32.partialorder %v4584_v8, 0.0  ;;  %v2732_v23 = vadd.f32 %v2731_v0, %v2442_v58  ;;  %v4586_v51 = vmul.f32 %v4458_v61, %v4074_v36  ;;  %v10621_v42 = vpop.f32.mrb[138].mxu0  ;;  %v16812_v61 = vld [vmem:[#allocation16_spill] sm:$0xff] }
 0x37a   :  { %v5225_v43 = vmul.f32 %v16807_v63, %v4201_v24  ;;  %v5226_v6 = vmul.f32 %v16808_v21, %v4202_v11  ;;  %v4839_v13 = vsel %vm4711_vm10, 1.0, %v4583_v53  ;;  %v4840_v3 = vsel %vm4712_vm11, 1.0, %v4584_v8  ;;  %v2449_v24 = vpop.f32.mrb[137].mxu1  ;;  %v2741_v36 = vpop.f32.mrb[139].mxu0  ;;  %v16810_v53 = vld [vmem:[#allocation12_spill] sm:$0xff]  ;;  %v16813_v21 = vld [vmem:[#allocation259_spill] sm:$0xff] }
 0x37b   :  { %v4585_v55 = vmul.f32 %v4457_v29, %v4073_v62  ;;  %8003 = vrcp.f32 %v4839_v13  ;;  %v2882_v11 = vadd.f32 %v9607_v4, %v2729_v56  ;;  %vm4714_vm13 = vcmp.eq.f32.partialorder %v4586_v51, 0.0  ;;  %v10624_v37 = vpop.f32.mrb[138].mxu1 }
 0x37c   :  { %v10616_v47 = vadd.f32 %v5225_v43, %v4969_v49  ;;  %v10618_v34 = vadd.f32 %v5226_v6, %v4970_v26  ;;  %8005 = vrcp.f32 %v4840_v3  ;;  %v2883_v0 = vadd.f32 %v9607_v4, %v2732_v23  ;;  %v2452_v8 = vpop.f32.mrb[139].mxu1  ;;  %v16811_v49 = vld [vmem:[#allocation14_spill] sm:$0xff] }
 0x37d   :  { %vm4713_vm12 = vcmp.eq.f32.partialorder %v4585_v55, 0.0  ;;  %v4842_v40 = vsel %vm4714_vm13, 1.0, %v4586_v51  ;;  %v3236_v62 = vadd.f32 %v2925_v33, %v16809_v30  ;;  %v3237_v26 = vadd.f32 %v2925_v33, %v16810_v53  ;;  %3084 = vperm.xlu1 %7666, %v2882_v11  }
 0x37e   :  { %v4841_v58 = vsel %vm4713_vm12, 1.0, %v4585_v55  ;;  %v3238_v29 = vadd.f32 %v2930_v25, %v16811_v49  ;;  %v3239_v63 = vadd.f32 %v2930_v25, %v16812_v61  ;;  %3089 = vperm.xlu0 %7665, %v2883_v0   ;;  %v2737_v43 = vadd.f32 %v2736_v15, %v2447_v50  ;;  %v16814_v25 = vld [vmem:[#allocation138_spill] sm:$0xff]  ;;  %v16815_v15 = vld [vmem:[#allocation139_spill] sm:$0xff]  ;;  %v10639_v0 = vpop.f32.mrb[140].mxu0 }
 0x37f   :  { %8007 = vrcp.f32 %v4841_v58  ;;  %v4075_v6 = vsub.f32 %v16813_v21, %v3236_v62  ;;  %v4076_v56 = vsub.f32 %v10240_v38, %v3237_v26  ;;  %v4203_v23 = vsub.f32 %v10176_v19, %v3236_v62  ;;  %v2746_v62 = vpop.f32.mrb[141].mxu0 }
 0x380   :  { %8009 = vrcp.f32 %v4842_v40  ;;  %v4204_v13 = vsub.f32 %v10176_v19, %v3237_v26  ;;  %v4077_v33 = vsub.f32 %v10246_v12, %v3238_v29  ;;  %v4078_v3 = vsub.f32 %v10276_v59, %v3239_v63  ;;  %v10646_v59 = vpop.f32.mrb[140].mxu1  ;;  %v10651_v61 = vpop.f32.mrb[142].mxu0 }
 0x381   :  { %v4205_v55 = vsub.f32 %v10176_v19, %v3238_v29  ;;  %v7507_v51 = vadd.f32 -1.0, %v4075_v6  ;;  %v7508_v11 = vadd.f32 -1.0, %v4076_v56  ;;  %v4971_v24 = vmul.f32 %v4075_v6, %v16814_v25  ;;  %v2457_v29 = vpop.f32.mrb[141].mxu1  ;;  %v2749_v62 = vpop.f32.mrb[143].mxu0 }
 0x382   :  { %v4972_v50 = vmul.f32 %v4076_v56, %v16815_v15  ;;  %v16816_v38 = vsub.f32 1.0, %v16814_v25  ;;  %v16817_v58 = vsub.f32 1.0, %v16815_v15  ;;  %v4206_v12 = vsub.f32 %v10176_v19, %v3239_v63 }
 0x383   :  { %v7509_v30 = vadd.f32 -1.0, %v4077_v33  ;;  %v4459_v53 = vadd.f32 %v7507_v51, %v16814_v25  ;;  %v4460_v26 = vadd.f32 %v7508_v11, %v16815_v15  ;;  %v7510_v8 = vadd.f32 -1.0, %v4078_v3 }
 0x384   :  { %v5227_v36 = vmul.f32 %v16816_v38, %v4203_v23  ;;  %v5228_v40 = vmul.f32 %v16817_v58, %v4204_v13  ;;  %v4973_v49 = vmul.f32 %v4077_v33, %v9703_v46  ;;  %v16818_v13 = vld [vmem:[#allocation140_spill] sm:$0xff]  ;;  %v2458_v58 = vpop.f32.mrb[142].mxu1  ;;  %v16819_v15 = vsub.f32 1.0, %v9703_v46 }
 0x385   :  { %v4461_v63 = vadd.f32 %v7509_v30, %v9703_v46  ;;  %v4974_v38 = vmul.f32 %v4078_v3, %v16818_v13  ;;  %v8004_v10 = vpop.eup %8003  ;;  %v4587_v51 = vmul.f32 %v4459_v53, %v4075_v6  ;;  %v4588_v25 = vmul.f32 %v4460_v26, %v4076_v56  ;;  %v2460_v41 = vpop.f32.mrb[143].mxu1 }
 0x386   :  { %v10653_v21 = vadd.f32 %v5227_v36, %v4971_v24  ;;  %v10655_v23 = vadd.f32 %v5228_v40, %v4972_v50  ;;  %v4462_v11 = vadd.f32 %v7510_v8, %v16818_v13  ;;  %v5229_v29 = vmul.f32 %v16819_v15, %v4205_v55  ;;  %v8006_v48 = vpop.eup %8005  ;;  %v2935_v41 = vpop.permute.xlu1 %2934 }
 0x387   :  { %v10663_v24 = vmul.f32 %v8004_v10, %v10604_v57  ;;  %v4589_v50 = vmul.f32 %v4461_v63, %v4077_v33  ;;  %v16821_v36 = vsub.f32 1.0, %v16818_v13  ;;  %v2884_v30 = vadd.f32 %v9607_v4, %v2737_v43  ;;  %v2940_v43 = vpop.permute.xlu0 %2939  ;;  %v10686_v8 = vpop.f32.mrb[144].mxu1 }
 0x388   :  { %v10669_v62 = vmul.f32 %v8006_v48, %v10606_v35  ;;  %vm4715_vm14 = vcmp.eq.f32.partialorder %v4587_v51, 0.0  ;;  %vm4716_vm15 = vcmp.eq.f32.partialorder %v4588_v25, 0.0  ;;  %v4590_v6 = vmul.f32 %v4462_v11, %v4078_v3  ;;  %v10676_v48 = vpop.f32.mrb[144].mxu0  ;;  %v16825_v3 = vld [vmem:[#allocation168_spill] sm:$0xff]  ;;  %v2465_v15 = vpop.f32.mrb[145].mxu1 }
 0x389   :  { %16820 = vst [vmem:[#allocation8_spill] sm:$0xff] %v10663_v24  ;;  %v5230_v40 = vmul.f32 %v16821_v36, %v4206_v12  ;;  %v8008_v56 = vpop.eup %8007  ;;  %v4843_v46 = vsel %vm4715_vm14, 1.0, %v4587_v51  ;;  %v4844_v55 = vsel %vm4716_vm15, 1.0, %v4588_v25  ;;  %vm4717_vm0 = vcmp.eq.f32.partialorder %v4589_v50, 0.0  ;;  %3094 = vperm.xlu1 %7666, %v2884_v30   ;;  %v2754_v63 = vpop.f32.mrb[145].mxu0 }
 0x38a   :  { %16822 = vst [vmem:[#allocation131_spill] sm:$0xff] %v10669_v62  ;;  %v16823_v10 = vcvt.s32.f32 %v10563_v1  ;;  %v8010_v33 = vpop.eup %8009  ;;  %v10674_v12 = vmul.f32 %v8008_v56, %v10616_v47  ;;  %8011 = vrcp.f32 %v4843_v46  ;;  %v10680_v35 = vadd.f32 %v10176_v19, %v10569_v7  ;;  %v10692_v7 = vpop.f32.mrb[146].mxu0 }
 0x38b   :  { %v10684_v26 = vmul.f32 %v8010_v33, %v10618_v34  ;;  %8013 = vrcp.f32 %v4844_v55  ;;  %vm4718_vm1 = vcmp.eq.f32.partialorder %v4590_v6, 0.0  ;;  %v4845_v51 = vsel %vm4717_vm0, 1.0, %v4589_v50  ;;  %v10700_v30 = vpop.f32.mrb[146].mxu1  ;;  %v2757_v56 = vpop.f32.mrb[147].mxu0  ;;  %v16834_v33 = vld [vmem:[#allocation22_spill] sm:$0xff] }
 0x38c   :  { %v3835_v57 = vadd.f32 1.0, %v16823_v10  ;;  %16824 = vst [vmem:[#allocation132_spill] sm:$0xff] %v10674_v12  ;;  %v4846_v25 = vsel %vm4718_vm1, 1.0, %v4590_v6  ;;  %v10690_v11 = vadd.f32 %v5229_v29, %v4973_v49  ;;  %v10696_v36 = vadd.f32 %v10176_v19, %v10586_v20  ;;  %v16830_v20 = vld [vmem:[#allocation18_spill] sm:$0xff]  ;;  %v16833_v10 = vld [vmem:[#allocation21_spill] sm:$0xff] }
 0x38d   :  { %16826 = vst [vmem:[#allocation133_spill] sm:$0xff] %v10684_v26  ;;  %v10698_v34 = vadd.f32 %v5230_v40, %v4974_v38  ;;  %8015 = vrcp.f32 %v4845_v51  ;;  %v16828_v49 = vmul.u32 256, %v10550_v17  ;;  %v2740_v50 = vadd.f32 %v10621_v42, %v10624_v37  ;;  %v2468_v38 = vpop.f32.mrb[147].mxu1  ;;  %v16835_v51 = vld [vmem:[#allocation24_spill] sm:$0xff] }
 0x38e   :  { %v10703_v46 = vadd.f32 %v10176_v19, %v3835_v57  ;;  %8017 = vrcp.f32 %v4846_v25  ;;  %v3240_v6 = vadd.f32 %v2935_v41, %v16830_v20  ;;  %v3241_v57 = vadd.f32 %v2935_v41, %v16833_v10 }
 0x38f   :  { %v10708_v29 = vadd.s32 %v16828_v49, %v10027_v18  ;;  %v16831_v40 = vmov %v16828_v49  ;;  %v3242_v63 = vadd.f32 %v2940_v43, %v16834_v33  ;;  %v10721_v15 = vadd.f32 %v2940_v43, %v16835_v51 }
 0x390   :  { %v10716_v55 = vadd.s32 %v16831_v40, %v10070_v44  ;;  %v10725_v25 = vadd.f32 %v10639_v0, %v10646_v59  ;;  %v2885_v42 = vadd.f32 %v9607_v4, %v2740_v50  ;;  %v4079_v37 = vsub.f32 %v10348_v14, %v3240_v6  ;;  %v16836_v59 = vld [vmem:[#allocation145_spill] sm:$0xff] }
 0x391   :  { %16829 = vst [vmem:[#allocation10_spill] sm:$0xff] %v10708_v29  ;;  %v4207_v56 = vsub.f32 %v10176_v19, %v3240_v6  ;;  %v10731_v17 = vadd.f32 %v10651_v61, %v2458_v58  ;;  %v4080_v41 = vsub.f32 %v10384_v45, %v3241_v57  ;;  %v4208_v49 = vsub.f32 %v10176_v19, %v3241_v57  ;;  %v10741_v6 = vpop.f32.mrb[148].mxu0  ;;  %v16838_v58 = vld [vmem:[#allocation146_spill] sm:$0xff]  ;;  %v10750_v57 = vpop.f32.mrb[148].mxu1 }
 0x392   :  { %16832 = vst [vmem:[#allocation12_spill] sm:$0xff] %v10716_v55  ;;  %v4081_v43 = vsub.f32 %v10419_v5, %v3242_v63  ;;  %v4082_v20 = vsub.f32 %v10425_v22, %v10721_v15  ;;  %v7511_v0 = vadd.f32 -1.0, %v4079_v37  ;;  %v4975_v38 = vmul.f32 %v4079_v37, %v16836_v59  ;;  %3099 = vperm.xlu0 %7665, %v2885_v42   ;;  %v2762_v33 = vpop.f32.mrb[149].mxu0  ;;  %v2473_v53 = vpop.f32.mrb[149].mxu1 }
 0x393   :  { %v16837_v50 = vsub.f32 1.0, %v16836_v59  ;;  %v10744_v61 = vadd.s32 96, %v9999_v52  ;;  %v7512_v45 = vadd.f32 -1.0, %v4080_v41  ;;  %v4976_v40 = vmul.f32 %v4080_v41, %v16838_v58  ;;  %v10755_v26 = vpop.f32.mrb[150].mxu0  ;;  %v10764_v24 = vpop.f32.mrb[150].mxu1 }
 0x394   :  { %v16839_v5 = vsub.f32 1.0, %v16838_v58  ;;  %v4209_v22 = vsub.f32 %v10176_v19, %v3242_v63  ;;  %v8012_v51 = vpop.eup %8011  ;;  %v7514_v13 = vadd.f32 -1.0, %v4082_v20  ;;  %v2476_v47 = vpop.f32.mrb[151].mxu1 }
 0x395   :  { %v5231_v14 = vmul.f32 %v16837_v50, %v4207_v56  ;;  %v4463_v56 = vadd.f32 %v7511_v0, %v16836_v59  ;;  %v7513_v50 = vadd.f32 -1.0, %v4081_v43  ;;  %v8014_v12 = vpop.eup %8013  ;;  %v10758_v62 = vmul.f32 %v8012_v51, %v10653_v21  ;;  %v2765_v0 = vpop.f32.mrb[151].mxu0 }
 0x396   :  { %v5232_v10 = vmul.f32 %v16839_v5, %v4208_v49  ;;  %v4464_v49 = vadd.f32 %v7512_v45, %v16838_v58  ;;  %v16841_v5 = vld [vmem:[#allocation147_spill] sm:$0xff]  ;;  %v10767_v59 = vmul.f32 %v8014_v12, %v10655_v23  ;;  %v4210_v23 = vsub.f32 %v10176_v19, %v10721_v15 }
 0x397   :  { %v10753_v42 = vadd.f32 %v5231_v14, %v4975_v38  ;;  %16840 = vst [vmem:[#allocation14_spill] sm:$0xff] %v10758_v62  ;;  %v4977_v33 = vmul.f32 %v4081_v43, %v16841_v5  ;;  %v4591_v38 = vmul.f32 %v4463_v56, %v4079_v37  ;;  %v4465_v53 = vadd.f32 %v7513_v50, %v16841_v5  ;;  %v16843_v14 = vld [vmem:[#allocation148_spill] sm:$0xff]  ;;  %v8016_v21 = vpop.eup %8015  ;;  %v2945_v37 = vpop.permute.xlu1 %2944 }
 0x398   :  { %v10761_v63 = vadd.f32 %v5232_v10, %v4976_v40  ;;  %16842 = vst [vmem:[#allocation16_spill] sm:$0xff] %v10767_v59  ;;  %v4466_v1 = vadd.f32 %v7514_v13, %v16843_v14  ;;  %v4592_v51 = vmul.f32 %v4464_v49, %v4080_v41  ;;  %v4978_v45 = vmul.f32 %v4082_v20, %v16843_v14  ;;  %v8018_v62 = vpop.eup %8017  ;;  %v16847_v41 = vld [vmem:[#allocation174_spill] sm:$0xff]  ;;  %v2950_v49 = vpop.permute.xlu0 %2949 }
 0x399   :  { %v16844_v58 = vsub.f32 1.0, %v16841_v5  ;;  %v3708_v10 = vcvt.s32.f32 %v10708_v29  ;;  %v10776_v0 = vmul.f32 %v8016_v21, %v10690_v11  ;;  %vm4719_vm2 = vcmp.eq.f32.partialorder %v4591_v38, 0.0  ;;  %v10785_v11 = vpop.f32.mrb[152].mxu0  ;;  %v16848_v5 = vld [vmem:[#allocation175_spill] sm:$0xff] }
 0x39a   :  { %v3709_v12 = vcvt.s32.f32 %v10716_v55  ;;  %v10782_v47 = vmul.f32 %v8018_v62, %v10698_v34  ;;  %vm4720_vm3 = vcmp.eq.f32.partialorder %v4592_v51, 0.0  ;;  %v4847_v13 = vsel %vm4719_vm2, 1.0, %v4591_v38  ;;  %v2770_v62 = vpop.f32.mrb[153].mxu0 }
 0x39b   :  { %v5233_v40 = vmul.f32 %v16844_v58, %v4209_v22  ;;  %16845 = vst [vmem:[#allocation259_spill] sm:$0xff] %v10776_v0  ;;  %v4848_v56 = vsel %vm4720_vm3, 1.0, %v4592_v51  ;;  %8019 = vrcp.f32 %v4847_v13  ;;  %v4593_v50 = vmul.f32 %v4465_v53, %v4081_v43  ;;  %v10790_v0 = vpop.f32.mrb[152].mxu1  ;;  %v10799_v22 = vpop.f32.mrb[154].mxu0 }
 0x39c   :  { %16846 = vst [vmem:[#allocation138_spill] sm:$0xff] %v10782_v47  ;;  %8021 = vrcp.f32 %v4848_v56  ;;  %v4594_v15 = vmul.f32 %v4466_v1, %v4082_v20  ;;  %v10788_v58 = vadd.f32 1.0, %v3708_v10  ;;  %v16849_v38 = vsub.f32 1.0, %v16843_v14  ;;  %v2481_v53 = vpop.f32.mrb[153].mxu1  ;;  %v2773_v62 = vpop.f32.mrb[155].mxu0 }
 0x39d   :  { %vm4721_vm4 = vcmp.eq.f32.partialorder %v4593_v50, 0.0  ;;  %v10795_v13 = vadd.f32 %v5233_v40, %v4977_v33  ;;  %v10797_v43 = vadd.f32 1.0, %v3709_v12  ;;  %v2886_v20 = vadd.f32 %v9607_v4, %v10725_v25  ;;  %v10805_v56 = vpop.f32.mrb[154].mxu1  ;;  %v16850_v33 = vld [vmem:[#allocation26_spill] sm:$0xff]  ;;  %v16853_v25 = vld [vmem:[#allocation32_spill] sm:$0xff] }
 0x39e   :  { %v5234_v51 = vmul.f32 %v16849_v38, %v4210_v23  ;;  %vm4722_vm5 = vcmp.eq.f32.partialorder %v4594_v15, 0.0  ;;  %v4849_v1 = vsel %vm4721_vm4, 1.0, %v4593_v50  ;;  %v2887_v10 = vadd.f32 %v9607_v4, %v10731_v17  ;;  %v2484_v12 = vpop.f32.mrb[155].mxu1  ;;  %v16851_v38 = vld [vmem:[#allocation28_spill] sm:$0xff]  ;;  %v16852_v50 = vld [vmem:[#allocation30_spill] sm:$0xff] }
 0x39f   :  { %v4850_v14 = vsel %vm4722_vm5, 1.0, %v4594_v15  ;;  %8023 = vrcp.f32 %v4849_v1  ;;  %v3244_v40 = vadd.f32 %v2945_v37, %v16850_v33  ;;  %v3245_v53 = vadd.f32 %v2945_v37, %v16851_v38  ;;  %3104 = vperm.xlu1 %7666, %v2886_v20  }
 0x3a0   :  { %v10807_v23 = vadd.f32 %v5234_v51, %v4978_v45  ;;  %8025 = vrcp.f32 %v4850_v14  ;;  %v3246_v21 = vadd.f32 %v2950_v49, %v16852_v50  ;;  %v10813_v34 = vadd.f32 %v2950_v49, %v16853_v25  ;;  %3109 = vperm.xlu0 %7665, %v2887_v10  }
 0x3a1   :  { %v4083_v17 = vsub.f32 %v10434_v60, %v3244_v40  ;;  %v4211_v15 = vsub.f32 %v10176_v19, %v3244_v40  ;;  %v10819_v45 = vadd.f32 %v10676_v48, %v10686_v8  ;;  %v10823_v51 = vadd.f32 %v10692_v7, %v10700_v30  ;;  %v10838_v30 = vpop.f32.mrb[156].mxu0  ;;  %v10844_v40 = vpop.f32.mrb[156].mxu1 }
 0x3a2   :  { %v4084_v37 = vsub.f32 %v10461_v31, %v3245_v53  ;;  %v4212_v1 = vsub.f32 %v10176_v19, %v3245_v53  ;;  %v4085_v49 = vsub.f32 %v10526_v32, %v3246_v21  ;;  %v4086_v20 = vsub.f32 %v10529_v28, %v10813_v34  ;;  %v2778_v12 = vpop.f32.mrb[157].mxu0 }
 0x3a3   :  { %v7515_v60 = vadd.f32 -1.0, %v4083_v17  ;;  %v4979_v10 = vmul.f32 %v4083_v17, %v9758_v54  ;;  %v16854_v62 = vsub.f32 1.0, %v9758_v54  ;;  %v16855_v8 = vmul.u32 256, %v10744_v61 }
 0x3a4   :  { %v7516_v31 = vadd.f32 -1.0, %v4084_v37  ;;  %v4980_v14 = vmul.f32 %v4084_v37, %v9760_v27  ;;  %v16856_v32 = vsub.f32 1.0, %v9760_v27  ;;  %v4213_v28 = vsub.f32 %v10176_v19, %v3246_v21 }
 0x3a5   :  { %v5235_v48 = vmul.f32 %v16854_v62, %v4211_v15  ;;  %v10836_v7 = vadd.s32 %v16855_v8, %v10027_v18  ;;  %v8020_v38 = vpop.eup %8019  ;;  %v4467_v53 = vadd.f32 %v7515_v60, %v9758_v54  ;;  %v7517_v25 = vadd.f32 -1.0, %v4085_v49  ;;  %v2489_v62 = vpop.f32.mrb[157].mxu1 }
 0x3a6   :  { %v5236_v33 = vmul.f32 %v16856_v32, %v4212_v1  ;;  %v7518_v15 = vadd.f32 -1.0, %v4086_v20  ;;  %v10849_v8 = vpop.f32.mrb[158].mxu0  ;;  %v8022_v47 = vpop.eup %8021  ;;  %v10852_v59 = vmul.f32 %v8020_v38, %v10753_v42  ;;  %v4468_v1 = vadd.f32 %v7516_v31, %v9760_v27  ;;  %v16859_v32 = vld [vmem:[#allocation153_spill] sm:$0xff]  ;;  %v16861_v62 = vld [vmem:[#allocation154_spill] sm:$0xff] }
 0x3a7   :  { %v10847_v50 = vadd.f32 %v5235_v48, %v4979_v10  ;;  %16857 = vst [vmem:[#allocation139_spill] sm:$0xff] %v10849_v8  ;;  %v4981_v12 = vmul.f32 %v4085_v49, %v16859_v32  ;;  %v10858_v55 = vpop.f32.mrb[158].mxu1  ;;  %v2781_v54 = vpop.f32.mrb[159].mxu0  ;;  %v10861_v60 = vmul.f32 %v8022_v47, %v10761_v63  ;;  %v4595_v10 = vmul.f32 %v4467_v53, %v4083_v17 }
 0x3a8   :  { %16858 = vst [vmem:[#allocation140_spill] sm:$0xff] %v10852_v59  ;;  %v10855_v21 = vadd.f32 %v5236_v33, %v4980_v14  ;;  %v4469_v48 = vadd.f32 %v7517_v25, %v16859_v32  ;;  %v4470_v29 = vadd.f32 %v7518_v15, %v16861_v62  ;;  %v2492_v8 = vpop.f32.mrb[159].mxu1  ;;  %v4596_v42 = vmul.f32 %v4468_v1, %v4084_v37  ;;  %v2955_v25 = vpop.permute.xlu1 %2954 }
 0x3a9   :  { %16860 = vst [vmem:[#allocation168_spill] sm:$0xff] %v10861_v60  ;;  %v4214_v27 = vsub.f32 %v10176_v19, %v10813_v34  ;;  %v4982_v31 = vmul.f32 %v4086_v20, %v16861_v62  ;;  %v16862_v14 = vsub.f32 1.0, %v16859_v32  ;;  %v8024_v38 = vpop.eup %8023  ;;  %vm4723_vm6 = vcmp.eq.f32.partialorder %v4595_v10, 0.0  ;;  %v2960_v8 = vpop.permute.xlu0 %2959 }
 0x3aa   :  { %v4597_v54 = vmul.f32 %v4469_v48, %v4085_v49  ;;  %v16863_v63 = vmul.u32 256, %v10744_v61  ;;  %v10876_v17 = vadd.s32 104, %v9999_v52  ;;  %v8026_v37 = vpop.eup %8025  ;;  %v10879_v53 = vmul.f32 %v8024_v38, %v10795_v13  ;;  %v10885_v1 = vpop.f32.mrb[160].mxu0 }
 0x3ab   :  { %v5237_v33 = vmul.f32 %v16862_v14, %v4213_v28  ;;  %vm4724_vm7 = vcmp.eq.f32.partialorder %v4596_v42, 0.0  ;;  %v4851_v34 = vsel %vm4723_vm6, 1.0, %v4595_v10  ;;  %v3710_v28 = vcvt.s32.f32 %v10836_v7  ;;  %v10893_v48 = vpop.f32.mrb[160].mxu1  ;;  %v2786_v14 = vpop.f32.mrb[161].mxu0 }
 0x3ac   :  { %v10873_v47 = vadd.s32 %v16863_v63, %v10070_v44  ;;  %16864 = vst [vmem:[#allocation18_spill] sm:$0xff] %v10879_v53  ;;  %v10883_v15 = vmul.f32 %v8026_v37, %v10807_v23  ;;  %v4852_v49 = vsel %vm4724_vm7, 1.0, %v4596_v42  ;;  %8027 = vrcp.f32 %v4851_v34  ;;  %v2497_v42 = vpop.f32.mrb[161].mxu1  ;;  %v10900_v38 = vpop.f32.mrb[162].mxu0 }
 0x3ad   :  { %v4598_v61 = vmul.f32 %v4470_v29, %v4086_v20  ;;  %8029 = vrcp.f32 %v4852_v49  ;;  %vm4725_vm8 = vcmp.eq.f32.partialorder %v4597_v54, 0.0  ;;  %v16866_v32 = vsub.f32 1.0, %v16861_v62  ;;  %v10906_v37 = vpop.f32.mrb[162].mxu1  ;;  %v2789_v34 = vpop.f32.mrb[163].mxu0  ;;  %v16867_v49 = vld [vmem:[#allocation34_spill] sm:$0xff] }
 0x3ae   :  { %16865 = vst [vmem:[#allocation21_spill] sm:$0xff] %v10883_v15  ;;  %v10891_v10 = vadd.f32 %v10176_v19, %v10788_v58  ;;  %v4853_v23 = vsel %vm4725_vm8, 1.0, %v4597_v54  ;;  %v10897_v29 = vadd.f32 %v10176_v19, %v10797_v43  ;;  %v3711_v20 = vcvt.s32.f32 %v10873_v47  ;;  %v2500_v14 = vpop.f32.mrb[163].mxu1 }
 0x3af   :  { %v5238_v13 = vmul.f32 %v16866_v32, %v4214_v27  ;;  %vm4726_vm9 = vcmp.eq.f32.partialorder %v4598_v61, 0.0  ;;  %v10902_v27 = vadd.f32 %v5237_v33, %v4981_v12  ;;  %v3838_v58 = vadd.f32 1.0, %v3710_v28  ;;  %v16869_v33 = vld [vmem:[#allocation38_spill] sm:$0xff] }
 0x3b0   :  { %v4854_v62 = vsel %vm4726_vm9, 1.0, %v4598_v61  ;;  %8031 = vrcp.f32 %v4853_v23  ;;  %v2888_v54 = vadd.f32 %v9607_v4, %v10819_v45  ;;  %v2889_v43 = vadd.f32 %v9607_v4, %v10823_v51  ;;  %v16868_v61 = vld [vmem:[#allocation36_spill] sm:$0xff] }
 0x3b1   :  { %v10904_v63 = vadd.f32 %v5238_v13, %v4982_v31  ;;  %v3248_v32 = vadd.f32 %v2955_v25, %v16867_v49  ;;  %8033 = vrcp.f32 %v4854_v62  ;;  %v3249_v12 = vadd.f32 %v2955_v25, %v16868_v61  ;;  %v16870_v13 = vld [vmem:[#allocation40_spill] sm:$0xff] }
 0x3b2   :  { %v3250_v31 = vadd.f32 %v2960_v8, %v16869_v33  ;;  %v10916_v28 = vadd.f32 %v2960_v8, %v16870_v13  ;;  %3114 = vperm.xlu1 %7666, %v2888_v54   ;;  %3119 = vperm.xlu0 %7665, %v2889_v43   ;;  %v10922_v45 = vadd.f32 %v10741_v6, %v10750_v57  ;;  %v3839_v51 = vadd.f32 1.0, %v3711_v20  ;;  %v10933_v6 = vpop.f32.mrb[164].mxu0  ;;  %v16873_v20 = vld [vmem:[#allocation159_spill] sm:$0xff] }
 0x3b3   :  { %v4087_v42 = vsub.f32 %v10556_v2, %v3248_v32  ;;  %v4215_v23 = vsub.f32 %v10176_v19, %v3248_v32  ;;  %v4088_v62 = vsub.f32 %v10559_v9, %v3249_v12  ;;  %v4216_v25 = vsub.f32 %v10176_v19, %v3249_v12  ;;  %16872 = vst [vmem:[#allocation22_spill] sm:$0xff] %v10933_v6  ;;  %v10939_v12 = vpop.f32.mrb[164].mxu1 }
 0x3b4   :  { %v4089_v34 = vsub.f32 %v10572_v39, %v3250_v31  ;;  %v4090_v8 = vsub.f32 %v10680_v35, %v10916_v28  ;;  %v16871_v54 = vsub.f32 1.0, %v9787_v16  ;;  %v3442_v32 = vmul.u32 256, %v10876_v17  ;;  %16875 = vst [vmem:[#allocation24_spill] sm:$0xff] %v10939_v12  ;;  %v2794_v35 = vpop.f32.mrb[165].mxu0 }
 0x3b5   :  { %v7519_v49 = vadd.f32 -1.0, %v4087_v42  ;;  %v4983_v2 = vmul.f32 %v4087_v42, %v9787_v16  ;;  %v7520_v57 = vadd.f32 -1.0, %v4088_v62  ;;  %v4984_v9 = vmul.f32 %v4088_v62, %v16873_v20  ;;  %v10944_v53 = vpop.f32.mrb[166].mxu0 }
 0x3b6   :  { %v5239_v43 = vmul.f32 %v16871_v54, %v4215_v23  ;;  %v16874_v14 = vsub.f32 1.0, %v16873_v20  ;;  %v4217_v39 = vsub.f32 %v10176_v19, %v3250_v31  ;;  %v8028_v33 = vpop.eup %8027  ;;  %v7521_v23 = vadd.f32 -1.0, %v4089_v34  ;;  %v2505_v54 = vpop.f32.mrb[165].mxu1  ;;  %16876 = vst [vmem:[#allocation145_spill] sm:$0xff] %v10944_v53 }
 0x3b7   :  { %v4471_v13 = vadd.f32 %v7519_v49, %v9787_v16  ;;  %v7522_v17 = vadd.f32 -1.0, %v4090_v8  ;;  %v8030_v60 = vpop.eup %8029  ;;  %v10947_v59 = vmul.f32 %v8028_v33, %v10847_v50  ;;  %v10953_v6 = vpop.f32.mrb[166].mxu1  ;;  %v16878_v54 = vld [vmem:[#allocation161_spill] sm:$0xff] }
 0x3b8   :  { %v5240_v61 = vmul.f32 %v16874_v14, %v4216_v25  ;;  %v10942_v15 = vadd.f32 %v5239_v43, %v4983_v2  ;;  %v4472_v25 = vadd.f32 %v7520_v57, %v16873_v20  ;;  %v16877_v14 = vld [vmem:[#allocation160_spill] sm:$0xff]  ;;  %v2797_v16 = vpop.f32.mrb[167].mxu0  ;;  %v10956_v49 = vmul.f32 %v8030_v60, %v10855_v21  ;;  %v2508_v12 = vpop.f32.mrb[167].mxu1 }
 0x3b9   :  { %v4985_v35 = vmul.f32 %v4089_v34, %v16877_v14  ;;  %v4599_v2 = vmul.f32 %v4471_v13, %v4087_v42  ;;  %v4473_v43 = vadd.f32 %v7521_v23, %v16877_v14  ;;  %v4474_v53 = vadd.f32 %v7522_v17, %v16878_v54  ;;  %v2965_v12 = vpop.permute.xlu1 %2964  ;;  %v2970_v23 = vpop.permute.xlu0 %2969 }
 0x3ba   :  { %v10950_v31 = vadd.f32 %v5240_v61, %v4984_v9  ;;  %v4600_v50 = vmul.f32 %v4472_v25, %v4088_v62  ;;  %v4218_v57 = vsub.f32 %v10176_v19, %v10916_v28  ;;  %v4986_v20 = vmul.f32 %v4090_v8, %v16878_v54  ;;  %v8032_v33 = vpop.eup %8031  ;;  %v10980_v17 = vpop.f32.mrb[168].mxu0  ;;  %v16884_v25 = vld [vmem:[#allocation176_spill] sm:$0xff] }
 0x3bb   :  { %v16879_v9 = vsub.f32 1.0, %v16877_v14  ;;  %vm4727_vm10 = vcmp.eq.f32.partialorder %v4599_v2, 0.0  ;;  %v4601_v16 = vmul.f32 %v4473_v43, %v4089_v34  ;;  %v10966_v21 = vadd.f32 %v10176_v19, %v3838_v58  ;;  %v8034_v42 = vpop.eup %8033  ;;  %16882 = vst [vmem:[#allocation148_spill] sm:$0xff] %v10980_v17  ;;  %v2802_v43 = vpop.f32.mrb[169].mxu0  ;;  %v16889_v14 = vld [vmem:[#allocation44_spill] sm:$0xff] }
 0x3bc   :  { %v10969_v60 = vadd.f32 %v10176_v19, %v3839_v51  ;;  %v10972_v62 = vmul.f32 %v8032_v33, %v10902_v27  ;;  %vm4728_vm11 = vcmp.eq.f32.partialorder %v4600_v50, 0.0  ;;  %v4855_v28 = vsel %vm4727_vm10, 1.0, %v4599_v2  ;;  %v10985_v2 = vpop.f32.mrb[168].mxu1 }
 0x3bd   :  { %v5241_v61 = vmul.f32 %v16879_v9, %v4217_v39  ;;  %v10975_v13 = vadd.s32 %v3442_v32, %v10027_v18  ;;  %v10978_v39 = vmul.f32 %v8034_v42, %v10904_v63  ;;  %v4856_v34 = vsel %vm4728_vm11, 1.0, %v4600_v50  ;;  %16885 = vst [vmem:[#allocation174_spill] sm:$0xff] %v10985_v2  ;;  %v10993_v50 = vpop.f32.mrb[170].mxu0 }
 0x3be   :  { %16880 = vst [vmem:[#allocation146_spill] sm:$0xff] %v10972_v62  ;;  %8035 = vrcp.f32 %v4855_v28  ;;  %v4602_v58 = vmul.f32 %v4474_v53, %v4090_v8  ;;  %vm4729_vm12 = vcmp.eq.f32.partialorder %v4601_v16, 0.0  ;;  %v16883_v27 = vsub.f32 1.0, %v16878_v54  ;;  %v2513_v8 = vpop.f32.mrb[169].mxu1  ;;  %16886 = vst [vmem:[#allocation175_spill] sm:$0xff] %v10993_v50 }
 0x3bf   :  { %16881 = vst [vmem:[#allocation147_spill] sm:$0xff] %v10978_v39  ;;  %8037 = vrcp.f32 %v4856_v34  ;;  %v4857_v9 = vsel %vm4729_vm12, 1.0, %v4601_v16  ;;  %v10988_v63 = vadd.s32 %v3442_v32, %v10070_v44  ;;  %v10991_v53 = vadd.s32 112, %v9999_v52  ;;  %v10996_v28 = vpop.f32.mrb[170].mxu1  ;;  %v2805_v34 = vpop.f32.mrb[171].mxu0 }
 0x3c0   :  { %v5242_v51 = vmul.f32 %v16883_v27, %v4218_v57  ;;  %vm4730_vm13 = vcmp.eq.f32.partialorder %v4602_v58, 0.0  ;;  %v5369_v42 = vadd.f32 %v5241_v61, %v4985_v35  ;;  %v3712_v57 = vcvt.s32.f32 %v10975_v13  ;;  %16887 = vst [vmem:[#allocation26_spill] sm:$0xff] %v10996_v28  ;;  %v16888_v27 = vld [vmem:[#allocation42_spill] sm:$0xff]  ;;  %v2516_v8 = vpop.f32.mrb[171].mxu1  ;;  %v16891_v61 = vld [vmem:[#allocation48_spill] sm:$0xff] }
 0x3c1   :  { %v4858_v33 = vsel %vm4730_vm13, 1.0, %v4602_v58  ;;  %8039 = vrcp.f32 %v4857_v9  ;;  %v2890_v16 = vadd.f32 %v9607_v4, %v10922_v45  ;;  %v2764_v32 = vadd.f32 %v10755_v26, %v10764_v24  ;;  %v16890_v35 = vld [vmem:[#allocation46_spill] sm:$0xff]  ;;  %v16894_v8 = vld [vmem:[#allocation167_spill] sm:$0xff] }
 0x3c2   :  { %v5370_v54 = vadd.f32 %v5242_v51, %v4986_v20  ;;  %v3252_v43 = vadd.f32 %v2965_v12, %v16888_v27  ;;  %8041 = vrcp.f32 %v4858_v33  ;;  %v3253_v58 = vadd.f32 %v2965_v12, %v16889_v14 }
 0x3c3   :  { %v3254_v20 = vadd.f32 %v2970_v23, %v16890_v35  ;;  %v3255_v51 = vadd.f32 %v2970_v23, %v16891_v61  ;;  %v2891_v39 = vadd.f32 %v9607_v4, %v2764_v32  ;;  %3124 = vperm.xlu1 %7666, %v2890_v16   ;;  %v2769_v24 = vadd.f32 %v10785_v11, %v10790_v0  ;;  %v16892_v23 = vld [vmem:[#allocation166_spill] sm:$0xff] }
 0x3c4   :  { %v4091_v9 = vsub.f32 %v10696_v36, %v3252_v43  ;;  %v4219_v34 = vsub.f32 %v10176_v19, %v3252_v43  ;;  %v4092_v26 = vsub.f32 %v10703_v46, %v3253_v58  ;;  %v4220_v45 = vsub.f32 %v10176_v19, %v3253_v58 }
 0x3c5   :  { %v4093_v12 = vsub.f32 %v10891_v10, %v3254_v20  ;;  %v4094_v14 = vsub.f32 %v10897_v29, %v3255_v51  ;;  %v16893_v32 = vsub.f32 1.0, %v16892_v23  ;;  %3129 = vperm.xlu0 %7665, %v2891_v39   ;;  %v3713_v16 = vcvt.s32.f32 %v10988_v63 }
 0x3c6   :  { %v7523_v33 = vadd.f32 -1.0, %v4091_v9  ;;  %v4987_v27 = vmul.f32 %v4091_v9, %v16892_v23  ;;  %v7524_v43 = vadd.f32 -1.0, %v4092_v26  ;;  %v4988_v0 = vmul.f32 %v4092_v26, %v16894_v8 }
 0x3c7   :  { %v5243_v36 = vmul.f32 %v16893_v32, %v4219_v34  ;;  %v16895_v46 = vsub.f32 1.0, %v16894_v8  ;;  %v4221_v58 = vsub.f32 %v10176_v19, %v3254_v20  ;;  %v7525_v61 = vadd.f32 -1.0, %v4093_v12 }
 0x3c8   :  { %v8036_v10 = vpop.eup %8035  ;;  %v4475_v29 = vadd.f32 %v7523_v33, %v16892_v23  ;;  %v7526_v50 = vadd.f32 -1.0, %v4094_v14  ;;  %v4476_v34 = vadd.f32 %v7524_v43, %v16894_v8  ;;  %v4989_v62 = vmul.f32 %v4093_v12, %v16825_v3  ;;  %v16898_v23 = vld [vmem:[#allocation169_spill] sm:$0xff] }
 0x3c9   :  { %v5244_v11 = vmul.f32 %v16895_v46, %v4220_v45  ;;  %v11024_v35 = vadd.f32 %v5243_v36, %v4987_v27  ;;  %v8038_v28 = vpop.eup %8037  ;;  %v11027_v39 = vmul.f32 %v8036_v10, %v10942_v15  ;;  %v4477_v33 = vadd.f32 %v7525_v61, %v16825_v3  ;;  %v2980_v61 = vpop.permute.xlu0 %2979 }
 0x3ca   :  { %v11034_v45 = vmul.f32 %v8038_v28, %v10950_v31  ;;  %v4603_v20 = vmul.f32 %v4475_v29, %v4091_v9  ;;  %v4478_v27 = vadd.f32 %v7526_v50, %v16898_v23  ;;  %v4604_v36 = vmul.f32 %v4476_v34, %v4092_v26 }
 0x3cb   :  { %16896 = vst [vmem:[#allocation28_spill] sm:$0xff] %v11027_v39  ;;  %v11030_v32 = vadd.f32 %v5244_v11, %v4988_v0  ;;  %v4222_v46 = vsub.f32 %v10176_v19, %v3255_v51  ;;  %v4990_v15 = vmul.f32 %v4094_v14, %v16898_v23  ;;  %v16899_v10 = vsub.f32 1.0, %v16825_v3  ;;  %v8040_v8 = vpop.eup %8039 }
 0x3cc   :  { %16897 = vst [vmem:[#allocation30_spill] sm:$0xff] %v11034_v45  ;;  %vm4731_vm14 = vcmp.eq.f32.partialorder %v4603_v20, 0.0  ;;  %v4605_v0 = vmul.f32 %v4477_v33, %v4093_v12  ;;  %v3840_v11 = vadd.f32 1.0, %v3712_v57  ;;  %v3841_v39 = vadd.f32 1.0, %v3713_v16  ;;  %v8042_v31 = vpop.eup %8041  ;;  %v2975_v12 = vpop.permute.xlu1 %2974  ;;  %v16903_v57 = vld [vmem:[#allocation177_spill] sm:$0xff] }
 0x3cd   :  { %v5245_v43 = vmul.f32 %v16899_v10, %v4221_v58  ;;  %v11042_v28 = vmul.f32 %v8040_v8, %v5369_v42  ;;  %vm4732_vm15 = vcmp.eq.f32.partialorder %v4604_v36, 0.0  ;;  %v4859_v9 = vsel %vm4731_vm14, 1.0, %v4603_v20  ;;  %v16906_v10 = vld [vmem:[#allocation52_spill] sm:$0xff] }
 0x3ce   :  { %v3443_v50 = vmul.u32 256, %v10991_v53  ;;  %v11045_v26 = vmul.f32 %v8042_v31, %v5370_v54  ;;  %v4860_v51 = vsel %vm4732_vm15, 1.0, %v4604_v36  ;;  %8043 = vrcp.f32 %v4859_v9  ;;  %v16905_v36 = vld [vmem:[#allocation50_spill] sm:$0xff] }
 0x3cf   :  { %16900 = vst [vmem:[#allocation32_spill] sm:$0xff] %v11042_v28  ;;  %v4606_v29 = vmul.f32 %v4478_v27, %v4094_v14  ;;  %8045 = vrcp.f32 %v4860_v51  ;;  %vm4733_vm0 = vcmp.eq.f32.partialorder %v4605_v0, 0.0  ;;  %v16902_v3 = vsub.f32 1.0, %v16898_v23 }
 0x3d0   :  { %16901 = vst [vmem:[#allocation153_spill] sm:$0xff] %v11045_v26  ;;  %v5122_v16 = vsub.f32 1.0, %v16903_v57  ;;  %v4861_v42 = vsel %vm4733_vm0, 1.0, %v4605_v0  ;;  %v3969_v34 = vadd.f32 %v10176_v19, %v3840_v11  ;;  %v3970_v53 = vadd.f32 %v10176_v19, %v3841_v39  ;;  %v16907_v39 = vld [vmem:[#allocation54_spill] sm:$0xff]  ;;  %v16976_v26 = vld [vmem:[#allocation12_spill] sm:$0xff] }
 0x3d1   :  { %v5246_v58 = vmul.f32 %v16902_v3, %v4222_v46  ;;  %vm4734_vm1 = vcmp.eq.f32.partialorder %v4606_v29, 0.0  ;;  %v11052_v20 = vadd.f32 %v5245_v43, %v4989_v62  ;;  %v11057_v14 = vadd.s32 %v3443_v50, %v10027_v18  ;;  %v16908_v62 = vld [vmem:[#allocation56_spill] sm:$0xff]  ;;  %v11080_v3 = vpop.f32.mrb[172].mxu0 }
 0x3d2   :  { %v4862_v54 = vsel %vm4734_vm1, 1.0, %v4606_v29  ;;  %8047 = vrcp.f32 %v4861_v42  ;;  %v2892_v23 = vadd.f32 %v9607_v4, %v2769_v24  ;;  %v2772_v27 = vadd.f32 %v10799_v22, %v10805_v56  ;;  %v11078_v29 = vpop.f32.mrb[172].mxu1  ;;  %16910 = vst [vmem:[#allocation36_spill] sm:$0xff] %v11080_v3 }
 0x3d3   :  { %v11054_v33 = vadd.f32 %v5246_v58, %v4990_v15  ;;  %16904 = vst [vmem:[#allocation154_spill] sm:$0xff] %v11057_v14  ;;  %v3256_v46 = vadd.f32 %v2975_v12, %v16905_v36  ;;  %8049 = vrcp.f32 %v4862_v54  ;;  %v3257_v8 = vadd.f32 %v2975_v12, %v16906_v10  ;;  %16909 = vst [vmem:[#allocation34_spill] sm:$0xff] %v11078_v29  ;;  %v16916_v10 = vld [vmem:[#allocation275_spill] sm:$0xff] }
 0x3d4   :  { %v3258_v0 = vadd.f32 %v2980_v61, %v16907_v39  ;;  %v11066_v43 = vadd.f32 %v2980_v61, %v16908_v62  ;;  %v2893_v15 = vadd.f32 %v9607_v4, %v2772_v27  ;;  %3134 = vperm.xlu1 %7666, %v2892_v23   ;;  %v11073_v22 = vadd.f32 %v10838_v30, %v10844_v40  ;;  %v2521_v40 = vpop.f32.mrb[173].mxu1 }
 0x3d5   :  { %v4095_v11 = vsub.f32 %v10966_v21, %v3256_v46  ;;  %v4223_v31 = vsub.f32 %v10176_v19, %v3256_v46  ;;  %v4096_v56 = vsub.f32 %v10969_v60, %v3257_v8  ;;  %v4224_v24 = vsub.f32 %v10176_v19, %v3257_v8  ;;  %v2810_v60 = vpop.f32.mrb[173].mxu0  ;;  %v11092_v27 = vpop.f32.mrb[174].mxu1 }
 0x3d6   :  { %v4097_v9 = vsub.f32 %v3969_v34, %v3258_v0  ;;  %v4098_v51 = vsub.f32 %v3970_v53, %v11066_v43  ;;  %v16911_v12 = vsub.f32 1.0, %v16847_v41  ;;  %3139 = vperm.xlu0 %7665, %v2893_v15   ;;  %v11086_v30 = vadd.s32 %v3443_v50, %v10070_v44  ;;  %16914 = vst [vmem:[#allocation40_spill] sm:$0xff] %v11092_v27  ;;  %v11094_v36 = vpop.f32.mrb[174].mxu0  ;;  %v2524_v15 = vpop.f32.mrb[175].mxu1 }
 0x3d7   :  { %v7527_v58 = vadd.f32 -1.0, %v4095_v11  ;;  %v4991_v21 = vmul.f32 %v4095_v11, %v16847_v41  ;;  %v7528_v61 = vadd.f32 -1.0, %v4096_v56  ;;  %v4992_v34 = vmul.f32 %v4096_v56, %v16848_v5  ;;  %16915 = vst [vmem:[#allocation159_spill] sm:$0xff] %v11094_v36 }
 0x3d8   :  { %v5247_v42 = vmul.f32 %v16911_v12, %v4223_v31  ;;  %16912 = vst [vmem:[#allocation38_spill] sm:$0xff] %v11086_v30  ;;  %v16913_v53 = vsub.f32 1.0, %v16848_v5  ;;  %v4225_v23 = vsub.f32 %v10176_v19, %v3258_v0  ;;  %v8044_v46 = vpop.eup %8043  ;;  %vm6136_vm2 = vcmp.gt.f32.partialorder %v16916_v10, 0.0  ;;  %v2813_v31 = vpop.f32.mrb[175].mxu0  ;;  %v235_v0 = vld [vmem:[%s16205_s2 + $0x88] sm:$0xff]  ;;  %v16933_v10 = vld [vmem:[#allocation274_spill] sm:$0xff] }
 0x3d9   :  { %v4479_v50 = vadd.f32 %v7527_v58, %v16847_v41  ;;  %v7529_v39 = vadd.f32 -1.0, %v4097_v9  ;;  %v7530_v62 = vadd.f32 -1.0, %v4098_v51  ;;  %v8046_v12 = vpop.eup %8045  ;;  %v4480_v40 = vadd.f32 %v7528_v61, %v16848_v5 }
 0x3da   :  { %v5248_v54 = vmul.f32 %v16913_v53, %v4224_v24  ;;  %v11098_v8 = vadd.f32 %v5247_v42, %v4991_v21  ;;  %v11104_v24 = vmul.f32 %v8044_v46, %v11024_v35  ;;  %v4993_v41 = vmul.f32 %v4097_v9, %v16884_v25 }
 0x3db   :  { %v11111_v58 = vmul.f32 %v8046_v12, %v11030_v32  ;;  %v4607_v21 = vmul.f32 %v4479_v50, %v4095_v11  ;;  %v4481_v42 = vadd.f32 %v7529_v39, %v16884_v25  ;;  %v4482_v53 = vadd.f32 %v7530_v62, %v16903_v57  ;;  %v16923_v12 = vld [vmem:[#allocation277_spill] sm:$0xff] }
 0x3dc   :  { %16917 = vst [vmem:[#allocation160_spill] sm:$0xff] %v11104_v24  ;;  %v11107_v60 = vadd.f32 %v5248_v54, %v4992_v34  ;;  %v4608_v15 = vmul.f32 %v4480_v40, %v4096_v56  ;;  %v4226_v31 = vsub.f32 %v10176_v19, %v11066_v43  ;;  %v4994_v35 = vmul.f32 %v4098_v51, %v16903_v57  ;;  %v8048_v34 = vpop.eup %8047  ;;  %v16920_v54 = vld [vmem:[#allocation271_spill] sm:$0xff] }
 0x3dd   :  { %16918 = vst [vmem:[#allocation161_spill] sm:$0xff] %v11111_v58  ;;  %v16919_v5 = vsub.f32 1.0, %v16884_v25  ;;  %vm6776_vm3 = vcmp.lt.s32.totalorder %v16920_v54, 512  ;;  %v11121_v46 = vsub.f32 0.0, %v235_v0  ;;  %vm4735_vm4 = vcmp.eq.f32.partialorder %v4607_v21, 0.0  ;;  %v8050_v50 = vpop.eup %8049  ;;  %v16924_v0 = vld [vmem:[#allocation292_spill] sm:$0xff] }
 0x3de   :  { %v4609_v32 = vmul.f32 %v4481_v42, %v4097_v9  ;;  %v3714_v11 = vcvt.s32.f32 %v11057_v14  ;;  %v11125_v56 = vmul.f32 %v8048_v34, %v11052_v20  ;;  %vm4736_vm5 = vcmp.eq.f32.partialorder %v4608_v15, 0.0 }
 0x3df   :  { %v5249_v61 = vmul.f32 %v16919_v5, %v4225_v23  ;;  %v4863_v43 = vsel %vm4735_vm4, 1.0, %v4607_v21  ;;  %v3715_v39 = vcvt.s32.f32 %v11086_v30  ;;  %v11129_v25 = vmul.f32 %v8050_v50, %v11054_v33  ;;  %v16927_v50 = vld [vmem:[#allocation286_spill] sm:$0xff] }
 0x3e0   :  { %16921 = vst [vmem:[#allocation176_spill] sm:$0xff] %v11125_v56  ;;  %v4864_v23 = vsel %vm4736_vm5, 1.0, %v4608_v15  ;;  %8051 = vrcp.f32 %v4863_v43  ;;  %v4610_v62 = vmul.f32 %v4482_v53, %v4098_v51  ;;  %vm6137_vm6 = vcmp.gt.f32.partialorder %v16923_v12, 0.0  ;;  %v2985_v51 = vpop.permute.xlu1 %2984  ;;  %v236_v53 = vld [vmem:[%s16205_s2 + $0x90] sm:$0xff] }
 0x3e1   :  { %16922 = vst [vmem:[#allocation42_spill] sm:$0xff] %v11129_v25  ;;  %v6411_v9 = vmul.f32 1.442695, %v16924_v0  ;;  %8053 = vrcp.f32 %v4864_v23  ;;  %vm4737_vm7 = vcmp.eq.f32.partialorder %v4609_v32, 0.0  ;;  %v5250_v20 = vmul.f32 %v5122_v16, %v4226_v31  ;;  %v16925_v16 = vld [vmem:[#allocation139_spill] sm:$0xff]  ;;  %v16939_v30 = vld [vmem:[#allocation258_spill] sm:$0xff] }
 0x3e2   :  { %v6413_v40 = vmul.f32 1.442695, %v11121_v46  ;;  %vm4738_vm8 = vcmp.eq.f32.partialorder %v4610_v62, 0.0  ;;  %v4865_v21 = vsel %vm4737_vm7, 1.0, %v4609_v32  ;;  %v3842_v42 = vadd.f32 1.0, %v3714_v11  ;;  %v16926_v11 = vld [vmem:[#allocation294_spill] sm:$0xff] }
 0x3e3   :  { %v4866_v5 = vsel %vm4738_vm8, 1.0, %v4610_v62  ;;  %v5377_v33 = vadd.f32 %v5249_v61, %v4993_v41  ;;  %v11136_v34 = vadd.f32 %v5250_v20, %v4994_v35  ;;  %v3843_v15 = vadd.f32 1.0, %v3715_v39  ;;  %v16928_v35 = vld [vmem:[#allocation278_spill] sm:$0xff]  ;;  %v237_v39 = vld [vmem:[%s16205_s2 + $0x98] sm:$0xff] }
 0x3e4   :  { %8055 = vrcp.f32 %v4865_v21  ;;  %v2894_v57 = vadd.f32 %v9607_v4, %v11073_v22  ;;  %v2780_v31 = vadd.f32 %v16925_v16, %v10858_v55  ;;  %v3376_v32 = vadd.s32 120, %v9999_v52  ;;  %v16929_v61 = vld [vmem:[#allocation182_spill] sm:$0xff]  ;;  %v16930_v23 = vld [vmem:[#allocation183_spill] sm:$0xff]  ;;  %v16932_v21 = vld [vmem:[#allocation60_spill] sm:$0xff] }
 0x3e5   :  { %v6648_v41 = vsel %vm6136_vm2, %v16927_v50, %v16926_v11  ;;  %vm6138_vm9 = vcmp.gt.f32.partialorder %v16928_v35, 0.0  ;;  %8057 = vrcp.f32 %v4866_v5  ;;  %v5123_v43 = vsub.f32 1.0, %v16929_v61  ;;  %v16931_v62 = vld [vmem:[#allocation58_spill] sm:$0xff]  ;;  %v16934_v11 = vld [vmem:[#allocation276_spill] sm:$0xff] }
 0x3e6   :  { %v2895_v22 = vadd.f32 %v9607_v4, %v2780_v31  ;;  %v5124_v55 = vsub.f32 1.0, %v16930_v23  ;;  %v3260_v20 = vadd.f32 %v2985_v51, %v16931_v62  ;;  %v3261_v16 = vadd.f32 %v2985_v51, %v16932_v21  ;;  %3144 = vperm.xlu1 %7666, %v2894_v57   ;;  %v16942_v12 = vld [vmem:[#allocation6_spill] sm:$0xff] }
 0x3e7   :  { %vm6777_vm10 = vcmp.lt.s32.totalorder %v16933_v10, 512  ;;  %vm6778_vm11 = vcmp.lt.s32.totalorder %v16934_v11, 512  ;;  %8059 = vpow2.f32 %v6411_v9  ;;  %v11161_v5 = vsub.f32 0.0, %v236_v53 }
 0x3e8   :  { %v3971_v50 = vadd.f32 %v10176_v19, %v3842_v42  ;;  %v3972_v36 = vadd.f32 %v10176_v19, %v3843_v15  ;;  %8061 = vpow2.f32 %v6413_v40  ;;  %v4227_v31 = vsub.f32 %v10176_v19, %v3260_v20  ;;  %3149 = vperm.xlu0 %7665, %v2895_v22  }
 0x3e9   :  { %v4228_v27 = vsub.f32 %v10176_v19, %v3261_v16  ;;  %v3444_v62 = vmul.u32 256, %v3376_v32  ;;  %v11169_v51 = vsel %vm6776_vm3, %v6648_v41, 0.0  ;;  %v11171_v57 = vsub.f32 0.0, %v237_v39 }
 0x3ea   :  { %16935 = vst [vmem:[#allocation44_spill] sm:$0xff] %v11169_v51  ;;  %v4099_v9 = vsub.f32 %v3971_v50, %v3260_v20  ;;  %v4100_v53 = vsub.f32 %v3972_v36, %v3261_v16  ;;  %v8052_v21 = vpop.eup %8051  ;;  %v5251_v3 = vmul.f32 %v5123_v43, %v4227_v31  ;;  %v16940_v20 = vld [vmem:[#allocation289_spill] sm:$0xff]  ;;  %vm6139_vm12 = vcmp.gt.f32.partialorder %v16924_v0, 0.0 }
 0x3eb   :  { %v5252_v42 = vmul.f32 %v5124_v55, %v4228_v27  ;;  %v11174_v15 = vadd.s32 %v3444_v62, %v10027_v18  ;;  %v11177_v40 = vadd.s32 %v3444_v62, %v10070_v44  ;;  %v8054_v29 = vpop.eup %8053  ;;  %v11180_v32 = vmul.f32 %v8052_v21, %v11098_v8  ;;  %v238_v8 = vld [vmem:[%s16205_s2 + $0xa0] sm:$0xff]  ;;  %v16943_v62 = vld [vmem:[#allocation291_spill] sm:$0xff] }
 0x3ec   :  { %v7531_v22 = vadd.f32 -1.0, %v4099_v9  ;;  %v7532_v41 = vadd.f32 -1.0, %v4100_v53  ;;  %v4995_v39 = vmul.f32 %v4099_v9, %v16929_v61  ;;  %v6649_v36 = vsel %vm6137_vm6, %v16940_v20, %v16939_v30 }
 0x3ed   :  { %16936 = vst [vmem:[#allocation46_spill] sm:$0xff] %v11174_v15  ;;  %16937 = vst [vmem:[#allocation48_spill] sm:$0xff] %v11177_v40  ;;  %v11189_v27 = vmul.f32 %v8054_v29, %v11107_v60  ;;  %v4996_v43 = vmul.f32 %v4100_v53, %v16930_v23  ;;  %v6415_v55 = vmul.f32 1.442695, %v11161_v5  ;;  %v6650_v29 = vsel %vm6138_vm9, %v16943_v62, %v16942_v12 }
 0x3ee   :  { %16938 = vst [vmem:[#allocation166_spill] sm:$0xff] %v11180_v32  ;;  %v4483_v16 = vadd.f32 %v7531_v22, %v16929_v61  ;;  %v4484_v50 = vadd.f32 %v7532_v41, %v16930_v23  ;;  %v11198_v31 = vadd.f32 %v5251_v3, %v4995_v39  ;;  %v8056_v30 = vpop.eup %8055  ;;  %v6417_v60 = vmul.f32 1.442695, %v11171_v57  ;;  %v16953_v32 = vld [vmem:[#allocation64_spill] sm:$0xff] }
 0x3ef   :  { %16941 = vst [vmem:[#allocation167_spill] sm:$0xff] %v11189_v27  ;;  %v11205_v21 = vadd.f32 %v5252_v42, %v4996_v43  ;;  %v3716_v20 = vcvt.s32.f32 %v11174_v15  ;;  %v8058_v14 = vpop.eup %8057  ;;  %v11208_v27 = vmul.f32 %v8056_v30, %v5377_v33  ;;  %v3717_v3 = vcvt.s32.f32 %v11177_v40  ;;  %v16948_v43 = vld [vmem:[#allocation279_spill] sm:$0xff]  ;;  %v2990_v30 = vpop.permute.xlu0 %2989  ;;  %v16951_v40 = vld [vmem:[#allocation185_spill] sm:$0xff] }
 0x3f0   :  { %v4611_v61 = vmul.f32 %v4483_v16, %v4099_v9  ;;  %v4612_v22 = vmul.f32 %v4484_v50, %v4100_v53  ;;  %vm6140_vm13 = vcmp.gt.f32.partialorder %v11121_v46, 0.0  ;;  %v6267_v23 = vadd.f32 1.0, %v16924_v0  ;;  %v11255_v0 = vpop.f32.mrb[176].mxu0 }
 0x3f1   :  { %16944 = vst [vmem:[#allocation169_spill] sm:$0xff] %v11208_v27  ;;  %v11213_v41 = vsub.f32 0.0, %v238_v8  ;;  %v11216_v35 = vmul.f32 %v8058_v14, %v11136_v34  ;;  %v8060_v42 = vpop.eup %8059  ;;  %v6268_v39 = vadd.f32 1.0, %v11121_v46  ;;  %8063 = vpow2.f32 %v6415_v55  ;;  %v239_v14 = vld [vmem:[%s16205_s2 + $0xa8] sm:$0xff]  ;;  %16955 = vst [vmem:[#allocation56_spill] sm:$0xff] %v11255_v0  ;;  %v241_v46 = vld [vmem:[%s16205_s2 + $0xb8] sm:$0xff] }
 0x3f2   :  { %vm4739_vm14 = vcmp.eq.f32.partialorder %v4611_v61, 0.0  ;;  %vm4740_vm15 = vcmp.eq.f32.partialorder %v4612_v22, 0.0  ;;  %v8062_v33 = vpop.eup %8061  ;;  %v11221_v9 = vsel %vm6777_vm10, %v6649_v36, 0.0  ;;  %v11225_v53 = vsel %vm6778_vm11, %v6650_v29, 0.0  ;;  %v16949_v34 = vld [vmem:[#allocation281_spill] sm:$0xff]  ;;  %v240_v29 = vld [vmem:[%s16205_s2 + $0xb0] sm:$0xff] }
 0x3f3   :  { %16945 = vst [vmem:[#allocation177_spill] sm:$0xff] %v11216_v35  ;;  %16946 = vst [vmem:[#allocation50_spill] sm:$0xff] %v11221_v9  ;;  %vm6779_vm0 = vcmp.lt.s32.totalorder %v16948_v43, 512  ;;  %8065 = vpow2.f32 %v6417_v60  ;;  %vm6780_vm1 = vcmp.lt.s32.totalorder %v16949_v34, 512  ;;  %v4867_v55 = vsel %vm4739_vm14, 1.0, %v4611_v61  ;;  %v16952_v35 = vld [vmem:[#allocation62_spill] sm:$0xff] }
 0x3f4   :  { %16947 = vst [vmem:[#allocation52_spill] sm:$0xff] %v11225_v53  ;;  %v4868_v8 = vsel %vm4740_vm15, 1.0, %v4612_v22  ;;  %v3844_v16 = vadd.f32 1.0, %v3716_v20  ;;  %v3845_v50 = vadd.f32 1.0, %v3717_v3  ;;  %v11233_v36 = vadd.f32 1.0, %v11161_v5  ;;  %v16950_v22 = vld [vmem:[#allocation184_spill] sm:$0xff] }
 0x3f5   :  { %v11236_v12 = vadd.f32 1.0, %v11171_v57  ;;  %v6419_v62 = vmul.f32 1.442695, %v11213_v41  ;;  %8067 = vrcp.f32 %v4867_v55  ;;  %v6651_v60 = vsel %vm6139_vm12, %v6267_v23, %v8060_v42  ;;  %v11253_v55 = vpop.f32.mrb[176].mxu1 }
 0x3f6   :  { %v6652_v20 = vsel %vm6140_vm13, %v6268_v39, %v8062_v33  ;;  %vm6141_vm2 = vcmp.gt.f32.partialorder %v11161_v5, 0.0  ;;  %v11247_v61 = vsub.f32 0.0, %v239_v14  ;;  %8069 = vrcp.f32 %v4868_v8  ;;  %16954 = vst [vmem:[#allocation54_spill] sm:$0xff] %v11253_v55  ;;  %v2818_v33 = vpop.f32.mrb[177].mxu0 }
 0x3f7   :  { %v5125_v3 = vsub.f32 1.0, %v16950_v22  ;;  %v5126_v15 = vsub.f32 1.0, %v16951_v40  ;;  %v3262_v27 = vadd.f32 %v2990_v30, %v16952_v35  ;;  %v3263_v25 = vadd.f32 %v2990_v30, %v16953_v32  ;;  %v2529_v32 = vpop.f32.mrb[177].mxu1 }
 0x3f8   :  { %vm6142_vm3 = vcmp.gt.f32.partialorder %v11171_v57, 0.0  ;;  %v11261_v23 = vsub.f32 0.0, %v240_v29  ;;  %v3973_v42 = vadd.f32 %v10176_v19, %v3844_v16  ;;  %v3974_v39 = vadd.f32 %v10176_v19, %v3845_v50  ;;  %v11271_v0 = vpop.f32.mrb[178].mxu1  ;;  %v11273_v29 = vpop.f32.mrb[178].mxu0 }
 0x3f9   :  { %v2785_v35 = vadd.f32 %v10885_v1, %v10893_v48  ;;  %8071 = vpow2.f32 %v6419_v62  ;;  %v4229_v14 = vsub.f32 %v10176_v19, %v3262_v27  ;;  %v4230_v8 = vsub.f32 %v10176_v19, %v3263_v25  ;;  %16956 = vst [vmem:[#allocation275_spill] sm:$0xff] %v11271_v0  ;;  %16957 = vst [vmem:[#allocation271_spill] sm:$0xff] %v11273_v29  ;;  %v2532_v48 = vpop.f32.mrb[179].mxu1  ;;  %v2821_v32 = vpop.f32.mrb[179].mxu0 }
 0x3fa   :  { %v2788_v30 = vadd.f32 %v10900_v38, %v10906_v37  ;;  %v6421_v16 = vmul.f32 1.442695, %v11247_v61  ;;  %v4101_v50 = vsub.f32 %v3973_v42, %v3262_v27  ;;  %v4102_v55 = vsub.f32 %v3974_v39, %v3263_v25  ;;  %v16959_v42 = vld [vmem:[#allocation285_spill] sm:$0xff] }
 0x3fb   :  { %v2896_v1 = vadd.f32 %v9607_v4, %v2785_v35  ;;  %v11277_v62 = vsub.f32 0.0, %v241_v46  ;;  %v5253_v33 = vmul.f32 %v5125_v3, %v4229_v14  ;;  %v5254_v56 = vmul.f32 %v5126_v15, %v4230_v8  ;;  %v8064_v24 = vpop.eup %8063  ;;  %v16960_v46 = vld [vmem:[#allocation287_spill] sm:$0xff] }
 0x3fc   :  { %v2897_v58 = vadd.f32 %v9607_v4, %v2788_v30  ;;  %v7533_v38 = vadd.f32 -1.0, %v4101_v50  ;;  %v7534_v37 = vadd.f32 -1.0, %v4102_v55  ;;  %v4997_v0 = vmul.f32 %v4101_v50, %v16950_v22 }
 0x3fd   :  { %v4998_v29 = vmul.f32 %v4102_v55, %v16951_v40  ;;  %3154 = vperm.xlu1 %7666, %v2896_v1   ;;  %v8066_v27 = vpop.eup %8065  ;;  %v11284_v25 = vsel %vm6779_vm0, %v6651_v60, 0.0  ;;  %vm6781_vm4 = vcmp.lt.s32.totalorder %v16959_v42, 512  ;;  %vm6782_vm5 = vcmp.lt.s32.totalorder %v16960_v46, 512 }
 0x3fe   :  { %16958 = vst [vmem:[#allocation277_spill] sm:$0xff] %v11284_v25  ;;  %v3377_v15 = vadd.s32 128, %v9999_v52  ;;  %3159 = vperm.xlu0 %7665, %v2897_v58   ;;  %v4485_v3 = vadd.f32 %v7533_v38, %v16950_v22  ;;  %v4486_v39 = vadd.f32 %v7534_v37, %v16951_v40  ;;  %v11291_v35 = vadd.f32 %v5253_v33, %v4997_v0  ;;  %v16967_v33 = vld [vmem:[#allocation288_spill] sm:$0xff]  ;;  %v2995_v38 = vpop.permute.xlu1 %2994 }
 0x3ff   :  { %v11293_v14 = vadd.f32 %v5254_v56, %v4998_v29  ;;  %v8068_v8 = vpop.eup %8067  ;;  %v11297_v60 = vsel %vm6780_vm1, %v6652_v20, 0.0  ;;  %8073 = vpow2.f32 %v6421_v16  ;;  %v6423_v30 = vmul.f32 1.442695, %v11261_v23 }
 0x400   :  { %16961 = vst [vmem:[#allocation292_spill] sm:$0xff] %v11297_v60  ;;  %v3445_v1 = vmul.u32 256, %v3377_v15  ;;  %v8070_v48 = vpop.eup %8069  ;;  %v6425_v58 = vmul.f32 1.442695, %v11277_v62  ;;  %v11302_v22 = vmul.f32 %v8068_v8, %v11198_v31  ;;  %v4613_v40 = vmul.f32 %v4485_v3, %v4101_v50  ;;  %v242_v50 = vld [vmem:[%s16205_s2 + $0xc0] sm:$0xff]  ;;  %v243_v3 = vld [vmem:[%s16205_s2 + $0xc8] sm:$0xff] }
 0x401   :  { %v4614_v0 = vmul.f32 %v4486_v39, %v4102_v55  ;;  %v6653_v56 = vsel %vm6141_vm2, %v11233_v36, %v8064_v24  ;;  %v11308_v29 = vmul.f32 %v8070_v48, %v11205_v21  ;;  %vm6143_vm6 = vcmp.gt.f32.partialorder %v11213_v41, 0.0  ;;  %v16969_v8 = vld [vmem:[#allocation293_spill] sm:$0xff] }
 0x402   :  { %16962 = vst [vmem:[#allocation139_spill] sm:$0xff] %v11302_v22  ;;  %v11311_v20 = vadd.s32 %v3445_v1, %v10027_v18  ;;  %v11314_v16 = vadd.s32 %v3445_v1, %v10070_v44  ;;  %vm6144_vm7 = vcmp.gt.f32.partialorder %v11247_v61, 0.0  ;;  %vm4741_vm8 = vcmp.eq.f32.partialorder %v4613_v40, 0.0  ;;  %v244_v1 = vld [vmem:[%s16205_s2 + $0xd0] sm:$0xff] }
 0x403   :  { %16963 = vst [vmem:[#allocation294_spill] sm:$0xff] %v11308_v29  ;;  %vm4742_vm9 = vcmp.eq.f32.partialorder %v4614_v0, 0.0  ;;  %v8072_v31 = vpop.eup %8071  ;;  %v6654_v24 = vsel %vm6142_vm3, %v11236_v12, %v8066_v27  ;;  %v6271_v5 = vadd.f32 1.0, %v11213_v41  ;;  %8075 = vpow2.f32 %v6423_v30  ;;  %v16972_v41 = vld [vmem:[#allocation66_spill] sm:$0xff] }
 0x404   :  { %16964 = vst [vmem:[#allocation286_spill] sm:$0xff] %v11311_v20  ;;  %16965 = vst [vmem:[#allocation278_spill] sm:$0xff] %v11314_v16  ;;  %v4869_v21 = vsel %vm4741_vm8, 1.0, %v4613_v40  ;;  %v11324_v36 = vsel %vm6781_vm4, %v6653_v56, 0.0  ;;  %v6272_v55 = vadd.f32 1.0, %v11247_v61  ;;  %8077 = vpow2.f32 %v6425_v58  ;;  %v245_v40 = vld [vmem:[%s16205_s2 + $0xd8] sm:$0xff] }
 0x405   :  { %16966 = vst [vmem:[#allocation182_spill] sm:$0xff] %v11324_v36  ;;  %v4870_v32 = vsel %vm4742_vm9, 1.0, %v4614_v0  ;;  %vm6783_vm10 = vcmp.lt.s32.totalorder %v16967_v33, 512  ;;  %8079 = vrcp.f32 %v4869_v21  ;;  %v3718_v57 = vcvt.s32.f32 %v11311_v20  ;;  %v16970_v0 = vld [vmem:[#allocation190_spill] sm:$0xff] }
 0x406   :  { %v3719_v12 = vcvt.s32.f32 %v11314_v16  ;;  %v11335_v37 = vsel %vm6782_vm5, %v6654_v24, 0.0  ;;  %v11338_v27 = vadd.f32 1.0, %v11261_v23  ;;  %v11341_v15 = vadd.f32 1.0, %v11277_v62  ;;  %v16971_v24 = vld [vmem:[#allocation191_spill] sm:$0xff]  ;;  %v16975_v36 = vld [vmem:[#allocation10_spill] sm:$0xff] }
 0x407   :  { %16968 = vst [vmem:[#allocation183_spill] sm:$0xff] %v11335_v37  ;;  %8081 = vrcp.f32 %v4870_v32  ;;  %v6655_v39 = vsel %vm6143_vm6, %v6271_v5, %v8072_v31  ;;  %vm6784_vm11 = vcmp.lt.s32.totalorder %v16969_v8, 512  ;;  %v11349_v30 = vsub.f32 0.0, %v242_v50  ;;  %v16973_v5 = vld [vmem:[#allocation68_spill] sm:$0xff] }
 0x408   :  { %v3846_v48 = vadd.f32 1.0, %v3718_v57  ;;  %v3847_v58 = vadd.f32 1.0, %v3719_v12  ;;  %v5127_v56 = vsub.f32 1.0, %v16970_v0  ;;  %v5128_v21 = vsub.f32 1.0, %v16971_v24 }
 0x409   :  { %v3264_v31 = vadd.f32 %v2995_v38, %v16972_v41  ;;  %v3265_v32 = vadd.f32 %v2995_v38, %v16973_v5  ;;  %v8074_v50 = vpop.eup %8073  ;;  %vm6145_vm12 = vcmp.gt.f32.partialorder %v11261_v23, 0.0  ;;  %v11362_v16 = vsub.f32 0.0, %v243_v3  ;;  %v16990_v23 = vld [vmem:[#allocation193_spill] sm:$0xff] }
 0x40a   :  { %v3975_v57 = vadd.f32 %v10176_v19, %v3846_v48  ;;  %v3976_v12 = vadd.f32 %v10176_v19, %v3847_v58  ;;  %v3378_v20 = vadd.s32 136, %v9999_v52  ;;  %v11369_v29 = vsel %vm6783_vm10, %v6655_v39, 0.0 }
 0x40b   :  { %16974 = vst [vmem:[#allocation58_spill] sm:$0xff] %v11369_v29  ;;  %vm6146_vm13 = vcmp.gt.f32.partialorder %v11277_v62, 0.0  ;;  %v11372_v41 = vsub.f32 0.0, %v244_v1  ;;  %v4231_v38 = vsub.f32 %v10176_v19, %v3264_v31  ;;  %v4232_v5 = vsub.f32 %v10176_v19, %v3265_v32 }
 0x40c   :  { %v11376_v3 = vsub.f32 0.0, %v245_v40  ;;  %v4103_v22 = vsub.f32 %v3975_v57, %v3264_v31  ;;  %v4104_v48 = vsub.f32 %v3976_v12, %v3265_v32  ;;  %v3446_v37 = vmul.u32 256, %v3378_v20 }
 0x40d   :  { %v6656_v58 = vsel %vm6144_vm7, %v6272_v55, %v8074_v50  ;;  %vm6785_vm14 = vcmp.lt.s32.totalorder %v16975_v36, 512  ;;  %v6427_v39 = vmul.f32 1.442695, %v11349_v30  ;;  %v5255_v29 = vmul.f32 %v5127_v56, %v4231_v38  ;;  %v8076_v1 = vpop.eup %8075 }
 0x40e   :  { %v5256_v60 = vmul.f32 %v5128_v21, %v4232_v5  ;;  %vm6786_vm15 = vcmp.lt.s32.totalorder %v16976_v26, 512  ;;  %v6429_v28 = vmul.f32 1.442695, %v11362_v16  ;;  %v7535_v25 = vadd.f32 -1.0, %v4103_v22  ;;  %v8078_v32 = vpop.eup %8077 }
 0x40f   :  { %v7536_v40 = vadd.f32 -1.0, %v4104_v48  ;;  %v4999_v31 = vmul.f32 %v4103_v22, %v16970_v0  ;;  %v6431_v20 = vmul.f32 1.442695, %v11372_v41  ;;  %v5000_v61 = vmul.f32 %v4104_v48, %v16971_v24  ;;  %v8080_v21 = vpop.eup %8079 }
 0x410   :  { %v11388_v55 = vadd.s32 %v3446_v37, %v10027_v18  ;;  %v11391_v56 = vadd.s32 %v3446_v37, %v10070_v44  ;;  %v6433_v50 = vmul.f32 1.442695, %v11376_v3  ;;  %v4487_v57 = vadd.f32 %v7535_v25, %v16970_v0  ;;  %v16981_v0 = vld [vmem:[#allocation239_spill] sm:$0xff] }
 0x411   :  { %v4488_v12 = vadd.f32 %v7536_v40, %v16971_v24  ;;  %v11396_v38 = vadd.f32 %v5255_v29, %v4999_v31  ;;  %v8082_v5 = vpop.eup %8081  ;;  %v11399_v45 = vmul.f32 %v8080_v21, %v11291_v35  ;;  %v11401_v53 = vadd.f32 %v5256_v60, %v5000_v61  ;;  %v16986_v40 = vld [vmem:[#allocation245_spill] sm:$0xff] }
 0x412   :  { %16977 = vst [vmem:[#allocation60_spill] sm:$0xff] %v11388_v55  ;;  %16978 = vst [vmem:[#allocation274_spill] sm:$0xff] %v11391_v56  ;;  %v3720_v9 = vcvt.s32.f32 %v11388_v55  ;;  %v3721_v37 = vcvt.s32.f32 %v11391_v56  ;;  %8083 = vpow2.f32 %v6427_v39  ;;  %v11406_v51 = vmul.f32 %v8082_v5, %v11293_v14  ;;  %v16987_v61 = vld [vmem:[#allocation249_spill] sm:$0xff] }
 0x413   :  { %16979 = vst [vmem:[#allocation276_spill] sm:$0xff] %v11399_v45  ;;  %v4615_v17 = vmul.f32 %v4487_v57, %v4103_v22  ;;  %v4616_v25 = vmul.f32 %v4488_v12, %v4104_v48  ;;  %vm5735_vm0 = vcmp.eq.s32.totalorder %v16981_v0, 0  ;;  %v16982_v29 = vstv %s10263_s9  ;;  %v3000_v48 = vpop.permute.xlu0 %2999  ;;  %v16989_v57 = vld [vmem:[#allocation250_spill] sm:$0xff]  ;;  %v17001_v56 = vld [vmem:[#allocation145_spill] sm:$0xff] }
 0x414   :  { %16980 = vst [vmem:[#allocation258_spill] sm:$0xff] %v11406_v51  ;;  %vm11411_vm1 = vcmp.eq.s32.totalorder %v16982_v29, 1  ;;  %v11417_v35 = vsel %vm6784_vm11, %v6656_v58, 0.0  ;;  %v11420_v60 = vadd.f32 1.0, %v11349_v30  ;;  %v11423_v39 = vadd.f32 1.0, %v11362_v16  ;;  %v16995_v29 = vld [vmem:[#allocation254_spill] sm:$0xff] }
 0x415   :  { %16985 = vst [vmem:[#allocation289_spill] sm:$0xff] %v11417_v35  ;;  %8085 = vpow2.f32 %v6429_v28  ;;  %vm6147_vm2 = vcmp.gt.f32.partialorder %v11349_v30, 0.0  ;;  %vm4743_vm3 = vcmp.eq.f32.partialorder %v4615_v17, 0.0  ;;  %v3848_v14 = vadd.f32 1.0, %v3720_v9 }
 0x416   :  { %8087 = vpow2.f32 %v6431_v20  ;;  %v3849_v22 = vadd.f32 1.0, %v3721_v37  ;;  %vm5736_vm4 = vcmp.eq.s32.totalorder %v16986_v40, 0  ;;  %v6657_v58 = vsel %vm6145_vm12, %v11338_v27, %v8076_v1  ;;  %v16988_v20 = vld [vmem:[#allocation192_spill] sm:$0xff]  ;;  %v16991_v1 = vld [vmem:[#allocation70_spill] sm:$0xff]  ;;  %v11442_v37 = vpop.f32.mrb[180].mxu0 }
 0x417   :  { %vm6148_vm5 = vcmp.gt.f32.partialorder %v11362_v16, 0.0  ;;  %8089 = vpow2.f32 %v6433_v50  ;;  %vm4744_vm6 = vcmp.eq.f32.partialorder %v4616_v25, 0.0  ;;  %v4871_v31 = vsel %vm4743_vm3, 1.0, %v4615_v17  ;;  %v16992_v50 = vld [vmem:[#allocation72_spill] sm:$0xff]  ;;  %v11440_v17 = vpop.f32.mrb[180].mxu1  ;;  %16994 = vst [vmem:[#allocation291_spill] sm:$0xff] %v11442_v37  ;;  %vm11490_vm3 = vmand %vm5735_vm0, %vm11411_vm1 }
 0x418   :  { %vm5737_vm7 = vcmp.eq.s32.totalorder %v16987_v61, 0  ;;  %v6658_v28 = vsel %vm6146_vm13, %v11341_v15, %v8078_v32  ;;  %v4872_v9 = vsel %vm4744_vm6, 1.0, %v4616_v25  ;;  %8091 = vrcp.f32 %v4871_v31  ;;  %16993 = vst [vmem:[#allocation6_spill] sm:$0xff] %v11440_v17  ;;  %v16997_v25 = vld [vmem:[#allocation24_spill] sm:$0xff]  ;;  %vm11512_vm6 = vmand %vm5736_vm4, %vm11411_vm1  ;;  %v17015_v16 = vld [vmem:[#allocation266_spill] sm:$0xff] }
 0x419   :  { %v5129_v21 = vsub.f32 1.0, %v16988_v20  ;;  %vm5738_vm8 = vcmp.eq.s32.totalorder %v16989_v57, 0  ;;  %8093 = vrcp.f32 %v4872_v9  ;;  %v5130_v27 = vsub.f32 1.0, %v16990_v23  ;;  %v2537_v9 = vpop.f32.mrb[181].mxu1 }
 0x41a   :  { %v3266_v12 = vadd.f32 %v3000_v48, %v16991_v1  ;;  %v3267_v5 = vadd.f32 %v3000_v48, %v16992_v50  ;;  %vm5739_vm9 = vcmp.eq.s32.totalorder %v16995_v29, 0  ;;  %v11447_v62 = vsel %vm6785_vm14, %v6657_v58, 0.0  ;;  %v16998_v48 = vld [vmem:[#allocation22_spill] sm:$0xff]  ;;  %v2826_v1 = vpop.f32.mrb[181].mxu0  ;;  %v16999_v50 = vld [vmem:[#allocation255_spill] sm:$0xff]  ;;  %v11464_v55 = vpop.f32.mrb[182].mxu1 }
 0x41b   :  { %16996 = vst [vmem:[#allocation279_spill] sm:$0xff] %v11447_v62  ;;  %vm6787_vm10 = vcmp.lt.s32.totalorder %v10836_v7, 512  ;;  %vm6788_vm11 = vcmp.lt.s32.totalorder %v10873_v47, 512  ;;  %v3977_v15 = vadd.f32 %v10176_v19, %v3848_v14  ;;  %v3978_v32 = vadd.f32 %v10176_v19, %v3849_v22  ;;  %17002 = vst [vmem:[#allocation184_spill] sm:$0xff] %v11464_v55  ;;  %v11466_v22 = vpop.f32.mrb[182].mxu0  ;;  %v2540_v51 = vpop.f32.mrb[183].mxu1 }
 0x41c   :  { %v2793_v31 = vadd.f32 %v16998_v48, %v16997_v25  ;;  %vm5740_vm12 = vcmp.eq.s32.totalorder %v16999_v50, 0  ;;  %v11458_v37 = vsel %vm6786_vm15, %v6658_v28, 0.0  ;;  %v4233_v58 = vsub.f32 %v10176_v19, %v3266_v12  ;;  %17003 = vst [vmem:[#allocation185_spill] sm:$0xff] %v11466_v22  ;;  %v246_v48 = vld [vmem:[%s16205_s2 + $0xe0] sm:$0xff]  ;;  %v2829_v45 = vpop.f32.mrb[183].mxu0  ;;  %v8084_v55 = vpop.eup %8083  ;;  %v247_v22 = vld [vmem:[%s16205_s2 + $0xe8] sm:$0xff] }
 0x41d   :  { %17000 = vst [vmem:[#allocation281_spill] sm:$0xff] %v11458_v37  ;;  %v4234_v17 = vsub.f32 %v10176_v19, %v3267_v5  ;;  %v2796_v14 = vadd.f32 %v17001_v56, %v10953_v6  ;;  %v6277_v25 = vadd.f32 1.0, %v11372_v41  ;;  %v4105_v9 = vsub.f32 %v3977_v15, %v3266_v12  ;;  %v17004_v45 = vld [vmem:[#allocation256_spill] sm:$0xff]  ;;  %v17038_v29 = vld [vmem:[#allocation262_spill] sm:$0xff] }
 0x41e   :  { %v4106_v28 = vsub.f32 %v3978_v32, %v3267_v5  ;;  %v2898_v1 = vadd.f32 %v9607_v4, %v2793_v31  ;;  %v6278_v37 = vadd.f32 1.0, %v11376_v3  ;;  %v5257_v62 = vmul.f32 %v5129_v21, %v4233_v58  ;;  %v17007_v32 = vld [vmem:[#allocation257_spill] sm:$0xff] }
 0x41f   :  { %v5258_v6 = vmul.f32 %v5130_v27, %v4234_v17  ;;  %v2899_v56 = vadd.f32 %v9607_v4, %v2796_v14  ;;  %v7537_v35 = vadd.f32 -1.0, %v4105_v9  ;;  %v5001_v12 = vmul.f32 %v4105_v9, %v16988_v20  ;;  %v8086_v51 = vpop.eup %8085 }
 0x420   :  { %v7538_v26 = vadd.f32 -1.0, %v4106_v28  ;;  %v5002_v5 = vmul.f32 %v4106_v28, %v16990_v23  ;;  %3164 = vperm.xlu1 %7666, %v2898_v1   ;;  %vm6149_vm14 = vcmp.gt.f32.partialorder %v11372_v41, 0.0  ;;  %vm6150_vm15 = vcmp.gt.f32.partialorder %v11376_v3, 0.0  ;;  %v8088_v17 = vpop.eup %8087  ;;  %v17037_v41 = vld [vmem:[#allocation76_spill] sm:$0xff] }
 0x421   :  { %v11483_v21 = vsub.f32 0.0, %v246_v48  ;;  %v3379_v27 = vadd.s32 144, %v9999_v52  ;;  %3169 = vperm.xlu0 %7665, %v2899_v56   ;;  %v4489_v31 = vadd.f32 %v7537_v35, %v16988_v20  ;;  %v11497_v14 = vadd.f32 %v5257_v62, %v5001_v12  ;;  %v8090_v1 = vpop.eup %8089  ;;  %v17008_v56 = vld [vmem:[#allocation260_spill] sm:$0xff]  ;;  %v17011_v35 = vld [vmem:[#allocation263_spill] sm:$0xff] }
 0x422   :  { %v4490_v58 = vadd.f32 %v7538_v26, %v16990_v23  ;;  %v11499_v48 = vadd.f32 %v5258_v6, %v5002_v5  ;;  %v6659_v0 = vsel %vm6147_vm2, %v11420_v60, %v8084_v55  ;;  %vm6789_vm0 = vcmp.lt.s32.totalorder %v10975_v13, 512  ;;  %v8092_v36 = vpop.eup %8091  ;;  %v17012_v62 = vld [vmem:[#allocation8_spill] sm:$0xff]  ;;  %vm11530_vm2 = vmand %vm5737_vm7, %vm11411_vm1  ;;  %v3005_v6 = vpop.permute.xlu1 %3004 }
 0x423   :  { %v11506_v4 = vsub.f32 0.0, %v247_v22  ;;  %v3447_v2 = vmul.u32 256, %v3379_v27  ;;  %vm5744_vm13 = vcmp.eq.s32.totalorder %v17011_v35, 0  ;;  %v6660_v30 = vsel %vm6148_vm5, %v11423_v39, %v8086_v51  ;;  %v8094_v23 = vpop.eup %8093  ;;  %vm11547_vm5 = vmand %vm5738_vm8, %vm11411_vm1 }
 0x424   :  { %v11521_v55 = vadd.f32 1.0, %v11483_v21  ;;  %v4617_v60 = vmul.f32 %v4489_v31, %v4105_v9  ;;  %v4618_v20 = vmul.f32 %v4490_v58, %v4106_v28  ;;  %v5995_v40 = vsel %vm11490_vm3, 1.0, %v17012_v62  ;;  %vm11561_vm3 = vmand %vm5739_vm9, %vm11411_vm1  ;;  %v17024_v31 = vld [vmem:[#allocation131_spill] sm:$0xff]  ;;  %v17025_v58 = vld [vmem:[#allocation261_spill] sm:$0xff] }
 0x425   :  { %vm5745_vm4 = vcmp.eq.s32.totalorder %v17015_v16, 0  ;;  %v6661_v39 = vsel %vm6149_vm14, %v6277_v25, %v8088_v17  ;;  %v11538_v9 = vmul.f32 %v8092_v36, %v11396_v38  ;;  %v11541_v28 = vadd.s32 %v3447_v2, %v10027_v18  ;;  %v17020_v38 = vld [vmem:[#allocation267_spill] sm:$0xff]  ;;  %vm11578_vm9 = vmand %vm5740_vm12, %vm11411_vm1  ;;  %v17023_v17 = vld [vmem:[#allocation74_spill] sm:$0xff] }
 0x426   :  { %v11552_v12 = vmul.f32 %v8094_v23, %v11401_v53  ;;  %vm4745_vm7 = vcmp.eq.f32.partialorder %v4617_v60, 0.0  ;;  %vm4746_vm14 = vcmp.eq.f32.partialorder %v4618_v20, 0.0  ;;  %v11555_v36 = vadd.s32 %v3447_v2, %v10070_v44  ;;  %v17029_v23 = vld [vmem:[#allocation133_spill] sm:$0xff]  ;;  %v17030_v62 = vld [vmem:[#allocation14_spill] sm:$0xff] }
 0x427   :  { %vm5746_vm8 = vcmp.eq.s32.totalorder %v17020_v38, 0  ;;  %v11568_v57 = vsel %vm6787_vm10, %v6659_v0, 0.0  ;;  %v11572_v53 = vsel %vm6788_vm11, %v6660_v30, 0.0  ;;  %v4873_v2 = vsel %vm4745_vm7, 1.0, %v4617_v60  ;;  %v17028_v60 = vld [vmem:[#allocation198_spill] sm:$0xff] }
 0x428   :  { %v4874_v25 = vsel %vm4746_vm14, 1.0, %v4618_v20  ;;  %v11584_v5 = vsel %vm6150_vm15, %v6278_v37, %v8090_v1  ;;  %v11588_v51 = vsel %vm6789_vm0, %v6661_v39, 0.0  ;;  %v11591_v27 = vadd.f32 1.0, %v11506_v4  ;;  %v17027_v37 = vld [vmem:[#allocation132_spill] sm:$0xff] }
 0x429   :  { %v3268_v15 = vadd.f32 %v3005_v6, %v17023_v17  ;;  %v5996_v50 = vsel %vm11512_vm6, 1.0, %v17024_v31  ;;  %v11598_v0 = vmul.f32 %v17025_v58, %v5995_v40  ;;  %8095 = vrcp.f32 %v4873_v2  ;;  %v17031_v39 = vld [vmem:[#allocation16_spill] sm:$0xff]  ;;  %v17032_v17 = vld [vmem:[#allocation269_spill] sm:$0xff]  ;;  %v17036_v31 = vld [vmem:[#allocation199_spill] sm:$0xff] }
 0x42a   :  { %v3722_v3 = vcvt.s32.f32 %v11541_v28  ;;  %v5997_v1 = vsel %vm11530_vm2, 1.0, %v17027_v37  ;;  %8097 = vrcp.f32 %v4874_v25  ;;  %v3723_v30 = vcvt.s32.f32 %v11555_v36 }
 0x42b   :  { %17026 = vst [vmem:[#allocation62_spill] sm:$0xff] %v11598_v0  ;;  %v5131_v20 = vsub.f32 1.0, %v17028_v60  ;;  %v5998_v26 = vsel %vm11547_vm5, 1.0, %v17029_v23  ;;  %v5999_v40 = vsel %vm11561_vm3, 1.0, %v17030_v62  ;;  %v6000_v2 = vsel %vm11578_vm9, 1.0, %v17031_v39  ;;  %v17040_v39 = vld [vmem:[#allocation264_spill] sm:$0xff]  ;;  %vm11669_vm3 = vmand %vm5744_vm13, %vm11411_vm1 }
 0x42c   :  { %vm5747_vm10 = vcmp.eq.s32.totalorder %v17032_v17, 0  ;;  %v3850_v22 = vadd.f32 1.0, %v3722_v3  ;;  %vm17033_vm11 = vcmp.eq.s32.totalorder %v17004_v45, 0  ;;  %v3851_v61 = vadd.f32 1.0, %v3723_v30  ;;  %v17045_v30 = vld [vmem:[#allocation265_spill] sm:$0xff]  ;;  %vm11684_vm13 = vmand %vm5745_vm4, %vm11411_vm1 }
 0x42d   :  { %vm11620_vm12 = vmand %vm17033_vm11, %vm11411_vm1  ;;  %v5132_v58 = vsub.f32 1.0, %v17036_v31  ;;  %v3269_v37 = vadd.f32 %v3005_v6, %v17037_v41  ;;  %v4235_v23 = vsub.f32 %v10176_v19, %v3268_v15  ;;  %v11628_v62 = vmul.f32 %v17038_v29, %v5996_v50 }
 0x42e   :  { %v11631_v3 = vmul.f32 %v17040_v39, %v5997_v1  ;;  %vm17042_vm15 = vcmp.eq.s32.totalorder %v17007_v32, 0  ;;  %vm5748_vm0 = vcmp.eq.s32.totalorder %v16920_v54, 0  ;;  %vm6790_vm2 = vcmp.lt.s32.totalorder %v10988_v63, 512  ;;  %v17050_v39 = vld [vmem:[#allocation268_spill] sm:$0xff]  ;;  %vm11703_vm4 = vmand %vm5746_vm8, %vm11411_vm1 }
 0x42f   :  { %17039 = vst [vmem:[#allocation64_spill] sm:$0xff] %v11628_v62  ;;  %vm11637_vm6 = vmand %vm17042_vm15, %vm11411_vm1  ;;  %v3979_v6 = vadd.f32 %v10176_v19, %v3850_v22  ;;  %v3380_v50 = vadd.s32 152, %v9999_v52  ;;  %v11646_v41 = vmul.f32 %v17045_v30, %v5998_v26  ;;  %vm17047_vm5 = vcmp.eq.s32.totalorder %v17008_v56, 0  ;;  %v17052_v26 = vld [vmem:[#allocation270_spill] sm:$0xff]  ;;  %v17056_v62 = vld [vmem:[#allocation259_spill] sm:$0xff] }
 0x430   :  { %17041 = vst [vmem:[#allocation285_spill] sm:$0xff] %v11631_v3  ;;  %vm11652_vm7 = vmand %vm17047_vm5, %vm11411_vm1  ;;  %vm5749_vm14 = vcmp.eq.s32.totalorder %v16933_v10, 0  ;;  %v3980_v1 = vadd.f32 %v10176_v19, %v3851_v61  ;;  %v4236_v29 = vsub.f32 %v10176_v19, %v3269_v37  ;;  %v5259_v22 = vmul.f32 %v5131_v20, %v4235_v23  ;;  %v17087_v10 = vld [vmem:[#allocation201_spill] sm:$0xff] }
 0x431   :  { %17046 = vst [vmem:[#allocation287_spill] sm:$0xff] %v11646_v41  ;;  %v11660_v3 = vmul.f32 %v17050_v39, %v5999_v40  ;;  %v11663_v30 = vmul.f32 %v17052_v26, %v6000_v2  ;;  %vm5750_vm9 = vcmp.eq.s32.totalorder %v16934_v11, 0  ;;  %v4107_v61 = vsub.f32 %v3979_v6, %v3268_v15  ;;  %v17057_v40 = vld [vmem:[#allocation138_spill] sm:$0xff]  ;;  %v17060_v6 = vld [vmem:[#allocation140_spill] sm:$0xff] }
 0x432   :  { %v3448_v41 = vmul.u32 256, %v3380_v50  ;;  %v6001_v20 = vsel %vm11620_vm12, 1.0, %v17056_v62  ;;  %v6002_v2 = vsel %vm11637_vm6, 1.0, %v17057_v40  ;;  %vm5751_vm11 = vcmp.eq.s32.totalorder %v16948_v43, 0  ;;  %v17061_v39 = vld [vmem:[#allocation168_spill] sm:$0xff]  ;;  %v17064_v26 = vld [vmem:[#allocation18_spill] sm:$0xff]  ;;  %vm11750_vm6 = vmand %vm5747_vm10, %vm11411_vm1 }
 0x433   :  { %17051 = vst [vmem:[#allocation288_spill] sm:$0xff] %v11660_v3  ;;  %17053 = vst [vmem:[#allocation293_spill] sm:$0xff] %v11663_v30  ;;  %v4108_v15 = vsub.f32 %v3980_v1, %v3269_v37  ;;  %v5260_v23 = vmul.f32 %v5132_v58, %v4236_v29  ;;  %v6003_v25 = vsel %vm11652_vm7, 1.0, %v17060_v6  ;;  %v7539_v62 = vadd.f32 -1.0, %v4107_v61  ;;  %v8096_v29 = vpop.eup %8095  ;;  %v17098_v43 = vld [vmem:[#allocation12_spill] sm:$0xff] }
 0x434   :  { %v5003_v45 = vmul.f32 %v4107_v61, %v17028_v60  ;;  %v11694_v50 = vadd.s32 %v3448_v41, %v10027_v18  ;;  %v6004_v16 = vsel %vm11669_vm3, 1.0, %v17061_v39  ;;  %v11709_v1 = vadd.s32 %v3448_v41, %v10070_v44  ;;  %v8098_v39 = vpop.eup %8097  ;;  %vm11765_vm10 = vmand %vm5748_vm0, %vm11411_vm1 }
 0x435   :  { %v7540_v37 = vadd.f32 -1.0, %v4108_v15  ;;  %v5004_v32 = vmul.f32 %v4108_v15, %v17036_v31  ;;  %v6005_v56 = vsel %vm11684_vm13, 1.0, %v17064_v26  ;;  %vm5752_vm12 = vcmp.eq.s32.totalorder %v16949_v34, 0  ;;  %v17065_v26 = vld [vmem:[#allocation272_spill] sm:$0xff]  ;;  %vm11781_vm13 = vmand %vm5749_vm14, %vm11411_vm1 }
 0x436   :  { %v4491_v40 = vadd.f32 %v7539_v62, %v17028_v60  ;;  %v11716_v38 = vadd.f32 %v5259_v22, %v5003_v45  ;;  %v3724_v6 = vcvt.s32.f32 %v11694_v50  ;;  %vm5753_vm8 = vcmp.eq.s32.totalorder %v16959_v42, 0  ;;  %v17067_v60 = vld [vmem:[#allocation21_spill] sm:$0xff]  ;;  %vm11809_vm14 = vmand %vm5751_vm11, %vm11411_vm1  ;;  %v3015_v42 = vpop.permute.xlu1 %3014 }
 0x437   :  { %v11721_v30 = vmul.f32 %v8096_v29, %v11497_v14  ;;  %v4492_v41 = vadd.f32 %v7540_v37, %v17036_v31  ;;  %v11724_v3 = vadd.f32 %v5260_v23, %v5004_v32  ;;  %v3725_v35 = vcvt.s32.f32 %v11709_v1  ;;  %v17068_v45 = vld [vmem:[#allocation273_spill] sm:$0xff]  ;;  %v17070_v31 = vld [vmem:[#allocation280_spill] sm:$0xff]  ;;  %v17072_v37 = vld [vmem:[#allocation282_spill] sm:$0xff] }
 0x438   :  { %v11728_v0 = vmul.f32 %v17065_v26, %v6001_v20  ;;  %v6006_v22 = vsel %vm11703_vm4, 1.0, %v17067_v60  ;;  %vm5754_vm15 = vcmp.eq.s32.totalorder %v16960_v46, 0  ;;  %v11735_v62 = vmul.f32 %v8098_v39, %v11499_v48  ;;  %v17088_v60 = vld [vmem:[#allocation78_spill] sm:$0xff]  ;;  %vm11838_vm4 = vmand %vm5752_vm12, %vm11411_vm1 }
 0x439   :  { %v4619_v14 = vmul.f32 %v4491_v40, %v4107_v61  ;;  %v11738_v29 = vmul.f32 %v17068_v45, %v6002_v2  ;;  %v11741_v23 = vmul.f32 %v17070_v31, %v6003_v25  ;;  %v11744_v32 = vmul.f32 %v17072_v37, %v6004_v16  ;;  %v17076_v61 = vld [vmem:[#allocation283_spill] sm:$0xff]  ;;  %v3010_v40 = vpop.permute.xlu0 %3009  ;;  %v17078_v16 = vld [vmem:[#allocation284_spill] sm:$0xff]  ;;  %v11798_v31 = vpop.f32.mrb[184].mxu1  ;;  %vm11870_vm12 = vmand %vm5754_vm15, %vm11411_vm1 }
 0x43a   :  { %17066 = vst [vmem:[#allocation190_spill] sm:$0xff] %v11728_v0  ;;  %vm5755_vm5 = vcmp.eq.s32.totalorder %v16967_v33, 0  ;;  %v4620_v48 = vmul.f32 %v4492_v41, %v4108_v15  ;;  %v11756_v2 = vmul.f32 %v17076_v61, %v6005_v56  ;;  %v3852_v25 = vadd.f32 1.0, %v3724_v6  ;;  %17090 = vst [vmem:[#allocation249_spill] sm:$0xff] %v11798_v31  ;;  %v11800_v37 = vpop.f32.mrb[184].mxu0 }
 0x43b   :  { %17069 = vst [vmem:[#allocation191_spill] sm:$0xff] %v11738_v29  ;;  %17071 = vst [vmem:[#allocation66_spill] sm:$0xff] %v11741_v23  ;;  %vm4747_vm7 = vcmp.eq.f32.partialorder %v4619_v14, 0.0  ;;  %v3853_v58 = vadd.f32 1.0, %v3725_v35  ;;  %v11759_v39 = vmul.f32 %v17078_v16, %v6006_v22  ;;  %v11772_v15 = vsel %vm6790_vm2, %v11584_v5, 0.0  ;;  %v17084_v5 = vld [vmem:[#allocation200_spill] sm:$0xff] }
 0x43c   :  { %17073 = vst [vmem:[#allocation68_spill] sm:$0xff] %v11744_v32  ;;  %17077 = vst [vmem:[#allocation239_spill] sm:$0xff] %v11756_v2  ;;  %vm4748_vm3 = vcmp.eq.f32.partialorder %v4620_v48, 0.0  ;;  %v4875_v56 = vsel %vm4747_vm7, 1.0, %v4619_v14  ;;  %v6007_v6 = vsel %vm11750_vm6, 1.0, %v10947_v59  ;;  %vm5756_vm0 = vcmp.eq.s32.totalorder %v16969_v8, 0 }
 0x43d   :  { %17079 = vst [vmem:[#allocation245_spill] sm:$0xff] %v11759_v39  ;;  %v4876_v41 = vsel %vm4748_vm3, 1.0, %v4620_v48  ;;  %8099 = vrcp.f32 %v4875_v56  ;;  %v5133_v35 = vsub.f32 1.0, %v17084_v5  ;;  %vm11791_vm2 = vmand %vm5750_vm9, %vm11411_vm1  ;;  %v5134_v26 = vsub.f32 1.0, %v17087_v10  ;;  %v17089_v14 = vld [vmem:[#allocation80_spill] sm:$0xff]  ;;  %v17094_v48 = vld [vmem:[#allocation10_spill] sm:$0xff] }
 0x43e   :  { %8101 = vrcp.f32 %v4876_v41  ;;  %v3270_v22 = vadd.f32 %v3010_v40, %v17088_v60  ;;  %v3271_v45 = vadd.f32 %v3010_v40, %v17089_v14  ;;  %17091 = vst [vmem:[#allocation192_spill] sm:$0xff] %v11800_v37  ;;  %v6008_v20 = vsel %vm11765_vm10, 1.0, %v10956_v49  ;;  %v17095_v16 = vld [vmem:[#allocation174_spill] sm:$0xff]  ;;  %v17096_v56 = vld [vmem:[#allocation148_spill] sm:$0xff]  ;;  %v2545_v60 = vpop.f32.mrb[185].mxu1  ;;  %v2834_v17 = vpop.f32.mrb[185].mxu0  ;;  %vm11851_vm7 = vmand %vm5753_vm8, %vm11411_vm1 }
 0x43f   :  { %vm5757_vm9 = vcmp.eq.s32.totalorder %v17094_v48, 0  ;;  %v3981_v61 = vadd.f32 %v10176_v19, %v3852_v25  ;;  %v3982_v40 = vadd.f32 %v10176_v19, %v3853_v58  ;;  %v2801_v41 = vadd.f32 %v17096_v56, %v17095_v16  ;;  %v17097_v49 = vld [vmem:[#allocation146_spill] sm:$0xff]  ;;  %v17100_v23 = vld [vmem:[#allocation175_spill] sm:$0xff]  ;;  %v11826_v29 = vpop.f32.mrb[186].mxu1  ;;  %v11828_v58 = vpop.f32.mrb[186].mxu0  ;;  %vm11879_vm8 = vmand %vm5755_vm5, %vm11411_vm1 }
 0x440   :  { %v6009_v14 = vsel %vm11781_vm13, 1.0, %v17097_v49  ;;  %vm5758_vm11 = vcmp.eq.s32.totalorder %v17098_v43, 0  ;;  %v4237_v39 = vsub.f32 %v10176_v19, %v3270_v22  ;;  %v4238_v2 = vsub.f32 %v10176_v19, %v3271_v45  ;;  %v17099_v32 = vld [vmem:[#allocation26_spill] sm:$0xff]  ;;  %17101 = vst [vmem:[#allocation250_spill] sm:$0xff] %v11826_v29  ;;  %17102 = vst [vmem:[#allocation193_spill] sm:$0xff] %v11828_v58  ;;  %v17103_v16 = vld [vmem:[#allocation147_spill] sm:$0xff] }
 0x441   :  { %v2804_v25 = vadd.f32 %v17100_v23, %v17099_v32  ;;  %v6010_v56 = vsel %vm11791_vm2, 1.0, %v17103_v16  ;;  %v4109_v60 = vsub.f32 %v3981_v61, %v3270_v22  ;;  %v4110_v54 = vsub.f32 %v3982_v40, %v3271_v45  ;;  %v17104_v17 = vld [vmem:[#allocation130_spill] sm:$0xff]  ;;  %v2548_v0 = vpop.f32.mrb[187].mxu1  ;;  %v2837_v37 = vpop.f32.mrb[187].mxu0  ;;  %v17107_v32 = vld [vmem:[#allocation28_spill] sm:$0xff]  ;;  %vm11911_vm5 = vmand %vm5756_vm0, %vm11411_vm1 }
 0x442   :  { %v2900_v49 = vadd.f32 %v17104_v17, %v2801_v41  ;;  %v6011_v58 = vsel %vm11809_vm14, 1.0, %v17107_v32  ;;  %vm5759_vm6 = vcmp.eq.s32.totalorder %v10836_v7, 0  ;;  %v5261_v59 = vmul.f32 %v5133_v35, %v4237_v39  ;;  %v17110_v40 = vld [vmem:[#allocation290_spill] sm:$0xff]  ;;  %vm11937_vm0 = vmand %vm5757_vm9, %vm11411_vm1 }
 0x443   :  { %v5262_v22 = vmul.f32 %v5134_v26, %v4238_v2  ;;  %v2901_v45 = vadd.f32 %v17104_v17, %v2804_v25  ;;  %v7541_v0 = vadd.f32 -1.0, %v4109_v60  ;;  %v7542_v37 = vadd.f32 -1.0, %v4110_v54  ;;  %v17112_v2 = vld [vmem:[#allocation44_spill] sm:$0xff]  ;;  %v17114_v26 = vld [vmem:[#allocation50_spill] sm:$0xff]  ;;  %vm11952_vm2 = vmand %vm5758_vm11, %vm11411_vm1 }
 0x444   :  { %v5005_v61 = vmul.f32 %v4109_v60, %v17084_v5  ;;  %v5006_v11 = vmul.f32 %v4110_v54, %v17087_v10  ;;  %3174 = vperm.xlu1 %7666, %v2900_v49   ;;  %v11858_v39 = vmul.f32 %v17110_v40, %v6007_v6  ;;  %v11861_v35 = vmul.f32 %v17112_v2, %v6008_v20  ;;  %v17120_v49 = vld [vmem:[#allocation52_spill] sm:$0xff]  ;;  %v17123_v40 = vld [vmem:[#allocation277_spill] sm:$0xff]  ;;  %vm11972_vm9 = vmand %vm5759_vm6, %vm11411_vm1 }
 0x445   :  { %v11864_v41 = vmul.f32 %v17114_v26, %v6009_v14  ;;  %v3381_v25 = vadd.s32 160, %v9999_v52  ;;  %3179 = vperm.xlu0 %7665, %v2901_v45   ;;  %vm5760_vm10 = vcmp.eq.s32.totalorder %v10873_v47, 0  ;;  %v4493_v20 = vadd.f32 %v7541_v0, %v17084_v5  ;;  %v17122_v45 = vld [vmem:[#allocation30_spill] sm:$0xff]  ;;  %v17125_v0 = vld [vmem:[#allocation32_spill] sm:$0xff] }
 0x446   :  { %17111 = vst [vmem:[#allocation70_spill] sm:$0xff] %v11858_v39  ;;  %17113 = vst [vmem:[#allocation72_spill] sm:$0xff] %v11861_v35  ;;  %v4494_v46 = vadd.f32 %v7542_v37, %v17087_v10  ;;  %v11886_v14 = vadd.f32 %v5261_v59, %v5005_v61  ;;  %v11888_v16 = vadd.f32 %v5262_v22, %v5006_v11  ;;  %v6012_v33 = vsel %vm11838_vm4, 1.0, %v17122_v45  ;;  %v17126_v61 = vld [vmem:[#allocation153_spill] sm:$0xff]  ;;  %v17129_v11 = vld [vmem:[#allocation160_spill] sm:$0xff] }
 0x447   :  { %17115 = vst [vmem:[#allocation254_spill] sm:$0xff] %v11864_v41  ;;  %v11891_v32 = vmul.f32 %v17120_v49, %v6010_v56  ;;  %v11897_v2 = vmul.f32 %v17123_v40, %v6011_v58  ;;  %vm5761_vm15 = vcmp.eq.s32.totalorder %v10975_v13, 0  ;;  %v3449_v26 = vmul.u32 256, %v3381_v25  ;;  %v8100_v5 = vpop.eup %8099  ;;  %v17134_v45 = vld [vmem:[#allocation182_spill] sm:$0xff]  ;;  %v17144_v58 = vld [vmem:[#allocation176_spill] sm:$0xff]  ;;  %vm12001_vm4 = vmand %vm5760_vm10, %vm11411_vm1 }
 0x448   :  { %v6013_v10 = vsel %vm11851_vm7, 1.0, %v17125_v0  ;;  %v6435_v59 = vmul.f32 1.442695, %v11483_v21  ;;  %v4621_v22 = vmul.f32 %v4493_v20, %v4109_v60  ;;  %v4622_v56 = vmul.f32 %v4494_v46, %v4110_v54  ;;  %v8102_v37 = vpop.eup %8101  ;;  %v17130_v20 = vld [vmem:[#allocation292_spill] sm:$0xff]  ;;  %v248_v7 = vld [vmem:[%s16205_s2 + $0xf0] sm:$0xff]  ;;  %vm12015_vm7 = vmand %vm5761_vm15, %vm11411_vm1 }
 0x449   :  { %17121 = vst [vmem:[#allocation24_spill] sm:$0xff] %v11891_v32  ;;  %17124 = vst [vmem:[#allocation22_spill] sm:$0xff] %v11897_v2  ;;  %v6014_v23 = vsel %vm11870_vm12, 1.0, %v17126_v61  ;;  %v6015_v34 = vsel %vm11879_vm8, 1.0, %v17129_v11  ;;  %v11919_v60 = vmul.f32 %v8100_v5, %v11716_v38  ;;  %v11922_v54 = vadd.s32 %v3449_v26, %v10027_v18  ;;  %v17139_v5 = vld [vmem:[#allocation82_spill] sm:$0xff]  ;;  %v17165_v32 = vld [vmem:[#allocation169_spill] sm:$0xff] }
 0x44a   :  { %v11925_v25 = vmul.f32 %v8102_v37, %v11724_v3  ;;  %vm4749_vm3 = vcmp.eq.f32.partialorder %v4621_v22, 0.0  ;;  %vm4750_vm13 = vcmp.eq.f32.partialorder %v4622_v56, 0.0  ;;  %v11928_v8 = vadd.s32 %v3449_v26, %v10070_v44  ;;  %v17136_v26 = vld [vmem:[#allocation161_spill] sm:$0xff]  ;;  %v17147_v11 = vld [vmem:[#allocation206_spill] sm:$0xff] }
 0x44b   :  { %v11931_v46 = vmul.f32 %v17130_v20, %v6012_v33  ;;  %v6437_v6 = vmul.f32 1.442695, %v11506_v4  ;;  %v4877_v3 = vsel %vm4749_vm3, 1.0, %v4621_v22  ;;  %v4878_v49 = vsel %vm4750_vm13, 1.0, %v4622_v56  ;;  %v17140_v22 = vld [vmem:[#allocation183_spill] sm:$0xff]  ;;  %v17142_v56 = vld [vmem:[#allocation58_spill] sm:$0xff] }
 0x44c   :  { %v11943_v40 = vmul.f32 %v17134_v45, %v6013_v10  ;;  %v6016_v33 = vsel %vm11911_vm5, 1.0, %v17136_v26  ;;  %vm5762_vm14 = vcmp.eq.s32.totalorder %v10988_v63, 0  ;;  %8103 = vpow2.f32 %v6435_v59  ;;  %v17148_v20 = vld [vmem:[#allocation289_spill] sm:$0xff]  ;;  %v17150_v45 = vld [vmem:[#allocation42_spill] sm:$0xff] }
 0x44d   :  { %17131 = vst [vmem:[#allocation255_spill] sm:$0xff] %v11931_v46  ;;  %v3272_v0 = vadd.f32 %v3015_v42, %v17139_v5  ;;  %v11959_v10 = vmul.f32 %v17140_v22, %v6014_v23  ;;  %v11962_v37 = vmul.f32 %v17142_v56, %v6015_v34  ;;  %8105 = vrcp.f32 %v4877_v3  ;;  %v17151_v22 = vld [vmem:[#allocation207_spill] sm:$0xff]  ;;  %v17152_v56 = vld [vmem:[#allocation84_spill] sm:$0xff]  ;;  %vm12054_vm8 = vmand %vm5762_vm14, %vm11411_vm1 }
 0x44e   :  { %17135 = vst [vmem:[#allocation145_spill] sm:$0xff] %v11943_v40  ;;  %v3726_v61 = vcvt.s32.f32 %v11922_v54  ;;  %v6017_v43 = vsel %vm11937_vm0, 1.0, %v17144_v58  ;;  %8107 = vrcp.f32 %v4878_v49  ;;  %v3727_v23 = vcvt.s32.f32 %v11928_v8  ;;  %v249_v49 = vld [vmem:[%s16205_s2 + $0xf8] sm:$0xff]  ;;  %v17169_v35 = vld [vmem:[#allocation38_spill] sm:$0xff] }
 0x44f   :  { %17141 = vst [vmem:[#allocation256_spill] sm:$0xff] %v11959_v10  ;;  %17143 = vst [vmem:[#allocation257_spill] sm:$0xff] %v11962_v37  ;;  %v5135_v34 = vsub.f32 1.0, %v17147_v11  ;;  %v11979_v3 = vmul.f32 %v17148_v20, %v6016_v33  ;;  %v6018_v38 = vsel %vm11952_vm2, 1.0, %v17150_v45  ;;  %vm6151_vm11 = vcmp.gt.f32.partialorder %v11483_v21, 0.0  ;;  %v17153_v20 = vld [vmem:[#allocation279_spill] sm:$0xff] }
 0x450   :  { %8109 = vpow2.f32 %v6437_v6  ;;  %v3854_v26 = vadd.f32 1.0, %v3726_v61  ;;  %v3855_v5 = vadd.f32 1.0, %v3727_v23  ;;  %v5136_v33 = vsub.f32 1.0, %v17151_v22  ;;  %v17157_v61 = vld [vmem:[#allocation166_spill] sm:$0xff]  ;;  %v17162_v40 = vld [vmem:[#allocation167_spill] sm:$0xff]  ;;  %v17172_v21 = vld [vmem:[#allocation208_spill] sm:$0xff] }
 0x451   :  { %17149 = vst [vmem:[#allocation260_spill] sm:$0xff] %v11979_v3  ;;  %v3273_v58 = vadd.f32 %v3015_v42, %v17152_v56  ;;  %v4239_v48 = vsub.f32 %v10176_v19, %v3272_v0  ;;  %v11995_v45 = vmul.f32 %v17153_v20, %v6017_v43  ;;  %v6019_v23 = vsel %vm11972_vm9, 1.0, %v17157_v61  ;;  %v12103_v6 = vpop.f32.mrb[188].mxu0 }
 0x452   :  { %vm6152_vm6 = vcmp.gt.f32.partialorder %v11506_v4, 0.0  ;;  %v3983_v42 = vadd.f32 %v10176_v19, %v3854_v26  ;;  %v3382_v56 = vadd.s32 168, %v9999_v52  ;;  %v12019_v43 = vsub.f32 0.0, %v248_v7  ;;  %v17164_v7 = vld [vmem:[#allocation154_spill] sm:$0xff]  ;;  %v17175_v4 = vld [vmem:[#allocation88_spill] sm:$0xff]  ;;  %17177 = vst [vmem:[#allocation261_spill] sm:$0xff] %v12103_v6 }
 0x453   :  { %17154 = vst [vmem:[#allocation263_spill] sm:$0xff] %v11995_v45  ;;  %v3984_v20 = vadd.f32 %v10176_v19, %v3855_v5  ;;  %v4240_v59 = vsub.f32 %v10176_v19, %v3273_v58  ;;  %v5263_v61 = vmul.f32 %v5135_v34, %v4239_v48  ;;  %v17160_v45 = vld [vmem:[#allocation281_spill] sm:$0xff]  ;;  %v12026_v26 = vsub.f32 0.0, %v249_v49 }
 0x454   :  { %v12024_v3 = vmul.f32 %v17160_v45, %v6018_v38  ;;  %v4111_v37 = vsub.f32 %v3983_v42, %v3272_v0  ;;  %v3450_v10 = vmul.u32 256, %v3382_v56  ;;  %v6020_v13 = vsel %vm12001_vm4, 1.0, %v17162_v40 }
 0x455   :  { %v12032_v46 = vmul.f32 %v11568_v57, %v6019_v23  ;;  %vm6791_vm12 = vcmp.lt.s32.totalorder %v17164_v7, 512  ;;  %v4112_v5 = vsub.f32 %v3984_v20, %v3273_v58  ;;  %v5264_v2 = vmul.f32 %v5136_v33, %v4240_v59  ;;  %v250_v57 = vld [vmem:[%s16205_s2 + $0x100] sm:$0xff] }
 0x456   :  { %17161 = vst [vmem:[#allocation8_spill] sm:$0xff] %v12024_v3  ;;  %v6021_v34 = vsel %vm12015_vm7, 1.0, %v17165_v32  ;;  %v7543_v38 = vadd.f32 -1.0, %v4111_v37  ;;  %v5007_v49 = vmul.f32 %v4111_v37, %v17147_v11  ;;  %v12040_v0 = vadd.s32 %v3450_v10, %v10027_v18  ;;  %v8104_v48 = vpop.eup %8103 }
 0x457   :  { %17163 = vst [vmem:[#allocation266_spill] sm:$0xff] %v12032_v46  ;;  %v6439_v40 = vmul.f32 1.442695, %v12019_v43  ;;  %v7544_v45 = vadd.f32 -1.0, %v4112_v5  ;;  %v5008_v33 = vmul.f32 %v4112_v5, %v17151_v22  ;;  %v12048_v58 = vadd.s32 %v3450_v10, %v10070_v44  ;;  %v8106_v32 = vpop.eup %8105 }
 0x458   :  { %v6441_v23 = vmul.f32 1.442695, %v12026_v26  ;;  %v4495_v42 = vadd.f32 %v7543_v38, %v17147_v11  ;;  %v12060_v56 = vadd.f32 %v5263_v61, %v5007_v49  ;;  %v3728_v47 = vcvt.s32.f32 %v12040_v0  ;;  %v8108_v20 = vpop.eup %8107 }
 0x459   :  { %v12064_v10 = vmul.f32 %v8106_v32, %v11886_v14  ;;  %v4496_v59 = vadd.f32 %v7544_v45, %v17151_v22  ;;  %v12067_v46 = vadd.f32 %v5264_v2, %v5008_v33  ;;  %v3729_v63 = vcvt.s32.f32 %v12048_v58  ;;  %v17170_v14 = vld [vmem:[#allocation177_spill] sm:$0xff]  ;;  %v17174_v33 = vld [vmem:[#allocation86_spill] sm:$0xff] }
 0x45a   :  { %v8110_v3 = vpop.eup %8109  ;;  %v12071_v41 = vmul.f32 %v11572_v53, %v6020_v13  ;;  %vm6792_vm10 = vcmp.lt.s32.totalorder %v17169_v35, 512  ;;  %v12074_v11 = vsub.f32 0.0, %v250_v57  ;;  %v12077_v61 = vmul.f32 %v8108_v20, %v11888_v16  ;;  %v3020_v57 = vpop.permute.xlu0 %3019  ;;  %v17178_v20 = vld [vmem:[#allocation34_spill] sm:$0xff] }
 0x45b   :  { %v4623_v38 = vmul.f32 %v4495_v42, %v4111_v37  ;;  %v6022_v22 = vsel %vm12054_vm8, 1.0, %v17170_v14  ;;  %v12083_v2 = vmul.f32 %v11588_v51, %v6021_v34  ;;  %vm5763_vm15 = vcmp.eq.s32.totalorder %v17164_v7, 0  ;;  %v2842_v14 = vpop.f32.mrb[189].mxu0 }
 0x45c   :  { %17168 = vst [vmem:[#allocation267_spill] sm:$0xff] %v12071_v41  ;;  %v6663_v53 = vsel %vm6151_vm11, %v11521_v55, %v8104_v48  ;;  %v4624_v13 = vmul.f32 %v4496_v59, %v4112_v5  ;;  %8111 = vpow2.f32 %v6439_v40  ;;  %v3856_v49 = vadd.f32 1.0, %v3728_v47  ;;  %v251_v5 = vld [vmem:[%s16205_s2 + $0x108] sm:$0xff]  ;;  %v17179_v59 = vld [vmem:[#allocation36_spill] sm:$0xff]  ;;  %vm12139_vm14 = vmand %vm5763_vm15, %vm11411_vm1 }
 0x45d   :  { %17171 = vst [vmem:[#allocation74_spill] sm:$0xff] %v12083_v2  ;;  %vm4751_vm5 = vcmp.eq.f32.partialorder %v4623_v38, 0.0  ;;  %v3857_v16 = vadd.f32 1.0, %v3729_v63  ;;  %vm5764_vm3 = vcmp.eq.s32.totalorder %v17169_v35, 0  ;;  %v6664_v37 = vsel %vm6152_vm6, %v11591_v27, %v8110_v3  ;;  %v17173_v48 = vld [vmem:[#allocation209_spill] sm:$0xff]  ;;  %v12101_v3 = vpop.f32.mrb[188].mxu1 }
 0x45e   :  { %8113 = vpow2.f32 %v6441_v23  ;;  %vm4752_vm13 = vcmp.eq.f32.partialorder %v4624_v13, 0.0  ;;  %v4879_v51 = vsel %vm4751_vm5, 1.0, %v4623_v38  ;;  %v6443_v34 = vmul.f32 1.442695, %v12074_v11  ;;  %17176 = vst [vmem:[#allocation131_spill] sm:$0xff] %v12101_v3  ;;  %v2553_v38 = vpop.f32.mrb[189].mxu1  ;;  %vm12156_vm11 = vmand %vm5764_vm3, %vm11411_vm1 }
 0x45f   :  { %v4880_v45 = vsel %vm4752_vm13, 1.0, %v4624_v13  ;;  %8115 = vrcp.f32 %v4879_v51  ;;  %v5137_v55 = vsub.f32 1.0, %v17172_v21  ;;  %v5138_v40 = vsub.f32 1.0, %v17173_v48 }
 0x460   :  { %8117 = vrcp.f32 %v4880_v45  ;;  %v3274_v32 = vadd.f32 %v3020_v57, %v17174_v33  ;;  %v3275_v27 = vadd.f32 %v3020_v57, %v17175_v4  ;;  %v12107_v23 = vsel %vm6791_vm12, %v6663_v53, 0.0  ;;  %v17181_v45 = vld [vmem:[#allocation40_spill] sm:$0xff]  ;;  %v17182_v33 = vld [vmem:[#allocation159_spill] sm:$0xff]  ;;  %v12120_v4 = vpop.f32.mrb[190].mxu1 }
 0x461   :  { %v3985_v42 = vadd.f32 %v10176_v19, %v3856_v49  ;;  %v3986_v47 = vadd.f32 %v10176_v19, %v3857_v16  ;;  %v2809_v63 = vadd.f32 %v17179_v59, %v17178_v20  ;;  %v12114_v13 = vmul.f32 %v11772_v15, %v6022_v22  ;;  %17183 = vst [vmem:[#allocation198_spill] sm:$0xff] %v12120_v4  ;;  %v12122_v49 = vpop.f32.mrb[190].mxu0  ;;  %v2556_v38 = vpop.f32.mrb[191].mxu1 }
 0x462   :  { %v4241_v57 = vsub.f32 %v10176_v19, %v3274_v32  ;;  %v4242_v51 = vsub.f32 %v10176_v19, %v3275_v27  ;;  %v2812_v53 = vadd.f32 %v17182_v33, %v17181_v45  ;;  %17184 = vst [vmem:[#allocation133_spill] sm:$0xff] %v12122_v49  ;;  %v12124_v16 = vsub.f32 0.0, %v251_v5  ;;  %v2845_v15 = vpop.f32.mrb[191].mxu0  ;;  %v17191_v38 = vld [vmem:[#allocation139_spill] sm:$0xff] }
 0x463   :  { %17180 = vst [vmem:[#allocation132_spill] sm:$0xff] %v12114_v13  ;;  %v4113_v2 = vsub.f32 %v3985_v42, %v3274_v32  ;;  %v4114_v20 = vsub.f32 %v3986_v47, %v3275_v27  ;;  %v2902_v59 = vadd.f32 %v17104_v17, %v2809_v63  ;;  %8119 = vpow2.f32 %v6443_v34 }
 0x464   :  { %v5265_v22 = vmul.f32 %v5137_v55, %v4241_v57  ;;  %v5266_v14 = vmul.f32 %v5138_v40, %v4242_v51  ;;  %v2903_v13 = vadd.f32 %v17104_v17, %v2812_v53  ;;  %v6920_v5 = vsel %vm6792_vm10, %v6664_v37, 0.0  ;;  %v17187_v57 = vld [vmem:[#allocation46_spill] sm:$0xff] }
 0x465   :  { %v7545_v41 = vadd.f32 -1.0, %v4113_v2  ;;  %v7546_v39 = vadd.f32 -1.0, %v4114_v20  ;;  %v5009_v45 = vmul.f32 %v4113_v2, %v17172_v21  ;;  %v5010_v33 = vmul.f32 %v4114_v20, %v17173_v48  ;;  %3184 = vperm.xlu1 %7666, %v2902_v59  }
 0x466   :  { %vm6153_vm0 = vcmp.gt.f32.partialorder %v12019_v43, 0.0  ;;  %vm6154_vm2 = vcmp.gt.f32.partialorder %v12026_v26, 0.0  ;;  %v3383_v34 = vadd.s32 176, %v9999_v52  ;;  %3189 = vperm.xlu0 %7665, %v2903_v13   ;;  %v8112_v55 = vpop.eup %8111  ;;  %v6281_v63 = vadd.f32 1.0, %v12019_v43  ;;  %v252_v43 = vld [vmem:[%s16205_s2 + $0x110] sm:$0xff] }
 0x467   :  { %v4497_v32 = vadd.f32 %v7545_v41, %v17172_v21  ;;  %v4498_v37 = vadd.f32 %v7546_v39, %v17173_v48  ;;  %v12145_v27 = vadd.f32 %v5265_v22, %v5009_v45  ;;  %v12147_v42 = vadd.f32 %v5266_v14, %v5010_v33  ;;  %v17190_v39 = vld [vmem:[#allocation48_spill] sm:$0xff]  ;;  %v3025_v14 = vpop.permute.xlu1 %3024 }
 0x468   :  { %v8114_v47 = vpop.eup %8113  ;;  %v6282_v13 = vadd.f32 1.0, %v12026_v26  ;;  %vm6793_vm9 = vcmp.lt.s32.totalorder %v17187_v57, 512  ;;  %v3451_v7 = vmul.u32 256, %v3383_v34  ;;  %vm5765_vm4 = vcmp.eq.s32.totalorder %v17187_v57, 0 }
 0x469   :  { %v8116_v51 = vpop.eup %8115  ;;  %vm6794_vm6 = vcmp.lt.s32.totalorder %v17190_v39, 512  ;;  %v6445_v21 = vmul.f32 1.442695, %v12124_v16  ;;  %v4625_v48 = vmul.f32 %v4497_v32, %v4113_v2  ;;  %v4626_v53 = vmul.f32 %v4498_v37, %v4114_v20  ;;  %v17195_v20 = vld [vmem:[#allocation294_spill] sm:$0xff]  ;;  %vm12229_vm3 = vmand %vm5765_vm4, %vm11411_vm1 }
 0x46a   :  { %v8118_v59 = vpop.eup %8117  ;;  %v6023_v15 = vsel %vm12139_vm14, 1.0, %v17191_v38  ;;  %vm6155_vm7 = vcmp.gt.f32.partialorder %v12074_v11, 0.0  ;;  %v12168_v35 = vmul.f32 %v8116_v51, %v12060_v56  ;;  %v12171_v22 = vadd.s32 %v3451_v7, %v10027_v18  ;;  %v17196_v37 = vld [vmem:[#allocation90_spill] sm:$0xff] }
 0x46b   :  { %v12174_v45 = vmul.f32 %v8118_v59, %v12067_v46  ;;  %vm4753_vm12 = vcmp.eq.f32.partialorder %v4625_v48, 0.0  ;;  %vm4754_vm8 = vcmp.eq.f32.partialorder %v4626_v53, 0.0  ;;  %v12177_v2 = vadd.s32 %v3451_v7, %v10070_v44 }
 0x46c   :  { %17192 = vst [vmem:[#allocation14_spill] sm:$0xff] %v12171_v22  ;;  %v6024_v33 = vsel %vm12156_vm11, 1.0, %v17195_v20  ;;  %v6283_v34 = vadd.f32 1.0, %v12074_v11  ;;  %v4881_v56 = vsel %vm4753_vm12, 1.0, %v4625_v48  ;;  %v4882_v40 = vsel %vm4754_vm8, 1.0, %v4626_v53 }
 0x46d   :  { %17193 = vst [vmem:[#allocation16_spill] sm:$0xff] %v12174_v45  ;;  %17194 = vst [vmem:[#allocation269_spill] sm:$0xff] %v12177_v2  ;;  %vm5766_vm10 = vcmp.eq.s32.totalorder %v17190_v39, 0  ;;  %v6665_v32 = vsel %vm6153_vm0, %v6281_v63, %v8112_v55  ;;  %v6666_v46 = vsel %vm6154_vm2, %v6282_v13, %v8114_v47  ;;  %8121 = vpow2.f32 %v6445_v21  ;;  %v8120_v51 = vpop.eup %8119  ;;  %v17199_v55 = vld [vmem:[#allocation214_spill] sm:$0xff]  ;;  %v253_v13 = vld [vmem:[%s16205_s2 + $0x118] sm:$0xff] }
 0x46e   :  { %v3276_v7 = vadd.f32 %v3025_v14, %v17196_v37  ;;  %v12190_v59 = vmul.f32 %v12107_v23, %v6023_v15  ;;  %v6284_v41 = vadd.f32 1.0, %v12124_v16  ;;  %8123 = vrcp.f32 %v4881_v56  ;;  %v17201_v15 = vld [vmem:[#allocation215_spill] sm:$0xff]  ;;  %vm12263_vm0 = vmand %vm5766_vm10, %vm11411_vm1 }
 0x46f   :  { %v3730_v48 = vcvt.s32.f32 %v12171_v22  ;;  %v12194_v53 = vmul.f32 %v6920_v5, %v6024_v33  ;;  %vm6156_vm15 = vcmp.gt.f32.partialorder %v12124_v16, 0.0  ;;  %8125 = vrcp.f32 %v4882_v40  ;;  %v17200_v5 = vld [vmem:[#allocation286_spill] sm:$0xff]  ;;  %v17202_v33 = vld [vmem:[#allocation92_spill] sm:$0xff] }
 0x470   :  { %17197 = vst [vmem:[#allocation199_spill] sm:$0xff] %v12190_v59  ;;  %v3731_v26 = vcvt.s32.f32 %v12177_v2  ;;  %v5139_v47 = vsub.f32 1.0, %v17199_v55  ;;  %v6921_v23 = vsel %vm6793_vm9, %v6665_v32, 0.0  ;;  %v12206_v63 = vsel %vm6794_vm6, %v6666_v46, 0.0 }
 0x471   :  { %17198 = vst [vmem:[#allocation76_spill] sm:$0xff] %v12194_v53  ;;  %vm6795_vm5 = vcmp.lt.s32.totalorder %v17200_v5, 512  ;;  %v3858_v21 = vadd.f32 1.0, %v3730_v48  ;;  %v5140_v20 = vsub.f32 1.0, %v17201_v15  ;;  %v3277_v56 = vadd.f32 %v3025_v14, %v17202_v33  ;;  %v17205_v14 = vld [vmem:[#allocation278_spill] sm:$0xff] }
 0x472   :  { %v3859_v38 = vadd.f32 1.0, %v3731_v26  ;;  %v4243_v40 = vsub.f32 %v10176_v19, %v3276_v7  ;;  %v6667_v32 = vsel %vm6155_vm7, %v6283_v34, %v8120_v51  ;;  %v12217_v37 = vsub.f32 0.0, %v252_v43 }
 0x473   :  { %v3987_v46 = vadd.f32 %v10176_v19, %v3858_v21  ;;  %v3384_v53 = vadd.s32 184, %v9999_v52  ;;  %v12221_v59 = vsub.f32 0.0, %v253_v13  ;;  %v4244_v26 = vsub.f32 %v10176_v19, %v3277_v56 }
 0x474   :  { %v3988_v48 = vadd.f32 %v10176_v19, %v3859_v38  ;;  %v5267_v49 = vmul.f32 %v5139_v47, %v4243_v40  ;;  %vm6796_vm13 = vcmp.lt.s32.totalorder %v17205_v14, 512  ;;  %v12235_v34 = vadd.f32 1.0, %v12217_v37 }
 0x475   :  { %v4115_v51 = vsub.f32 %v3987_v46, %v3276_v7  ;;  %v3452_v43 = vmul.u32 256, %v3384_v53  ;;  %v12239_v13 = vsel %vm6795_vm5, %v6667_v32, 0.0  ;;  %v12242_v47 = vadd.f32 1.0, %v12221_v59  ;;  %v17207_v7 = vld [vmem:[#allocation276_spill] sm:$0xff] }
 0x476   :  { %v4116_v21 = vsub.f32 %v3988_v48, %v3277_v56  ;;  %v5268_v57 = vmul.f32 %v5140_v20, %v4244_v26  ;;  %v6447_v38 = vmul.f32 1.442695, %v12217_v37  ;;  %v6025_v53 = vsel %vm12229_vm3, 1.0, %v17207_v7  ;;  %v254_v32 = vld [vmem:[%s16205_s2 + $0x120] sm:$0xff] }
 0x477   :  { %v7547_v33 = vadd.f32 -1.0, %v4115_v51  ;;  %v5011_v40 = vmul.f32 %v4115_v51, %v17199_v55  ;;  %v12247_v4 = vadd.s32 %v3452_v43, %v10027_v18  ;;  %v8122_v6 = vpop.eup %8121  ;;  %v12257_v56 = vadd.s32 %v3452_v43, %v10070_v44 }
 0x478   :  { %v7548_v46 = vadd.f32 -1.0, %v4116_v21  ;;  %v5012_v20 = vmul.f32 %v4116_v21, %v17201_v15  ;;  %v8124_v48 = vpop.eup %8123  ;;  %v6449_v11 = vmul.f32 1.442695, %v12221_v59  ;;  %vm5767_vm2 = vcmp.eq.s32.totalorder %v17200_v5, 0 }
 0x479   :  { %17206 = vst [vmem:[#allocation262_spill] sm:$0xff] %v12247_v4  ;;  %17208 = vst [vmem:[#allocation264_spill] sm:$0xff] %v12257_v56  ;;  %v4499_v7 = vadd.f32 %v7547_v33, %v17199_v55  ;;  %v12269_v3 = vadd.f32 %v5267_v49, %v5011_v40  ;;  %v3732_v2 = vcvt.s32.f32 %v12247_v4  ;;  %v8126_v22 = vpop.eup %8125  ;;  %v12273_v43 = vmul.f32 %v8124_v48, %v12145_v27  ;;  %v255_v49 = vld [vmem:[%s16205_s2 + $0x128] sm:$0xff] }
 0x47a   :  { %v4500_v29 = vadd.f32 %v7548_v46, %v17201_v15  ;;  %v12276_v31 = vadd.f32 %v5268_v57, %v5012_v20  ;;  %v3733_v39 = vcvt.s32.f32 %v12257_v56  ;;  %v6668_v45 = vsel %vm6156_vm15, %v6284_v41, %v8122_v6  ;;  %v17211_v15 = vld [vmem:[#allocation258_spill] sm:$0xff]  ;;  %v17216_v20 = vld [vmem:[#allocation96_spill] sm:$0xff]  ;;  %vm12333_vm12 = vmand %vm5767_vm2, %vm11411_vm1 }
 0x47b   :  { %v12285_v55 = vsub.f32 0.0, %v254_v32  ;;  %v12288_v27 = vmul.f32 %v8126_v22, %v12147_v42  ;;  %v4627_v33 = vmul.f32 %v4499_v7, %v4115_v51  ;;  %v6026_v57 = vsel %vm12263_vm0, 1.0, %v17211_v15  ;;  %v3030_v32 = vpop.permute.xlu0 %3029  ;;  %v17215_v46 = vld [vmem:[#allocation94_spill] sm:$0xff]  ;;  %v17220_v15 = vld [vmem:[#allocation60_spill] sm:$0xff] }
 0x47c   :  { %v12293_v40 = vmul.f32 %v6921_v23, %v6025_v53  ;;  %vm5768_vm14 = vcmp.eq.s32.totalorder %v17205_v14, 0  ;;  %8127 = vpow2.f32 %v6447_v38  ;;  %v4628_v6 = vmul.f32 %v4500_v29, %v4116_v21  ;;  %v17213_v21 = vld [vmem:[#allocation216_spill] sm:$0xff]  ;;  %v17214_v38 = vld [vmem:[#allocation217_spill] sm:$0xff] }
 0x47d   :  { %8129 = vpow2.f32 %v6449_v11  ;;  %vm4755_vm9 = vcmp.eq.f32.partialorder %v4627_v33, 0.0  ;;  %v3860_v16 = vadd.f32 1.0, %v3732_v2  ;;  %v3861_v41 = vadd.f32 1.0, %v3733_v39  ;;  %v17218_v39 = vld [vmem:[#allocation54_spill] sm:$0xff]  ;;  %vm12346_vm5 = vmand %vm5768_vm14, %vm11411_vm1 }
 0x47e   :  { %17212 = vst [vmem:[#allocation265_spill] sm:$0xff] %v12293_v40  ;;  %v12298_v42 = vsel %vm6796_vm13, %v6668_v45, 0.0  ;;  %vm6157_vm11 = vcmp.gt.f32.partialorder %v12217_v37, 0.0  ;;  %v12301_v22 = vsub.f32 0.0, %v255_v49  ;;  %vm4756_vm4 = vcmp.eq.f32.partialorder %v4628_v6, 0.0  ;;  %v17219_v49 = vld [vmem:[#allocation56_spill] sm:$0xff] }
 0x47f   :  { %v4883_v23 = vsel %vm4755_vm9, 1.0, %v4627_v33  ;;  %vm6158_vm6 = vcmp.gt.f32.partialorder %v12221_v59, 0.0  ;;  %v6451_v51 = vmul.f32 1.442695, %v12285_v55  ;;  %v4884_v29 = vsel %vm4756_vm4, 1.0, %v4628_v6 }
 0x480   :  { %8131 = vrcp.f32 %v4883_v23  ;;  %v5141_v2 = vsub.f32 1.0, %v17213_v21  ;;  %v5142_v53 = vsub.f32 1.0, %v17214_v38  ;;  %v3278_v45 = vadd.f32 %v3030_v32, %v17215_v46  ;;  %v17222_v46 = vld [vmem:[#allocation271_spill] sm:$0xff] }
 0x481   :  { %8133 = vrcp.f32 %v4884_v29  ;;  %v3279_v48 = vadd.f32 %v3030_v32, %v17216_v20  ;;  %v12310_v26 = vmul.f32 %v12206_v63, %v6026_v57  ;;  %v3989_v11 = vadd.f32 %v10176_v19, %v3860_v16  ;;  %v17221_v29 = vld [vmem:[#allocation275_spill] sm:$0xff] }
 0x482   :  { %v3990_v7 = vadd.f32 %v10176_v19, %v3861_v41  ;;  %v2817_v33 = vadd.f32 %v17219_v49, %v17218_v39  ;;  %vm6797_vm7 = vcmp.lt.s32.totalorder %v17220_v15, 512  ;;  %v4245_v6 = vsub.f32 %v10176_v19, %v3278_v45  ;;  %v256_v49 = vld [vmem:[%s16205_s2 + $0x130] sm:$0xff] }
 0x483   :  { %17217 = vst [vmem:[#allocation268_spill] sm:$0xff] %v12310_v26  ;;  %v4246_v23 = vsub.f32 %v10176_v19, %v3279_v48  ;;  %v2820_v40 = vadd.f32 %v17222_v46, %v17221_v29  ;;  %8135 = vpow2.f32 %v6451_v51  ;;  %v4117_v32 = vsub.f32 %v3989_v11, %v3278_v45 }
 0x484   :  { %v4118_v63 = vsub.f32 %v3990_v7, %v3279_v48  ;;  %v2904_v57 = vadd.f32 %v17104_v17, %v2817_v33  ;;  %v6453_v16 = vmul.f32 1.442695, %v12301_v22  ;;  %v5269_v41 = vmul.f32 %v5141_v2, %v4245_v6 }
 0x485   :  { %v5270_v20 = vmul.f32 %v5142_v53, %v4246_v23  ;;  %v2905_v39 = vadd.f32 %v17104_v17, %v2820_v40  ;;  %v7549_v26 = vadd.f32 -1.0, %v4117_v32  ;;  %v5013_v4 = vmul.f32 %v4117_v32, %v17213_v21  ;;  %v17225_v40 = vld [vmem:[#allocation274_spill] sm:$0xff] }
 0x486   :  { %v7550_v56 = vadd.f32 -1.0, %v4118_v63  ;;  %v5014_v51 = vmul.f32 %v4118_v63, %v17214_v38  ;;  %3194 = vperm.xlu1 %7666, %v2904_v57   ;;  %v8128_v45 = vpop.eup %8127  ;;  %vm5769_vm8 = vcmp.eq.s32.totalorder %v17220_v15, 0  ;;  %vm6798_vm10 = vcmp.lt.s32.totalorder %v17225_v40, 512 }
 0x487   :  { %vm6159_vm15 = vcmp.gt.f32.partialorder %v12285_v55, 0.0  ;;  %v6287_v53 = vadd.f32 1.0, %v12285_v55  ;;  %v3385_v48 = vadd.s32 192, %v9999_v52  ;;  %3199 = vperm.xlu0 %7665, %v2905_v39   ;;  %v8130_v11 = vpop.eup %8129  ;;  %v4501_v7 = vadd.f32 %v7549_v26, %v17213_v21 }
 0x488   :  { %v4502_v33 = vadd.f32 %v7550_v56, %v17214_v38  ;;  %v12352_v6 = vadd.f32 %v5269_v41, %v5013_v4  ;;  %v12354_v23 = vadd.f32 %v5270_v20, %v5014_v51  ;;  %vm5770_vm3 = vcmp.eq.s32.totalorder %v17225_v40, 0  ;;  %v257_v56 = vld [vmem:[%s16205_s2 + $0x138] sm:$0xff]  ;;  %v259_v40 = vld [vmem:[%s16205_s2 + $0x148] sm:$0xff] }
 0x489   :  { %v12358_v29 = vadd.f32 1.0, %v12301_v22  ;;  %8137 = vpow2.f32 %v6453_v16  ;;  %v12360_v46 = vsub.f32 0.0, %v256_v49  ;;  %v3453_v14 = vmul.u32 256, %v3385_v48 }
 0x48a   :  { %v8132_v57 = vpop.eup %8131  ;;  %v6027_v21 = vsel %vm12333_vm12, 1.0, %v11538_v9  ;;  %v6669_v4 = vsel %vm6157_vm11, %v12235_v34, %v8128_v45  ;;  %v4629_v38 = vmul.f32 %v4501_v7, %v4117_v32  ;;  %v4630_v26 = vmul.f32 %v4502_v33, %v4118_v63  ;;  %v3035_v34 = vpop.permute.xlu1 %3034  ;;  %v17230_v45 = vld [vmem:[#allocation98_spill] sm:$0xff]  ;;  %vm12441_vm12 = vmand %vm5770_vm3, %vm11411_vm1 }
 0x48b   :  { %v8134_v41 = vpop.eup %8133  ;;  %v6028_v16 = vsel %vm12346_vm5, 1.0, %v11552_v12  ;;  %v6670_v20 = vsel %vm6158_vm6, %v12242_v47, %v8130_v11  ;;  %vm6160_vm13 = vcmp.gt.f32.partialorder %v12301_v22, 0.0  ;;  %v12379_v9 = vmul.f32 %v8132_v57, %v12269_v3  ;;  %vm12420_vm6 = vmand %vm5769_vm8, %vm11411_vm1 }
 0x48c   :  { %v12382_v37 = vadd.s32 %v3453_v14, %v10027_v18  ;;  %v12385_v32 = vmul.f32 %v8134_v41, %v12276_v31  ;;  %vm4757_vm0 = vcmp.eq.f32.partialorder %v4629_v38, 0.0  ;;  %vm4758_vm2 = vcmp.eq.f32.partialorder %v4630_v26, 0.0 }
 0x48d   :  { %v12388_v12 = vadd.s32 %v3453_v14, %v10070_v44  ;;  %v12390_v63 = vsub.f32 0.0, %v257_v56  ;;  %v6455_v59 = vmul.f32 1.442695, %v12360_v46  ;;  %v4885_v47 = vsel %vm4757_vm0, 1.0, %v4629_v38  ;;  %v8136_v3 = vpop.eup %8135  ;;  %v17234_v56 = vld [vmem:[#allocation223_spill] sm:$0xff] }
 0x48e   :  { %v4886_v39 = vsel %vm4758_vm2, 1.0, %v4630_v26  ;;  %v12394_v49 = vmul.f32 %v12239_v13, %v6027_v21  ;;  %v12397_v51 = vmul.f32 %v12298_v42, %v6028_v16  ;;  %v6925_v31 = vsel %vm6797_vm7, %v6669_v4, 0.0  ;;  %v17231_v42 = vld [vmem:[#allocation222_spill] sm:$0xff]  ;;  %v258_v21 = vld [vmem:[%s16205_s2 + $0x140] sm:$0xff] }
 0x48f   :  { %v3280_v2 = vadd.f32 %v3035_v34, %v17230_v45  ;;  %v12404_v48 = vsel %vm6798_vm10, %v6670_v20, 0.0  ;;  %vm6799_vm14 = vcmp.lt.s32.totalorder %v11541_v28, 512  ;;  %8139 = vrcp.f32 %v4885_v47 }
 0x490   :  { %17228 = vst [vmem:[#allocation270_spill] sm:$0xff] %v12394_v49  ;;  %17229 = vst [vmem:[#allocation259_spill] sm:$0xff] %v12397_v51  ;;  %v3734_v11 = vcvt.s32.f32 %v12382_v37  ;;  %vm5771_vm9 = vcmp.eq.s32.totalorder %v11541_v28, 0  ;;  %vm6800_vm11 = vcmp.lt.s32.totalorder %v11555_v36, 512  ;;  %8141 = vrcp.f32 %v4886_v39 }
 0x491   :  { %v3735_v13 = vcvt.s32.f32 %v12388_v12  ;;  %v5143_v5 = vsub.f32 1.0, %v17231_v42  ;;  %vm5772_vm4 = vcmp.eq.s32.totalorder %v11555_v36, 0  ;;  %v6671_v7 = vsel %vm6159_vm15, %v6287_v53, %v8136_v3  ;;  %v17235_v53 = vld [vmem:[#allocation100_spill] sm:$0xff]  ;;  %vm12498_vm10 = vmand %vm5771_vm9, %vm11411_vm1 }
 0x492   :  { %8143 = vpow2.f32 %v6455_v59  ;;  %v6457_v33 = vmul.f32 1.442695, %v12390_v63  ;;  %v3862_v14 = vadd.f32 1.0, %v3734_v11  ;;  %v5144_v55 = vsub.f32 1.0, %v17234_v56  ;;  %vm12512_vm15 = vmand %vm5772_vm4, %vm11411_vm1 }
 0x493   :  { %v3863_v4 = vadd.f32 1.0, %v3735_v13  ;;  %v3281_v38 = vadd.f32 %v3035_v34, %v17235_v53  ;;  %v4247_v26 = vsub.f32 %v10176_v19, %v3280_v2  ;;  %v8138_v41 = vpop.eup %8137  ;;  %vm6161_vm7 = vcmp.gt.f32.partialorder %v12360_v46, 0.0 }
 0x494   :  { %v6289_v15 = vadd.f32 1.0, %v12360_v46  ;;  %v12433_v16 = vadd.f32 1.0, %v12390_v63  ;;  %v3991_v20 = vadd.f32 %v10176_v19, %v3862_v14  ;;  %v3386_v59 = vadd.s32 200, %v9999_v52 }
 0x495   :  { %v12447_v47 = vsel %vm6799_vm14, %v6671_v7, 0.0  ;;  %v3992_v39 = vadd.f32 %v10176_v19, %v3863_v4  ;;  %v4248_v3 = vsub.f32 %v10176_v19, %v3281_v38  ;;  %v5271_v45 = vmul.f32 %v5143_v5, %v4247_v26 }
 0x496   :  { %v6029_v11 = vsel %vm12420_vm6, 1.0, %v11721_v30  ;;  %v12457_v13 = vsub.f32 0.0, %v258_v21  ;;  %v4119_v14 = vsub.f32 %v3991_v20, %v3280_v2  ;;  %v3454_v53 = vmul.u32 256, %v3386_v59 }
 0x497   :  { %v6672_v7 = vsel %vm6160_vm13, %v12358_v29, %v8138_v41  ;;  %8145 = vpow2.f32 %v6457_v33  ;;  %v4120_v4 = vsub.f32 %v3992_v39, %v3281_v38  ;;  %v5272_v51 = vmul.f32 %v5144_v55, %v4248_v3 }
 0x498   :  { %v6030_v5 = vsel %vm12441_vm12, 1.0, %v11735_v62  ;;  %v7551_v30 = vadd.f32 -1.0, %v4119_v14  ;;  %v5015_v57 = vmul.f32 %v4119_v14, %v17231_v42  ;;  %v12467_v26 = vadd.s32 %v3454_v53, %v10027_v18 }
 0x499   :  { %vm6162_vm8 = vcmp.gt.f32.partialorder %v12390_v63, 0.0  ;;  %v12470_v2 = vsub.f32 0.0, %v259_v40  ;;  %v7552_v21 = vadd.f32 -1.0, %v4120_v4  ;;  %v5016_v22 = vmul.f32 %v4120_v4, %v17234_v56  ;;  %v8140_v33 = vpop.eup %8139 }
 0x49a   :  { %v12474_v29 = vadd.s32 %v3454_v53, %v10070_v44  ;;  %v6459_v55 = vmul.f32 1.442695, %v12457_v13  ;;  %v4503_v62 = vadd.f32 %v7551_v30, %v17231_v42  ;;  %v12478_v38 = vadd.f32 %v5271_v45, %v5015_v57  ;;  %v8142_v20 = vpop.eup %8141  ;;  %v260_v57 = vld [vmem:[%s16205_s2 + $0x150] sm:$0xff] }
 0x49b   :  { %v3736_v41 = vcvt.s32.f32 %v12467_v26  ;;  %v12482_v59 = vmul.f32 %v8140_v33, %v12352_v6  ;;  %v4504_v34 = vadd.f32 %v7552_v21, %v17234_v56  ;;  %v12485_v39 = vadd.f32 %v5272_v51, %v5016_v22  ;;  %v17249_v6 = vld [vmem:[#allocation291_spill] sm:$0xff] }
 0x49c   :  { %v3737_v3 = vcvt.s32.f32 %v12474_v29  ;;  %v8144_v40 = vpop.eup %8143  ;;  %v12488_v53 = vmul.f32 %v6925_v31, %v6029_v11  ;;  %v12492_v42 = vsel %vm6800_vm11, %v6672_v7, 0.0  ;;  %v12503_v51 = vmul.f32 %v8142_v20, %v12354_v23  ;;  %v261_v20 = vld [vmem:[%s16205_s2 + $0x158] sm:$0xff] }
 0x49d   :  { %v4631_v56 = vmul.f32 %v4503_v62, %v4119_v14  ;;  %v12506_v45 = vmul.f32 %v12404_v48, %v6030_v5  ;;  %v12517_v28 = vadd.f32 1.0, %v12457_v13  ;;  %v6461_v11 = vmul.f32 1.442695, %v12470_v2  ;;  %v3040_v14 = vpop.permute.xlu0 %3039 }
 0x49e   :  { %17238 = vst [vmem:[#allocation138_spill] sm:$0xff] %v12488_v53  ;;  %v4632_v7 = vmul.f32 %v4504_v34, %v4120_v4  ;;  %vm6801_vm5 = vcmp.lt.s32.totalorder %v11694_v50, 512  ;;  %vm6802_vm3 = vcmp.lt.s32.totalorder %v11709_v1, 512  ;;  %8147 = vpow2.f32 %v6459_v55  ;;  %v17246_v55 = vld [vmem:[#allocation102_spill] sm:$0xff] }
 0x49f   :  { %17241 = vst [vmem:[#allocation140_spill] sm:$0xff] %v12506_v45  ;;  %vm4759_vm13 = vcmp.eq.f32.partialorder %v4631_v56, 0.0  ;;  %v3864_v23 = vadd.f32 1.0, %v3736_v41  ;;  %v3865_v48 = vadd.f32 1.0, %v3737_v3  ;;  %v6031_v36 = vsel %vm12498_vm10, 1.0, %v11919_v60  ;;  %v17244_v60 = vld [vmem:[#allocation224_spill] sm:$0xff] }
 0x4a0   :  { %v6673_v5 = vsel %vm6161_vm7, %v6289_v15, %v8144_v40  ;;  %vm4760_vm0 = vcmp.eq.f32.partialorder %v4632_v7, 0.0  ;;  %v4887_v30 = vsel %vm4759_vm13, 1.0, %v4631_v56  ;;  %v6032_v4 = vsel %vm12512_vm15, 1.0, %v11925_v25  ;;  %v17245_v15 = vld [vmem:[#allocation225_spill] sm:$0xff]  ;;  %v17247_v41 = vld [vmem:[#allocation104_spill] sm:$0xff]  ;;  %v17248_v40 = vld [vmem:[#allocation6_spill] sm:$0xff] }
 0x4a1   :  { %vm5773_vm2 = vcmp.eq.s32.totalorder %v11694_v50, 0  ;;  %vm6163_vm14 = vcmp.gt.f32.partialorder %v12457_v13, 0.0  ;;  %v4888_v21 = vsel %vm4760_vm0, 1.0, %v4632_v7  ;;  %8149 = vrcp.f32 %v4887_v30  ;;  %v8146_v46 = vpop.eup %8145  ;;  %v17251_v30 = vld [vmem:[#allocation185_spill] sm:$0xff]  ;;  %v262_v50 = vld [vmem:[%s16205_s2 + $0x160] sm:$0xff] }
 0x4a2   :  { %v5145_v22 = vsub.f32 1.0, %v17244_v60  ;;  %8151 = vrcp.f32 %v4888_v21  ;;  %v5146_v33 = vsub.f32 1.0, %v17245_v15  ;;  %v3282_v62 = vadd.f32 %v3040_v14, %v17246_v55  ;;  %vm12589_vm7 = vmand %vm5773_vm2, %vm11411_vm1 }
 0x4a3   :  { %v3283_v25 = vadd.f32 %v3040_v14, %v17247_v41  ;;  %8153 = vpow2.f32 %v6461_v11  ;;  %v3993_v34 = vadd.f32 %v10176_v19, %v3864_v23  ;;  %v3994_v3 = vadd.f32 %v10176_v19, %v3865_v48  ;;  %v17250_v11 = vld [vmem:[#allocation184_spill] sm:$0xff] }
 0x4a4   :  { %v2825_v56 = vadd.f32 %v17249_v6, %v17248_v40  ;;  %vm5774_vm9 = vcmp.eq.s32.totalorder %v11709_v1, 0  ;;  %v12547_v31 = vsub.f32 0.0, %v260_v57  ;;  %v4249_v7 = vsub.f32 %v10176_v19, %v3282_v62 }
 0x4a5   :  { %v4250_v14 = vsub.f32 %v10176_v19, %v3283_v25  ;;  %v2828_v21 = vadd.f32 %v17251_v30, %v17250_v11  ;;  %v6674_v23 = vsel %vm6162_vm8, %v12433_v16, %v8146_v46  ;;  %v4121_v55 = vsub.f32 %v3993_v34, %v3282_v62 }
 0x4a6   :  { %v4122_v48 = vsub.f32 %v3994_v3, %v3283_v25  ;;  %v2906_v41 = vadd.f32 %v17104_v17, %v2825_v56  ;;  %vm6164_vm11 = vcmp.gt.f32.partialorder %v12470_v2, 0.0  ;;  %v12558_v40 = vsub.f32 0.0, %v261_v20 }
 0x4a7   :  { %v5273_v57 = vmul.f32 %v5145_v22, %v4249_v7  ;;  %v5274_v6 = vmul.f32 %v5146_v33, %v4250_v14  ;;  %v2907_v45 = vadd.f32 %v17104_v17, %v2828_v21  ;;  %v7553_v53 = vadd.f32 -1.0, %v4121_v55  ;;  %v3045_v14 = vpop.permute.xlu1 %3044 }
 0x4a8   :  { %v7554_v49 = vadd.f32 -1.0, %v4122_v48  ;;  %v5017_v11 = vmul.f32 %v4121_v55, %v17244_v60  ;;  %v5018_v30 = vmul.f32 %v4122_v48, %v17245_v15  ;;  %3204 = vperm.xlu1 %7666, %v2906_v41   ;;  %v12564_v63 = vmul.f32 %v12447_v47, %v6031_v36  ;;  %v8148_v22 = vpop.eup %8147 }
 0x4a9   :  { %v6292_v16 = vadd.f32 1.0, %v12470_v2  ;;  %v6463_v46 = vmul.f32 1.442695, %v12547_v31  ;;  %v3387_v62 = vadd.s32 208, %v9999_v52  ;;  %3209 = vperm.xlu0 %7665, %v2907_v45   ;;  %v4505_v33 = vadd.f32 %v7553_v53, %v17244_v60 }
 0x4aa   :  { %17252 = vst [vmem:[#allocation168_spill] sm:$0xff] %v12564_v63  ;;  %v4506_v25 = vadd.f32 %v7554_v49, %v17245_v15  ;;  %v12571_v20 = vadd.f32 %v5273_v57, %v5017_v11  ;;  %v12573_v34 = vadd.f32 %v5274_v6, %v5018_v30  ;;  %v12576_v3 = vmul.f32 %v12492_v42, %v6032_v4  ;;  %v263_v57 = vld [vmem:[%s16205_s2 + $0x168] sm:$0xff]  ;;  %v17258_v6 = vld [vmem:[#allocation106_spill] sm:$0xff] }
 0x4ab   :  { %v6929_v47 = vsel %vm6801_vm5, %v6673_v5, 0.0  ;;  %v6930_v36 = vsel %vm6802_vm3, %v6674_v23, 0.0  ;;  %v3455_v56 = vmul.u32 256, %v3387_v62  ;;  %v8150_v45 = vpop.eup %8149  ;;  %vm5775_vm4 = vcmp.eq.s32.totalorder %v11922_v54, 0  ;;  %vm12618_vm5 = vmand %vm5774_vm9, %vm11411_vm1 }
 0x4ac   :  { %17253 = vst [vmem:[#allocation18_spill] sm:$0xff] %v12576_v3  ;;  %vm6803_vm6 = vcmp.lt.s32.totalorder %v11922_v54, 512  ;;  %v6465_v49 = vmul.f32 1.442695, %v12558_v40  ;;  %v4633_v53 = vmul.f32 %v4505_v33, %v4121_v55  ;;  %v4634_v60 = vmul.f32 %v4506_v25, %v4122_v48  ;;  %v8152_v15 = vpop.eup %8151  ;;  %vm12668_vm0 = vmand %vm5775_vm4, %vm11411_vm1 }
 0x4ad   :  { %v6675_v5 = vsel %vm6163_vm14, %v12517_v28, %v8148_v22  ;;  %8155 = vpow2.f32 %v6463_v46  ;;  %v12597_v4 = vmul.f32 %v8150_v45, %v12478_v38  ;;  %v12600_v7 = vadd.s32 %v3455_v56, %v10027_v18  ;;  %v8154_v21 = vpop.eup %8153  ;;  %v17259_v22 = vld [vmem:[#allocation230_spill] sm:$0xff] }
 0x4ae   :  { %v12606_v23 = vmul.f32 %v8152_v15, %v12485_v39  ;;  %vm4761_vm12 = vcmp.eq.f32.partialorder %v4633_v53, 0.0  ;;  %vm4762_vm8 = vcmp.eq.f32.partialorder %v4634_v60, 0.0  ;;  %v12609_v13 = vadd.s32 %v3455_v56, %v10070_v44 }
 0x4af   :  { %vm5776_vm10 = vcmp.eq.s32.totalorder %v11928_v8, 0  ;;  %vm6804_vm15 = vcmp.lt.s32.totalorder %v11928_v8, 512  ;;  %v6293_v38 = vadd.f32 1.0, %v12547_v31  ;;  %v4889_v28 = vsel %vm4761_vm12, 1.0, %v4633_v53 }
 0x4b0   :  { %v4890_v55 = vsel %vm4762_vm8, 1.0, %v4634_v60  ;;  %v6033_v48 = vsel %vm12589_vm7, 1.0, %v12064_v10  ;;  %vm6165_vm3 = vcmp.gt.f32.partialorder %v12547_v31, 0.0  ;;  %v12627_v41 = vadd.f32 1.0, %v12558_v40  ;;  %v17261_v60 = vld [vmem:[#allocation231_spill] sm:$0xff]  ;;  %vm12689_vm9 = vmand %vm5776_vm10, %vm11411_vm1  ;;  %v17268_v31 = vld [vmem:[#allocation16_spill] sm:$0xff] }
 0x4b1   :  { %8157 = vpow2.f32 %v6465_v49  ;;  %v3284_v1 = vadd.f32 %v3045_v14, %v17258_v6  ;;  %v12635_v11 = vsel %vm6803_vm6, %v6675_v5, 0.0  ;;  %v12637_v30 = vsub.f32 0.0, %v262_v50 }
 0x4b2   :  { %8159 = vrcp.f32 %v4889_v28  ;;  %v3738_v10 = vcvt.s32.f32 %v12600_v7  ;;  %v6676_v46 = vsel %vm6164_vm11, %v6292_v16, %v8154_v21  ;;  %v3739_v62 = vcvt.s32.f32 %v12609_v13  ;;  %v17262_v16 = vld [vmem:[#allocation108_spill] sm:$0xff] }
 0x4b3   :  { %8161 = vrcp.f32 %v4890_v55  ;;  %v5147_v33 = vsub.f32 1.0, %v17259_v22  ;;  %v6034_v25 = vsel %vm12618_vm5, 1.0, %v12077_v61  ;;  %v12647_v56 = vmul.f32 %v6929_v47, %v6033_v48 }
 0x4b4   :  { %vm6166_vm13 = vcmp.gt.f32.partialorder %v12558_v40, 0.0  ;;  %v12650_v45 = vsub.f32 0.0, %v263_v57  ;;  %v3866_v49 = vadd.f32 1.0, %v3738_v10  ;;  %v3867_v53 = vadd.f32 1.0, %v3739_v62 }
 0x4b5   :  { %17260 = vst [vmem:[#allocation272_spill] sm:$0xff] %v12647_v56  ;;  %v5148_v2 = vsub.f32 1.0, %v17261_v60  ;;  %v3285_v15 = vadd.f32 %v3045_v14, %v17262_v16  ;;  %v4251_v42 = vsub.f32 %v10176_v19, %v3284_v1  ;;  %v6932_v5 = vsel %vm6804_vm15, %v6676_v46, 0.0  ;;  %v264_v16 = vld [vmem:[%s16205_s2 + $0x170] sm:$0xff] }
 0x4b6   :  { %v6467_v21 = vmul.f32 1.442695, %v12637_v30  ;;  %v3995_v61 = vadd.f32 %v10176_v19, %v3866_v49  ;;  %v3388_v47 = vadd.s32 216, %v9999_v52  ;;  %v12660_v50 = vmul.f32 %v6930_v36, %v6034_v25 }
 0x4b7   :  { %v3996_v28 = vadd.f32 %v10176_v19, %v3867_v53  ;;  %v4252_v55 = vsub.f32 %v10176_v19, %v3285_v15  ;;  %v5275_v39 = vmul.f32 %v5147_v33, %v4251_v42  ;;  %v8156_v48 = vpop.eup %8155  ;;  %vm6805_vm2 = vcmp.lt.s32.totalorder %v12040_v0, 512 }
 0x4b8   :  { %17263 = vst [vmem:[#allocation21_spill] sm:$0xff] %v12660_v50  ;;  %v12674_v57 = vadd.f32 1.0, %v12637_v30  ;;  %v4123_v36 = vsub.f32 %v3995_v61, %v3284_v1  ;;  %v3456_v6 = vmul.u32 256, %v3388_v47  ;;  %vm6806_vm14 = vcmp.lt.s32.totalorder %v12048_v58, 512  ;;  %v3050_v1 = vpop.permute.xlu0 %3049 }
 0x4b9   :  { %v12678_v10 = vadd.f32 1.0, %v12650_v45  ;;  %v6469_v46 = vmul.f32 1.442695, %v12650_v45  ;;  %v4124_v62 = vsub.f32 %v3996_v28, %v3285_v15  ;;  %v5276_v54 = vmul.f32 %v5148_v2, %v4252_v55 }
 0x4ba   :  { %8163 = vpow2.f32 %v6467_v21  ;;  %v7555_v33 = vadd.f32 -1.0, %v4123_v36  ;;  %v5019_v25 = vmul.f32 %v4123_v36, %v17259_v22  ;;  %v12683_v49 = vadd.s32 %v3456_v6, %v10027_v18 }
 0x4bb   :  { %v8158_v53 = vpop.eup %8157  ;;  %v6035_v2 = vsel %vm12668_vm0, 1.0, %v12168_v35  ;;  %v7556_v15 = vadd.f32 -1.0, %v4124_v62  ;;  %v5020_v42 = vmul.f32 %v4124_v62, %v17261_v60  ;;  %v12701_v21 = vadd.s32 %v3456_v6, %v10070_v44 }
 0x4bc   :  { %v8160_v61 = vpop.eup %8159  ;;  %v6677_v8 = vsel %vm6165_vm3, %v6293_v38, %v8156_v48  ;;  %v4507_v47 = vadd.f32 %v7555_v33, %v17259_v22  ;;  %v12706_v28 = vadd.f32 %v5275_v39, %v5019_v25  ;;  %v3740_v35 = vcvt.s32.f32 %v12683_v49  ;;  %v265_v22 = vld [vmem:[%s16205_s2 + $0x178] sm:$0xff] }
 0x4bd   :  { %v8162_v55 = vpop.eup %8161  ;;  %vm5777_vm11 = vcmp.eq.s32.totalorder %v12040_v0, 0  ;;  %v12711_v14 = vmul.f32 %v8160_v61, %v12571_v20  ;;  %v4508_v50 = vadd.f32 %v7556_v15, %v17261_v60  ;;  %v12714_v6 = vadd.f32 %v5276_v54, %v5020_v42  ;;  %v17273_v15 = vld [vmem:[#allocation110_spill] sm:$0xff]  ;;  %v17274_v42 = vld [vmem:[#allocation112_spill] sm:$0xff] }
 0x4be   :  { %v3741_v56 = vcvt.s32.f32 %v12701_v21  ;;  %v6036_v38 = vsel %vm12689_vm9, 1.0, %v17268_v31  ;;  %v12723_v39 = vsub.f32 0.0, %v264_v16  ;;  %v12726_v48 = vmul.f32 %v8162_v55, %v12573_v34  ;;  %v17275_v31 = vld [vmem:[#allocation249_spill] sm:$0xff]  ;;  %vm12775_vm15 = vmand %vm5777_vm11, %vm11411_vm1 }
 0x4bf   :  { %v4635_v20 = vmul.f32 %v4507_v47, %v4123_v36  ;;  %v12729_v60 = vmul.f32 %v12635_v11, %v6035_v2  ;;  %vm5778_vm4 = vcmp.eq.s32.totalorder %v12048_v58, 0  ;;  %v6678_v54 = vsel %vm6166_vm13, %v12627_v41, %v8158_v53  ;;  %v17272_v53 = vld [vmem:[#allocation233_spill] sm:$0xff]  ;;  %v266_v47 = vld [vmem:[%s16205_s2 + $0x180] sm:$0xff] }
 0x4c0   :  { %8165 = vpow2.f32 %v6469_v46  ;;  %v4636_v33 = vmul.f32 %v4508_v50, %v4124_v62  ;;  %v12737_v25 = vsel %vm6805_vm2, %v6677_v8, 0.0  ;;  %vm6167_vm6 = vcmp.gt.f32.partialorder %v12637_v30, 0.0  ;;  %v17271_v46 = vld [vmem:[#allocation232_spill] sm:$0xff]  ;;  %vm12792_vm0 = vmand %vm5778_vm4, %vm11411_vm1 }
 0x4c1   :  { %17269 = vst [vmem:[#allocation273_spill] sm:$0xff] %v12729_v60  ;;  %vm4763_vm7 = vcmp.eq.f32.partialorder %v4635_v20, 0.0  ;;  %v3868_v34 = vadd.f32 1.0, %v3740_v35  ;;  %v3869_v36 = vadd.f32 1.0, %v3741_v56  ;;  %v12740_v11 = vmul.f32 %v6932_v5, %v6036_v38  ;;  %v17276_v38 = vld [vmem:[#allocation192_spill] sm:$0xff] }
 0x4c2   :  { %vm6168_vm12 = vcmp.gt.f32.partialorder %v12650_v45, 0.0  ;;  %v12743_v2 = vsub.f32 0.0, %v265_v22  ;;  %vm4764_vm8 = vcmp.eq.f32.partialorder %v4636_v33, 0.0  ;;  %v4891_v40 = vsel %vm4763_vm7, 1.0, %v4635_v20  ;;  %v3055_v45 = vpop.permute.xlu1 %3054 }
 0x4c3   :  { %17270 = vst [vmem:[#allocation280_spill] sm:$0xff] %v12740_v11  ;;  %v6471_v41 = vmul.f32 1.442695, %v12723_v39  ;;  %v4892_v50 = vsel %vm4764_vm8, 1.0, %v4636_v33  ;;  %8167 = vrcp.f32 %v4891_v40  ;;  %v5149_v62 = vsub.f32 1.0, %v17271_v46  ;;  %v17277_v40 = vld [vmem:[#allocation250_spill] sm:$0xff] }
 0x4c4   :  { %8169 = vrcp.f32 %v4892_v50  ;;  %v5150_v16 = vsub.f32 1.0, %v17272_v53  ;;  %v3286_v56 = vadd.f32 %v3050_v1, %v17273_v15  ;;  %v3287_v5 = vadd.f32 %v3050_v1, %v17274_v42  ;;  %v8164_v61 = vpop.eup %8163 }
 0x4c5   :  { %v12752_v8 = vsel %vm6806_vm14, %v6678_v54, 0.0  ;;  %v3997_v35 = vadd.f32 %v10176_v19, %v3868_v34  ;;  %v3998_v55 = vadd.f32 %v10176_v19, %v3869_v36  ;;  %v2833_v22 = vadd.f32 %v17276_v38, %v17275_v31  ;;  %v17278_v54 = vld [vmem:[#allocation193_spill] sm:$0xff]  ;;  %v17279_v34 = vld [vmem:[#allocation14_spill] sm:$0xff] }
 0x4c6   :  { %v6473_v20 = vmul.f32 1.442695, %v12743_v2  ;;  %v4253_v33 = vsub.f32 %v10176_v19, %v3286_v56  ;;  %v4254_v1 = vsub.f32 %v10176_v19, %v3287_v5  ;;  %v2836_v50 = vadd.f32 %v17278_v54, %v17277_v40 }
 0x4c7   :  { %8171 = vpow2.f32 %v6471_v41  ;;  %v4125_v15 = vsub.f32 %v3997_v35, %v3286_v56  ;;  %v4126_v42 = vsub.f32 %v3998_v55, %v3287_v5  ;;  %v2908_v11 = vadd.f32 %v17104_v17, %v2833_v22 }
 0x4c8   :  { %vm5779_vm10 = vcmp.eq.s32.totalorder %v17279_v34, 0  ;;  %v12768_v36 = vsub.f32 0.0, %v266_v47  ;;  %v5277_v60 = vmul.f32 %v5149_v62, %v4253_v33  ;;  %v5278_v31 = vmul.f32 %v5150_v16, %v4254_v1  ;;  %v17282_v62 = vld [vmem:[#allocation269_spill] sm:$0xff] }
 0x4c9   :  { %v2909_v38 = vadd.f32 %v17104_v17, %v2836_v50  ;;  %v7557_v41 = vadd.f32 -1.0, %v4125_v15  ;;  %v7558_v56 = vadd.f32 -1.0, %v4126_v42  ;;  %v5021_v5 = vmul.f32 %v4125_v15, %v17271_v46  ;;  %3214 = vperm.xlu1 %7666, %v2908_v11   ;;  %v267_v11 = vld [vmem:[%s16205_s2 + $0x188] sm:$0xff]  ;;  %vm12855_vm7 = vmand %vm5779_vm10, %vm11411_vm1 }
 0x4ca   :  { %v5022_v35 = vmul.f32 %v4126_v42, %v17272_v53  ;;  %v8166_v47 = vpop.eup %8165  ;;  %vm5780_vm5 = vcmp.eq.s32.totalorder %v17282_v62, 0  ;;  %vm6807_vm3 = vcmp.lt.s32.totalorder %v17279_v34, 512  ;;  %vm6808_vm13 = vcmp.lt.s32.totalorder %v17282_v62, 512 }
 0x4cb   :  { %v12785_v0 = vadd.f32 1.0, %v12723_v39  ;;  %v3389_v16 = vadd.s32 224, %v9999_v52  ;;  %3219 = vperm.xlu0 %7665, %v2909_v38   ;;  %vm6169_vm2 = vcmp.gt.f32.partialorder %v12723_v39, 0.0  ;;  %v4509_v22 = vadd.f32 %v7557_v41, %v17271_v46  ;;  %vm12872_vm10 = vmand %vm5780_vm5, %vm11411_vm1 }
 0x4cc   :  { %v4510_v33 = vadd.f32 %v7558_v56, %v17272_v53  ;;  %v12802_v1 = vadd.f32 %v5277_v60, %v5021_v5  ;;  %v12804_v40 = vadd.f32 %v5278_v31, %v5022_v35  ;;  %v6037_v58 = vsel %vm12775_vm15, 1.0, %v12273_v43  ;;  %v17286_v5 = vld [vmem:[#allocation114_spill] sm:$0xff] }
 0x4cd   :  { %v6679_v54 = vsel %vm6167_vm6, %v12674_v57, %v8164_v61  ;;  %8173 = vpow2.f32 %v6473_v20  ;;  %v3457_v50 = vmul.u32 256, %v3389_v16  ;;  %v8168_v38 = vpop.eup %8167  ;;  %v6680_v46 = vsel %vm6168_vm12, %v12678_v10, %v8166_v47  ;;  %v17288_v16 = vld [vmem:[#allocation262_spill] sm:$0xff] }
 0x4ce   :  { %v6475_v60 = vmul.f32 1.442695, %v12768_v36  ;;  %v4637_v53 = vmul.f32 %v4509_v22, %v4125_v15  ;;  %v4638_v31 = vmul.f32 %v4510_v33, %v4126_v42  ;;  %v8170_v41 = vpop.eup %8169  ;;  %v6038_v43 = vsel %vm12792_vm0, 1.0, %v12288_v27  ;;  %v17292_v33 = vld [vmem:[#allocation238_spill] sm:$0xff] }
 0x4cf   :  { %vm6170_vm14 = vcmp.gt.f32.partialorder %v12743_v2, 0.0  ;;  %v12820_v3 = vsub.f32 0.0, %v267_v11  ;;  %v12823_v30 = vmul.f32 %v8168_v38, %v12706_v28  ;;  %v12826_v57 = vadd.s32 %v3457_v50, %v10027_v18  ;;  %v17291_v11 = vld [vmem:[#allocation264_spill] sm:$0xff] }
 0x4d0   :  { %v12829_v10 = vmul.f32 %v8170_v41, %v12714_v6  ;;  %vm4765_vm9 = vcmp.eq.f32.partialorder %v4637_v53, 0.0  ;;  %vm4766_vm11 = vcmp.eq.f32.partialorder %v4638_v31, 0.0  ;;  %v12832_v61 = vadd.s32 %v3457_v50, %v10070_v44  ;;  %v17296_v41 = vld [vmem:[#allocation116_spill] sm:$0xff] }
 0x4d1   :  { %v6935_v27 = vsel %vm6807_vm3, %v6679_v54, 0.0  ;;  %v6298_v20 = vadd.f32 1.0, %v12743_v2  ;;  %v4893_v15 = vsel %vm4765_vm9, 1.0, %v4637_v53  ;;  %v4894_v28 = vsel %vm4766_vm11, 1.0, %v4638_v31  ;;  %v8172_v42 = vpop.eup %8171  ;;  %v17295_v53 = vld [vmem:[#allocation240_spill] sm:$0xff] }
 0x4d2   :  { %v12838_v56 = vmul.f32 %v12737_v25, %v6037_v58  ;;  %v12842_v6 = vsel %vm6808_vm13, %v6680_v46, 0.0  ;;  %8175 = vpow2.f32 %v6475_v60  ;;  %v3288_v35 = vadd.f32 %v3055_v45, %v17286_v5  ;;  %v268_v46 = vld [vmem:[%s16205_s2 + $0x190] sm:$0xff] }
 0x4d3   :  { %v12846_v47 = vmul.f32 %v12752_v8, %v6038_v43  ;;  %vm5781_vm4 = vcmp.eq.s32.totalorder %v17288_v16, 0  ;;  %vm6809_vm6 = vcmp.lt.s32.totalorder %v17288_v16, 512  ;;  %8177 = vrcp.f32 %v4893_v15 }
 0x4d4   :  { %17285 = vst [vmem:[#allocation282_spill] sm:$0xff] %v12838_v56  ;;  %v3742_v55 = vcvt.s32.f32 %v12826_v57  ;;  %vm6810_vm12 = vcmp.lt.s32.totalorder %v17291_v11, 512  ;;  %v6477_v8 = vmul.f32 1.442695, %v12820_v3  ;;  %8179 = vrcp.f32 %v4894_v28  ;;  %vm12929_vm3 = vmand %vm5781_vm4, %vm11411_vm1 }
 0x4d5   :  { %17287 = vst [vmem:[#allocation283_spill] sm:$0xff] %v12846_v47  ;;  %v3743_v22 = vcvt.s32.f32 %v12832_v61  ;;  %v5151_v58 = vsub.f32 1.0, %v17292_v33  ;;  %vm6171_vm8 = vcmp.gt.f32.partialorder %v12768_v36, 0.0  ;;  %v6299_v54 = vadd.f32 1.0, %v12768_v36 }
 0x4d6   :  { %v12866_v50 = vadd.f32 1.0, %v12820_v3  ;;  %v3870_v34 = vadd.f32 1.0, %v3742_v55  ;;  %v5152_v31 = vsub.f32 1.0, %v17295_v53  ;;  %v3289_v43 = vadd.f32 %v3055_v45, %v17296_v41 }
 0x4d7   :  { %v3871_v60 = vadd.f32 1.0, %v3743_v22  ;;  %v4255_v15 = vsub.f32 %v10176_v19, %v3288_v35  ;;  %v8174_v28 = vpop.eup %8173  ;;  %v6039_v62 = vsel %vm12855_vm7, 1.0, %v12379_v9  ;;  %v6681_v5 = vsel %vm6169_vm2, %v12785_v0, %v8172_v42  ;;  %v269_v9 = vld [vmem:[%s16205_s2 + $0x198] sm:$0xff] }
 0x4d8   :  { %v3999_v55 = vadd.f32 %v10176_v19, %v3870_v34  ;;  %v3390_v47 = vadd.s32 232, %v9999_v52  ;;  %8181 = vpow2.f32 %v6477_v8  ;;  %v4256_v45 = vsub.f32 %v10176_v19, %v3289_v43 }
 0x4d9   :  { %v4000_v22 = vadd.f32 %v10176_v19, %v3871_v60  ;;  %v5279_v41 = vmul.f32 %v5151_v58, %v4255_v15  ;;  %v6040_v56 = vsel %vm12872_vm10, 1.0, %v12385_v32  ;;  %v12898_v39 = vsub.f32 0.0, %v268_v46 }
 0x4da   :  { %v4127_v0 = vsub.f32 %v3999_v55, %v3288_v35  ;;  %v3458_v42 = vmul.u32 256, %v3390_v47  ;;  %v12900_v25 = vmul.f32 %v6935_v27, %v6039_v62  ;;  %v6682_v8 = vsel %vm6170_vm14, %v6298_v20, %v8174_v28 }
 0x4db   :  { %vm6172_vm15 = vcmp.gt.f32.partialorder %v12820_v3, 0.0  ;;  %v4128_v58 = vsub.f32 %v4000_v22, %v3289_v43  ;;  %v5280_v34 = vmul.f32 %v5152_v31, %v4256_v45  ;;  %v12907_v32 = vsel %vm6809_vm6, %v6681_v5, 0.0 }
 0x4dc   :  { %17297 = vst [vmem:[#allocation284_spill] sm:$0xff] %v12900_v25  ;;  %v7559_v38 = vadd.f32 -1.0, %v4127_v0  ;;  %v5023_v60 = vmul.f32 %v4127_v0, %v17292_v33  ;;  %v12911_v46 = vadd.s32 %v3458_v42, %v10027_v18  ;;  %v8176_v35 = vpop.eup %8175  ;;  %vm5782_vm5 = vcmp.eq.s32.totalorder %v17291_v11, 0 }
 0x4dd   :  { %v12914_v27 = vsub.f32 0.0, %v269_v9  ;;  %v7560_v2 = vadd.f32 -1.0, %v4128_v58  ;;  %v5024_v20 = vmul.f32 %v4128_v58, %v17295_v53  ;;  %v12918_v47 = vadd.s32 %v3458_v42, %v10070_v44  ;;  %v8178_v31 = vpop.eup %8177  ;;  %vm12991_vm6 = vmand %vm5782_vm5, %vm11411_vm1 }
 0x4de   :  { %v6479_v43 = vmul.f32 1.442695, %v12898_v39  ;;  %v4511_v15 = vadd.f32 %v7559_v38, %v17292_v33  ;;  %v12922_v28 = vadd.f32 %v5279_v41, %v5023_v60  ;;  %v3744_v62 = vcvt.s32.f32 %v12911_v46  ;;  %v8180_v5 = vpop.eup %8179 }
 0x4df   :  { %v12934_v22 = vmul.f32 %v8178_v31, %v12802_v1  ;;  %v4512_v45 = vadd.f32 %v7560_v2, %v17295_v53  ;;  %v12937_v9 = vadd.f32 %v5280_v34, %v5024_v20  ;;  %v3745_v33 = vcvt.s32.f32 %v12918_v47  ;;  %v17301_v2 = vld [vmem:[#allocation241_spill] sm:$0xff]  ;;  %v17302_v31 = vld [vmem:[#allocation242_spill] sm:$0xff] }
 0x4e0   :  { %v12941_v41 = vmul.f32 %v12842_v6, %v6040_v56  ;;  %v12945_v42 = vsel %vm6810_vm12, %v6682_v8, 0.0  ;;  %v12948_v16 = vmul.f32 %v8180_v5, %v12804_v40  ;;  %v4639_v38 = vmul.f32 %v4511_v15, %v4127_v0  ;;  %v270_v56 = vld [vmem:[%s16205_s2 + $0x1a0] sm:$0xff]  ;;  %v271_v20 = vld [vmem:[%s16205_s2 + $0x1a8] sm:$0xff]  ;;  %v17303_v15 = vld [vmem:[#allocation118_spill] sm:$0xff] }
 0x4e1   :  { %v6683_v1 = vsel %vm6171_vm8, %v6299_v54, %v8176_v35  ;;  %vm6811_vm13 = vcmp.lt.s32.totalorder %v12382_v37, 512  ;;  %v12954_v53 = vadd.f32 1.0, %v12898_v39  ;;  %v4640_v6 = vmul.f32 %v4512_v45, %v4128_v58  ;;  %v3060_v54 = vpop.permute.xlu0 %3059  ;;  %v17304_v5 = vld [vmem:[#allocation120_spill] sm:$0xff] }
 0x4e2   :  { %17300 = vst [vmem:[#allocation200_spill] sm:$0xff] %v12941_v41  ;;  %v6041_v8 = vsel %vm12929_vm3, 1.0, %v12482_v59  ;;  %vm6812_vm0 = vcmp.lt.s32.totalorder %v12388_v12, 512  ;;  %vm4767_vm2 = vcmp.eq.f32.partialorder %v4639_v38, 0.0  ;;  %v3872_v40 = vadd.f32 1.0, %v3744_v62  ;;  %v8182_v0 = vpop.eup %8181  ;;  %v17307_v41 = vld [vmem:[#allocation198_spill] sm:$0xff] }
 0x4e3   :  { %v3873_v36 = vadd.f32 1.0, %v3745_v33  ;;  %8183 = vpow2.f32 %v6479_v43  ;;  %v6481_v34 = vmul.f32 1.442695, %v12914_v27  ;;  %vm4768_vm14 = vcmp.eq.f32.partialorder %v4640_v6, 0.0 }
 0x4e4   :  { %v4895_v60 = vsel %vm4767_vm2, 1.0, %v4639_v38  ;;  %vm5783_vm9 = vcmp.eq.s32.totalorder %v12382_v37, 0  ;;  %v12965_v35 = vsub.f32 0.0, %v270_v56  ;;  %v4896_v58 = vsel %vm4768_vm14, 1.0, %v4640_v6  ;;  %v17305_v56 = vld [vmem:[#allocation131_spill] sm:$0xff]  ;;  %v17306_v6 = vld [vmem:[#allocation261_spill] sm:$0xff] }
 0x4e5   :  { %8185 = vrcp.f32 %v4895_v60  ;;  %v5153_v59 = vsub.f32 1.0, %v17301_v2  ;;  %vm5784_vm11 = vcmp.eq.s32.totalorder %v12388_v12, 0  ;;  %v5154_v43 = vsub.f32 1.0, %v17302_v31  ;;  %vm13029_vm12 = vmand %vm5783_vm9, %vm11411_vm1  ;;  %v272_v12 = vld [vmem:[%s16205_s2 + $0x1b0] sm:$0xff] }
 0x4e6   :  { %8187 = vrcp.f32 %v4896_v58  ;;  %v3290_v62 = vadd.f32 %v3060_v54, %v17303_v15  ;;  %v3291_v55 = vadd.f32 %v3060_v54, %v17304_v5  ;;  %v6684_v45 = vsel %vm6172_vm15, %v12866_v50, %v8182_v0  ;;  %v17308_v54 = vld [vmem:[#allocation133_spill] sm:$0xff]  ;;  %vm13045_vm10 = vmand %vm5784_vm11, %vm11411_vm1 }
 0x4e7   :  { %v4001_v33 = vadd.f32 %v10176_v19, %v3872_v40  ;;  %v4002_v38 = vadd.f32 %v10176_v19, %v3873_v36  ;;  %v2841_v60 = vadd.f32 %v17306_v6, %v17305_v56  ;;  %vm6173_vm4 = vcmp.gt.f32.partialorder %v12898_v39, 0.0 }
 0x4e8   :  { %8189 = vpow2.f32 %v6481_v34  ;;  %v4257_v58 = vsub.f32 %v10176_v19, %v3290_v62  ;;  %v4258_v15 = vsub.f32 %v10176_v19, %v3291_v55  ;;  %v2844_v5 = vadd.f32 %v17308_v54, %v17307_v41 }
 0x4e9   :  { %v12995_v50 = vsub.f32 0.0, %v271_v20  ;;  %v4129_v40 = vsub.f32 %v4001_v33, %v3290_v62  ;;  %v4130_v36 = vsub.f32 %v4002_v38, %v3291_v55  ;;  %v2910_v0 = vadd.f32 %v17104_v17, %v2841_v60  ;;  %v3065_v60 = vpop.permute.xlu1 %3064 }
 0x4ea   :  { %v6483_v34 = vmul.f32 1.442695, %v12965_v35  ;;  %v5281_v56 = vmul.f32 %v5153_v59, %v4257_v58  ;;  %v5282_v6 = vmul.f32 %v5154_v43, %v4258_v15  ;;  %v2911_v41 = vadd.f32 %v17104_v17, %v2844_v5 }
 0x4eb   :  { %vm6174_vm7 = vcmp.gt.f32.partialorder %v12914_v27, 0.0  ;;  %v7561_v54 = vadd.f32 -1.0, %v4129_v40  ;;  %v7562_v11 = vadd.f32 -1.0, %v4130_v36  ;;  %v5025_v25 = vmul.f32 %v4129_v40, %v17301_v2  ;;  %3224 = vperm.xlu1 %7666, %v2910_v0  }
 0x4ec   :  { %v5026_v63 = vmul.f32 %v4130_v36, %v17302_v31  ;;  %v6042_v20 = vsel %vm12991_vm6, 1.0, %v12503_v51  ;;  %v6939_v62 = vsel %vm6811_vm13, %v6683_v1, 0.0  ;;  %v6302_v59 = vadd.f32 1.0, %v12914_v27  ;;  %3229 = vperm.xlu0 %7665, %v2911_v41  }
 0x4ed   :  { %v3391_v17 = vadd.s32 240, %v9999_v52  ;;  %v4513_v43 = vadd.f32 %v7561_v54, %v17301_v2  ;;  %v4514_v55 = vadd.f32 %v7562_v11, %v17302_v31  ;;  %v13012_v33 = vadd.f32 %v5281_v56, %v5025_v25  ;;  %v8184_v58 = vpop.eup %8183 }
 0x4ee   :  { %v13014_v38 = vadd.f32 %v5282_v6, %v5026_v63  ;;  %v13017_v51 = vmul.f32 %v12907_v32, %v6041_v8  ;;  %v6940_v1 = vsel %vm6812_vm0, %v6684_v45, 0.0  ;;  %8191 = vpow2.f32 %v6483_v34  ;;  %v17316_v45 = vld [vmem:[#allocation123_spill] sm:$0xff] }
 0x4ef   :  { %v3459_v15 = vmul.u32 256, %v3391_v17  ;;  %v8186_v5 = vpop.eup %8185  ;;  %v13022_v3 = vmul.f32 %v12945_v42, %v6042_v20  ;;  %v6485_v2 = vmul.f32 1.442695, %v12995_v50  ;;  %v4641_v25 = vmul.f32 %v4513_v43, %v4129_v40  ;;  %v17320_v17 = vld [vmem:[#allocation248_spill] sm:$0xff] }
 0x4f0   :  { %17311 = vst [vmem:[#allocation201_spill] sm:$0xff] %v13017_v51  ;;  %v4642_v31 = vmul.f32 %v4514_v55, %v4130_v36  ;;  %v8188_v63 = vpop.eup %8187  ;;  %vm6813_vm8 = vcmp.lt.s32.totalorder %v12467_v26, 512  ;;  %v13035_v8 = vmul.f32 %v8186_v5, %v12922_v28  ;;  %v3292_v40 = vadd.f32 %v3065_v60, %v17316_v45 }
 0x4f1   :  { %17312 = vst [vmem:[#allocation78_spill] sm:$0xff] %v13022_v3  ;;  %v13038_v42 = vadd.s32 %v3459_v15, %v10027_v18  ;;  %v13050_v36 = vmul.f32 %v8188_v63, %v12937_v9  ;;  %vm4769_vm15 = vcmp.eq.f32.partialorder %v4641_v25, 0.0  ;;  %v13053_v28 = vadd.s32 %v3459_v15, %v10070_v44 }
 0x4f2   :  { %vm4770_vm5 = vcmp.eq.f32.partialorder %v4642_v31, 0.0  ;;  %v8190_v0 = vpop.eup %8189  ;;  %vm5785_vm3 = vcmp.eq.s32.totalorder %v12467_v26, 0  ;;  %vm6814_vm13 = vcmp.lt.s32.totalorder %v12474_v29, 512  ;;  %vm6175_vm0 = vcmp.gt.f32.partialorder %v12965_v35, 0.0 }
 0x4f3   :  { %17315 = vst [vmem:[#allocation80_spill] sm:$0xff] %v13038_v42  ;;  %17319 = vst [vmem:[#allocation10_spill] sm:$0xff] %v13053_v28  ;;  %v4897_v34 = vsel %vm4769_vm15, 1.0, %v4641_v25  ;;  %v4898_v56 = vsel %vm4770_vm5, 1.0, %v4642_v31  ;;  %v6043_v9 = vsel %vm13029_vm12, 1.0, %v12597_v4  ;;  %v6685_v6 = vsel %vm6173_vm4, %v12954_v53, %v8184_v58  ;;  %v273_v4 = vld [vmem:[%s16205_s2 + $0x1b8] sm:$0xff] }
 0x4f4   :  { %v6303_v41 = vadd.f32 1.0, %v12965_v35  ;;  %8193 = vpow2.f32 %v6485_v2  ;;  %v6044_v54 = vsel %vm13045_vm10, 1.0, %v12606_v23  ;;  %vm5786_vm2 = vcmp.eq.s32.totalorder %v12474_v29, 0  ;;  %v17322_v2 = vld [vmem:[#allocation251_spill] sm:$0xff]  ;;  %v17323_v31 = vld [vmem:[#allocation125_spill] sm:$0xff]  ;;  %vm13126_vm6 = vmand %vm5785_vm3, %vm11411_vm1 }
 0x4f5   :  { %v13073_v11 = vadd.f32 1.0, %v12995_v50  ;;  %8195 = vrcp.f32 %v4897_v34  ;;  %v3746_v20 = vcvt.s32.f32 %v13038_v42  ;;  %v13079_v39 = vsub.f32 0.0, %v272_v12  ;;  %vm13145_vm12 = vmand %vm5786_vm2, %vm11411_vm1 }
 0x4f6   :  { %8197 = vrcp.f32 %v4898_v56  ;;  %v3747_v53 = vcvt.s32.f32 %v13053_v28  ;;  %v5155_v43 = vsub.f32 1.0, %v17320_v17  ;;  %v13083_v23 = vmul.f32 %v6939_v62, %v6043_v9 }
 0x4f7   :  { %v6686_v55 = vsel %vm6174_vm7, %v6302_v59, %v8190_v0  ;;  %v13089_v58 = vsel %vm6813_vm8, %v6685_v6, 0.0  ;;  %vm6176_vm14 = vcmp.gt.f32.partialorder %v12995_v50, 0.0  ;;  %v3874_v15 = vadd.f32 1.0, %v3746_v20  ;;  %v274_v20 = vld [vmem:[%s16205_s2 + $0x1c0] sm:$0xff] }
 0x4f8   :  { %17321 = vst [vmem:[#allocation174_spill] sm:$0xff] %v13083_v23  ;;  %v3875_v5 = vadd.f32 1.0, %v3747_v53  ;;  %v5156_v25 = vsub.f32 1.0, %v17322_v2  ;;  %v3293_v63 = vadd.f32 %v3065_v60, %v17323_v31  ;;  %v4259_v32 = vsub.f32 %v10176_v19, %v3292_v40  ;;  %v8192_v45 = vpop.eup %8191 }
 0x4f9   :  { %v13095_v62 = vmul.f32 %v6940_v1, %v6044_v54  ;;  %v13097_v37 = vsub.f32 0.0, %v273_v4  ;;  %v4003_v27 = vadd.f32 %v10176_v19, %v3874_v15  ;;  %v3392_v59 = vadd.s32 248, %v9999_v52  ;;  %v3070_v15 = vpop.permute.xlu0 %3069 }
 0x4fa   :  { %v6487_v0 = vmul.f32 1.442695, %v13079_v39  ;;  %v4004_v12 = vadd.f32 %v10176_v19, %v3875_v5  ;;  %v4260_v34 = vsub.f32 %v10176_v19, %v3293_v63  ;;  %v5283_v56 = vmul.f32 %v5155_v43, %v4259_v32 }
 0x4fb   :  { %17324 = vst [vmem:[#allocation148_spill] sm:$0xff] %v13095_v62  ;;  %v6942_v60 = vsel %vm6814_vm13, %v6686_v55, 0.0  ;;  %vm6815_vm9 = vcmp.lt.s32.totalorder %v12600_v7, 512  ;;  %v4131_v1 = vsub.f32 %v4003_v27, %v3292_v40  ;;  %v3460_v9 = vmul.u32 256, %v3392_v59 }
 0x4fc   :  { %v6687_v6 = vsel %vm6175_vm0, %v6303_v41, %v8192_v45  ;;  %vm6816_vm11 = vcmp.lt.s32.totalorder %v12609_v13, 512  ;;  %v13111_v54 = vadd.f32 1.0, %v13079_v39  ;;  %v4132_v4 = vsub.f32 %v4004_v12, %v3293_v63 }
 0x4fd   :  { %v5284_v53 = vmul.f32 %v5156_v25, %v4260_v34  ;;  %vm5787_vm4 = vcmp.eq.s32.totalorder %v12600_v7, 0  ;;  %v6489_v43 = vmul.f32 1.442695, %v13097_v37  ;;  %v7563_v40 = vadd.f32 -1.0, %v4131_v1 }
 0x4fe   :  { %v5027_v55 = vmul.f32 %v4131_v1, %v17320_v17  ;;  %v13120_v35 = vadd.s32 %v3460_v9, %v10027_v18  ;;  %v8194_v41 = vpop.eup %8193  ;;  %vm5788_vm7 = vcmp.eq.s32.totalorder %v12609_v13, 0  ;;  %8199 = vpow2.f32 %v6487_v0  ;;  %vm13198_vm3 = vmand %vm5787_vm4, %vm11411_vm1 }
 0x4ff   :  { %v7564_v5 = vadd.f32 -1.0, %v4132_v4  ;;  %v5028_v25 = vmul.f32 %v4132_v4, %v17322_v2  ;;  %v13133_v31 = vadd.s32 %v3460_v9, %v10070_v44  ;;  %v8196_v63 = vpop.eup %8195  ;;  %v13135_v32 = vsub.f32 0.0, %v274_v20  ;;  %vm13209_vm0 = vmand %vm5788_vm7, %vm11411_vm1 }
 0x500   :  { %17325 = vst [vmem:[#allocation146_spill] sm:$0xff] %v13120_v35  ;;  %v4515_v45 = vadd.f32 %v7563_v40, %v17320_v17  ;;  %v13138_v27 = vadd.f32 %v5283_v56, %v5027_v55  ;;  %v3748_v26 = vcvt.s32.f32 %v13120_v35  ;;  %v8198_v59 = vpop.eup %8197  ;;  %v13150_v12 = vmul.f32 %v8196_v63, %v13012_v33  ;;  %v17336_v63 = vld [vmem:[#allocation127_spill] sm:$0xff] }
 0x501   :  { %17328 = vst [vmem:[#allocation12_spill] sm:$0xff] %v13133_v31  ;;  %v4516_v34 = vadd.f32 %v7564_v5, %v17322_v2  ;;  %v13153_v9 = vadd.f32 %v5284_v53, %v5028_v25  ;;  %v3749_v17 = vcvt.s32.f32 %v13133_v31  ;;  %v6045_v56 = vsel %vm13126_vm6, 1.0, %v12711_v14  ;;  %v275_v14 = vld [vmem:[%s16205_s2 + $0x1c8] sm:$0xff] }
 0x502   :  { %17331 = vst [vmem:[#allocation26_spill] sm:$0xff] %v13150_v12  ;;  %vm6177_vm8 = vcmp.gt.f32.partialorder %v13079_v39, 0.0  ;;  %v13161_v29 = vadd.f32 1.0, %v13097_v37  ;;  %v13164_v20 = vmul.f32 %v8198_v59, %v13014_v38  ;;  %v4643_v33 = vmul.f32 %v4515_v45, %v4131_v1 }
 0x503   :  { %v6688_v2 = vsel %vm6176_vm14, %v13073_v11, %v8194_v41  ;;  %v6943_v53 = vsel %vm6815_vm9, %v6687_v6, 0.0  ;;  %8201 = vpow2.f32 %v6489_v43  ;;  %v4644_v40 = vmul.f32 %v4516_v34, %v4132_v4  ;;  %v17334_v41 = vld [vmem:[#allocation252_spill] sm:$0xff] }
 0x504   :  { %17332 = vst [vmem:[#allocation175_spill] sm:$0xff] %v13164_v20  ;;  %v6046_v55 = vsel %vm13145_vm12, 1.0, %v12726_v48  ;;  %vm4771_vm10 = vcmp.eq.f32.partialorder %v4643_v33, 0.0  ;;  %v3876_v38 = vadd.f32 1.0, %v3748_v26  ;;  %v3877_v1 = vadd.f32 1.0, %v3749_v17  ;;  %v17335_v48 = vld [vmem:[#allocation253_spill] sm:$0xff] }
 0x505   :  { %v13178_v50 = vmul.f32 %v13089_v58, %v6045_v56  ;;  %vm6178_vm15 = vcmp.gt.f32.partialorder %v13097_v37, 0.0  ;;  %v6491_v11 = vmul.f32 1.442695, %v13135_v32  ;;  %vm4772_vm5 = vcmp.eq.f32.partialorder %v4644_v40, 0.0  ;;  %v17337_v26 = vld [vmem:[#allocation129_spill] sm:$0xff]  ;;  %v277_v37 = vld [vmem:[%s16205_s2 + $0x1d8] sm:$0xff] }
 0x506   :  { %v4899_v6 = vsel %vm4771_vm10, 1.0, %v4643_v33  ;;  %v13182_v43 = vsub.f32 0.0, %v275_v14  ;;  %v4900_v4 = vsel %vm4772_vm5, 1.0, %v4644_v40  ;;  %v5157_v5 = vsub.f32 1.0, %v17334_v41  ;;  %v3075_v14 = vpop.permute.xlu1 %3074 }
 0x507   :  { %17333 = vst [vmem:[#allocation147_spill] sm:$0xff] %v13178_v50  ;;  %8203 = vrcp.f32 %v4899_v6  ;;  %v5158_v25 = vsub.f32 1.0, %v17335_v48  ;;  %v3294_v45 = vadd.f32 %v3070_v15, %v17336_v63  ;;  %v3295_v58 = vadd.f32 %v3070_v15, %v17337_v26 }
 0x508   :  { %8205 = vrcp.f32 %v4900_v4  ;;  %v13188_v59 = vmul.f32 %v6942_v60, %v6046_v55  ;;  %v6944_v0 = vsel %vm6816_vm11, %v6688_v2, 0.0  ;;  %v4005_v34 = vadd.f32 %v10176_v19, %v3876_v38  ;;  %v8200_v56 = vpop.eup %8199 }
 0x509   :  { %v4006_v17 = vadd.f32 %v10176_v19, %v3877_v1  ;;  %vm6817_vm13 = vcmp.lt.s32.totalorder %v12683_v49, 512  ;;  %8207 = vpow2.f32 %v6491_v11  ;;  %v4261_v60 = vsub.f32 %v10176_v19, %v3294_v45 }
 0x50a   :  { %17338 = vst [vmem:[#allocation130_spill] sm:$0xff] %v13188_v59  ;;  %v4262_v2 = vsub.f32 %v10176_v19, %v3295_v58  ;;  %vm6818_vm2 = vcmp.lt.s32.totalorder %v12701_v21, 512  ;;  %v4133_v7 = vsub.f32 %v4005_v34, %v3294_v45  ;;  %v3393_v55 = vadd.s32 256, %v9999_v52 }
 0x50b   :  { %v4134_v40 = vsub.f32 %v4006_v17, %v3295_v58  ;;  %vm6179_vm14 = vcmp.gt.f32.partialorder %v13135_v32, 0.0  ;;  %v6307_v38 = vadd.f32 1.0, %v13135_v32  ;;  %v6493_v1 = vmul.f32 1.442695, %v13182_v43 }
 0x50c   :  { %v5285_v15 = vmul.f32 %v5157_v5, %v4261_v60  ;;  %v5286_v11 = vmul.f32 %v5158_v25, %v4262_v2  ;;  %vm5789_vm9 = vcmp.eq.s32.totalorder %v12683_v49, 0  ;;  %v7565_v13 = vadd.f32 -1.0, %v4133_v7 }
 0x50d   :  { %v7566_v6 = vadd.f32 -1.0, %v4134_v40  ;;  %v5029_v4 = vmul.f32 %v4133_v7, %v17334_v41  ;;  %v5030_v63 = vmul.f32 %v4134_v40, %v17335_v48  ;;  %v8202_v45 = vpop.eup %8201  ;;  %v6047_v26 = vsel %vm13198_vm3, 1.0, %v12823_v30 }
 0x50e   :  { %v6048_v58 = vsel %vm13209_vm0, 1.0, %v12829_v10  ;;  %v6689_v5 = vsel %vm6177_vm8, %v13111_v54, %v8200_v56  ;;  %v3461_v25 = vmul.u32 256, %v3393_v55  ;;  %vm5790_vm11 = vcmp.eq.s32.totalorder %v12701_v21, 0  ;;  %vm13297_vm8 = vmand %vm5789_vm9, %vm11411_vm1 }
 0x50f   :  { %v4517_v34 = vadd.f32 %v7565_v13, %v17334_v41  ;;  %v4518_v17 = vadd.f32 %v7566_v6, %v17335_v48  ;;  %v13233_v60 = vadd.f32 %v5285_v15, %v5029_v4  ;;  %v13235_v2 = vadd.f32 %v5286_v11, %v5030_v63  ;;  %v282_v4 = vld [vmem:[%s16205_s2 + $0x200] sm:$0xff] }
 0x510   :  { %v13238_v30 = vadd.f32 1.0, %v13182_v43  ;;  %8209 = vpow2.f32 %v6493_v1  ;;  %v13241_v10 = vadd.s32 %v3461_v25, %v10027_v18  ;;  %v13244_v39 = vadd.s32 %v3461_v25, %v10070_v44  ;;  %v17347_v63 = vld [vmem:[#allocation4_spill] sm:$0xff]  ;;  %v283_v25 = vld [vmem:[%s16205_s2 + $0x208] sm:$0xff] }
 0x511   :  { %v8204_v54 = vpop.eup %8203  ;;  %v13246_v56 = vmul.f32 %v6943_v53, %v6047_v26  ;;  %v6690_v41 = vsel %vm6178_vm15, %v13161_v29, %v8202_v45  ;;  %v4645_v48 = vmul.f32 %v4517_v34, %v4133_v7  ;;  %v4646_v33 = vmul.f32 %v4518_v17, %v4134_v40  ;;  %v276_v53 = vld [vmem:[%s16205_s2 + $0x1d0] sm:$0xff]  ;;  %vm13318_vm15 = vmand %vm5790_vm11, %vm11411_vm1 }
 0x512   :  { %v8206_v55 = vpop.eup %8205  ;;  %v13251_v15 = vmul.f32 %v6944_v0, %v6048_v58  ;;  %v6945_v1 = vsel %vm6817_vm13, %v6689_v5, 0.0  ;;  %vm6180_vm4 = vcmp.gt.f32.partialorder %v13182_v43, 0.0  ;;  %v13263_v29 = vmul.f32 %v8204_v54, %v13138_v27  ;;  %v17348_v27 = vld [vmem:[#allocation5_spill] sm:$0xff]  ;;  %v17349_v17 = vld [vmem:[#allocation134_spill] sm:$0xff] }
 0x513   :  { %17343 = vst [vmem:[#allocation28_spill] sm:$0xff] %v13246_v56  ;;  %v3750_v7 = vcvt.s32.f32 %v13241_v10  ;;  %v13267_v0 = vmul.f32 %v8206_v55, %v13153_v9  ;;  %vm4773_vm6 = vcmp.eq.f32.partialorder %v4645_v48, 0.0  ;;  %vm4774_vm7 = vcmp.eq.f32.partialorder %v4646_v33, 0.0  ;;  %v8208_v11 = vpop.eup %8207 }
 0x514   :  { %17344 = vst [vmem:[#allocation290_spill] sm:$0xff] %v13251_v15  ;;  %17345 = vst [vmem:[#allocation44_spill] sm:$0xff] %v13263_v29  ;;  %v3751_v40 = vcvt.s32.f32 %v13244_v39  ;;  %v4901_v13 = vsel %vm4773_vm6, 1.0, %v4645_v48  ;;  %v4902_v6 = vsel %vm4774_vm7, 1.0, %v4646_v33  ;;  %v3296_v45 = vadd.f32 %v3075_v14, %v17347_v63  ;;  %v17350_v48 = vld [vmem:[#allocation135_spill] sm:$0xff] }
 0x515   :  { %17346 = vst [vmem:[#allocation50_spill] sm:$0xff] %v13267_v0  ;;  %v3297_v26 = vadd.f32 %v3075_v14, %v17348_v27  ;;  %v13277_v58 = vsel %vm6818_vm2, %v6690_v41, 0.0  ;;  %vm6819_vm12 = vcmp.lt.s32.totalorder %v12826_v57, 512  ;;  %v13280_v9 = vsub.f32 0.0, %v276_v53 }
 0x516   :  { %v13282_v5 = vsub.f32 0.0, %v277_v37  ;;  %8211 = vrcp.f32 %v4901_v13  ;;  %v3878_v34 = vadd.f32 1.0, %v3750_v7  ;;  %v5159_v54 = vsub.f32 1.0, %v17349_v17 }
 0x517   :  { %v5160_v33 = vsub.f32 1.0, %v17350_v48  ;;  %v6691_v41 = vsel %vm6179_vm14, %v6307_v38, %v8208_v11  ;;  %8213 = vrcp.f32 %v4902_v6  ;;  %v13291_v14 = vsub.f32 0.0, %v282_v4 }
 0x518   :  { %v3879_v55 = vadd.f32 1.0, %v3751_v40  ;;  %v13301_v37 = vsub.f32 0.0, %v283_v25  ;;  %v4007_v7 = vadd.f32 %v10176_v19, %v3878_v34  ;;  %v4263_v13 = vsub.f32 %v10176_v19, %v3296_v45 }
 0x519   :  { %v4264_v32 = vsub.f32 %v10176_v19, %v3297_v26  ;;  %vm6820_vm10 = vcmp.lt.s32.totalorder %v12832_v61, 512  ;;  %v13308_v38 = vadd.f32 1.0, %v13280_v9  ;;  %v13311_v40 = vadd.f32 1.0, %v13282_v5 }
 0x51a   :  { %v4008_v49 = vadd.f32 %v10176_v19, %v3879_v55  ;;  %v8210_v11 = vpop.eup %8209  ;;  %v4135_v4 = vsub.f32 %v4007_v7, %v3296_v45  ;;  %v5287_v63 = vmul.f32 %v5159_v54, %v4263_v13  ;;  %v3394_v25 = vadd.s32 264, %v9999_v52 }
 0x51b   :  { %v5288_v27 = vmul.f32 %v5160_v33, %v4264_v32  ;;  %v6049_v34 = vsel %vm13297_vm8, 1.0, %v12934_v22  ;;  %v13328_v55 = vsel %vm6819_vm12, %v6691_v41, 0.0  ;;  %v6507_v31 = vmul.f32 1.442695, %v13291_v14 }
 0x51c   :  { %v4136_v21 = vsub.f32 %v4008_v49, %v3297_v26  ;;  %v6509_v35 = vmul.f32 1.442695, %v13301_v37  ;;  %v7567_v0 = vadd.f32 -1.0, %v4135_v4  ;;  %v5031_v45 = vmul.f32 %v4135_v4, %v17349_v17 }
 0x51d   :  { %v3462_v54 = vmul.u32 256, %v3394_v25  ;;  %v6692_v22 = vsel %vm6180_vm4, %v13238_v30, %v8210_v11  ;;  %v13349_v49 = vmul.f32 %v6945_v1, %v6049_v34  ;;  %8215 = vpow2.f32 %v6507_v31  ;;  %v284_v30 = vld [vmem:[%s16205_s2 + $0x210] sm:$0xff] }
 0x51e   :  { %v7568_v53 = vadd.f32 -1.0, %v4136_v21  ;;  %v5032_v41 = vmul.f32 %v4136_v21, %v17350_v48  ;;  %v4519_v7 = vadd.f32 %v7567_v0, %v17349_v17  ;;  %v13341_v26 = vadd.f32 %v5287_v63, %v5031_v45 }
 0x51f   :  { %v13344_v13 = vadd.s32 %v3462_v54, %v10027_v18  ;;  %v13347_v32 = vadd.s32 %v3462_v54, %v10070_v44  ;;  %17355 = vst [vmem:[#allocation52_spill] sm:$0xff] %v13349_v49  ;;  %8217 = vpow2.f32 %v6509_v35  ;;  %v13361_v1 = vsel %vm6820_vm10, %v6692_v22, 0.0 }
 0x520   :  { %v4520_v25 = vadd.f32 %v7568_v53, %v17350_v48  ;;  %v13352_v43 = vadd.f32 %v5288_v27, %v5032_v41  ;;  %v8212_v0 = vpop.eup %8211  ;;  %v4647_v17 = vmul.f32 %v4519_v7, %v4135_v4  ;;  %v13364_v31 = vmul.f32 1.442695, %v13280_v9  ;;  %v285_v4 = vld [vmem:[%s16205_s2 + $0x218] sm:$0xff] }
 0x521   :  { %v3752_v11 = vcvt.s32.f32 %v13344_v13  ;;  %v3753_v63 = vcvt.s32.f32 %v13347_v32  ;;  %v8214_v45 = vpop.eup %8213  ;;  %v13367_v48 = vmul.f32 %v8212_v0, %v13233_v60  ;;  %v13370_v34 = vmul.f32 1.442695, %v13282_v5  ;;  %v3080_v60 = vpop.permute.xlu0 %3079 }
 0x522   :  { %v4648_v27 = vmul.f32 %v4520_v25, %v4136_v21  ;;  %v13373_v35 = vmul.f32 %v8214_v45, %v13235_v2  ;;  %vm4775_vm5 = vcmp.eq.f32.partialorder %v4647_v17, 0.0  ;;  %v13378_v54 = vsub.f32 0.0, %v284_v30  ;;  %v17358_v30 = vld [vmem:[#allocation136_spill] sm:$0xff]  ;;  %v17360_v45 = vld [vmem:[#allocation9_spill] sm:$0xff] }
 0x523   :  { %17356 = vst [vmem:[#allocation30_spill] sm:$0xff] %v13367_v48  ;;  %v4903_v22 = vsel %vm4775_vm5, 1.0, %v4647_v17  ;;  %v3880_v53 = vadd.f32 1.0, %v3752_v11  ;;  %v3881_v41 = vadd.f32 1.0, %v3753_v63  ;;  %vm6187_vm13 = vcmp.gt.f32.partialorder %v13291_v14, 0.0  ;;  %v17359_v11 = vld [vmem:[#allocation7_spill] sm:$0xff] }
 0x524   :  { %17357 = vst [vmem:[#allocation277_spill] sm:$0xff] %v13373_v35  ;;  %vm4776_vm3 = vcmp.eq.f32.partialorder %v4648_v27, 0.0  ;;  %vm6188_vm0 = vcmp.gt.f32.partialorder %v13301_v37, 0.0  ;;  %v6315_v21 = vadd.f32 1.0, %v13291_v14  ;;  %v6316_v2 = vadd.f32 1.0, %v13301_v37  ;;  %v286_v14 = vld [vmem:[%s16205_s2 + $0x220] sm:$0xff] }
 0x525   :  { %vm5799_vm2 = vcmp.eq.s32.totalorder %v13241_v10, 0  ;;  %v4904_v7 = vsel %vm4776_vm3, 1.0, %v4648_v27  ;;  %8219 = vrcp.f32 %v4903_v22  ;;  %v13385_v25 = vsub.f32 0.0, %v285_v4  ;;  %v17361_v27 = vld [vmem:[#allocation137_spill] sm:$0xff] }
 0x526   :  { %8221 = vrcp.f32 %v4904_v7  ;;  %v5161_v0 = vsub.f32 1.0, %v17358_v30  ;;  %v6511_v17 = vmul.f32 1.442695, %v13378_v54  ;;  %v3298_v63 = vadd.f32 %v3080_v60, %v17359_v11  ;;  %vm13428_vm6 = vmand %vm5799_vm2, %vm11411_vm1 }
 0x527   :  { %vm5800_vm14 = vcmp.eq.s32.totalorder %v13244_v39, 0  ;;  %v3299_v33 = vadd.f32 %v3080_v60, %v17360_v45  ;;  %v4009_v35 = vadd.f32 %v10176_v19, %v3880_v53  ;;  %v4010_v48 = vadd.f32 %v10176_v19, %v3881_v41  ;;  %v8216_v29 = vpop.eup %8215 }
 0x528   :  { %vm6827_vm9 = vcmp.lt.s32.totalorder %v13241_v10, 512  ;;  %v5162_v4 = vsub.f32 1.0, %v17361_v27  ;;  %v4265_v22 = vsub.f32 %v10176_v19, %v3298_v63  ;;  %v3395_v7 = vadd.s32 272, %v9999_v52  ;;  %vm13443_vm7 = vmand %vm5800_vm14, %vm11411_vm1 }
 0x529   :  { %vm6828_vm11 = vcmp.lt.s32.totalorder %v13244_v39, 512  ;;  %v4137_v11 = vsub.f32 %v4009_v35, %v3298_v63  ;;  %v4138_v28 = vsub.f32 %v4010_v48, %v3299_v33  ;;  %v4266_v49 = vsub.f32 %v10176_v19, %v3299_v33  ;;  %v8218_v60 = vpop.eup %8217  ;;  %v287_v39 = vld [vmem:[%s16205_s2 + $0x228] sm:$0xff] }
 0x52a   :  { %8223 = vpow2.f32 %v6511_v17  ;;  %v6513_v53 = vmul.f32 1.442695, %v13385_v25  ;;  %v5289_v41 = vmul.f32 %v5161_v0, %v4265_v22  ;;  %v3463_v45 = vmul.u32 256, %v3395_v7 }
 0x52b   :  { %v7569_v15 = vadd.f32 -1.0, %v4137_v11  ;;  %v7570_v56 = vadd.f32 -1.0, %v4138_v28  ;;  %v5033_v20 = vmul.f32 %v4137_v11, %v17358_v30  ;;  %v5034_v59 = vmul.f32 %v4138_v28, %v17361_v27 }
 0x52c   :  { %v6699_v50 = vsel %vm6187_vm13, %v6315_v21, %v8216_v29  ;;  %v5290_v62 = vmul.f32 %v5162_v4, %v4266_v49  ;;  %v13406_v48 = vadd.s32 %v3463_v45, %v10027_v18  ;;  %v13409_v33 = vadd.s32 %v3463_v45, %v10070_v44 }
 0x52d   :  { %v6700_v35 = vsel %vm6188_vm0, %v6316_v2, %v8218_v60  ;;  %v4521_v0 = vadd.f32 %v7569_v15, %v17358_v30  ;;  %v4522_v17 = vadd.f32 %v7570_v56, %v17361_v27  ;;  %v13415_v63 = vadd.f32 %v5289_v41, %v5033_v20  ;;  %v3085_v60 = vpop.permute.xlu1 %3084  ;;  %v17368_v56 = vld [vmem:[#allocation11_spill] sm:$0xff] }
 0x52e   :  { %vm6189_vm4 = vcmp.gt.f32.partialorder %v13378_v54, 0.0  ;;  %8225 = vpow2.f32 %v6513_v53  ;;  %v13418_v29 = vadd.f32 %v5290_v62, %v5034_v59  ;;  %v3754_v49 = vcvt.s32.f32 %v13406_v48 }
 0x52f   :  { %v8220_v21 = vpop.eup %8219  ;;  %v6317_v20 = vadd.f32 1.0, %v13378_v54  ;;  %v4649_v15 = vmul.f32 %v4521_v0, %v4137_v11  ;;  %v4650_v62 = vmul.f32 %v4522_v17, %v4138_v28  ;;  %v3755_v59 = vcvt.s32.f32 %v13409_v33  ;;  %v17366_v0 = vld [vmem:[#allocation62_spill] sm:$0xff] }
 0x530   :  { %v8222_v37 = vpop.eup %8221  ;;  %v6955_v2 = vsel %vm6827_vm9, %v6699_v50, 0.0  ;;  %v6956_v30 = vsel %vm6828_vm11, %v6700_v35, 0.0  ;;  %v5608_v27 = vmul.f32 %v8220_v21, %v13341_v26  ;;  %vm6190_vm12 = vcmp.gt.f32.partialorder %v13385_v25, 0.0 }
 0x531   :  { %v6318_v28 = vadd.f32 1.0, %v13385_v25  ;;  %v5610_v10 = vmul.f32 %v8222_v37, %v13352_v43  ;;  %vm4777_vm8 = vcmp.eq.f32.partialorder %v4649_v15, 0.0  ;;  %vm4778_vm10 = vcmp.eq.f32.partialorder %v4650_v62, 0.0  ;;  %v17382_v25 = vld [vmem:[#allocation15_spill] sm:$0xff] }
 0x532   :  { %v13450_v50 = vsub.f32 0.0, %v286_v14  ;;  %v6059_v26 = vsel %vm13428_vm6, 1.0, %v5608_v27  ;;  %v4905_v22 = vsel %vm4777_vm8, 1.0, %v4649_v15  ;;  %v4906_v7 = vsel %vm4778_vm10, 1.0, %v4650_v62  ;;  %v17369_v62 = vld [vmem:[#allocation64_spill] sm:$0xff] }
 0x533   :  { %v3882_v11 = vadd.f32 1.0, %v3754_v49  ;;  %v6060_v53 = vsel %vm13443_vm7, 1.0, %v5610_v10  ;;  %v7083_v41 = vmul.f32 %v6955_v2, %v6059_v26  ;;  %8227 = vrcp.f32 %v4905_v22  ;;  %v17367_v49 = vld [vmem:[#allocation141_spill] sm:$0xff] }
 0x534   :  { %v3883_v43 = vadd.f32 1.0, %v3755_v59  ;;  %v8224_v45 = vpop.eup %8223  ;;  %v7084_v35 = vmul.f32 %v6956_v30, %v6060_v53  ;;  %vm5801_vm5 = vcmp.eq.s32.totalorder %v13344_v13, 0  ;;  %vm5802_vm3 = vcmp.eq.s32.totalorder %v13347_v32, 0  ;;  %v17370_v59 = vld [vmem:[#allocation142_spill] sm:$0xff]  ;;  %v17371_v30 = vld [vmem:[#allocation13_spill] sm:$0xff] }
 0x535   :  { %8229 = vrcp.f32 %v4906_v7  ;;  %v13462_v17 = vadd.f32 %v7083_v41, %v17366_v0  ;;  %v13464_v14 = vsub.f32 0.0, %v287_v39  ;;  %v5163_v21 = vsub.f32 1.0, %v17367_v49  ;;  %vm13503_vm2 = vmand %vm5801_vm5, %vm11411_vm1 }
 0x536   :  { %v3300_v15 = vadd.f32 %v3085_v60, %v17368_v56  ;;  %v13469_v37 = vadd.f32 %v7084_v35, %v17369_v62  ;;  %v5164_v2 = vsub.f32 1.0, %v17370_v59  ;;  %v3301_v27 = vadd.f32 %v3085_v60, %v17371_v30  ;;  %vm13515_vm14 = vmand %vm5802_vm3, %vm11411_vm1 }
 0x537   :  { %v4011_v4 = vadd.f32 %v10176_v19, %v3882_v11  ;;  %vm6829_vm13 = vcmp.lt.s32.totalorder %v13344_v13, 512  ;;  %v6515_v10 = vmul.f32 1.442695, %v13450_v50  ;;  %v4012_v26 = vadd.f32 %v10176_v19, %v3883_v43 }
 0x538   :  { %v4267_v22 = vsub.f32 %v10176_v19, %v3300_v15  ;;  %v8226_v7 = vpop.eup %8225  ;;  %vm6830_vm0 = vcmp.lt.s32.totalorder %v13347_v32, 512  ;;  %v4268_v53 = vsub.f32 %v10176_v19, %v3301_v27  ;;  %v3396_v41 = vadd.s32 280, %v9999_v52 }
 0x539   :  { %v4139_v39 = vsub.f32 %v4011_v4, %v3300_v15  ;;  %v6701_v60 = vsel %vm6189_vm4, %v6317_v20, %v8224_v45  ;;  %v6517_v11 = vmul.f32 1.442695, %v13464_v14  ;;  %v4140_v35 = vsub.f32 %v4012_v26, %v3301_v27 }
 0x53a   :  { %v5291_v0 = vmul.f32 %v5163_v21, %v4267_v22  ;;  %v5292_v62 = vmul.f32 %v5164_v2, %v4268_v53  ;;  %v3464_v30 = vmul.u32 256, %v3396_v41  ;;  %v6702_v23 = vsel %vm6190_vm12, %v6318_v28, %v8226_v7 }
 0x53b   :  { %v7571_v56 = vadd.f32 -1.0, %v4139_v39  ;;  %v5035_v43 = vmul.f32 %v4139_v39, %v17367_v49  ;;  %8231 = vpow2.f32 %v6515_v10  ;;  %v7572_v15 = vadd.f32 -1.0, %v4140_v35 }
 0x53c   :  { %v5036_v4 = vmul.f32 %v4140_v35, %v17370_v59  ;;  %v13492_v20 = vadd.s32 %v3464_v30, %v10027_v18  ;;  %v13495_v45 = vadd.s32 %v3464_v30, %v10070_v44  ;;  %v6957_v2 = vsel %vm6829_vm13, %v6701_v60, 0.0 }
 0x53d   :  { %v4523_v3 = vadd.f32 %v7571_v56, %v17367_v49  ;;  %v13489_v54 = vadd.f32 %v5291_v0, %v5035_v43  ;;  %v8228_v21 = vpop.eup %8227  ;;  %8233 = vpow2.f32 %v6517_v11  ;;  %v4524_v28 = vadd.f32 %v7572_v15, %v17370_v59  ;;  %v17379_v0 = vld [vmem:[#allocation287_spill] sm:$0xff] }
 0x53e   :  { %v13508_v49 = vadd.f32 %v5292_v62, %v5036_v4  ;;  %v5612_v10 = vmul.f32 %v8228_v21, %v13415_v63  ;;  %v3756_v22 = vcvt.s32.f32 %v13492_v20  ;;  %v3757_v7 = vcvt.s32.f32 %v13495_v45  ;;  %v289_v43 = vld [vmem:[%s16205_s2 + $0x238] sm:$0xff]  ;;  %v17381_v21 = vld [vmem:[#allocation144_spill] sm:$0xff] }
 0x53f   :  { %v8230_v27 = vpop.eup %8229  ;;  %v4651_v13 = vmul.f32 %v4523_v3, %v4139_v39  ;;  %8235 = vpow2.f32 %v13364_v31  ;;  %v6958_v59 = vsel %vm6830_vm0, %v6702_v23, 0.0  ;;  %v4652_v53 = vmul.f32 %v4524_v28, %v4140_v35  ;;  %v17378_v39 = vld [vmem:[#allocation285_spill] sm:$0xff]  ;;  %v17380_v15 = vld [vmem:[#allocation143_spill] sm:$0xff] }
 0x540   :  { %v5614_v63 = vmul.f32 %v8230_v27, %v13418_v29  ;;  %v17376_v41 = vsel %vm13318_vm15, 1.0, %v12948_v16  ;;  %8237 = vpow2.f32 %v13370_v34  ;;  %v6061_v3 = vsel %vm13503_vm2, 1.0, %v5612_v10  ;;  %v288_v16 = vld [vmem:[%s16205_s2 + $0x230] sm:$0xff]  ;;  %v3090_v34 = vpop.permute.xlu0 %3089  ;;  %v17383_v27 = vld [vmem:[#allocation17_spill] sm:$0xff] }
 0x541   :  { %v13530_v60 = vmul.f32 %v13277_v58, %v17376_v41  ;;  %vm4779_vm9 = vcmp.eq.f32.partialorder %v4651_v13, 0.0  ;;  %v7085_v23 = vmul.f32 %v6957_v2, %v6061_v3  ;;  %vm6191_vm11 = vcmp.gt.f32.partialorder %v13450_v50, 0.0 }
 0x542   :  { %v6062_v32 = vsel %vm13515_vm14, 1.0, %v5614_v63  ;;  %vm4780_vm4 = vcmp.eq.f32.partialorder %v4652_v53, 0.0  ;;  %v4907_v58 = vsel %vm4779_vm9, 1.0, %v4651_v13  ;;  %v3884_v31 = vadd.f32 1.0, %v3756_v22 }
 0x543   :  { %17377 = vst [vmem:[#allocation32_spill] sm:$0xff] %v13530_v60  ;;  %v7086_v6 = vmul.f32 %v6958_v59, %v6062_v32  ;;  %v3885_v29 = vadd.f32 1.0, %v3757_v7  ;;  %v13542_v11 = vadd.f32 %v7085_v23, %v17378_v39  ;;  %vm5803_vm15 = vcmp.eq.s32.totalorder %v13406_v48, 0 }
 0x544   :  { %v4908_v35 = vsel %vm4780_vm4, 1.0, %v4652_v53  ;;  %8239 = vrcp.f32 %v4907_v58  ;;  %vm5804_vm6 = vcmp.eq.s32.totalorder %v13409_v33, 0  ;;  %v13552_v62 = vsub.f32 0.0, %v288_v16  ;;  %vm13597_vm10 = vmand %vm5803_vm15, %vm11411_vm1 }
 0x545   :  { %v13546_v56 = vadd.f32 %v7086_v6, %v17379_v0  ;;  %8241 = vrcp.f32 %v4908_v35  ;;  %v8232_v30 = vpop.eup %8231  ;;  %v5165_v4 = vsub.f32 1.0, %v17380_v15  ;;  %v5166_v2 = vsub.f32 1.0, %v17381_v21  ;;  %vm13614_vm5 = vmand %vm5804_vm6, %vm11411_vm1 }
 0x546   :  { %v3302_v28 = vadd.f32 %v3090_v34, %v17382_v25  ;;  %v3303_v10 = vadd.f32 %v3090_v34, %v17383_v27  ;;  %vm6192_vm7 = vcmp.gt.f32.partialorder %v13464_v14, 0.0  ;;  %v6319_v26 = vadd.f32 1.0, %v13450_v50  ;;  %v278_v34 = vld [vmem:[%s16205_s2 + $0x1e0] sm:$0xff]  ;;  %v17390_v50 = vld [vmem:[#allocation293_spill] sm:$0xff] }
 0x547   :  { %v4013_v13 = vadd.f32 %v10176_v19, %v3884_v31  ;;  %v4014_v22 = vadd.f32 %v10176_v19, %v3885_v29  ;;  %v8234_v7 = vpop.eup %8233  ;;  %v6320_v59 = vadd.f32 1.0, %v13464_v14  ;;  %v13563_v63 = vsub.f32 0.0, %v289_v43 }
 0x548   :  { %v4269_v53 = vsub.f32 %v10176_v19, %v3302_v28  ;;  %v4270_v41 = vsub.f32 %v10176_v19, %v3303_v10  ;;  %vm6831_vm12 = vcmp.lt.s32.totalorder %v13406_v48, 512  ;;  %v3397_v23 = vadd.s32 288, %v9999_v52  ;;  %v290_v48 = vld [vmem:[%s16205_s2 + $0x240] sm:$0xff] }
 0x549   :  { %v4141_v3 = vsub.f32 %v4013_v13, %v3302_v28  ;;  %v4142_v32 = vsub.f32 %v4014_v22, %v3303_v10  ;;  %v13569_v16 = vpop.eup %8235  ;;  %vm6832_vm8 = vcmp.lt.s32.totalorder %v13409_v33, 512  ;;  %v6519_v6 = vmul.f32 1.442695, %v13552_v62  ;;  %v291_v33 = vld [vmem:[%s16205_s2 + $0x248] sm:$0xff] }
 0x54a   :  { %v5293_v58 = vmul.f32 %v5165_v4, %v4269_v53  ;;  %v5294_v31 = vmul.f32 %v5166_v2, %v4270_v41  ;;  %v13573_v29 = vpop.eup %8237  ;;  %v6703_v25 = vsel %vm6191_vm11, %v6319_v26, %v8232_v30  ;;  %v6704_v28 = vsel %vm6192_vm7, %v6320_v59, %v8234_v7 }
 0x54b   :  { %v7573_v39 = vadd.f32 -1.0, %v4141_v3  ;;  %v7574_v35 = vadd.f32 -1.0, %v4142_v32  ;;  %v5037_v0 = vmul.f32 %v4141_v3, %v17380_v15  ;;  %v5038_v43 = vmul.f32 %v4142_v32, %v17381_v21 }
 0x54c   :  { %v6521_v4 = vmul.f32 1.442695, %v13563_v63  ;;  %v3465_v2 = vmul.u32 256, %v3397_v23  ;;  %v13591_v41 = vsub.f32 0.0, %v278_v34  ;;  %8243 = vpow2.f32 %v6519_v6 }
 0x54d   :  { %v4525_v27 = vadd.f32 %v7573_v39, %v17380_v15  ;;  %v4526_v10 = vadd.f32 %v7574_v35, %v17381_v21  ;;  %v13587_v13 = vadd.f32 %v5293_v58, %v5037_v0  ;;  %v13589_v22 = vadd.f32 %v5294_v31, %v5038_v43  ;;  %v3095_v31 = vpop.permute.xlu1 %3094 }
 0x54e   :  { %v8240_v53 = vpop.eup %8239  ;;  %v13602_v14 = vadd.s32 %v3465_v2, %v10027_v18  ;;  %v13605_v30 = vadd.s32 %v3465_v2, %v10070_v44  ;;  %v6959_v21 = vsel %vm6831_vm12, %v6703_v25, 0.0  ;;  %v6960_v6 = vsel %vm6832_vm8, %v6704_v28, 0.0  ;;  %v17388_v28 = vld [vmem:[#allocation19_spill] sm:$0xff]  ;;  %v17389_v2 = vld [vmem:[#allocation288_spill] sm:$0xff] }
 0x54f   :  { %v8242_v15 = vpop.eup %8241  ;;  %v5616_v26 = vmul.f32 %v8240_v53, %v13489_v54  ;;  %v4653_v59 = vmul.f32 %v4525_v27, %v4141_v3  ;;  %v4654_v23 = vmul.f32 %v4526_v10, %v4142_v32  ;;  %vm6193_vm3 = vcmp.gt.f32.partialorder %v13552_v62, 0.0 }
 0x550   :  { %v5618_v58 = vmul.f32 %v8242_v15, %v13508_v49  ;;  %8245 = vpow2.f32 %v6521_v4  ;;  %v3758_v54 = vcvt.s32.f32 %v13602_v14  ;;  %v3759_v49 = vcvt.s32.f32 %v13605_v30 }
 0x551   :  { %v6063_v34 = vsel %vm13597_vm10, 1.0, %v5616_v26  ;;  %vm4781_vm13 = vcmp.eq.f32.partialorder %v4653_v59, 0.0  ;;  %vm4782_vm0 = vcmp.eq.f32.partialorder %v4654_v23, 0.0  ;;  %vm6194_vm2 = vcmp.gt.f32.partialorder %v13563_v63, 0.0  ;;  %v17392_v26 = vld [vmem:[#allocation149_spill] sm:$0xff] }
 0x552   :  { %v6064_v3 = vsel %vm13614_vm5, 1.0, %v5618_v58  ;;  %v7087_v32 = vmul.f32 %v6959_v21, %v6063_v34  ;;  %v6321_v39 = vadd.f32 1.0, %v13552_v62  ;;  %v4909_v35 = vsel %vm4781_vm13, 1.0, %v4653_v59  ;;  %v17394_v58 = vld [vmem:[#allocation20_spill] sm:$0xff] }
 0x553   :  { %v7088_v0 = vmul.f32 %v6960_v6, %v6064_v3  ;;  %v4910_v43 = vsel %vm4782_vm0, 1.0, %v4654_v23  ;;  %v13636_v25 = vsub.f32 0.0, %v290_v48  ;;  %v3304_v4 = vadd.f32 %v3095_v31, %v17388_v28  ;;  %v17393_v23 = vld [vmem:[#allocation150_spill] sm:$0xff] }
 0x554   :  { %v13640_v27 = vadd.f32 %v7087_v32, %v17389_v2  ;;  %8247 = vrcp.f32 %v4909_v35  ;;  %v13642_v10 = vsub.f32 0.0, %v291_v33  ;;  %v3886_v53 = vadd.f32 1.0, %v3758_v54 }
 0x555   :  { %v13645_v15 = vadd.f32 %v7088_v0, %v17390_v50  ;;  %8249 = vrcp.f32 %v4910_v43  ;;  %v3887_v21 = vadd.f32 1.0, %v3759_v49  ;;  %v5167_v7 = vsub.f32 1.0, %v17392_v26 }
 0x556   :  { %v6322_v59 = vadd.f32 1.0, %v13563_v63  ;;  %v5168_v6 = vsub.f32 1.0, %v17393_v23  ;;  %v3305_v48 = vadd.f32 %v3095_v31, %v17394_v58  ;;  %v4015_v34 = vadd.f32 %v10176_v19, %v3886_v53  ;;  %v8244_v32 = vpop.eup %8243 }
 0x557   :  { %17391 = vst [vmem:[#allocation153_spill] sm:$0xff] %v13645_v15  ;;  %vm5805_vm14 = vcmp.eq.s32.totalorder %v13492_v20, 0  ;;  %v6523_v33 = vmul.f32 1.442695, %v13636_v25  ;;  %v4016_v54 = vadd.f32 %v10176_v19, %v3887_v21  ;;  %v4271_v3 = vsub.f32 %v10176_v19, %v3304_v4 }
 0x558   :  { %vm5806_vm9 = vcmp.eq.s32.totalorder %v13495_v45, 0  ;;  %v4143_v49 = vsub.f32 %v4015_v34, %v3304_v4  ;;  %v4272_v35 = vsub.f32 %v10176_v19, %v3305_v48  ;;  %v3398_v0 = vadd.s32 296, %v9999_v52  ;;  %vm13684_vm15 = vmand %vm5805_vm14, %vm11411_vm1 }
 0x559   :  { %vm6833_vm11 = vcmp.lt.s32.totalorder %v13492_v20, 512  ;;  %v6525_v31 = vmul.f32 1.442695, %v13642_v10  ;;  %v4144_v43 = vsub.f32 %v4016_v54, %v3305_v48  ;;  %v5295_v28 = vmul.f32 %v5167_v7, %v4271_v3  ;;  %vm13697_vm6 = vmand %vm5806_vm9, %vm11411_vm1 }
 0x55a   :  { %v8246_v2 = vpop.eup %8245  ;;  %v7575_v53 = vadd.f32 -1.0, %v4143_v49  ;;  %v5039_v50 = vmul.f32 %v4143_v49, %v17392_v26  ;;  %v5296_v21 = vmul.f32 %v5168_v6, %v4272_v35  ;;  %v3466_v58 = vmul.u32 256, %v3398_v0 }
 0x55b   :  { %v6705_v60 = vsel %vm6193_vm3, %v6321_v39, %v8244_v32  ;;  %8251 = vpow2.f32 %v6523_v33  ;;  %v7576_v4 = vadd.f32 -1.0, %v4144_v43  ;;  %v5040_v34 = vmul.f32 %v4144_v43, %v17393_v23 }
 0x55c   :  { %v4527_v51 = vadd.f32 %v7575_v53, %v17392_v26  ;;  %v13666_v12 = vadd.f32 %v5295_v28, %v5039_v50  ;;  %v13669_v48 = vadd.s32 %v3466_v58, %v10027_v18  ;;  %v13672_v7 = vadd.s32 %v3466_v58, %v10070_v44  ;;  %v293_v28 = vld [vmem:[%s16205_s2 + $0x258] sm:$0xff]  ;;  %v3100_v50 = vpop.permute.xlu0 %3099 }
 0x55d   :  { %v6706_v6 = vsel %vm6194_vm2, %v6322_v59, %v8246_v2  ;;  %vm6834_vm4 = vcmp.lt.s32.totalorder %v13495_v45, 512  ;;  %v4528_v62 = vadd.f32 %v7576_v4, %v17393_v23  ;;  %v13678_v39 = vadd.f32 %v5296_v21, %v5040_v34  ;;  %v17399_v4 = vld [vmem:[#allocation190_spill] sm:$0xff] }
 0x55e   :  { %v8248_v33 = vpop.eup %8247  ;;  %8253 = vpow2.f32 %v6525_v31  ;;  %v4655_v54 = vmul.f32 %v4527_v51, %v4143_v49  ;;  %v3760_v63 = vcvt.s32.f32 %v13669_v48  ;;  %v3761_v59 = vcvt.s32.f32 %v13672_v7  ;;  %v292_v31 = vld [vmem:[%s16205_s2 + $0x250] sm:$0xff] }
 0x55f   :  { %v8250_v3 = vpop.eup %8249  ;;  %v6961_v23 = vsel %vm6833_vm11, %v6705_v60, 0.0  ;;  %v5620_v32 = vmul.f32 %v8248_v33, %v13587_v13  ;;  %vm6195_vm7 = vcmp.gt.f32.partialorder %v13636_v25, 0.0  ;;  %v4656_v51 = vmul.f32 %v4528_v62, %v4144_v43  ;;  %v17401_v33 = vld [vmem:[#allocation191_spill] sm:$0xff] }
 0x560   :  { %v6962_v49 = vsel %vm6834_vm4, %v6706_v6, 0.0  ;;  %v5622_v0 = vmul.f32 %v8250_v3, %v13589_v22  ;;  %vm6196_vm12 = vcmp.gt.f32.partialorder %v13642_v10, 0.0  ;;  %v6323_v20 = vadd.f32 1.0, %v13636_v25  ;;  %v17404_v3 = vld [vmem:[#allocation23_spill] sm:$0xff] }
 0x561   :  { %vm4783_vm8 = vcmp.eq.f32.partialorder %v4655_v54, 0.0  ;;  %v6065_v60 = vsel %vm13684_vm15, 1.0, %v5620_v32  ;;  %v6324_v45 = vadd.f32 1.0, %v13642_v10  ;;  %vm4784_vm10 = vcmp.eq.f32.partialorder %v4656_v51, 0.0  ;;  %v17405_v32 = vld [vmem:[#allocation25_spill] sm:$0xff] }
 0x562   :  { %v4911_v13 = vsel %vm4783_vm8, 1.0, %v4655_v54  ;;  %v6066_v43 = vsel %vm13697_vm6, 1.0, %v5622_v0  ;;  %v7089_v22 = vmul.f32 %v6961_v23, %v6065_v60  ;;  %v3888_v2 = vadd.f32 1.0, %v3760_v63  ;;  %v17403_v63 = vld [vmem:[#allocation151_spill] sm:$0xff]  ;;  %v17406_v0 = vld [vmem:[#allocation152_spill] sm:$0xff] }
 0x563   :  { %v3889_v53 = vadd.f32 1.0, %v3761_v59  ;;  %v7090_v21 = vmul.f32 %v6962_v49, %v6066_v43  ;;  %vm5807_vm5 = vcmp.eq.s32.totalorder %v13602_v14, 0  ;;  %v4912_v58 = vsel %vm4784_vm10, 1.0, %v4656_v51 }
 0x564   :  { %8255 = vrcp.f32 %v4911_v13  ;;  %v13718_v34 = vadd.f32 %v7089_v22, %v17399_v4  ;;  %vm5808_vm3 = vcmp.eq.s32.totalorder %v13605_v30, 0  ;;  %v13721_v6 = vsub.f32 0.0, %v292_v31  ;;  %vm13766_vm2 = vmand %vm5807_vm5, %vm11411_vm1 }
 0x565   :  { %8257 = vrcp.f32 %v4912_v58  ;;  %v8252_v62 = vpop.eup %8251  ;;  %v13724_v26 = vadd.f32 %v7090_v21, %v17401_v33  ;;  %v13726_v54 = vsub.f32 0.0, %v293_v28  ;;  %v5169_v59 = vsub.f32 1.0, %v17403_v63  ;;  %vm13778_vm14 = vmand %vm5808_vm3, %vm11411_vm1 }
 0x566   :  { %17400 = vst [vmem:[#allocation160_spill] sm:$0xff] %v13718_v34  ;;  %v3306_v23 = vadd.f32 %v3100_v50, %v17404_v3  ;;  %vm6835_vm13 = vcmp.lt.s32.totalorder %v13602_v14, 512  ;;  %v3307_v35 = vadd.f32 %v3100_v50, %v17405_v32  ;;  %v4017_v51 = vadd.f32 %v10176_v19, %v3888_v2 }
 0x567   :  { %17402 = vst [vmem:[#allocation292_spill] sm:$0xff] %v13724_v26  ;;  %v4018_v49 = vadd.f32 %v10176_v19, %v3889_v53  ;;  %vm6836_vm0 = vcmp.lt.s32.totalorder %v13605_v30, 512  ;;  %v5170_v60 = vsub.f32 1.0, %v17406_v0  ;;  %v3399_v31 = vadd.s32 304, %v9999_v52  ;;  %v295_v30 = vld [vmem:[%s16205_s2 + $0x268] sm:$0xff] }
 0x568   :  { %v4273_v13 = vsub.f32 %v10176_v19, %v3306_v23  ;;  %v8254_v43 = vpop.eup %8253  ;;  %v6527_v22 = vmul.f32 1.442695, %v13721_v6  ;;  %v4145_v28 = vsub.f32 %v4017_v51, %v3306_v23  ;;  %v4274_v58 = vsub.f32 %v10176_v19, %v3307_v35 }
 0x569   :  { %v4146_v21 = vsub.f32 %v4018_v49, %v3307_v35  ;;  %v6707_v2 = vsel %vm6195_vm7, %v6323_v20, %v8252_v62  ;;  %v6529_v53 = vmul.f32 1.442695, %v13726_v54  ;;  %v3467_v4 = vmul.u32 256, %v3399_v31  ;;  %v279_v20 = vld [vmem:[%s16205_s2 + $0x1e8] sm:$0xff] }
 0x56a   :  { %v5297_v50 = vmul.f32 %v5169_v59, %v4273_v13  ;;  %v7577_v33 = vadd.f32 -1.0, %v4145_v28  ;;  %v5041_v32 = vmul.f32 %v4145_v28, %v17403_v63  ;;  %v6708_v26 = vsel %vm6196_vm12, %v6324_v45, %v8254_v43 }
 0x56b   :  { %v7578_v3 = vadd.f32 -1.0, %v4146_v21  ;;  %v5042_v42 = vmul.f32 %v4146_v21, %v17406_v0  ;;  %v5298_v23 = vmul.f32 %v5170_v60, %v4274_v58  ;;  %v13748_v51 = vadd.s32 %v3467_v4, %v10027_v18 }
 0x56c   :  { %v13751_v25 = vadd.s32 %v3467_v4, %v10070_v44  ;;  %8259 = vpow2.f32 %v6527_v22  ;;  %v4529_v62 = vadd.f32 %v7577_v33, %v17403_v63  ;;  %v13758_v35 = vadd.f32 %v5297_v50, %v5041_v32  ;;  %v3105_v32 = vpop.permute.xlu1 %3104 }
 0x56d   :  { %v4530_v59 = vadd.f32 %v7578_v3, %v17406_v0  ;;  %v6963_v45 = vsel %vm6835_vm13, %v6707_v2, 0.0  ;;  %8261 = vpow2.f32 %v6529_v53  ;;  %v13770_v60 = vadd.f32 %v5298_v23, %v5042_v42  ;;  %v294_v42 = vld [vmem:[%s16205_s2 + $0x260] sm:$0xff]  ;;  %v17412_v23 = vld [vmem:[#allocation66_spill] sm:$0xff] }
 0x56e   :  { %v8256_v10 = vpop.eup %8255  ;;  %v3762_v63 = vcvt.s32.f32 %v13748_v51  ;;  %v4657_v14 = vmul.f32 %v4529_v62, %v4145_v28  ;;  %v3763_v22 = vcvt.s32.f32 %v13751_v25  ;;  %v13786_v58 = vsub.f32 0.0, %v279_v20 }
 0x56f   :  { %v8258_v0 = vpop.eup %8257  ;;  %v5624_v13 = vmul.f32 %v8256_v10, %v13666_v12  ;;  %v4658_v43 = vmul.f32 %v4530_v59, %v4146_v21  ;;  %v6964_v12 = vsel %vm6836_vm0, %v6708_v26, 0.0  ;;  %vm6197_vm9 = vcmp.gt.f32.partialorder %v13721_v6, 0.0  ;;  %v17414_v10 = vld [vmem:[#allocation68_spill] sm:$0xff] }
 0x570   :  { %17411 = vst [vmem:[#allocation182_spill] sm:$0xff] %v13786_v58  ;;  %v5626_v2 = vmul.f32 %v8258_v0, %v13678_v39  ;;  %vm6198_vm11 = vcmp.gt.f32.partialorder %v13726_v54, 0.0  ;;  %vm4785_vm4 = vcmp.eq.f32.partialorder %v4657_v14, 0.0  ;;  %v13800_v26 = vsub.f32 0.0, %v294_v42  ;;  %v17419_v42 = vld [vmem:[#allocation29_spill] sm:$0xff] }
 0x571   :  { %v6067_v53 = vsel %vm13766_vm2, 1.0, %v5624_v13  ;;  %vm4786_vm15 = vcmp.eq.f32.partialorder %v4658_v43, 0.0  ;;  %v3890_v39 = vadd.f32 1.0, %v3762_v63  ;;  %v4913_v4 = vsel %vm4785_vm4, 1.0, %v4657_v14  ;;  %v17416_v63 = vld [vmem:[#allocation155_spill] sm:$0xff]  ;;  %v17417_v13 = vld [vmem:[#allocation156_spill] sm:$0xff] }
 0x572   :  { %v6068_v28 = vsel %vm13778_vm14, 1.0, %v5626_v2  ;;  %v7091_v21 = vmul.f32 %v6963_v45, %v6067_v53  ;;  %v4914_v33 = vsel %vm4786_vm15, 1.0, %v4658_v43  ;;  %v3891_v3 = vadd.f32 1.0, %v3763_v22  ;;  %v17418_v14 = vld [vmem:[#allocation27_spill] sm:$0xff] }
 0x573   :  { %v7092_v50 = vmul.f32 %v6964_v12, %v6068_v28  ;;  %v6325_v62 = vadd.f32 1.0, %v13721_v6  ;;  %v6326_v59 = vadd.f32 1.0, %v13726_v54  ;;  %8263 = vrcp.f32 %v4913_v4 }
 0x574   :  { %v13803_v20 = vadd.f32 %v7091_v21, %v17412_v23  ;;  %8265 = vrcp.f32 %v4914_v33  ;;  %v13810_v49 = vsub.f32 0.0, %v295_v30  ;;  %v5171_v0 = vsub.f32 1.0, %v17416_v63 }
 0x575   :  { %v13808_v45 = vadd.f32 %v7092_v50, %v17414_v10  ;;  %v5172_v31 = vsub.f32 1.0, %v17417_v13  ;;  %v3308_v43 = vadd.f32 %v3105_v32, %v17418_v14  ;;  %v3309_v22 = vadd.f32 %v3105_v32, %v17419_v42 }
 0x576   :  { %17413 = vst [vmem:[#allocation161_spill] sm:$0xff] %v13803_v20  ;;  %v4019_v12 = vadd.f32 %v10176_v19, %v3890_v39  ;;  %v8260_v2 = vpop.eup %8259  ;;  %vm5809_vm6 = vcmp.eq.s32.totalorder %v13669_v48, 0  ;;  %vm5810_vm7 = vcmp.eq.s32.totalorder %v13672_v7, 0  ;;  %v6531_v53 = vmul.f32 1.442695, %v13800_v26 }
 0x577   :  { %17415 = vst [vmem:[#allocation82_spill] sm:$0xff] %v13808_v45  ;;  %v4020_v28 = vadd.f32 %v10176_v19, %v3891_v3  ;;  %v8262_v21 = vpop.eup %8261  ;;  %v4275_v50 = vsub.f32 %v10176_v19, %v3308_v43  ;;  %v4276_v4 = vsub.f32 %v10176_v19, %v3309_v22  ;;  %v3400_v33 = vadd.s32 312, %v9999_v52  ;;  %vm13852_vm10 = vmand %vm5809_vm6, %vm11411_vm1 }
 0x578   :  { %v4147_v30 = vsub.f32 %v4019_v12, %v3308_v43  ;;  %vm6837_vm12 = vcmp.lt.s32.totalorder %v13669_v48, 512  ;;  %vm6838_vm8 = vcmp.lt.s32.totalorder %v13672_v7, 512  ;;  %v6533_v39 = vmul.f32 1.442695, %v13810_v49  ;;  %vm13866_vm3 = vmand %vm5810_vm7, %vm11411_vm1 }
 0x579   :  { %v4148_v32 = vsub.f32 %v4020_v28, %v3309_v22  ;;  %v5299_v14 = vmul.f32 %v5171_v0, %v4275_v50  ;;  %v5300_v3 = vmul.f32 %v5172_v31, %v4276_v4  ;;  %v6709_v42 = vsel %vm6197_vm9, %v6325_v62, %v8260_v2 }
 0x57a   :  { %v7579_v23 = vadd.f32 -1.0, %v4147_v30  ;;  %v5043_v10 = vmul.f32 %v4147_v30, %v17416_v63  ;;  %v3468_v45 = vmul.u32 256, %v3400_v33  ;;  %v6710_v20 = vsel %vm6198_vm11, %v6326_v59, %v8262_v21 }
 0x57b   :  { %v7580_v43 = vadd.f32 -1.0, %v4148_v32  ;;  %v5044_v12 = vmul.f32 %v4148_v32, %v17417_v13  ;;  %8267 = vpow2.f32 %v6531_v53  ;;  %v13846_v31 = vadd.f32 1.0, %v13591_v41  ;;  %v17431_v53 = vld [vmem:[#allocation33_spill] sm:$0xff] }
 0x57c   :  { %v4531_v34 = vadd.f32 %v7579_v23, %v17416_v63  ;;  %v13834_v15 = vadd.f32 %v5299_v14, %v5043_v10  ;;  %v13840_v0 = vadd.s32 %v3468_v45, %v10027_v18  ;;  %v13843_v6 = vadd.s32 %v3468_v45, %v10070_v44  ;;  %v17425_v14 = vld [vmem:[#allocation31_spill] sm:$0xff] }
 0x57d   :  { %v4532_v22 = vadd.f32 %v7580_v43, %v17417_v13  ;;  %v13837_v28 = vadd.f32 %v5300_v3, %v5044_v12  ;;  %v8264_v62 = vpop.eup %8263  ;;  %17420 = vst [vmem:[#allocation183_spill] sm:$0xff] %v13846_v31  ;;  %vm6199_vm5 = vcmp.gt.f32.partialorder %v13800_v26, 0.0  ;;  %8269 = vpow2.f32 %v6533_v39 }
 0x57e   :  { %v4659_v59 = vmul.f32 %v4531_v34, %v4147_v30  ;;  %v8266_v63 = vpop.eup %8265  ;;  %v6965_v45 = vsel %vm6837_vm12, %v6709_v42, 0.0  ;;  %v6966_v13 = vsel %vm6838_vm8, %v6710_v20, 0.0  ;;  %v5628_v2 = vmul.f32 %v8264_v62, %v13758_v35  ;;  %v296_v34 = vld [vmem:[%s16205_s2 + $0x270] sm:$0xff]  ;;  %v3110_v30 = vpop.permute.xlu0 %3109  ;;  %v17426_v42 = vld [vmem:[#allocation239_spill] sm:$0xff]  ;;  %v17428_v62 = vld [vmem:[#allocation245_spill] sm:$0xff] }
 0x57f   :  { %v4660_v21 = vmul.f32 %v4532_v22, %v4148_v32  ;;  %v5630_v48 = vmul.f32 %v8266_v63, %v13770_v60  ;;  %vm6200_vm13 = vcmp.gt.f32.partialorder %v13810_v49, 0.0  ;;  %v3764_v35 = vcvt.s32.f32 %v13840_v0  ;;  %v297_v60 = vld [vmem:[%s16205_s2 + $0x278] sm:$0xff] }
 0x580   :  { %vm4787_vm0 = vcmp.eq.f32.partialorder %v4659_v59, 0.0  ;;  %v3765_v20 = vcvt.s32.f32 %v13843_v6  ;;  %v6069_v7 = vsel %vm13852_vm10, 1.0, %v5628_v2  ;;  %v6327_v50 = vadd.f32 1.0, %v13800_v26 }
 0x581   :  { %vm4788_vm2 = vcmp.eq.f32.partialorder %v4660_v21, 0.0  ;;  %v4915_v4 = vsel %vm4787_vm0, 1.0, %v4659_v59  ;;  %v6070_v33 = vsel %vm13866_vm3, 1.0, %v5630_v48  ;;  %v7093_v39 = vmul.f32 %v6965_v45, %v6069_v7  ;;  %v17430_v45 = vld [vmem:[#allocation157_spill] sm:$0xff] }
 0x582   :  { %vm5811_vm14 = vcmp.eq.s32.totalorder %v13748_v51, 0  ;;  %v13886_v32 = vsub.f32 0.0, %v296_v34  ;;  %v7094_v23 = vmul.f32 %v6966_v13, %v6070_v33  ;;  %vm5812_vm9 = vcmp.eq.s32.totalorder %v13751_v25, 0 }
 0x583   :  { %v4916_v10 = vsel %vm4788_vm2, 1.0, %v4660_v21  ;;  %8271 = vrcp.f32 %v4915_v4  ;;  %v3310_v3 = vadd.f32 %v3110_v30, %v17425_v14  ;;  %v13891_v43 = vadd.f32 %v7093_v39, %v17426_v42  ;;  %vm13933_vm15 = vmand %vm5811_vm14, %vm11411_vm1 }
 0x584   :  { %8273 = vrcp.f32 %v4916_v10  ;;  %v3892_v12 = vadd.f32 1.0, %v3764_v35  ;;  %v3893_v22 = vadd.f32 1.0, %v3765_v20  ;;  %v13894_v54 = vadd.f32 %v7094_v23, %v17428_v62  ;;  %v17432_v35 = vld [vmem:[#allocation158_spill] sm:$0xff]  ;;  %vm13945_vm6 = vmand %vm5812_vm9, %vm11411_vm1 }
 0x585   :  { %17427 = vst [vmem:[#allocation58_spill] sm:$0xff] %v13891_v43  ;;  %v6328_v59 = vadd.f32 1.0, %v13810_v49  ;;  %v13897_v63 = vsub.f32 0.0, %v297_v60  ;;  %v5173_v13 = vsub.f32 1.0, %v17430_v45  ;;  %v8268_v2 = vpop.eup %8267  ;;  %vm6839_vm11 = vcmp.lt.s32.totalorder %v13748_v51, 512 }
 0x586   :  { %17429 = vst [vmem:[#allocation176_spill] sm:$0xff] %v13894_v54  ;;  %v3311_v21 = vadd.f32 %v3110_v30, %v17431_v53  ;;  %v4021_v34 = vadd.f32 %v10176_v19, %v3892_v12  ;;  %v4022_v48 = vadd.f32 %v10176_v19, %v3893_v22  ;;  %vm6840_vm4 = vcmp.lt.s32.totalorder %v13751_v25, 512  ;;  %v299_v25 = vld [vmem:[%s16205_s2 + $0x288] sm:$0xff] }
 0x587   :  { %v5174_v20 = vsub.f32 1.0, %v17432_v35  ;;  %v4277_v7 = vsub.f32 %v10176_v19, %v3310_v3  ;;  %v3401_v4 = vadd.s32 320, %v9999_v52  ;;  %v8270_v33 = vpop.eup %8269  ;;  %v6535_v39 = vmul.f32 1.442695, %v13886_v32 }
 0x588   :  { %v4149_v60 = vsub.f32 %v4021_v34, %v3310_v3  ;;  %v4150_v23 = vsub.f32 %v4022_v48, %v3311_v21  ;;  %v4278_v10 = vsub.f32 %v10176_v19, %v3311_v21  ;;  %v6711_v30 = vsel %vm6199_vm5, %v6327_v50, %v8268_v2 }
 0x589   :  { %v6537_v14 = vmul.f32 1.442695, %v13897_v63  ;;  %v5301_v42 = vmul.f32 %v5173_v13, %v4277_v7  ;;  %v3469_v12 = vmul.u32 256, %v3401_v4  ;;  %v6712_v43 = vsel %vm6200_vm13, %v6328_v59, %v8270_v33 }
 0x58a   :  { %v7581_v22 = vadd.f32 -1.0, %v4149_v60  ;;  %v7582_v62 = vadd.f32 -1.0, %v4150_v23  ;;  %v5045_v53 = vmul.f32 %v4149_v60, %v17430_v45  ;;  %v5046_v54 = vmul.f32 %v4150_v23, %v17432_v35 }
 0x58b   :  { %v5302_v3 = vmul.f32 %v5174_v20, %v4278_v10  ;;  %v13918_v34 = vadd.s32 %v3469_v12, %v10027_v18  ;;  %v13921_v26 = vadd.s32 %v3469_v12, %v10070_v44  ;;  %8275 = vpow2.f32 %v6535_v39 }
 0x58c   :  { %v4533_v50 = vadd.f32 %v7581_v22, %v17430_v45  ;;  %v4534_v13 = vadd.f32 %v7582_v62, %v17432_v35  ;;  %v13925_v2 = vadd.f32 %v5301_v42, %v5045_v53  ;;  %v6967_v48 = vsel %vm6839_vm11, %v6711_v30, 0.0  ;;  %v3115_v62 = vpop.permute.xlu1 %3114  ;;  %v17438_v53 = vld [vmem:[#allocation70_spill] sm:$0xff] }
 0x58d   :  { %v8272_v21 = vpop.eup %8271  ;;  %8277 = vpow2.f32 %v6537_v14  ;;  %v13937_v59 = vadd.f32 %v5302_v3, %v5046_v54  ;;  %v3766_v45 = vcvt.s32.f32 %v13918_v34  ;;  %v298_v54 = vld [vmem:[%s16205_s2 + $0x280] sm:$0xff]  ;;  %v3767_v33 = vcvt.s32.f32 %v13921_v26 }
 0x58e   :  { %v8274_v35 = vpop.eup %8273  ;;  %v5632_v20 = vmul.f32 %v8272_v21, %v13834_v15  ;;  %v4661_v51 = vmul.f32 %v4533_v50, %v4149_v60  ;;  %v4662_v4 = vmul.f32 %v4534_v13, %v4150_v23  ;;  %v13954_v39 = vadd.f32 1.0, %v13786_v58  ;;  %v17440_v21 = vld [vmem:[#allocation72_spill] sm:$0xff] }
 0x58f   :  { %v6968_v15 = vsel %vm6840_vm4, %v6712_v43, 0.0  ;;  %v5634_v10 = vmul.f32 %v8274_v35, %v13837_v28  ;;  %vm6201_vm7 = vcmp.gt.f32.partialorder %v13886_v32, 0.0  ;;  %vm6202_vm12 = vcmp.gt.f32.partialorder %v13897_v63, 0.0 }
 0x590   :  { %17437 = vst [vmem:[#allocation206_spill] sm:$0xff] %v13954_v39  ;;  %v6071_v60 = vsel %vm13933_vm15, 1.0, %v5632_v20  ;;  %vm4789_vm8 = vcmp.eq.f32.partialorder %v4661_v51, 0.0  ;;  %vm4790_vm10 = vcmp.eq.f32.partialorder %v4662_v4, 0.0  ;;  %v13968_v43 = vsub.f32 0.0, %v298_v54  ;;  %v17443_v20 = vld [vmem:[#allocation163_spill] sm:$0xff] }
 0x591   :  { %v6072_v23 = vsel %vm13945_vm6, 1.0, %v5634_v10  ;;  %v7095_v30 = vmul.f32 %v6967_v48, %v6071_v60  ;;  %v3894_v28 = vadd.f32 1.0, %v3766_v45  ;;  %v4917_v42 = vsel %vm4789_vm8, 1.0, %v4661_v51  ;;  %v17442_v45 = vld [vmem:[#allocation162_spill] sm:$0xff]  ;;  %v17444_v51 = vld [vmem:[#allocation35_spill] sm:$0xff]  ;;  %v17445_v54 = vld [vmem:[#allocation37_spill] sm:$0xff] }
 0x592   :  { %v7096_v14 = vmul.f32 %v6968_v15, %v6072_v23  ;;  %v4918_v12 = vsel %vm4790_vm10, 1.0, %v4662_v4  ;;  %v3895_v22 = vadd.f32 1.0, %v3767_v33  ;;  %v6329_v50 = vadd.f32 1.0, %v13886_v32 }
 0x593   :  { %v13971_v3 = vadd.f32 %v7095_v30, %v17438_v53  ;;  %v6330_v13 = vadd.f32 1.0, %v13897_v63  ;;  %8279 = vrcp.f32 %v4917_v42  ;;  %v13978_v49 = vsub.f32 0.0, %v299_v25 }
 0x594   :  { %v13976_v48 = vadd.f32 %v7096_v14, %v17440_v21  ;;  %8281 = vrcp.f32 %v4918_v12  ;;  %v5175_v35 = vsub.f32 1.0, %v17442_v45  ;;  %v5176_v7 = vsub.f32 1.0, %v17443_v20 }
 0x595   :  { %17439 = vst [vmem:[#allocation289_spill] sm:$0xff] %v13971_v3  ;;  %v3312_v4 = vadd.f32 %v3115_v62, %v17444_v51  ;;  %v3313_v33 = vadd.f32 %v3115_v62, %v17445_v54  ;;  %v4023_v15 = vadd.f32 %v10176_v19, %v3894_v28  ;;  %v8276_v10 = vpop.eup %8275  ;;  %vm5813_vm5 = vcmp.eq.s32.totalorder %v13840_v0, 0 }
 0x596   :  { %17441 = vst [vmem:[#allocation42_spill] sm:$0xff] %v13976_v48  ;;  %vm5814_vm3 = vcmp.eq.s32.totalorder %v13843_v6, 0  ;;  %v6539_v60 = vmul.f32 1.442695, %v13968_v43  ;;  %v4024_v23 = vadd.f32 %v10176_v19, %v3895_v22  ;;  %v3402_v12 = vadd.s32 328, %v9999_v52  ;;  %vm14020_vm2 = vmand %vm5813_vm5, %vm11411_vm1 }
 0x597   :  { %v8278_v30 = vpop.eup %8277  ;;  %v4151_v25 = vsub.f32 %v4023_v15, %v3312_v4  ;;  %v4279_v14 = vsub.f32 %v10176_v19, %v3312_v4  ;;  %v4280_v42 = vsub.f32 %v10176_v19, %v3313_v33  ;;  %vm6841_vm13 = vcmp.lt.s32.totalorder %v13840_v0, 512  ;;  %vm14034_vm9 = vmand %vm5814_vm3, %vm11411_vm1 }
 0x598   :  { %vm6842_vm0 = vcmp.lt.s32.totalorder %v13843_v6, 512  ;;  %v6541_v28 = vmul.f32 1.442695, %v13978_v49  ;;  %v4152_v62 = vsub.f32 %v4024_v23, %v3313_v33  ;;  %v6713_v54 = vsel %vm6201_vm7, %v6329_v50, %v8276_v10 }
 0x599   :  { %v7583_v53 = vadd.f32 -1.0, %v4151_v25  ;;  %v5047_v21 = vmul.f32 %v4151_v25, %v17442_v45  ;;  %v5303_v51 = vmul.f32 %v5175_v35, %v4279_v14  ;;  %v5304_v22 = vmul.f32 %v5176_v7, %v4280_v42 }
 0x59a   :  { %v7584_v4 = vadd.f32 -1.0, %v4152_v62  ;;  %v5048_v15 = vmul.f32 %v4152_v62, %v17443_v20  ;;  %v3470_v39 = vmul.u32 256, %v3402_v12  ;;  %v6714_v48 = vsel %vm6202_vm12, %v6330_v13, %v8278_v30 }
 0x59b   :  { %8283 = vpow2.f32 %v6539_v60  ;;  %v4535_v3 = vadd.f32 %v7583_v53, %v17442_v45  ;;  %v14002_v31 = vadd.f32 %v5303_v51, %v5047_v21  ;;  %v14014_v7 = vmul.f32 1.442695, %v13591_v41  ;;  %v17450_v51 = vld [vmem:[#allocation39_spill] sm:$0xff]  ;;  %v17456_v60 = vld [vmem:[#allocation41_spill] sm:$0xff] }
 0x59c   :  { %v4536_v33 = vadd.f32 %v7584_v4, %v17443_v20  ;;  %v14005_v23 = vadd.f32 %v5304_v22, %v5048_v15  ;;  %v14008_v35 = vadd.s32 %v3470_v39, %v10027_v18  ;;  %v14011_v32 = vadd.s32 %v3470_v39, %v10070_v44 }
 0x59d   :  { %v8280_v50 = vpop.eup %8279  ;;  %vm6203_vm14 = vcmp.gt.f32.partialorder %v13968_v43, 0.0  ;;  %8285 = vpow2.f32 %v6541_v28  ;;  %v4663_v13 = vmul.f32 %v4535_v3, %v4151_v25  ;;  %v6969_v39 = vsel %vm6841_vm13, %v6713_v54, 0.0  ;;  %v300_v3 = vld [vmem:[%s16205_s2 + $0x290] sm:$0xff]  ;;  %v3120_v25 = vpop.permute.xlu0 %3119 }
 0x59e   :  { %v8282_v45 = vpop.eup %8281  ;;  %v6970_v20 = vsel %vm6842_vm0, %v6714_v48, 0.0  ;;  %v5636_v10 = vmul.f32 %v8280_v50, %v13925_v2  ;;  %v4664_v30 = vmul.f32 %v4536_v33, %v4152_v62  ;;  %vm6204_vm11 = vcmp.gt.f32.partialorder %v13978_v49, 0.0  ;;  %v17451_v54 = vld [vmem:[#allocation254_spill] sm:$0xff]  ;;  %v17453_v50 = vld [vmem:[#allocation24_spill] sm:$0xff] }
 0x59f   :  { %v5638_v0 = vmul.f32 %v8282_v45, %v13937_v59  ;;  %vm4791_vm4 = vcmp.eq.f32.partialorder %v4663_v13, 0.0  ;;  %v3768_v2 = vcvt.s32.f32 %v14008_v35  ;;  %v3769_v48 = vcvt.s32.f32 %v14011_v32  ;;  %v301_v59 = vld [vmem:[%s16205_s2 + $0x298] sm:$0xff] }
 0x5a0   :  { %v6073_v6 = vsel %vm14020_vm2, 1.0, %v5636_v10  ;;  %v6331_v14 = vadd.f32 1.0, %v13968_v43  ;;  %vm4792_vm15 = vcmp.eq.f32.partialorder %v4664_v30, 0.0  ;;  %v4919_v42 = vsel %vm4791_vm4, 1.0, %v4663_v13 }
 0x5a1   :  { %v6074_v12 = vsel %vm14034_vm9, 1.0, %v5638_v0  ;;  %v7097_v28 = vmul.f32 %v6969_v39, %v6073_v6  ;;  %vm5815_vm6 = vcmp.eq.s32.totalorder %v13918_v34, 0  ;;  %v14054_v62 = vsub.f32 0.0, %v300_v3  ;;  %v17455_v39 = vld [vmem:[#allocation164_spill] sm:$0xff] }
 0x5a2   :  { %v7098_v53 = vmul.f32 %v6970_v20, %v6074_v12  ;;  %vm5816_vm7 = vcmp.eq.s32.totalorder %v13921_v26, 0  ;;  %v4920_v21 = vsel %vm4792_vm15, 1.0, %v4664_v30  ;;  %8287 = vrcp.f32 %v4919_v42  ;;  %vm14101_vm10 = vmand %vm5815_vm6, %vm11411_vm1 }
 0x5a3   :  { %v3314_v22 = vadd.f32 %v3120_v25, %v17450_v51  ;;  %v14059_v4 = vadd.f32 %v7097_v28, %v17451_v54  ;;  %8289 = vrcp.f32 %v4920_v21  ;;  %v3896_v15 = vadd.f32 1.0, %v3768_v2  ;;  %v17457_v2 = vld [vmem:[#allocation165_spill] sm:$0xff]  ;;  %vm14113_vm5 = vmand %vm5816_vm7, %vm11411_vm1 }
 0x5a4   :  { %v3897_v33 = vadd.f32 1.0, %v3769_v48  ;;  %v14062_v63 = vadd.f32 %v7098_v53, %v17453_v50  ;;  %v6332_v13 = vadd.f32 1.0, %v13978_v49  ;;  %v14065_v45 = vsub.f32 0.0, %v301_v59 }
 0x5a5   :  { %17452 = vst [vmem:[#allocation207_spill] sm:$0xff] %v14059_v4  ;;  %v5177_v20 = vsub.f32 1.0, %v17455_v39  ;;  %v8284_v10 = vpop.eup %8283  ;;  %vm6843_vm12 = vcmp.lt.s32.totalorder %v13918_v34, 512  ;;  %v3315_v30 = vadd.f32 %v3120_v25, %v17456_v60  ;;  %v4025_v3 = vadd.f32 %v10176_v19, %v3896_v15 }
 0x5a6   :  { %17454 = vst [vmem:[#allocation84_spill] sm:$0xff] %v14062_v63  ;;  %v4026_v0 = vadd.f32 %v10176_v19, %v3897_v33  ;;  %vm6844_vm8 = vcmp.lt.s32.totalorder %v13921_v26, 512  ;;  %v5178_v48 = vsub.f32 1.0, %v17457_v2  ;;  %v4281_v6 = vsub.f32 %v10176_v19, %v3314_v22  ;;  %v303_v26 = vld [vmem:[%s16205_s2 + $0x2a8] sm:$0xff] }
 0x5a7   :  { %v3403_v42 = vadd.s32 336, %v9999_v52  ;;  %v8286_v12 = vpop.eup %8285  ;;  %v6543_v28 = vmul.f32 1.442695, %v14054_v62  ;;  %v4153_v59 = vsub.f32 %v4025_v3, %v3314_v22  ;;  %v4282_v21 = vsub.f32 %v10176_v19, %v3315_v30 }
 0x5a8   :  { %v4154_v53 = vsub.f32 %v4026_v0, %v3315_v30  ;;  %v6715_v25 = vsel %vm6203_vm14, %v6331_v14, %v8284_v10  ;;  %v6545_v51 = vmul.f32 1.442695, %v14065_v45  ;;  %v5305_v54 = vmul.f32 %v5177_v20, %v4281_v6 }
 0x5a9   :  { %v3471_v15 = vmul.u32 256, %v3403_v42  ;;  %v7585_v33 = vadd.f32 -1.0, %v4153_v59  ;;  %v5049_v60 = vmul.f32 %v4153_v59, %v17455_v39  ;;  %v6716_v4 = vsel %vm6204_vm11, %v6332_v13, %v8286_v12 }
 0x5aa   :  { %v7586_v50 = vadd.f32 -1.0, %v4154_v53  ;;  %v5050_v63 = vmul.f32 %v4154_v53, %v17457_v2  ;;  %v5306_v22 = vmul.f32 %v5178_v48, %v4282_v21  ;;  %8291 = vpow2.f32 %v6543_v28 }
 0x5ab   :  { %v14086_v3 = vadd.s32 %v3471_v15, %v10027_v18  ;;  %v14089_v43 = vadd.s32 %v3471_v15, %v10070_v44  ;;  %v4537_v14 = vadd.f32 %v7585_v33, %v17455_v39  ;;  %v14093_v10 = vadd.f32 %v5305_v54, %v5049_v60  ;;  %v3125_v15 = vpop.permute.xlu1 %3124  ;;  %v17462_v33 = vld [vmem:[#allocation22_spill] sm:$0xff] }
 0x5ac   :  { %v4538_v20 = vadd.f32 %v7586_v50, %v17457_v2  ;;  %v8288_v30 = vpop.eup %8287  ;;  %v6971_v0 = vsel %vm6843_vm12, %v6715_v25, 0.0  ;;  %8293 = vpow2.f32 %v6545_v51  ;;  %v14105_v13 = vadd.f32 %v5306_v22, %v5050_v63  ;;  %v302_v63 = vld [vmem:[%s16205_s2 + $0x2a0] sm:$0xff] }
 0x5ad   :  { %v3770_v39 = vcvt.s32.f32 %v14086_v3  ;;  %v8290_v2 = vpop.eup %8289  ;;  %v5640_v48 = vmul.f32 %v8288_v30, %v14002_v31  ;;  %v4665_v34 = vmul.f32 %v4537_v14, %v4153_v59  ;;  %v3771_v12 = vcvt.s32.f32 %v14089_v43  ;;  %v17464_v14 = vld [vmem:[#allocation255_spill] sm:$0xff] }
 0x5ae   :  { %v4666_v42 = vmul.f32 %v4538_v20, %v4154_v53  ;;  %8295 = vpow2.f32 %v14014_v7  ;;  %v6972_v31 = vsel %vm6844_vm8, %v6716_v4, 0.0  ;;  %v5642_v28 = vmul.f32 %v8290_v2, %v14005_v23 }
 0x5af   :  { %vm6205_vm3 = vcmp.gt.f32.partialorder %v14054_v62, 0.0  ;;  %v6075_v21 = vsel %vm14101_vm10, 1.0, %v5640_v48  ;;  %vm6206_vm13 = vcmp.gt.f32.partialorder %v14065_v45, 0.0  ;;  %vm4793_vm0 = vcmp.eq.f32.partialorder %v4665_v34, 0.0  ;;  %v17468_v48 = vld [vmem:[#allocation43_spill] sm:$0xff] }
 0x5b0   :  { %vm4794_vm2 = vcmp.eq.f32.partialorder %v4666_v42, 0.0  ;;  %v6076_v59 = vsel %vm14113_vm5, 1.0, %v5642_v28  ;;  %v7099_v53 = vmul.f32 %v6971_v0, %v6075_v21  ;;  %v14134_v7 = vsub.f32 0.0, %v302_v63  ;;  %v17466_v0 = vld [vmem:[#allocation170_spill] sm:$0xff] }
 0x5b1   :  { %v3898_v23 = vadd.f32 1.0, %v3770_v39  ;;  %v7100_v4 = vmul.f32 %v6972_v31, %v6076_v59  ;;  %v4921_v25 = vsel %vm4793_vm0, 1.0, %v4665_v34  ;;  %v4922_v51 = vsel %vm4794_vm2, 1.0, %v4666_v42  ;;  %v17467_v39 = vld [vmem:[#allocation171_spill] sm:$0xff]  ;;  %v17469_v34 = vld [vmem:[#allocation45_spill] sm:$0xff] }
 0x5b2   :  { %v3899_v54 = vadd.f32 1.0, %v3771_v12  ;;  %v14137_v50 = vadd.f32 %v7099_v53, %v17462_v33  ;;  %v6333_v60 = vadd.f32 1.0, %v14054_v62  ;;  %v6334_v22 = vadd.f32 1.0, %v14065_v45 }
 0x5b3   :  { %8297 = vrcp.f32 %v4921_v25  ;;  %v14142_v20 = vadd.f32 %v7100_v4, %v17464_v14  ;;  %v14144_v30 = vsub.f32 0.0, %v303_v26  ;;  %v5179_v49 = vsub.f32 1.0, %v17466_v0 }
 0x5b4   :  { %17463 = vst [vmem:[#allocation279_spill] sm:$0xff] %v14137_v50  ;;  %8299 = vrcp.f32 %v4922_v51  ;;  %v5180_v2 = vsub.f32 1.0, %v17467_v39  ;;  %v3316_v6 = vadd.f32 %v3125_v15, %v17468_v48  ;;  %v3317_v42 = vadd.f32 %v3125_v15, %v17469_v34  ;;  %v8292_v12 = vpop.eup %8291 }
 0x5b5   :  { %17465 = vst [vmem:[#allocation166_spill] sm:$0xff] %v14142_v20  ;;  %v4027_v63 = vadd.f32 %v10176_v19, %v3898_v23  ;;  %vm5817_vm14 = vcmp.eq.s32.totalorder %v14008_v35, 0  ;;  %vm5818_vm9 = vcmp.eq.s32.totalorder %v14011_v32, 0  ;;  %v6547_v31 = vmul.f32 1.442695, %v14134_v7 }
 0x5b6   :  { %v4028_v28 = vadd.f32 %v10176_v19, %v3899_v54  ;;  %v8294_v21 = vpop.eup %8293  ;;  %v4283_v53 = vsub.f32 %v10176_v19, %v3316_v6  ;;  %v4284_v26 = vsub.f32 %v10176_v19, %v3317_v42  ;;  %v3404_v4 = vadd.s32 344, %v9999_v52  ;;  %vm14188_vm15 = vmand %vm5817_vm14, %vm11411_vm1 }
 0x5b7   :  { %v4155_v59 = vsub.f32 %v4027_v63, %v3316_v6  ;;  %vm6845_vm11 = vcmp.lt.s32.totalorder %v14008_v35, 512  ;;  %vm6846_vm4 = vcmp.lt.s32.totalorder %v14011_v32, 512  ;;  %v6549_v23 = vmul.f32 1.442695, %v14144_v30  ;;  %vm14202_vm7 = vmand %vm5818_vm9, %vm11411_vm1 }
 0x5b8   :  { %v4156_v25 = vsub.f32 %v4028_v28, %v3317_v42  ;;  %v14161_v51 = vpop.eup %8295  ;;  %v5307_v33 = vmul.f32 %v5179_v49, %v4283_v53  ;;  %v5308_v14 = vmul.f32 %v5180_v2, %v4284_v26  ;;  %v6717_v48 = vsel %vm6205_vm3, %v6333_v60, %v8292_v12  ;;  %v3130_v26 = vpop.permute.xlu0 %3129 }
 0x5b9   :  { %17470 = vst [vmem:[#allocation281_spill] sm:$0xff] %v14161_v51  ;;  %v7587_v15 = vadd.f32 -1.0, %v4155_v59  ;;  %v5051_v54 = vmul.f32 %v4155_v59, %v17466_v0  ;;  %v3472_v63 = vmul.u32 256, %v3404_v4  ;;  %v6718_v20 = vsel %vm6206_vm13, %v6334_v22, %v8294_v21  ;;  %v17481_v21 = vld [vmem:[#allocation49_spill] sm:$0xff] }
 0x5ba   :  { %v7588_v6 = vadd.f32 -1.0, %v4156_v25  ;;  %v5052_v34 = vmul.f32 %v4156_v25, %v17467_v39  ;;  %8301 = vpow2.f32 %v6547_v31  ;;  %v14182_v2 = vmul.f32 1.442695, %v13786_v58 }
 0x5bb   :  { %v4539_v42 = vadd.f32 %v7587_v15, %v17466_v0  ;;  %v14170_v28 = vadd.f32 %v5307_v33, %v5051_v54  ;;  %v14176_v49 = vadd.s32 %v3472_v63, %v10027_v18  ;;  %v14179_v62 = vadd.s32 %v3472_v63, %v10070_v44 }
 0x5bc   :  { %v4540_v50 = vadd.f32 %v7588_v6, %v17467_v39  ;;  %v14173_v51 = vadd.f32 %v5308_v14, %v5052_v34  ;;  %vm6207_vm6 = vcmp.gt.f32.partialorder %v14134_v7, 0.0  ;;  %8303 = vpow2.f32 %v6549_v23  ;;  %v17475_v14 = vld [vmem:[#allocation47_spill] sm:$0xff]  ;;  %v17476_v6 = vld [vmem:[#allocation145_spill] sm:$0xff] }
 0x5bd   :  { %v8298_v60 = vpop.eup %8297  ;;  %v4667_v22 = vmul.f32 %v4539_v42, %v4155_v59  ;;  %v6973_v39 = vsel %vm6845_vm11, %v6717_v48, 0.0  ;;  %v6974_v12 = vsel %vm6846_vm4, %v6718_v20, 0.0  ;;  %v304_v59 = vld [vmem:[%s16205_s2 + $0x2b0] sm:$0xff]  ;;  %vm6208_vm12 = vcmp.gt.f32.partialorder %v14144_v30, 0.0 }
 0x5be   :  { %v8300_v0 = vpop.eup %8299  ;;  %v5644_v31 = vmul.f32 %v8298_v60, %v14093_v10  ;;  %v4668_v53 = vmul.f32 %v4540_v50, %v4156_v25  ;;  %v3772_v10 = vcvt.s32.f32 %v14176_v49  ;;  %v3773_v20 = vcvt.s32.f32 %v14179_v62  ;;  %v305_v25 = vld [vmem:[%s16205_s2 + $0x2b8] sm:$0xff]  ;;  %v17478_v60 = vld [vmem:[#allocation256_spill] sm:$0xff] }
 0x5bf   :  { %v5646_v35 = vmul.f32 %v8300_v0, %v14105_v13  ;;  %vm4795_vm8 = vcmp.eq.f32.partialorder %v4667_v22, 0.0  ;;  %vm5791_vm10 = vcmp.eq.s32.totalorder %v12826_v57, 0  ;;  %v6335_v50 = vadd.f32 1.0, %v14134_v7 }
 0x5c0   :  { %v6077_v32 = vsel %vm14188_vm15, 1.0, %v5644_v31  ;;  %vm4796_vm5 = vcmp.eq.f32.partialorder %v4668_v53, 0.0  ;;  %v4923_v4 = vsel %vm4795_vm8, 1.0, %v4667_v22  ;;  %vm5819_vm3 = vcmp.eq.s32.totalorder %v14086_v3, 0  ;;  %vm14264_vm14 = vmand %vm5791_vm10, %vm11411_vm1 }
 0x5c1   :  { %v6078_v13 = vsel %vm14202_vm7, 1.0, %v5646_v35  ;;  %v7101_v23 = vmul.f32 %v6973_v39, %v6077_v32  ;;  %v14223_v15 = vsub.f32 0.0, %v304_v59  ;;  %vm5820_vm13 = vcmp.eq.s32.totalorder %v14089_v43, 0  ;;  %v17480_v39 = vld [vmem:[#allocation172_spill] sm:$0xff]  ;;  %vm14278_vm9 = vmand %vm5819_vm3, %vm11411_vm1 }
 0x5c2   :  { %v7102_v54 = vmul.f32 %v6974_v12, %v6078_v13  ;;  %v4924_v33 = vsel %vm4796_vm5, 1.0, %v4668_v53  ;;  %8305 = vrcp.f32 %v4923_v4  ;;  %v3318_v48 = vadd.f32 %v3130_v26, %v17475_v14  ;;  %vm14290_vm11 = vmand %vm5820_vm13, %vm11411_vm1 }
 0x5c3   :  { %v14228_v34 = vadd.f32 %v7101_v23, %v17476_v6  ;;  %8307 = vrcp.f32 %v4924_v33  ;;  %v3900_v63 = vadd.f32 1.0, %v3772_v10  ;;  %v3901_v42 = vadd.f32 1.0, %v3773_v20  ;;  %v17482_v10 = vld [vmem:[#allocation173_spill] sm:$0xff] }
 0x5c4   :  { %v14231_v45 = vadd.f32 %v7102_v54, %v17478_v60  ;;  %v6336_v22 = vadd.f32 1.0, %v14144_v30  ;;  %v14234_v0 = vsub.f32 0.0, %v305_v25  ;;  %v5181_v12 = vsub.f32 1.0, %v17480_v39  ;;  %v8302_v31 = vpop.eup %8301 }
 0x5c5   :  { %17477 = vst [vmem:[#allocation167_spill] sm:$0xff] %v14228_v34  ;;  %vm6847_vm0 = vcmp.lt.s32.totalorder %v14086_v3, 512  ;;  %v3319_v53 = vadd.f32 %v3130_v26, %v17481_v21  ;;  %v4029_v59 = vadd.f32 %v10176_v19, %v3900_v63  ;;  %v4030_v35 = vadd.f32 %v10176_v19, %v3901_v42 }
 0x5c6   :  { %17479 = vst [vmem:[#allocation154_spill] sm:$0xff] %v14231_v45  ;;  %vm6848_vm2 = vcmp.lt.s32.totalorder %v14089_v43, 512  ;;  %v5182_v20 = vsub.f32 1.0, %v17482_v10  ;;  %v4285_v32 = vsub.f32 %v10176_v19, %v3318_v48  ;;  %v3405_v4 = vadd.s32 352, %v9999_v52  ;;  %v8304_v13 = vpop.eup %8303  ;;  %v307_v43 = vld [vmem:[%s16205_s2 + $0x2c8] sm:$0xff] }
 0x5c7   :  { %v6551_v23 = vmul.f32 1.442695, %v14223_v15  ;;  %v4157_v25 = vsub.f32 %v4029_v59, %v3318_v48  ;;  %v4158_v54 = vsub.f32 %v4030_v35, %v3319_v53  ;;  %v4286_v33 = vsub.f32 %v10176_v19, %v3319_v53 }
 0x5c8   :  { %v6719_v26 = vsel %vm6207_vm6, %v6335_v50, %v8302_v31  ;;  %v6553_v14 = vmul.f32 1.442695, %v14234_v0  ;;  %v5309_v6 = vmul.f32 %v5181_v12, %v4285_v32  ;;  %v3473_v63 = vmul.u32 256, %v3405_v4 }
 0x5c9   :  { %v7589_v42 = vadd.f32 -1.0, %v4157_v25  ;;  %v7590_v60 = vadd.f32 -1.0, %v4158_v54  ;;  %v5053_v21 = vmul.f32 %v4157_v25, %v17480_v39  ;;  %v5054_v45 = vmul.f32 %v4158_v54, %v17482_v10 }
 0x5ca   :  { %v6720_v34 = vsel %vm6208_vm12, %v6336_v22, %v8304_v13  ;;  %v5310_v48 = vmul.f32 %v5182_v20, %v4286_v33  ;;  %v14255_v59 = vadd.s32 %v3473_v63, %v10027_v18  ;;  %v14258_v7 = vadd.s32 %v3473_v63, %v10070_v44 }
 0x5cb   :  { %8309 = vpow2.f32 %v6551_v23  ;;  %v4541_v12 = vadd.f32 %v7589_v42, %v17480_v39  ;;  %v4542_v30 = vadd.f32 %v7590_v60, %v17482_v10  ;;  %v14270_v22 = vadd.f32 %v5309_v6, %v5053_v21  ;;  %v3135_v60 = vpop.permute.xlu1 %3134  ;;  %v17489_v21 = vld [vmem:[#allocation257_spill] sm:$0xff] }
 0x5cc   :  { %v8306_v31 = vpop.eup %8305  ;;  %v6975_v53 = vsel %vm6847_vm0, %v6719_v26, 0.0  ;;  %8311 = vpow2.f32 %v6553_v14  ;;  %v14282_v35 = vadd.f32 %v5310_v48, %v5054_v45  ;;  %v3774_v39 = vcvt.s32.f32 %v14255_v59  ;;  %v306_v45 = vld [vmem:[%s16205_s2 + $0x2c0] sm:$0xff] }
 0x5cd   :  { %v8308_v10 = vpop.eup %8307  ;;  %v5648_v20 = vmul.f32 %v8306_v31, %v14170_v28  ;;  %v4669_v3 = vmul.f32 %v4541_v12, %v4157_v25  ;;  %v4670_v4 = vmul.f32 %v4542_v30, %v4158_v54  ;;  %v3775_v13 = vcvt.s32.f32 %v14258_v7  ;;  %v17491_v31 = vld [vmem:[#allocation260_spill] sm:$0xff] }
 0x5ce   :  { %v6976_v23 = vsel %vm6848_vm2, %v6720_v34, 0.0  ;;  %v5650_v33 = vmul.f32 %v8308_v10, %v14173_v51  ;;  %vm6209_vm4 = vcmp.gt.f32.partialorder %v14223_v15, 0.0  ;;  %vm6210_vm15 = vcmp.gt.f32.partialorder %v14234_v0, 0.0 }
 0x5cf   :  { %v6079_v25 = vsel %vm14278_vm9, 1.0, %v5648_v20  ;;  %vm4797_vm6 = vcmp.eq.f32.partialorder %v4669_v3, 0.0  ;;  %vm4798_vm7 = vcmp.eq.f32.partialorder %v4670_v4, 0.0  ;;  %v14313_v34 = vsub.f32 0.0, %v306_v45  ;;  %v17494_v20 = vld [vmem:[#allocation179_spill] sm:$0xff]  ;;  %v17496_v45 = vld [vmem:[#allocation53_spill] sm:$0xff] }
 0x5d0   :  { %v6080_v54 = vsel %vm14290_vm11, 1.0, %v5650_v33  ;;  %v7103_v26 = vmul.f32 %v6975_v53, %v6079_v25  ;;  %v3902_v51 = vadd.f32 1.0, %v3774_v39  ;;  %vm6181_vm12 = vcmp.gt.f32.partialorder %v13280_v9, 0.0  ;;  %v17493_v39 = vld [vmem:[#allocation178_spill] sm:$0xff] }
 0x5d1   :  { %v7104_v14 = vmul.f32 %v6976_v23, %v6080_v54  ;;  %v4925_v6 = vsel %vm4797_vm6, 1.0, %v4669_v3  ;;  %v4926_v63 = vsel %vm4798_vm7, 1.0, %v4670_v4  ;;  %v3903_v42 = vadd.f32 1.0, %v3775_v13  ;;  %v17495_v3 = vld [vmem:[#allocation51_spill] sm:$0xff] }
 0x5d2   :  { %v14317_v48 = vadd.f32 %v7103_v26, %v17489_v21  ;;  %v6337_v12 = vadd.f32 1.0, %v14223_v15  ;;  %v6338_v30 = vadd.f32 1.0, %v14234_v0  ;;  %8313 = vrcp.f32 %v4925_v6 }
 0x5d3   :  { %v14322_v53 = vadd.f32 %v7104_v14, %v17491_v31  ;;  %8315 = vrcp.f32 %v4926_v63  ;;  %v14324_v57 = vsub.f32 0.0, %v307_v43  ;;  %v5183_v10 = vsub.f32 1.0, %v17493_v39 }
 0x5d4   :  { %17490 = vst [vmem:[#allocation169_spill] sm:$0xff] %v14317_v48  ;;  %v5184_v32 = vsub.f32 1.0, %v17494_v20  ;;  %v3320_v4 = vadd.f32 %v3135_v60, %v17495_v3  ;;  %v3321_v13 = vadd.f32 %v3135_v60, %v17496_v45  ;;  %v4031_v23 = vadd.f32 %v10176_v19, %v3902_v51 }
 0x5d5   :  { %17492 = vst [vmem:[#allocation38_spill] sm:$0xff] %v14322_v53  ;;  %v8310_v33 = vpop.eup %8309  ;;  %vm5821_vm8 = vcmp.eq.s32.totalorder %v14176_v49, 0  ;;  %vm5822_vm10 = vcmp.eq.s32.totalorder %v14179_v62, 0  ;;  %v6555_v25 = vmul.f32 1.442695, %v14313_v34  ;;  %v4032_v54 = vadd.f32 %v10176_v19, %v3903_v42 }
 0x5d6   :  { %v8312_v26 = vpop.eup %8311  ;;  %v4159_v43 = vsub.f32 %v4031_v23, %v3320_v4  ;;  %v4287_v14 = vsub.f32 %v10176_v19, %v3320_v4  ;;  %v4288_v6 = vsub.f32 %v10176_v19, %v3321_v13  ;;  %v3406_v63 = vadd.s32 360, %v9999_v52  ;;  %vm14369_vm13 = vmand %vm5821_vm8, %vm11411_vm1 }
 0x5d7   :  { %vm6849_vm5 = vcmp.lt.s32.totalorder %v14176_v49, 512  ;;  %vm6850_vm3 = vcmp.lt.s32.totalorder %v14179_v62, 512  ;;  %v6557_v51 = vmul.f32 1.442695, %v14324_v57  ;;  %v4160_v60 = vsub.f32 %v4032_v54, %v3321_v13  ;;  %vm14383_vm2 = vmand %vm5822_vm10, %vm11411_vm1 }
 0x5d8   :  { %v7591_v21 = vadd.f32 -1.0, %v4159_v43  ;;  %v5055_v31 = vmul.f32 %v4159_v43, %v17493_v39  ;;  %v5311_v3 = vmul.f32 %v5183_v10, %v4287_v14  ;;  %v5312_v42 = vmul.f32 %v5184_v32, %v4288_v6  ;;  %v309_v14 = vld [vmem:[%s16205_s2 + $0x2d8] sm:$0xff] }
 0x5d9   :  { %v6721_v45 = vsel %vm6209_vm4, %v6337_v12, %v8310_v33  ;;  %v7592_v4 = vadd.f32 -1.0, %v4160_v60  ;;  %v5056_v23 = vmul.f32 %v4160_v60, %v17494_v20  ;;  %v3474_v28 = vmul.u32 256, %v3406_v63  ;;  %v3140_v33 = vpop.permute.xlu0 %3139 }
 0x5da   :  { %v6722_v53 = vsel %vm6210_vm15, %v6338_v30, %v8312_v26  ;;  %8317 = vpow2.f32 %v6555_v25  ;;  %v4543_v48 = vadd.f32 %v7591_v21, %v17493_v39  ;;  %v14348_v58 = vadd.f32 %v5311_v3, %v5055_v31  ;;  %v17502_v31 = vld [vmem:[#allocation263_spill] sm:$0xff]  ;;  %v17504_v30 = vld [vmem:[#allocation180_spill] sm:$0xff] }
 0x5db   :  { %v4544_v13 = vadd.f32 %v7592_v4, %v17494_v20  ;;  %v14351_v54 = vadd.f32 %v5312_v42, %v5056_v23  ;;  %v14354_v10 = vadd.s32 %v3474_v28, %v10027_v18  ;;  %v14357_v15 = vadd.s32 %v3474_v28, %v10070_v44  ;;  %v17503_v4 = vld [vmem:[#allocation8_spill] sm:$0xff] }
 0x5dc   :  { %v8314_v12 = vpop.eup %8313  ;;  %v14363_v0 = vsel %vm6181_vm12, %v13308_v38, %v13569_v16  ;;  %vm6211_vm0 = vcmp.gt.f32.partialorder %v14313_v34, 0.0  ;;  %8319 = vpow2.f32 %v6557_v51  ;;  %v4671_v28 = vmul.f32 %v4543_v48, %v4159_v43  ;;  %v308_v48 = vld [vmem:[%s16205_s2 + $0x2d0] sm:$0xff] }
 0x5dd   :  { %v8316_v39 = vpop.eup %8315  ;;  %v6977_v20 = vsel %vm6849_vm5, %v6721_v45, 0.0  ;;  %v6978_v9 = vsel %vm6850_vm3, %v6722_v53, 0.0  ;;  %v5652_v38 = vmul.f32 %v8314_v12, %v14270_v22  ;;  %v4672_v32 = vmul.f32 %v4544_v13, %v4160_v60  ;;  %v17501_v60 = vld [vmem:[#allocation55_spill] sm:$0xff] }
 0x5de   :  { %v5654_v49 = vmul.f32 %v8316_v39, %v14282_v35  ;;  %vm6212_vm9 = vcmp.gt.f32.partialorder %v14324_v57, 0.0  ;;  %vm4799_vm11 = vcmp.eq.f32.partialorder %v4671_v28, 0.0  ;;  %v3776_v22 = vcvt.s32.f32 %v14354_v10 }
 0x5df   :  { %v3777_v53 = vcvt.s32.f32 %v14357_v15  ;;  %vm5792_vm4 = vcmp.eq.s32.totalorder %v12832_v61, 0  ;;  %v6081_v62 = vsel %vm14369_vm13, 1.0, %v5652_v38  ;;  %v6339_v25 = vadd.f32 1.0, %v14313_v34  ;;  %v17517_v61 = vld [vmem:[#allocation186_spill] sm:$0xff] }
 0x5e0   :  { %vm4800_vm15 = vcmp.eq.f32.partialorder %v4672_v32, 0.0  ;;  %v4927_v26 = vsel %vm4799_vm11, 1.0, %v4671_v28  ;;  %v6082_v35 = vsel %vm14383_vm2, 1.0, %v5654_v49  ;;  %v7105_v43 = vmul.f32 %v6977_v20, %v6081_v62  ;;  %v17505_v20 = vld [vmem:[#allocation57_spill] sm:$0xff]  ;;  %vm14445_vm10 = vmand %vm5792_vm4, %vm11411_vm1 }
 0x5e1   :  { %vm5823_vm6 = vcmp.eq.s32.totalorder %v14255_v59, 0  ;;  %v14404_v6 = vsub.f32 0.0, %v308_v48  ;;  %v7106_v63 = vmul.f32 %v6978_v9, %v6082_v35  ;;  %vm5824_vm7 = vcmp.eq.s32.totalorder %v14258_v7, 0 }
 0x5e2   :  { %v4928_v51 = vsel %vm4800_vm15, 1.0, %v4672_v32  ;;  %8321 = vrcp.f32 %v4927_v26  ;;  %v3322_v21 = vadd.f32 %v3140_v33, %v17501_v60  ;;  %v14409_v3 = vadd.f32 %v7105_v43, %v17502_v31  ;;  %v17506_v32 = vld [vmem:[#allocation181_spill] sm:$0xff]  ;;  %vm14459_vm5 = vmand %vm5823_vm6, %vm11411_vm1 }
 0x5e3   :  { %8323 = vrcp.f32 %v4928_v51  ;;  %v3904_v42 = vadd.f32 1.0, %v3776_v22  ;;  %v3905_v45 = vadd.f32 1.0, %v3777_v53  ;;  %v14412_v23 = vadd.f32 %v7106_v63, %v17503_v4  ;;  %vm14471_vm3 = vmand %vm5824_vm7, %vm11411_vm1 }
 0x5e4   :  { %v6340_v13 = vadd.f32 1.0, %v14324_v57  ;;  %v14415_v12 = vsub.f32 0.0, %v309_v14  ;;  %v5185_v28 = vsub.f32 1.0, %v17504_v30  ;;  %v8318_v39 = vpop.eup %8317  ;;  %vm6851_vm12 = vcmp.lt.s32.totalorder %v14255_v59, 512 }
 0x5e5   :  { %v3323_v9 = vadd.f32 %v3140_v33, %v17505_v20  ;;  %v4033_v38 = vadd.f32 %v10176_v19, %v3904_v42  ;;  %v4034_v16 = vadd.f32 %v10176_v19, %v3905_v45  ;;  %vm6852_vm8 = vcmp.lt.s32.totalorder %v14258_v7, 512  ;;  %v311_v7 = vld [vmem:[%s16205_s2 + $0x2e8] sm:$0xff] }
 0x5e6   :  { %v5186_v48 = vsub.f32 1.0, %v17506_v32  ;;  %v4289_v49 = vsub.f32 %v10176_v19, %v3322_v21  ;;  %v3407_v22 = vadd.s32 368, %v9999_v52  ;;  %v8320_v53 = vpop.eup %8319  ;;  %v6559_v62 = vmul.f32 1.442695, %v14404_v6 }
 0x5e7   :  { %v4161_v26 = vsub.f32 %v4033_v38, %v3322_v21  ;;  %v4162_v35 = vsub.f32 %v4034_v16, %v3323_v9  ;;  %v4290_v43 = vsub.f32 %v10176_v19, %v3323_v9  ;;  %v6723_v33 = vsel %vm6211_vm0, %v6339_v25, %v8318_v39 }
 0x5e8   :  { %v6561_v14 = vmul.f32 1.442695, %v14415_v12  ;;  %v5313_v63 = vmul.f32 %v5185_v28, %v4289_v49  ;;  %v3475_v51 = vmul.u32 256, %v3407_v22  ;;  %v6724_v4 = vsel %vm6212_vm9, %v6340_v13, %v8320_v53  ;;  %v310_v22 = vld [vmem:[%s16205_s2 + $0x2e0] sm:$0xff] }
 0x5e9   :  { %v7593_v60 = vadd.f32 -1.0, %v4161_v26  ;;  %v7594_v31 = vadd.f32 -1.0, %v4162_v35  ;;  %v5057_v42 = vmul.f32 %v4161_v26, %v17504_v30  ;;  %v5058_v45 = vmul.f32 %v4162_v35, %v17506_v32 }
 0x5ea   :  { %v5314_v21 = vmul.f32 %v5186_v48, %v4290_v43  ;;  %v14436_v20 = vadd.s32 %v3475_v51, %v10027_v18  ;;  %v14439_v34 = vadd.s32 %v3475_v51, %v10070_v44  ;;  %8325 = vpow2.f32 %v6559_v62  ;;  %v17519_v48 = vld [vmem:[#allocation59_spill] sm:$0xff] }
 0x5eb   :  { %v4545_v28 = vadd.f32 %v7593_v60, %v17504_v30  ;;  %v4546_v57 = vadd.f32 %v7594_v31, %v17506_v32  ;;  %v14451_v13 = vadd.f32 %v5313_v63, %v5057_v42  ;;  %v6979_v9 = vsel %vm6851_vm12, %v6723_v33, 0.0  ;;  %v3145_v42 = vpop.permute.xlu1 %3144 }
 0x5ec   :  { %v8322_v39 = vpop.eup %8321  ;;  %8327 = vpow2.f32 %v6561_v14  ;;  %v14463_v38 = vadd.f32 %v5314_v21, %v5058_v45  ;;  %v3778_v30 = vcvt.s32.f32 %v14436_v20  ;;  %v3779_v53 = vcvt.s32.f32 %v14439_v34  ;;  %v17513_v45 = vld [vmem:[#allocation266_spill] sm:$0xff] }
 0x5ed   :  { %v8324_v16 = vpop.eup %8323  ;;  %v5656_v32 = vmul.f32 %v8322_v39, %v14348_v58  ;;  %v4673_v59 = vmul.f32 %v4545_v28, %v4161_v26  ;;  %v4674_v49 = vmul.f32 %v4546_v57, %v4162_v35  ;;  %v6980_v62 = vsel %vm6852_vm8, %v6724_v4, 0.0  ;;  %v17515_v57 = vld [vmem:[#allocation267_spill] sm:$0xff] }
 0x5ee   :  { %v5658_v43 = vmul.f32 %v8324_v16, %v14351_v54  ;;  %vm6213_vm13 = vcmp.gt.f32.partialorder %v14404_v6, 0.0  ;;  %vm6214_vm0 = vcmp.gt.f32.partialorder %v14415_v12, 0.0  ;;  %v14494_v14 = vsub.f32 0.0, %v310_v22  ;;  %v17518_v16 = vld [vmem:[#allocation187_spill] sm:$0xff] }
 0x5ef   :  { %v6083_v26 = vsel %vm14459_vm5, 1.0, %v5656_v32  ;;  %vm4801_vm2 = vcmp.eq.f32.partialorder %v4673_v59, 0.0  ;;  %vm4802_vm9 = vcmp.eq.f32.partialorder %v4674_v49, 0.0  ;;  %v3906_v54 = vadd.f32 1.0, %v3778_v30 }
 0x5f0   :  { %v6084_v35 = vsel %vm14471_vm3, 1.0, %v5658_v43  ;;  %v7107_v33 = vmul.f32 %v6979_v9, %v6083_v26  ;;  %v4929_v51 = vsel %vm4801_vm2, 1.0, %v4673_v59  ;;  %v4930_v60 = vsel %vm4802_vm9, 1.0, %v4674_v49  ;;  %v17520_v49 = vld [vmem:[#allocation61_spill] sm:$0xff] }
 0x5f1   :  { %v7108_v63 = vmul.f32 %v6980_v62, %v6084_v35  ;;  %v3907_v31 = vadd.f32 1.0, %v3779_v53  ;;  %v6341_v21 = vadd.f32 1.0, %v14404_v6  ;;  %v6342_v28 = vadd.f32 1.0, %v14415_v12 }
 0x5f2   :  { %v14497_v4 = vadd.f32 %v7107_v33, %v17513_v45  ;;  %8329 = vrcp.f32 %v4929_v51  ;;  %v14504_v9 = vsub.f32 0.0, %v311_v7  ;;  %v5187_v30 = vsub.f32 1.0, %v17517_v61 }
 0x5f3   :  { %v14502_v39 = vadd.f32 %v7108_v63, %v17515_v57  ;;  %8331 = vrcp.f32 %v4930_v60  ;;  %v5188_v32 = vsub.f32 1.0, %v17518_v16  ;;  %v3324_v59 = vadd.f32 %v3145_v42, %v17519_v48 }
 0x5f4   :  { %17514 = vst [vmem:[#allocation177_spill] sm:$0xff] %v14497_v4  ;;  %v3325_v22 = vadd.f32 %v3145_v42, %v17520_v49  ;;  %v4035_v53 = vadd.f32 %v10176_v19, %v3906_v54  ;;  %v8326_v62 = vpop.eup %8325  ;;  %vm5825_vm11 = vcmp.eq.s32.totalorder %v14354_v10, 0  ;;  %vm5826_vm4 = vcmp.eq.s32.totalorder %v14357_v15, 0 }
 0x5f5   :  { %17516 = vst [vmem:[#allocation208_spill] sm:$0xff] %v14502_v39  ;;  %v6563_v43 = vmul.f32 1.442695, %v14494_v14  ;;  %v4036_v26 = vadd.f32 %v10176_v19, %v3907_v31  ;;  %v4291_v7 = vsub.f32 %v10176_v19, %v3324_v59  ;;  %v3408_v51 = vadd.s32 376, %v9999_v52  ;;  %vm14550_vm7 = vmand %vm5825_vm11, %vm11411_vm1 }
 0x5f6   :  { %v8328_v35 = vpop.eup %8327  ;;  %v4163_v33 = vsub.f32 %v4035_v53, %v3324_v59  ;;  %v4292_v63 = vsub.f32 %v10176_v19, %v3325_v22  ;;  %vm6853_vm15 = vcmp.lt.s32.totalorder %v14354_v10, 512  ;;  %vm6854_vm6 = vcmp.lt.s32.totalorder %v14357_v15, 512 }
 0x5f7   :  { %v6565_v54 = vmul.f32 1.442695, %v14504_v9  ;;  %v4164_v60 = vsub.f32 %v4036_v26, %v3325_v22  ;;  %v5315_v57 = vmul.f32 %v5187_v30, %v4291_v7  ;;  %v6725_v48 = vsel %vm6213_vm13, %v6341_v21, %v8326_v62 }
 0x5f8   :  { %v7595_v42 = vadd.f32 -1.0, %v4163_v33  ;;  %v5059_v45 = vmul.f32 %v4163_v33, %v17517_v61  ;;  %v5316_v31 = vmul.f32 %v5188_v32, %v4292_v63  ;;  %v3476_v53 = vmul.u32 256, %v3408_v51 }
 0x5f9   :  { %v7596_v59 = vadd.f32 -1.0, %v4164_v60  ;;  %v5060_v49 = vmul.f32 %v4164_v60, %v17518_v16  ;;  %v6726_v58 = vsel %vm6214_vm0, %v6342_v28, %v8328_v35  ;;  %8333 = vpow2.f32 %v6563_v43  ;;  %v3150_v35 = vpop.permute.xlu0 %3149 }
 0x5fa   :  { %v4547_v39 = vadd.f32 %v7595_v42, %v17517_v61  ;;  %v14528_v4 = vadd.f32 %v5315_v57, %v5059_v45  ;;  %v14534_v30 = vadd.s32 %v3476_v53, %v10027_v18  ;;  %v14537_v6 = vadd.s32 %v3476_v53, %v10070_v44  ;;  %v17526_v45 = vld [vmem:[#allocation63_spill] sm:$0xff]  ;;  %v17529_v53 = vld [vmem:[#allocation132_spill] sm:$0xff] }
 0x5fb   :  { %v4548_v22 = vadd.f32 %v7596_v59, %v17518_v16  ;;  %v14531_v26 = vadd.f32 %v5316_v31, %v5060_v49  ;;  %v17521_v12 = vsel %vm14264_vm14, 1.0, %v13035_v8  ;;  %vm6215_vm12 = vcmp.gt.f32.partialorder %v14494_v14, 0.0  ;;  %vm14564_vm14 = vmand %vm5826_vm4, %vm11411_vm1  ;;  %v17527_v31 = vld [vmem:[#allocation74_spill] sm:$0xff]  ;;  %v17531_v61 = vld [vmem:[#allocation188_spill] sm:$0xff] }
 0x5fc   :  { %v8330_v21 = vpop.eup %8329  ;;  %v14544_v28 = vmul.f32 %v13328_v55, %v17521_v12  ;;  %8335 = vpow2.f32 %v6565_v54  ;;  %v4675_v16 = vmul.f32 %v4547_v39, %v4163_v33  ;;  %v6981_v50 = vsel %vm6853_vm15, %v6725_v48, 0.0  ;;  %v312_v39 = vld [vmem:[%s16205_s2 + $0x2f0] sm:$0xff] }
 0x5fd   :  { %v8332_v32 = vpop.eup %8331  ;;  %v6982_v8 = vsel %vm6854_vm6, %v6726_v58, 0.0  ;;  %v5660_v55 = vmul.f32 %v8330_v21, %v14451_v13  ;;  %v4676_v43 = vmul.f32 %v4548_v22, %v4164_v60  ;;  %vm6216_vm8 = vcmp.gt.f32.partialorder %v14504_v9, 0.0 }
 0x5fe   :  { %v5662_v10 = vmul.f32 %v8332_v32, %v14463_v38  ;;  %vm4803_vm5 = vcmp.eq.f32.partialorder %v4675_v16, 0.0  ;;  %v3780_v13 = vcvt.s32.f32 %v14534_v30  ;;  %v3781_v58 = vcvt.s32.f32 %v14537_v6  ;;  %v313_v38 = vld [vmem:[%s16205_s2 + $0x2f8] sm:$0xff] }
 0x5ff   :  { %v6085_v15 = vsel %vm14550_vm7, 1.0, %v5660_v55  ;;  %v6343_v33 = vadd.f32 1.0, %v14494_v14  ;;  %vm4804_vm3 = vcmp.eq.f32.partialorder %v4676_v43, 0.0  ;;  %v4931_v7 = vsel %vm4803_vm5, 1.0, %v4675_v16 }
 0x600   :  { %v6086_v63 = vsel %vm14564_vm14, 1.0, %v5662_v10  ;;  %v7109_v51 = vmul.f32 %v6981_v50, %v6085_v15  ;;  %vm5827_vm13 = vcmp.eq.s32.totalorder %v14436_v20, 0  ;;  %v14584_v54 = vsub.f32 0.0, %v312_v39  ;;  %v17532_v50 = vld [vmem:[#allocation65_spill] sm:$0xff] }
 0x601   :  { %v7110_v60 = vmul.f32 %v6982_v8, %v6086_v63  ;;  %vm5828_vm0 = vcmp.eq.s32.totalorder %v14439_v34, 0  ;;  %v4932_v42 = vsel %vm4804_vm3, 1.0, %v4676_v43  ;;  %8337 = vrcp.f32 %v4931_v7  ;;  %v17533_v43 = vld [vmem:[#allocation189_spill] sm:$0xff]  ;;  %vm14632_vm4 = vmand %vm5827_vm13, %vm11411_vm1 }
 0x602   :  { %v3326_v57 = vadd.f32 %v3150_v35, %v17526_v45  ;;  %vm6182_vm2 = vcmp.gt.f32.partialorder %v13282_v5, 0.0  ;;  %v14590_v48 = vadd.f32 %v7109_v51, %v17527_v31  ;;  %8339 = vrcp.f32 %v4932_v42  ;;  %vm14644_vm15 = vmand %vm5828_vm0, %vm11411_vm1 }
 0x603   :  { %v3908_v59 = vadd.f32 1.0, %v3780_v13  ;;  %v3909_v49 = vadd.f32 1.0, %v3781_v58  ;;  %v14593_v22 = vadd.f32 %v7110_v60, %v17529_v53  ;;  %v6344_v21 = vadd.f32 1.0, %v14504_v9  ;;  %v8334_v32 = vpop.eup %8333 }
 0x604   :  { %17528 = vst [vmem:[#allocation209_spill] sm:$0xff] %v14590_v48  ;;  %v14596_v12 = vsub.f32 0.0, %v313_v38  ;;  %v5189_v16 = vsub.f32 1.0, %v17531_v61  ;;  %vm6855_vm9 = vcmp.lt.s32.totalorder %v14436_v20, 512  ;;  %v3327_v8 = vadd.f32 %v3150_v35, %v17532_v50 }
 0x605   :  { %17530 = vst [vmem:[#allocation86_spill] sm:$0xff] %v14593_v22  ;;  %v4037_v55 = vadd.f32 %v10176_v19, %v3908_v59  ;;  %v4038_v62 = vadd.f32 %v10176_v19, %v3909_v49  ;;  %vm6856_vm11 = vcmp.lt.s32.totalorder %v14439_v34, 512  ;;  %v5190_v39 = vsub.f32 1.0, %v17533_v43 }
 0x606   :  { %v4293_v10 = vsub.f32 %v10176_v19, %v3326_v57  ;;  %v3409_v13 = vadd.s32 384, %v9999_v52  ;;  %v8336_v58 = vpop.eup %8335  ;;  %v6567_v15 = vmul.f32 1.442695, %v14584_v54  ;;  %v4294_v51 = vsub.f32 %v10176_v19, %v3327_v8 }
 0x607   :  { %v4165_v7 = vsub.f32 %v4037_v55, %v3326_v57  ;;  %v4166_v63 = vsub.f32 %v4038_v62, %v3327_v8  ;;  %v6727_v35 = vsel %vm6215_vm12, %v6343_v33, %v8334_v32  ;;  %v6569_v38 = vmul.f32 1.442695, %v14596_v12 }
 0x608   :  { %v5317_v60 = vmul.f32 %v5189_v16, %v4293_v10  ;;  %v3477_v42 = vmul.u32 256, %v3409_v13  ;;  %v6728_v53 = vsel %vm6216_vm8, %v6344_v21, %v8336_v58  ;;  %v5318_v57 = vmul.f32 %v5190_v39, %v4294_v51  ;;  %v314_v13 = vld [vmem:[%s16205_s2 + $0x300] sm:$0xff] }
 0x609   :  { %v7597_v45 = vadd.f32 -1.0, %v4165_v7  ;;  %v7598_v31 = vadd.f32 -1.0, %v4166_v63  ;;  %v5061_v59 = vmul.f32 %v4165_v7, %v17531_v61  ;;  %v5062_v49 = vmul.f32 %v4166_v63, %v17533_v43 }
 0x60a   :  { %v14617_v50 = vadd.s32 %v3477_v42, %v10027_v18  ;;  %v14620_v14 = vadd.s32 %v3477_v42, %v10070_v44  ;;  %8341 = vpow2.f32 %v6567_v15  ;;  %v6983_v55 = vsel %vm6855_vm9, %v6727_v35, 0.0  ;;  %v3155_v42 = vpop.permute.xlu1 %3154 }
 0x60b   :  { %v4549_v33 = vadd.f32 %v7597_v45, %v17531_v61  ;;  %v4550_v16 = vadd.f32 %v7598_v31, %v17533_v43  ;;  %v14624_v32 = vadd.f32 %v5317_v60, %v5061_v59  ;;  %v8338_v8 = vpop.eup %8337  ;;  %8343 = vpow2.f32 %v6569_v38  ;;  %v17538_v45 = vld [vmem:[#allocation199_spill] sm:$0xff] }
 0x60c   :  { %v14636_v21 = vadd.f32 %v5318_v57, %v5062_v49  ;;  %v3782_v61 = vcvt.s32.f32 %v14617_v50  ;;  %v8340_v62 = vpop.eup %8339  ;;  %v5664_v43 = vmul.f32 %v8338_v8, %v14528_v4  ;;  %v3783_v58 = vcvt.s32.f32 %v14620_v14 }
 0x60d   :  { %v4677_v20 = vmul.f32 %v4549_v33, %v4165_v7  ;;  %v4678_v10 = vmul.f32 %v4550_v16, %v4166_v63  ;;  %v14656_v4 = vsel %vm6182_vm2, %v13311_v40, %v13573_v29  ;;  %v6984_v15 = vsel %vm6856_vm11, %v6728_v53, 0.0  ;;  %v315_v40 = vld [vmem:[%s16205_s2 + $0x308] sm:$0xff]  ;;  %v17540_v53 = vld [vmem:[#allocation76_spill] sm:$0xff]  ;;  %v17542_v16 = vld [vmem:[#allocation194_spill] sm:$0xff] }
 0x60e   :  { %v5666_v51 = vmul.f32 %v8340_v62, %v14531_v26  ;;  %vm6217_vm6 = vcmp.gt.f32.partialorder %v14584_v54, 0.0  ;;  %v6087_v7 = vsel %vm14632_vm4, 1.0, %v5664_v43  ;;  %vm6218_vm7 = vcmp.gt.f32.partialorder %v14596_v12, 0.0  ;;  %v17545_v43 = vld [vmem:[#allocation69_spill] sm:$0xff] }
 0x60f   :  { %vm4805_vm12 = vcmp.eq.f32.partialorder %v4677_v20, 0.0  ;;  %vm4806_vm14 = vcmp.eq.f32.partialorder %v4678_v10, 0.0  ;;  %v7111_v5 = vmul.f32 %v6983_v55, %v6087_v7  ;;  %v14670_v29 = vsub.f32 0.0, %v314_v13  ;;  %v17543_v55 = vld [vmem:[#allocation195_spill] sm:$0xff] }
 0x610   :  { %v6088_v63 = vsel %vm14644_vm15, 1.0, %v5666_v51  ;;  %v3910_v34 = vadd.f32 1.0, %v3782_v61  ;;  %vm6821_vm8 = vcmp.lt.s32.totalorder %v12911_v46, 512  ;;  %v4933_v35 = vsel %vm4805_vm12, 1.0, %v4677_v20  ;;  %v17544_v61 = vld [vmem:[#allocation67_spill] sm:$0xff] }
 0x611   :  { %v7112_v26 = vmul.f32 %v6984_v15, %v6088_v63  ;;  %v4934_v38 = vsel %vm4806_vm14, 1.0, %v4678_v10  ;;  %v3911_v60 = vadd.f32 1.0, %v3783_v58  ;;  %v14674_v31 = vadd.f32 %v7111_v5, %v17538_v45 }
 0x612   :  { %v6345_v59 = vadd.f32 1.0, %v14584_v54  ;;  %v6346_v49 = vadd.f32 1.0, %v14596_v12  ;;  %8345 = vrcp.f32 %v4933_v35  ;;  %v14681_v33 = vsub.f32 0.0, %v315_v40 }
 0x613   :  { %17539 = vst [vmem:[#allocation88_spill] sm:$0xff] %v14674_v31  ;;  %v14679_v57 = vadd.f32 %v7112_v26, %v17540_v53  ;;  %8347 = vrcp.f32 %v4934_v38  ;;  %v5191_v8 = vsub.f32 1.0, %v17542_v16  ;;  %v5192_v9 = vsub.f32 1.0, %v17543_v55 }
 0x614   :  { %v3328_v62 = vadd.f32 %v3155_v42, %v17544_v61  ;;  %v3329_v39 = vadd.f32 %v3155_v42, %v17545_v43  ;;  %v4039_v20 = vadd.f32 %v10176_v19, %v3910_v34  ;;  %v8342_v10 = vpop.eup %8341  ;;  %vm5829_vm5 = vcmp.eq.s32.totalorder %v14534_v30, 0 }
 0x615   :  { %17541 = vst [vmem:[#allocation34_spill] sm:$0xff] %v14679_v57  ;;  %vm5830_vm3 = vcmp.eq.s32.totalorder %v14537_v6, 0  ;;  %v6571_v13 = vmul.f32 1.442695, %v14670_v29  ;;  %v4040_v58 = vadd.f32 %v10176_v19, %v3911_v60  ;;  %v8344_v15 = vpop.eup %8343  ;;  %v3410_v5 = vadd.s32 392, %v9999_v52  ;;  %vm14725_vm2 = vmand %vm5829_vm5, %vm11411_vm1 }
 0x616   :  { %v4167_v51 = vsub.f32 %v4039_v20, %v3328_v62  ;;  %v4295_v7 = vsub.f32 %v10176_v19, %v3328_v62  ;;  %v4296_v63 = vsub.f32 %v10176_v19, %v3329_v39  ;;  %vm6857_vm13 = vcmp.lt.s32.totalorder %v14534_v30, 512  ;;  %vm14739_vm11 = vmand %vm5830_vm3, %vm11411_vm1 }
 0x617   :  { %vm6858_vm0 = vcmp.lt.s32.totalorder %v14537_v6, 512  ;;  %v6573_v40 = vmul.f32 1.442695, %v14681_v33  ;;  %v4168_v34 = vsub.f32 %v4040_v58, %v3329_v39  ;;  %v6729_v42 = vsel %vm6217_vm6, %v6345_v59, %v8342_v10 }
 0x618   :  { %v7599_v26 = vadd.f32 -1.0, %v4167_v51  ;;  %v5063_v35 = vmul.f32 %v4167_v51, %v17542_v16  ;;  %v5319_v38 = vmul.f32 %v5191_v8, %v4295_v7  ;;  %v5320_v60 = vmul.f32 %v5192_v9, %v4296_v63  ;;  %v3160_v63 = vpop.permute.xlu0 %3159 }
 0x619   :  { %v7600_v45 = vadd.f32 -1.0, %v4168_v34  ;;  %v5064_v53 = vmul.f32 %v4168_v34, %v17543_v55  ;;  %v3478_v61 = vmul.u32 256, %v3410_v5  ;;  %v6730_v62 = vsel %vm6218_vm7, %v6346_v49, %v8344_v15 }
 0x61a   :  { %8349 = vpow2.f32 %v6571_v13  ;;  %v4551_v43 = vadd.f32 %v7599_v26, %v17542_v16  ;;  %v14705_v20 = vadd.f32 %v5319_v38, %v5063_v35  ;;  %v14719_v12 = vsel %vm6821_vm8, %v14363_v0, 0.0 }
 0x61b   :  { %v4552_v39 = vadd.f32 %v7600_v45, %v17543_v55  ;;  %v14708_v58 = vadd.f32 %v5320_v60, %v5064_v53  ;;  %v14711_v8 = vadd.s32 %v3478_v61, %v10027_v18  ;;  %v14714_v54 = vadd.s32 %v3478_v61, %v10070_v44  ;;  %v17551_v53 = vld [vmem:[#allocation265_spill] sm:$0xff] }
 0x61c   :  { %v8346_v59 = vpop.eup %8345  ;;  %vm6219_vm9 = vcmp.gt.f32.partialorder %v14670_v29, 0.0  ;;  %8351 = vpow2.f32 %v6573_v40  ;;  %v4679_v16 = vmul.f32 %v4551_v43, %v4167_v51  ;;  %v6985_v9 = vsel %vm6857_vm13, %v6729_v42, 0.0  ;;  %v316_v51 = vld [vmem:[%s16205_s2 + $0x310] sm:$0xff]  ;;  %v17550_v42 = vld [vmem:[#allocation71_spill] sm:$0xff] }
 0x61d   :  { %v8348_v55 = vpop.eup %8347  ;;  %v6986_v0 = vsel %vm6858_vm0, %v6730_v62, 0.0  ;;  %v5668_v10 = vmul.f32 %v8346_v59, %v14624_v32  ;;  %v4680_v15 = vmul.f32 %v4552_v39, %v4168_v34  ;;  %vm6220_vm4 = vcmp.gt.f32.partialorder %v14681_v33, 0.0  ;;  %v17553_v39 = vld [vmem:[#allocation268_spill] sm:$0xff] }
 0x61e   :  { %v5670_v30 = vmul.f32 %v8348_v55, %v14636_v21  ;;  %vm4807_vm15 = vcmp.eq.f32.partialorder %v4679_v16, 0.0  ;;  %v3784_v32 = vcvt.s32.f32 %v14711_v8  ;;  %v3785_v7 = vcvt.s32.f32 %v14714_v54  ;;  %v317_v21 = vld [vmem:[%s16205_s2 + $0x318] sm:$0xff]  ;;  %v17555_v55 = vld [vmem:[#allocation196_spill] sm:$0xff] }
 0x61f   :  { %v6089_v6 = vsel %vm14725_vm2, 1.0, %v5668_v10  ;;  %v6347_v5 = vadd.f32 1.0, %v14670_v29  ;;  %vm4808_vm6 = vcmp.eq.f32.partialorder %v4680_v15, 0.0  ;;  %v4935_v40 = vsel %vm4807_vm15, 1.0, %v4679_v16  ;;  %v17556_v10 = vld [vmem:[#allocation73_spill] sm:$0xff] }
 0x620   :  { %v6090_v34 = vsel %vm14739_vm11, 1.0, %v5670_v30  ;;  %v7113_v26 = vmul.f32 %v6985_v9, %v6089_v6  ;;  %vm5831_vm7 = vcmp.eq.s32.totalorder %v14617_v50, 0  ;;  %v14759_v35 = vsub.f32 0.0, %v316_v51  ;;  %v17557_v30 = vld [vmem:[#allocation197_spill] sm:$0xff] }
 0x621   :  { %v7114_v38 = vmul.f32 %v6986_v0, %v6090_v34  ;;  %vm5832_vm12 = vcmp.eq.s32.totalorder %v14620_v14, 0  ;;  %v4936_v60 = vsel %vm4808_vm6, 1.0, %v4680_v15  ;;  %8353 = vrcp.f32 %v4935_v40  ;;  %vm14806_vm5 = vmand %vm5831_vm7, %vm11411_vm1 }
 0x622   :  { %v3330_v45 = vadd.f32 %v3160_v63, %v17550_v42  ;;  %v14764_v61 = vadd.f32 %v7113_v26, %v17551_v53  ;;  %8355 = vrcp.f32 %v4936_v60  ;;  %v3912_v62 = vadd.f32 1.0, %v3784_v32  ;;  %vm14818_vm3 = vmand %vm5832_vm12, %vm11411_vm1 }
 0x623   :  { %v3913_v43 = vadd.f32 1.0, %v3785_v7  ;;  %v14767_v59 = vadd.f32 %v7114_v38, %v17553_v39  ;;  %v6348_v49 = vadd.f32 1.0, %v14681_v33  ;;  %v14770_v16 = vsub.f32 0.0, %v317_v21 }
 0x624   :  { %17552 = vst [vmem:[#allocation36_spill] sm:$0xff] %v14764_v61  ;;  %v5193_v9 = vsub.f32 1.0, %v17555_v55  ;;  %v8350_v0 = vpop.eup %8349  ;;  %vm6859_vm14 = vcmp.lt.s32.totalorder %v14617_v50, 512  ;;  %v3331_v13 = vadd.f32 %v3160_v63, %v17556_v10  ;;  %v4041_v15 = vadd.f32 %v10176_v19, %v3912_v62 }
 0x625   :  { %17554 = vst [vmem:[#allocation40_spill] sm:$0xff] %v14767_v59  ;;  %v4042_v51 = vadd.f32 %v10176_v19, %v3913_v43  ;;  %vm6860_vm8 = vcmp.lt.s32.totalorder %v14620_v14, 512  ;;  %v5194_v32 = vsub.f32 1.0, %v17557_v30  ;;  %v4297_v7 = vsub.f32 %v10176_v19, %v3330_v45 }
 0x626   :  { %v3411_v6 = vadd.s32 400, %v9999_v52  ;;  %v8352_v40 = vpop.eup %8351  ;;  %v6575_v34 = vmul.f32 1.442695, %v14759_v35  ;;  %v4169_v26 = vsub.f32 %v4041_v15, %v3330_v45  ;;  %v4298_v38 = vsub.f32 %v10176_v19, %v3331_v13 }
 0x627   :  { %v4170_v21 = vsub.f32 %v4042_v51, %v3331_v13  ;;  %v6731_v63 = vsel %vm6219_vm9, %v6347_v5, %v8350_v0  ;;  %v6577_v60 = vmul.f32 1.442695, %v14770_v16  ;;  %v5321_v42 = vmul.f32 %v5193_v9, %v4297_v7  ;;  %v17567_v7 = vld [vmem:[#allocation75_spill] sm:$0xff] }
 0x628   :  { %v3479_v53 = vmul.u32 256, %v3411_v6  ;;  %v7601_v62 = vadd.f32 -1.0, %v4169_v26  ;;  %v5065_v39 = vmul.f32 %v4169_v26, %v17555_v55  ;;  %v6732_v59 = vsel %vm6220_vm4, %v6348_v49, %v8352_v40 }
 0x629   :  { %v7602_v43 = vadd.f32 -1.0, %v4170_v21  ;;  %v5066_v10 = vmul.f32 %v4170_v21, %v17557_v30  ;;  %v5322_v45 = vmul.f32 %v5194_v32, %v4298_v38  ;;  %8357 = vpow2.f32 %v6575_v34 }
 0x62a   :  { %v14791_v15 = vadd.s32 %v3479_v53, %v10027_v18  ;;  %v14794_v29 = vadd.s32 %v3479_v53, %v10070_v44  ;;  %v4553_v5 = vadd.f32 %v7601_v62, %v17555_v55  ;;  %v14798_v0 = vadd.f32 %v5321_v42, %v5065_v39  ;;  %v3165_v62 = vpop.permute.xlu1 %3164 }
 0x62b   :  { %v4554_v9 = vadd.f32 %v7602_v43, %v17557_v30  ;;  %v8354_v13 = vpop.eup %8353  ;;  %v6987_v51 = vsel %vm6859_vm14, %v6731_v63, 0.0  ;;  %8359 = vpow2.f32 %v6577_v60  ;;  %v14810_v49 = vadd.f32 %v5322_v45, %v5066_v10  ;;  %v17563_v43 = vld [vmem:[#allocation270_spill] sm:$0xff] }
 0x62c   :  { %v3786_v55 = vcvt.s32.f32 %v14791_v15  ;;  %v8356_v30 = vpop.eup %8355  ;;  %v5672_v32 = vmul.f32 %v8354_v13, %v14705_v20  ;;  %v4681_v50 = vmul.f32 %v4553_v5, %v4169_v26  ;;  %v3787_v40 = vcvt.s32.f32 %v14794_v29  ;;  %v17564_v5 = vld [vmem:[#allocation259_spill] sm:$0xff] }
 0x62d   :  { %v4682_v6 = vmul.f32 %v4554_v9, %v4170_v21  ;;  %v17562_v34 = vsel %vm14445_vm10, 1.0, %v13050_v36  ;;  %v6988_v20 = vsel %vm6860_vm8, %v6732_v59, 0.0  ;;  %v5674_v63 = vmul.f32 %v8356_v30, %v14708_v58  ;;  %v318_v36 = vld [vmem:[%s16205_s2 + $0x320] sm:$0xff]  ;;  %v319_v58 = vld [vmem:[%s16205_s2 + $0x328] sm:$0xff]  ;;  %v17566_v30 = vld [vmem:[#allocation203_spill] sm:$0xff] }
 0x62e   :  { %v14828_v38 = vmul.f32 %v13361_v1, %v17562_v34  ;;  %vm6221_vm13 = vcmp.gt.f32.partialorder %v14759_v35, 0.0  ;;  %v6091_v26 = vsel %vm14806_vm5, 1.0, %v5672_v32  ;;  %vm6222_vm0 = vcmp.gt.f32.partialorder %v14770_v16, 0.0 }
 0x62f   :  { %vm4809_vm2 = vcmp.eq.f32.partialorder %v4681_v50, 0.0  ;;  %vm4810_vm9 = vcmp.eq.f32.partialorder %v4682_v6, 0.0  ;;  %v6092_v1 = vsel %vm14818_vm3, 1.0, %v5674_v63  ;;  %v7115_v25 = vmul.f32 %v6987_v51, %v6091_v26  ;;  %v17565_v51 = vld [vmem:[#allocation202_spill] sm:$0xff] }
 0x630   :  { %v6349_v14 = vadd.f32 1.0, %v14759_v35  ;;  %v3914_v59 = vadd.f32 1.0, %v3786_v55  ;;  %vm6822_vm10 = vcmp.lt.s32.totalorder %v12918_v47, 512  ;;  %v7116_v21 = vmul.f32 %v6988_v20, %v6092_v1 }
 0x631   :  { %v4937_v60 = vsel %vm4809_vm2, 1.0, %v4681_v50  ;;  %v4938_v42 = vsel %vm4810_vm9, 1.0, %v4682_v6  ;;  %v3915_v53 = vadd.f32 1.0, %v3787_v40  ;;  %v7179_v39 = vadd.f32 %v7115_v25, %v17563_v43  ;;  %v17568_v6 = vld [vmem:[#allocation77_spill] sm:$0xff] }
 0x632   :  { %v6350_v10 = vadd.f32 1.0, %v14770_v16  ;;  %8361 = vrcp.f32 %v4937_v60  ;;  %v14849_v45 = vsub.f32 0.0, %v318_v36  ;;  %v7180_v9 = vadd.f32 %v7116_v21, %v17564_v5 }
 0x633   :  { %8363 = vrcp.f32 %v4938_v42  ;;  %v14852_v13 = vsub.f32 0.0, %v319_v58  ;;  %v5195_v33 = vsub.f32 1.0, %v17565_v51  ;;  %v14856_v55 = vadd.f32 %v7179_v39, %v13462_v17  ;;  %v8358_v34 = vpop.eup %8357 }
 0x634   :  { %v5196_v32 = vsub.f32 1.0, %v17566_v30  ;;  %v3332_v50 = vadd.f32 %v3165_v62, %v17567_v7  ;;  %v3333_v40 = vadd.f32 %v3165_v62, %v17568_v6  ;;  %v14862_v20 = vadd.f32 %v7180_v9, %v13469_v37 }
 0x635   :  { %vm5833_vm11 = vcmp.eq.s32.totalorder %v14711_v8, 0  ;;  %v4043_v63 = vadd.f32 %v10176_v19, %v3914_v59  ;;  %v4044_v26 = vadd.f32 %v10176_v19, %v3915_v53  ;;  %v8360_v36 = vpop.eup %8359  ;;  %vm5834_vm4 = vcmp.eq.s32.totalorder %v14714_v54, 0 }
 0x636   :  { %v6579_v17 = vmul.f32 1.442695, %v14849_v45  ;;  %v4299_v1 = vsub.f32 %v10176_v19, %v3332_v50  ;;  %v4300_v25 = vsub.f32 %v10176_v19, %v3333_v40  ;;  %vm6861_vm15 = vcmp.lt.s32.totalorder %v14711_v8, 512  ;;  %vm14898_vm7 = vmand %vm5833_vm11, %vm11411_vm1 }
 0x637   :  { %v4171_v58 = vsub.f32 %v4043_v63, %v3332_v50  ;;  %v4172_v37 = vsub.f32 %v4044_v26, %v3333_v40  ;;  %v3412_v21 = vadd.s32 408, %v9999_v52  ;;  %v6733_v59 = vsel %vm6221_vm13, %v6349_v14, %v8358_v34  ;;  %vm14913_vm12 = vmand %vm5834_vm4, %vm11411_vm1  ;;  %v320_v26 = vld [vmem:[%s16205_s2 + $0x330] sm:$0xff]  ;;  %v17578_v34 = vld [vmem:[#allocation205_spill] sm:$0xff] }
 0x638   :  { %v6581_v60 = vmul.f32 1.442695, %v14852_v13  ;;  %v5323_v42 = vmul.f32 %v5195_v33, %v4299_v1  ;;  %v5324_v53 = vmul.f32 %v5196_v32, %v4300_v25  ;;  %v6734_v9 = vsel %vm6222_vm0, %v6350_v10, %v8360_v36  ;;  %v3170_v25 = vpop.permute.xlu0 %3169 }
 0x639   :  { %v7603_v62 = vadd.f32 -1.0, %v4171_v58  ;;  %v7604_v43 = vadd.f32 -1.0, %v4172_v37  ;;  %v5067_v39 = vmul.f32 %v4171_v58, %v17565_v51  ;;  %v5068_v5 = vmul.f32 %v4172_v37, %v17566_v30 }
 0x63a   :  { %vm6862_vm6 = vcmp.lt.s32.totalorder %v14714_v54, 512  ;;  %8365 = vpow2.f32 %v6579_v17  ;;  %v3480_v7 = vmul.u32 256, %v3412_v21  ;;  %v14890_v6 = vsel %vm6822_vm10, %v14656_v4, 0.0 }
 0x63b   :  { %v4555_v35 = vadd.f32 %v7603_v62, %v17565_v51  ;;  %v4556_v14 = vadd.f32 %v7604_v43, %v17566_v30  ;;  %v14883_v50 = vadd.f32 %v5323_v42, %v5067_v39  ;;  %v14885_v33 = vadd.f32 %v5324_v53, %v5068_v5  ;;  %17569 = vst [vmem:[#allocation159_spill] sm:$0xff] %v14890_v6  ;;  %v17574_v62 = vld [vmem:[#allocation79_spill] sm:$0xff]  ;;  %v17575_v39 = vld [vmem:[#allocation138_spill] sm:$0xff] }
 0x63c   :  { %v8362_v32 = vpop.eup %8361  ;;  %v6989_v16 = vsel %vm6861_vm15, %v6733_v59, 0.0  ;;  %v14903_v51 = vadd.s32 %v3480_v7, %v10027_v18  ;;  %v14906_v30 = vadd.s32 %v3480_v7, %v10070_v44  ;;  %vm6223_vm14 = vcmp.gt.f32.partialorder %v14849_v45, 0.0 }
 0x63d   :  { %v8364_v40 = vpop.eup %8363  ;;  %v5676_v4 = vmul.f32 %v8362_v32, %v14798_v0  ;;  %8367 = vpow2.f32 %v6581_v60  ;;  %v4683_v8 = vmul.f32 %v4555_v35, %v4171_v58  ;;  %v4684_v63 = vmul.f32 %v4556_v14, %v4172_v37  ;;  %v17576_v35 = vld [vmem:[#allocation140_spill] sm:$0xff] }
 0x63e   :  { %v6990_v0 = vsel %vm6862_vm6, %v6734_v9, 0.0  ;;  %v5678_v36 = vmul.f32 %v8364_v40, %v14810_v49  ;;  %v3788_v17 = vcvt.s32.f32 %v14903_v51  ;;  %v3789_v1 = vcvt.s32.f32 %v14906_v30  ;;  %v321_v49 = vld [vmem:[%s16205_s2 + $0x338] sm:$0xff]  ;;  %v17577_v40 = vld [vmem:[#allocation204_spill] sm:$0xff] }
 0x63f   :  { %v6093_v21 = vsel %vm14898_vm7, 1.0, %v5676_v4  ;;  %vm6224_vm8 = vcmp.gt.f32.partialorder %v14852_v13, 0.0  ;;  %vm4811_vm5 = vcmp.eq.f32.partialorder %v4683_v8, 0.0  ;;  %vm4812_vm3 = vcmp.eq.f32.partialorder %v4684_v63, 0.0 }
 0x640   :  { %v6094_v58 = vsel %vm14913_vm12, 1.0, %v5678_v36  ;;  %v7117_v37 = vmul.f32 %v6989_v16, %v6093_v21  ;;  %v6351_v54 = vadd.f32 1.0, %v14849_v45  ;;  %v14935_v59 = vsub.f32 0.0, %v320_v26 }
 0x641   :  { %v7118_v60 = vmul.f32 %v6990_v0, %v6094_v58  ;;  %v4939_v42 = vsel %vm4811_vm5, 1.0, %v4683_v8  ;;  %v4940_v53 = vsel %vm4812_vm3, 1.0, %v4684_v63  ;;  %v3334_v43 = vadd.f32 %v3170_v25, %v17574_v62  ;;  %v17579_v63 = vld [vmem:[#allocation81_spill] sm:$0xff] }
 0x642   :  { %v7181_v5 = vadd.f32 %v7117_v37, %v17575_v39  ;;  %8369 = vrcp.f32 %v4939_v42  ;;  %v3916_v9 = vadd.f32 1.0, %v3788_v17  ;;  %v3917_v7 = vadd.f32 1.0, %v3789_v1 }
 0x643   :  { %v7182_v14 = vadd.f32 %v7118_v60, %v17576_v35  ;;  %vm5835_vm13 = vcmp.eq.s32.totalorder %v14791_v15, 0  ;;  %8371 = vrcp.f32 %v4940_v53  ;;  %v14941_v32 = vsub.f32 0.0, %v321_v49 }
 0x644   :  { %v8366_v16 = vpop.eup %8365  ;;  %v14944_v10 = vadd.f32 %v7181_v5, %v13542_v11  ;;  %v5197_v4 = vsub.f32 1.0, %v17577_v40  ;;  %v5198_v8 = vsub.f32 1.0, %v17578_v34  ;;  %v3335_v26 = vadd.f32 %v3170_v25, %v17579_v63  ;;  %vm14982_vm10 = vmand %vm5835_vm13, %vm11411_vm1 }
 0x645   :  { %v14950_v0 = vadd.f32 %v7182_v14, %v13546_v56  ;;  %vm5836_vm0 = vcmp.eq.s32.totalorder %v14794_v29, 0  ;;  %v4045_v36 = vadd.f32 %v10176_v19, %v3916_v9  ;;  %v4046_v17 = vadd.f32 %v10176_v19, %v3917_v7 }
 0x646   :  { %v6352_v1 = vadd.f32 1.0, %v14852_v13  ;;  %v6583_v11 = vmul.f32 1.442695, %v14935_v59  ;;  %v4301_v21 = vsub.f32 %v10176_v19, %v3334_v43  ;;  %v4302_v58 = vsub.f32 %v10176_v19, %v3335_v26  ;;  %vm14997_vm11 = vmand %vm5836_vm0, %vm11411_vm1 }
 0x647   :  { %v8368_v37 = vpop.eup %8367  ;;  %vm6863_vm2 = vcmp.lt.s32.totalorder %v14791_v15, 512  ;;  %v4173_v25 = vsub.f32 %v4045_v36, %v3334_v43  ;;  %v4174_v56 = vsub.f32 %v4046_v17, %v3335_v26  ;;  %v3413_v49 = vadd.s32 416, %v9999_v52  ;;  %v322_v17 = vld [vmem:[%s16205_s2 + $0x340] sm:$0xff]  ;;  %v17588_v26 = vld [vmem:[#allocation211_spill] sm:$0xff] }
 0x648   :  { %v6735_v60 = vsel %vm6223_vm14, %v6351_v54, %v8366_v16  ;;  %v6585_v42 = vmul.f32 1.442695, %v14941_v32  ;;  %v5325_v53 = vmul.f32 %v5197_v4, %v4301_v21  ;;  %v5326_v62 = vmul.f32 %v5198_v8, %v4302_v58  ;;  %v3175_v58 = vpop.permute.xlu1 %3174 }
 0x649   :  { %v7605_v39 = vadd.f32 -1.0, %v4173_v25  ;;  %v7606_v5 = vadd.f32 -1.0, %v4174_v56  ;;  %v5069_v9 = vmul.f32 %v4173_v25, %v17577_v40  ;;  %v5070_v7 = vmul.f32 %v4174_v56, %v17578_v34 }
 0x64a   :  { %v6736_v35 = vsel %vm6224_vm8, %v6352_v1, %v8368_v37  ;;  %vm6864_vm9 = vcmp.lt.s32.totalorder %v14794_v29, 512  ;;  %8373 = vpow2.f32 %v6583_v11  ;;  %v3481_v43 = vmul.u32 256, %v3413_v49 }
 0x64b   :  { %v4557_v45 = vadd.f32 %v7605_v39, %v17577_v40  ;;  %v4558_v54 = vadd.f32 %v7606_v5, %v17578_v34  ;;  %v14971_v14 = vadd.f32 %v5325_v53, %v5069_v9  ;;  %v14973_v16 = vadd.f32 %v5326_v62, %v5070_v7  ;;  %v17584_v62 = vld [vmem:[#allocation83_spill] sm:$0xff]  ;;  %v17585_v5 = vld [vmem:[#allocation168_spill] sm:$0xff] }
 0x64c   :  { %v8370_v4 = vpop.eup %8369  ;;  %8375 = vpow2.f32 %v14182_v2  ;;  %v6991_v8 = vsel %vm6863_vm2, %v6735_v60, 0.0  ;;  %v14987_v40 = vadd.s32 %v3481_v43, %v10027_v18  ;;  %v14990_v34 = vadd.s32 %v3481_v43, %v10070_v44  ;;  %v17586_v43 = vld [vmem:[#allocation18_spill] sm:$0xff] }
 0x64d   :  { %v8372_v63 = vpop.eup %8371  ;;  %v5680_v2 = vmul.f32 %v8370_v4, %v14883_v50  ;;  %vm6225_vm4 = vcmp.gt.f32.partialorder %v14935_v59, 0.0  ;;  %8377 = vpow2.f32 %v6585_v42  ;;  %v4685_v15 = vmul.f32 %v4557_v45, %v4173_v25 }
 0x64e   :  { %v4686_v36 = vmul.f32 %v4558_v54, %v4174_v56  ;;  %v6992_v50 = vsel %vm6864_vm9, %v6736_v35, 0.0  ;;  %v5682_v1 = vmul.f32 %v8372_v63, %v14885_v33  ;;  %v3790_v11 = vcvt.s32.f32 %v14987_v40  ;;  %v323_v33 = vld [vmem:[%s16205_s2 + $0x348] sm:$0xff]  ;;  %v17587_v63 = vld [vmem:[#allocation210_spill] sm:$0xff] }
 0x64f   :  { %v3791_v21 = vcvt.s32.f32 %v14990_v34  ;;  %v6095_v37 = vsel %vm14982_vm10, 1.0, %v5680_v2  ;;  %vm6226_vm15 = vcmp.gt.f32.partialorder %v14941_v32, 0.0  ;;  %vm4813_vm6 = vcmp.eq.f32.partialorder %v4685_v15, 0.0 }
 0x650   :  { %vm4814_vm7 = vcmp.eq.f32.partialorder %v4686_v36, 0.0  ;;  %v6096_v25 = vsel %vm14997_vm11, 1.0, %v5682_v1  ;;  %v7119_v56 = vmul.f32 %v6991_v8, %v6095_v37  ;;  %v6353_v29 = vadd.f32 1.0, %v14935_v59 }
 0x651   :  { %v15019_v49 = vsub.f32 0.0, %v322_v17  ;;  %v7120_v60 = vmul.f32 %v6992_v50, %v6096_v25  ;;  %v4941_v42 = vsel %vm4813_vm6, 1.0, %v4685_v15  ;;  %v4942_v53 = vsel %vm4814_vm7, 1.0, %v4686_v36  ;;  %v17589_v36 = vld [vmem:[#allocation85_spill] sm:$0xff] }
 0x652   :  { %v3336_v39 = vadd.f32 %v3175_v58, %v17584_v62  ;;  %v7183_v9 = vadd.f32 %v7119_v56, %v17585_v5  ;;  %8379 = vrcp.f32 %v4941_v42  ;;  %v3918_v7 = vadd.f32 1.0, %v3790_v11  ;;  %v17590_v50 = vld [vmem:[#allocation153_spill] sm:$0xff] }
 0x653   :  { %v3919_v35 = vadd.f32 1.0, %v3791_v21  ;;  %v7184_v45 = vadd.f32 %v7120_v60, %v17586_v43  ;;  %v6354_v54 = vadd.f32 1.0, %v14941_v32  ;;  %8381 = vrcp.f32 %v4942_v53 }
 0x654   :  { %v15025_v4 = vsub.f32 0.0, %v323_v33  ;;  %v8374_v8 = vpop.eup %8373  ;;  %v15028_v13 = vadd.f32 %v7183_v9, %v13640_v27  ;;  %v5199_v2 = vsub.f32 1.0, %v17587_v63  ;;  %v5200_v15 = vsub.f32 1.0, %v17588_v26 }
 0x655   :  { %v3337_v17 = vadd.f32 %v3175_v58, %v17589_v36  ;;  %v15034_v1 = vadd.f32 %v7184_v45, %v17590_v50  ;;  %vm5837_vm12 = vcmp.eq.s32.totalorder %v14903_v51, 0  ;;  %v4047_v11 = vadd.f32 %v10176_v19, %v3918_v7  ;;  %v280_v7 = vld [vmem:[%s16205_s2 + $0x1f0] sm:$0xff] }
 0x656   :  { %v4048_v21 = vadd.f32 %v10176_v19, %v3919_v35  ;;  %v15039_v37 = vpop.eup %8375  ;;  %vm5838_vm14 = vcmp.eq.s32.totalorder %v14906_v30, 0  ;;  %v6587_v27 = vmul.f32 1.442695, %v15019_v49  ;;  %v4303_v25 = vsub.f32 %v10176_v19, %v3336_v39  ;;  %vm15072_vm3 = vmand %vm5837_vm12, %vm11411_vm1 }
 0x657   :  { %v4304_v56 = vsub.f32 %v10176_v19, %v3337_v17  ;;  %v8378_v58 = vpop.eup %8377  ;;  %vm6865_vm8 = vcmp.lt.s32.totalorder %v14903_v51, 512  ;;  %v4175_v33 = vsub.f32 %v4047_v11, %v3336_v39  ;;  %v3414_v42 = vadd.s32 424, %v9999_v52  ;;  %vm15087_vm13 = vmand %vm5838_vm14, %vm11411_vm1 }
 0x658   :  { %v4176_v60 = vsub.f32 %v4048_v21, %v3337_v17  ;;  %v6737_v53 = vsel %vm6225_vm4, %v6353_v29, %v8374_v8  ;;  %v6589_v62 = vmul.f32 1.442695, %v15025_v4  ;;  %v5327_v5 = vmul.f32 %v5199_v2, %v4303_v25 }
 0x659   :  { %v5328_v9 = vmul.f32 %v5200_v15, %v4304_v56  ;;  %v7607_v35 = vadd.f32 -1.0, %v4175_v33  ;;  %v5071_v45 = vmul.f32 %v4175_v33, %v17587_v63  ;;  %v6738_v36 = vsel %vm6226_vm15, %v6354_v54, %v8378_v58  ;;  %v324_v56 = vld [vmem:[%s16205_s2 + $0x350] sm:$0xff] }
 0x65a   :  { %v7608_v43 = vadd.f32 -1.0, %v4176_v60  ;;  %v5072_v39 = vmul.f32 %v4176_v60, %v17588_v26  ;;  %vm6866_vm5 = vcmp.lt.s32.totalorder %v14906_v30, 512  ;;  %8383 = vpow2.f32 %v6587_v27  ;;  %v17598_v27 = vld [vmem:[#allocation160_spill] sm:$0xff] }
 0x65b   :  { %v3482_v59 = vmul.u32 256, %v3414_v42  ;;  %v4559_v29 = vadd.f32 %v7607_v35, %v17587_v63  ;;  %v15060_v2 = vadd.f32 %v5327_v5, %v5071_v45  ;;  %v15064_v50 = vsub.f32 0.0, %v280_v7  ;;  %v3180_v5 = vpop.permute.xlu0 %3179  ;;  %v17595_v45 = vld [vmem:[#allocation87_spill] sm:$0xff] }
 0x65c   :  { %v4560_v8 = vadd.f32 %v7608_v43, %v17588_v26  ;;  %v15062_v15 = vadd.f32 %v5328_v9, %v5072_v39  ;;  %v8380_v17 = vpop.eup %8379  ;;  %v6993_v11 = vsel %vm6865_vm8, %v6737_v53, 0.0  ;;  %vm6227_vm0 = vcmp.gt.f32.partialorder %v15019_v49, 0.0 }
 0x65d   :  { %v15077_v54 = vadd.s32 %v3482_v59, %v10027_v18  ;;  %v15080_v63 = vadd.s32 %v3482_v59, %v10070_v44  ;;  %v8382_v26 = vpop.eup %8381  ;;  %v5684_v21 = vmul.f32 %v8380_v17, %v14971_v14  ;;  %8385 = vpow2.f32 %v6589_v62  ;;  %v17597_v17 = vld [vmem:[#allocation21_spill] sm:$0xff] }
 0x65e   :  { %v4687_v51 = vmul.f32 %v4559_v29, %v4175_v33  ;;  %v4688_v25 = vmul.f32 %v4560_v8, %v4176_v60  ;;  %v6994_v14 = vsel %vm6866_vm5, %v6738_v36, 0.0  ;;  %v5686_v58 = vmul.f32 %v8382_v26, %v14973_v16  ;;  %v325_v16 = vld [vmem:[%s16205_s2 + $0x358] sm:$0xff]  ;;  %v17596_v36 = vld [vmem:[#allocation272_spill] sm:$0xff] }
 0x65f   :  { %v3792_v42 = vcvt.s32.f32 %v15077_v54  ;;  %v3793_v53 = vcvt.s32.f32 %v15080_v63  ;;  %v6097_v9 = vsel %vm15072_vm3, 1.0, %v5684_v21  ;;  %vm6228_vm2 = vcmp.gt.f32.partialorder %v15025_v4, 0.0 }
 0x660   :  { %vm4815_vm9 = vcmp.eq.f32.partialorder %v4687_v51, 0.0  ;;  %vm4816_vm10 = vcmp.eq.f32.partialorder %v4688_v25, 0.0  ;;  %v6098_v33 = vsel %vm15087_vm13, 1.0, %v5686_v58  ;;  %v7121_v60 = vmul.f32 %v6993_v11, %v6097_v9  ;;  %v17601_v9 = vld [vmem:[#allocation89_spill] sm:$0xff] }
 0x661   :  { %v6355_v30 = vadd.f32 1.0, %v15019_v49  ;;  %v15109_v62 = vsub.f32 0.0, %v324_v56  ;;  %v7122_v7 = vmul.f32 %v6994_v14, %v6098_v33  ;;  %v4943_v35 = vsel %vm4815_vm9, 1.0, %v4687_v51  ;;  %v17599_v51 = vld [vmem:[#allocation212_spill] sm:$0xff]  ;;  %v17600_v14 = vld [vmem:[#allocation213_spill] sm:$0xff] }
 0x662   :  { %v4944_v43 = vsel %vm4816_vm10, 1.0, %v4688_v25  ;;  %v3338_v39 = vadd.f32 %v3180_v5, %v17595_v45  ;;  %v7185_v59 = vadd.f32 %v7121_v60, %v17596_v36  ;;  %8387 = vrcp.f32 %v4943_v35  ;;  %v17602_v60 = vld [vmem:[#allocation292_spill] sm:$0xff] }
 0x663   :  { %v3920_v29 = vadd.f32 1.0, %v3792_v42  ;;  %v3921_v8 = vadd.f32 1.0, %v3793_v53  ;;  %v7186_v11 = vadd.f32 %v7122_v7, %v17597_v17  ;;  %v6356_v32 = vadd.f32 1.0, %v15025_v4  ;;  %v17609_v4 = vld [vmem:[#allocation280_spill] sm:$0xff] }
 0x664   :  { %8389 = vrcp.f32 %v4944_v43  ;;  %v15115_v26 = vsub.f32 0.0, %v325_v16  ;;  %v8384_v21 = vpop.eup %8383  ;;  %v15118_v56 = vadd.f32 %v7185_v59, %v17598_v27  ;;  %v5201_v25 = vsub.f32 1.0, %v17599_v51  ;;  %v281_v27 = vld [vmem:[%s16205_s2 + $0x1f8] sm:$0xff] }
 0x665   :  { %v5202_v58 = vsub.f32 1.0, %v17600_v14  ;;  %v3339_v33 = vadd.f32 %v3180_v5, %v17601_v9  ;;  %v15124_v42 = vadd.f32 %v7186_v11, %v17602_v60  ;;  %vm5839_vm11 = vcmp.eq.s32.totalorder %v14987_v40, 0 }
 0x666   :  { %v4049_v53 = vadd.f32 %v10176_v19, %v3920_v29  ;;  %v4050_v16 = vadd.f32 %v10176_v19, %v3921_v8  ;;  %vm5840_vm4 = vcmp.eq.s32.totalorder %v14990_v34, 0  ;;  %v6591_v7 = vmul.f32 1.442695, %v15109_v62  ;;  %vm15160_vm7 = vmand %vm5839_vm11, %vm11411_vm1 }
 0x667   :  { %v4305_v35 = vsub.f32 %v10176_v19, %v3338_v39  ;;  %v4306_v43 = vsub.f32 %v10176_v19, %v3339_v33  ;;  %v8386_v45 = vpop.eup %8385  ;;  %vm6867_vm15 = vcmp.lt.s32.totalorder %v14987_v40, 512  ;;  %v3415_v59 = vadd.s32 432, %v9999_v52  ;;  %vm15175_vm12 = vmand %vm5840_vm4, %vm11411_vm1 }
 0x668   :  { %v4177_v5 = vsub.f32 %v4049_v53, %v3338_v39  ;;  %v4178_v36 = vsub.f32 %v4050_v16, %v3339_v33  ;;  %v6739_v29 = vsel %vm6227_vm0, %v6355_v30, %v8384_v21  ;;  %v6593_v8 = vmul.f32 1.442695, %v15115_v26 }
 0x669   :  { %v5329_v17 = vmul.f32 %v5201_v25, %v4305_v35  ;;  %v5330_v11 = vmul.f32 %v5202_v58, %v4306_v43  ;;  %v6740_v33 = vsel %vm6228_vm2, %v6356_v32, %v8386_v45  ;;  %vm6868_vm6 = vcmp.lt.s32.totalorder %v14990_v34, 512  ;;  %v326_v45 = vld [vmem:[%s16205_s2 + $0x360] sm:$0xff] }
 0x66a   :  { %v7609_v9 = vadd.f32 -1.0, %v4177_v5  ;;  %v7610_v60 = vadd.f32 -1.0, %v4178_v36  ;;  %v5073_v61 = vmul.f32 %v4177_v5, %v17599_v51  ;;  %v5074_v39 = vmul.f32 %v4178_v36, %v17600_v14 }
 0x66b   :  { %8391 = vpow2.f32 %v6591_v7  ;;  %v3483_v49 = vmul.u32 256, %v3415_v59  ;;  %v15152_v16 = vsub.f32 0.0, %v281_v27  ;;  %v6995_v35 = vsel %vm6867_vm15, %v6739_v29, 0.0 }
 0x66c   :  { %v4561_v30 = vadd.f32 %v7609_v9, %v17599_v51  ;;  %v4562_v21 = vadd.f32 %v7610_v60, %v17600_v14  ;;  %v15148_v25 = vadd.f32 %v5329_v17, %v5073_v61  ;;  %v15150_v58 = vadd.f32 %v5330_v11, %v5074_v39  ;;  %v8388_v53 = vpop.eup %8387  ;;  %v3185_v11 = vpop.permute.xlu1 %3184 }
 0x66d   :  { %v15165_v32 = vadd.s32 %v3483_v49, %v10027_v18  ;;  %v15168_v61 = vadd.s32 %v3483_v49, %v10070_v44  ;;  %v5688_v14 = vmul.f32 %v8388_v53, %v15060_v2  ;;  %vm6229_vm14 = vcmp.gt.f32.partialorder %v15109_v62, 0.0 }
 0x66e   :  { %v8390_v51 = vpop.eup %8389  ;;  %8393 = vpow2.f32 %v6593_v8  ;;  %v4689_v40 = vmul.f32 %v4561_v30, %v4177_v5  ;;  %v4690_v43 = vmul.f32 %v4562_v21, %v4178_v36  ;;  %v6996_v2 = vsel %vm6868_vm6, %v6740_v33, 0.0  ;;  %v17607_v33 = vld [vmem:[#allocation91_spill] sm:$0xff]  ;;  %v17608_v30 = vld [vmem:[#allocation273_spill] sm:$0xff] }
 0x66f   :  { %v5690_v59 = vmul.f32 %v8390_v51, %v15062_v15  ;;  %v3794_v29 = vcvt.s32.f32 %v15165_v32  ;;  %v3795_v17 = vcvt.s32.f32 %v15168_v61  ;;  %v6099_v27 = vsel %vm15160_vm7, 1.0, %v5688_v14  ;;  %v327_v15 = vld [vmem:[%s16205_s2 + $0x368] sm:$0xff] }
 0x670   :  { %vm6230_vm8 = vcmp.gt.f32.partialorder %v15115_v26, 0.0  ;;  %vm4817_vm5 = vcmp.eq.f32.partialorder %v4689_v40, 0.0  ;;  %vm4818_vm3 = vcmp.eq.f32.partialorder %v4690_v43, 0.0  ;;  %v7123_v36 = vmul.f32 %v6995_v35, %v6099_v27 }
 0x671   :  { %v6100_v5 = vsel %vm15175_vm12, 1.0, %v5690_v59  ;;  %v6357_v34 = vadd.f32 1.0, %v15109_v62  ;;  %v15197_v8 = vsub.f32 0.0, %v326_v45  ;;  %vm6183_vm13 = vcmp.gt.f32.partialorder %v13591_v41, 0.0  ;;  %v17610_v59 = vld [vmem:[#allocation161_spill] sm:$0xff] }
 0x672   :  { %v7124_v9 = vmul.f32 %v6996_v2, %v6100_v5  ;;  %v4945_v60 = vsel %vm4817_vm5, 1.0, %v4689_v40  ;;  %v4946_v39 = vsel %vm4818_vm3, 1.0, %v4690_v43  ;;  %v3340_v49 = vadd.f32 %v3185_v11, %v17607_v33  ;;  %v17611_v40 = vld [vmem:[#allocation218_spill] sm:$0xff]  ;;  %v17612_v2 = vld [vmem:[#allocation219_spill] sm:$0xff]  ;;  %v17613_v33 = vld [vmem:[#allocation93_spill] sm:$0xff] }
 0x673   :  { %v7187_v21 = vadd.f32 %v7123_v36, %v17608_v30  ;;  %8395 = vrcp.f32 %v4945_v60  ;;  %v3922_v53 = vadd.f32 1.0, %v3794_v29  ;;  %v3923_v35 = vadd.f32 1.0, %v3795_v17  ;;  %v17614_v60 = vld [vmem:[#allocation82_spill] sm:$0xff] }
 0x674   :  { %v7188_v51 = vadd.f32 %v7124_v9, %v17609_v4  ;;  %v6358_v14 = vadd.f32 1.0, %v15115_v26  ;;  %8397 = vrcp.f32 %v4946_v39  ;;  %v15204_v7 = vsub.f32 0.0, %v327_v15 }
 0x675   :  { %v8392_v45 = vpop.eup %8391  ;;  %v15207_v27 = vadd.f32 %v7187_v21, %v17610_v59  ;;  %v5203_v43 = vsub.f32 1.0, %v17611_v40  ;;  %v5204_v5 = vsub.f32 1.0, %v17612_v2  ;;  %v3341_v36 = vadd.f32 %v3185_v11, %v17613_v33 }
 0x676   :  { %v15213_v29 = vadd.f32 %v7188_v51, %v17614_v60  ;;  %vm5841_vm0 = vcmp.eq.s32.totalorder %v15077_v54, 0  ;;  %v4051_v17 = vadd.f32 %v10176_v19, %v3922_v53  ;;  %v4052_v15 = vadd.f32 %v10176_v19, %v3923_v35 }
 0x677   :  { %vm5842_vm2 = vcmp.eq.s32.totalorder %v15080_v63, 0  ;;  %v6595_v9 = vmul.f32 1.442695, %v15197_v8  ;;  %v4307_v39 = vsub.f32 %v10176_v19, %v3340_v49  ;;  %v4308_v30 = vsub.f32 %v10176_v19, %v3341_v36  ;;  %vm15250_vm11 = vmand %vm5841_vm0, %vm11411_vm1 }
 0x678   :  { %v8394_v21 = vpop.eup %8393  ;;  %vm6869_vm9 = vcmp.lt.s32.totalorder %v15077_v54, 512  ;;  %v4179_v11 = vsub.f32 %v4051_v17, %v3340_v49  ;;  %v4180_v4 = vsub.f32 %v4052_v15, %v3341_v36  ;;  %v3416_v51 = vadd.s32 440, %v9999_v52  ;;  %v17615_v36 = vld [vmem:[#allocation281_spill] sm:$0xff]  ;;  %v17616_v17 = vld [vmem:[#allocation183_spill] sm:$0xff]  ;;  %vm15265_vm4 = vmand %vm5842_vm2, %vm11411_vm1 }
 0x679   :  { %v6741_v53 = vsel %vm6229_vm14, %v6357_v34, %v8392_v45  ;;  %v6597_v35 = vmul.f32 1.442695, %v15204_v7  ;;  %v5331_v59 = vmul.f32 %v5203_v43, %v4307_v39  ;;  %v5332_v33 = vmul.f32 %v5204_v5, %v4308_v30 }
 0x67a   :  { %v7611_v60 = vadd.f32 -1.0, %v4179_v11  ;;  %v7612_v57 = vadd.f32 -1.0, %v4180_v4  ;;  %v5075_v31 = vmul.f32 %v4179_v11, %v17611_v40  ;;  %v5076_v22 = vmul.f32 %v4180_v4, %v17612_v2 }
 0x67b   :  { %v6742_v48 = vsel %vm6230_vm8, %v6358_v14, %v8394_v21  ;;  %vm6870_vm10 = vcmp.lt.s32.totalorder %v15080_v63, 512  ;;  %8399 = vpow2.f32 %v6595_v9  ;;  %v3484_v49 = vmul.u32 256, %v3416_v51  ;;  %v328_v9 = vld [vmem:[%s16205_s2 + $0x370] sm:$0xff]  ;;  %v3190_v51 = vpop.permute.xlu0 %3189  ;;  %v329_v63 = vld [vmem:[%s16205_s2 + $0x378] sm:$0xff] }
 0x67c   :  { %v4563_v62 = vadd.f32 %v7611_v60, %v17611_v40  ;;  %v4564_v34 = vadd.f32 %v7612_v57, %v17612_v2  ;;  %v15234_v45 = vadd.f32 %v5331_v59, %v5075_v31  ;;  %v15236_v43 = vadd.f32 %v5332_v33, %v5076_v22 }
 0x67d   :  { %v8396_v5 = vpop.eup %8395  ;;  %v15242_v15 = vsel %vm6183_vm13, %v17616_v17, %v17615_v36  ;;  %v6997_v26 = vsel %vm6869_vm9, %v6741_v53, 0.0  ;;  %v15255_v22 = vadd.s32 %v3484_v49, %v10027_v18  ;;  %v15258_v31 = vadd.s32 %v3484_v49, %v10070_v44  ;;  %v17622_v49 = vld [vmem:[#allocation95_spill] sm:$0xff] }
 0x67e   :  { %v8398_v41 = vpop.eup %8397  ;;  %v5692_v14 = vmul.f32 %v8396_v5, %v15148_v25  ;;  %vm6231_vm15 = vcmp.gt.f32.partialorder %v15197_v8, 0.0  ;;  %8401 = vpow2.f32 %v6597_v35  ;;  %v4691_v54 = vmul.f32 %v4563_v62, %v4179_v11  ;;  %v17621_v35 = vld [vmem:[#allocation80_spill] sm:$0xff] }
 0x67f   :  { %v4692_v2 = vmul.f32 %v4564_v34, %v4180_v4  ;;  %v6998_v25 = vsel %vm6870_vm10, %v6742_v48, 0.0  ;;  %v5694_v39 = vmul.f32 %v8398_v41, %v15150_v58  ;;  %v3796_v30 = vcvt.s32.f32 %v15255_v22  ;;  %v17623_v34 = vld [vmem:[#allocation282_spill] sm:$0xff] }
 0x680   :  { %v3797_v21 = vcvt.s32.f32 %v15258_v31  ;;  %v6101_v53 = vsel %vm15250_vm11, 1.0, %v5692_v14  ;;  %vm6232_vm6 = vcmp.gt.f32.partialorder %v15204_v7, 0.0  ;;  %vm4819_vm7 = vcmp.eq.f32.partialorder %v4691_v54, 0.0 }
 0x681   :  { %vm4820_vm12 = vcmp.eq.f32.partialorder %v4692_v2, 0.0  ;;  %v6102_v11 = vsel %vm15265_vm4, 1.0, %v5694_v39  ;;  %v7125_v4 = vmul.f32 %v6997_v26, %v6101_v53  ;;  %v6359_v48 = vadd.f32 1.0, %v15197_v8  ;;  %v17624_v26 = vld [vmem:[#allocation283_spill] sm:$0xff] }
 0x682   :  { %v15287_v58 = vsub.f32 0.0, %v328_v9  ;;  %vm6823_vm14 = vcmp.lt.s32.totalorder %v17621_v35, 512  ;;  %v7126_v59 = vmul.f32 %v6998_v25, %v6102_v11  ;;  %v4947_v33 = vsel %vm4819_vm7, 1.0, %v4691_v54  ;;  %v17625_v9 = vld [vmem:[#allocation58_spill] sm:$0xff]  ;;  %v17627_v54 = vld [vmem:[#allocation220_spill] sm:$0xff]  ;;  %v17628_v25 = vld [vmem:[#allocation221_spill] sm:$0xff] }
 0x683   :  { %v4948_v60 = vsel %vm4820_vm12, 1.0, %v4692_v2  ;;  %v3342_v62 = vadd.f32 %v3190_v51, %v17622_v49  ;;  %v7189_v5 = vadd.f32 %v7125_v4, %v17623_v34  ;;  %8403 = vrcp.f32 %v4947_v33  ;;  %v17629_v11 = vld [vmem:[#allocation97_spill] sm:$0xff]  ;;  %v17630_v33 = vld [vmem:[#allocation176_spill] sm:$0xff] }
 0x684   :  { %v3924_v36 = vadd.f32 1.0, %v3796_v30  ;;  %v3925_v17 = vadd.f32 1.0, %v3797_v21  ;;  %v7190_v57 = vadd.f32 %v7126_v59, %v17624_v26  ;;  %v6360_v41 = vadd.f32 1.0, %v15204_v7 }
 0x685   :  { %8405 = vrcp.f32 %v4948_v60  ;;  %v15294_v14 = vsub.f32 0.0, %v329_v63  ;;  %v8400_v40 = vpop.eup %8399  ;;  %v15297_v39 = vadd.f32 %v7189_v5, %v17625_v9  ;;  %v5205_v2 = vsub.f32 1.0, %v17627_v54 }
 0x686   :  { %v5206_v53 = vsub.f32 1.0, %v17628_v25  ;;  %v3343_v4 = vadd.f32 %v3190_v51, %v17629_v11  ;;  %v15303_v30 = vadd.f32 %v7190_v57, %v17630_v33  ;;  %vm5843_vm8 = vcmp.eq.s32.totalorder %v15165_v32, 0 }
 0x687   :  { %17626 = vst [vmem:[#allocation46_spill] sm:$0xff] %v15297_v39  ;;  %v4053_v21 = vadd.f32 %v10176_v19, %v3924_v36  ;;  %v4054_v63 = vadd.f32 %v10176_v19, %v3925_v17  ;;  %vm5844_vm5 = vcmp.eq.s32.totalorder %v15168_v61, 0  ;;  %v6599_v59 = vmul.f32 1.442695, %v15287_v58  ;;  %vm15339_vm0 = vmand %vm5843_vm8, %vm11411_vm1 }
 0x688   :  { %17631 = vst [vmem:[#allocation48_spill] sm:$0xff] %v15303_v30  ;;  %v4309_v60 = vsub.f32 %v10176_v19, %v3342_v62  ;;  %v4310_v49 = vsub.f32 %v10176_v19, %v3343_v4  ;;  %v8402_v34 = vpop.eup %8401  ;;  %vm6871_vm3 = vcmp.lt.s32.totalorder %v15165_v32, 512  ;;  %v3417_v26 = vadd.s32 448, %v9999_v52  ;;  %vm15354_vm2 = vmand %vm5844_vm5, %vm11411_vm1 }
 0x689   :  { %v4181_v51 = vsub.f32 %v4053_v21, %v3342_v62  ;;  %v4182_v5 = vsub.f32 %v4054_v63, %v3343_v4  ;;  %v6743_v36 = vsel %vm6231_vm15, %v6359_v48, %v8400_v40  ;;  %v6601_v17 = vmul.f32 1.442695, %v15294_v14  ;;  %v330_v63 = vld [vmem:[%s16205_s2 + $0x380] sm:$0xff] }
 0x68a   :  { %v5333_v57 = vmul.f32 %v5205_v2, %v4309_v60  ;;  %v5334_v9 = vmul.f32 %v5206_v53, %v4310_v49  ;;  %v6744_v6 = vsel %vm6232_vm6, %v6360_v41, %v8402_v34  ;;  %vm6872_vm13 = vcmp.lt.s32.totalorder %v15168_v61, 512  ;;  %v3195_v34 = vpop.permute.xlu1 %3194  ;;  %v331_v61 = vld [vmem:[%s16205_s2 + $0x388] sm:$0xff] }
 0x68b   :  { %v7613_v11 = vadd.f32 -1.0, %v4181_v51  ;;  %v7614_v33 = vadd.f32 -1.0, %v4182_v5  ;;  %v5077_v30 = vmul.f32 %v4181_v51, %v17627_v54  ;;  %v5078_v39 = vmul.f32 %v4182_v5, %v17628_v25 }
 0x68c   :  { %8407 = vpow2.f32 %v6599_v59  ;;  %v3485_v62 = vmul.u32 256, %v3417_v26  ;;  %v15331_v4 = vsel %vm6823_vm14, %v15242_v15, 0.0  ;;  %v6999_v7 = vsel %vm6871_vm3, %v6743_v36, 0.0 }
 0x68d   :  { %v4565_v8 = vadd.f32 %v7613_v11, %v17627_v54  ;;  %v4566_v48 = vadd.f32 %v7614_v33, %v17628_v25  ;;  %v15324_v40 = vadd.f32 %v5333_v57, %v5077_v30  ;;  %v15326_v2 = vadd.f32 %v5334_v9, %v5078_v39  ;;  %v8404_v53 = vpop.eup %8403  ;;  %17632 = vst [vmem:[#allocation139_spill] sm:$0xff] %v15331_v4  ;;  %v17637_v9 = vld [vmem:[#allocation99_spill] sm:$0xff]  ;;  %v17638_v33 = vld [vmem:[#allocation284_spill] sm:$0xff]  ;;  %v17640_v30 = vld [vmem:[#allocation289_spill] sm:$0xff] }
 0x68e   :  { %v15344_v39 = vadd.s32 %v3485_v62, %v10027_v18  ;;  %v15347_v54 = vadd.s32 %v3485_v62, %v10070_v44  ;;  %v5696_v15 = vmul.f32 %v8404_v53, %v15234_v45  ;;  %vm6233_vm9 = vcmp.gt.f32.partialorder %v15287_v58, 0.0  ;;  %v17639_v53 = vld [vmem:[#allocation200_spill] sm:$0xff]  ;;  %v17676_v4 = vld [vmem:[#allocation166_spill] sm:$0xff] }
 0x68f   :  { %v8406_v25 = vpop.eup %8405  ;;  %8409 = vpow2.f32 %v6601_v17  ;;  %v4693_v32 = vmul.f32 %v4565_v8, %v4181_v51  ;;  %v4694_v21 = vmul.f32 %v4566_v48, %v4182_v5  ;;  %vm5793_vm10 = vcmp.eq.s32.totalorder %v12911_v46, 0 }
 0x690   :  { %v7000_v45 = vsel %vm6872_vm13, %v6744_v6, 0.0  ;;  %v5698_v59 = vmul.f32 %v8406_v25, %v15236_v43  ;;  %v3798_v60 = vcvt.s32.f32 %v15344_v39  ;;  %v3799_v49 = vcvt.s32.f32 %v15347_v54  ;;  %vm15410_vm14 = vmand %vm5793_vm10, %vm11411_vm1 }
 0x691   :  { %v6103_v51 = vsel %vm15339_vm0, 1.0, %v5696_v15  ;;  %vm6234_vm11 = vcmp.gt.f32.partialorder %v15294_v14, 0.0  ;;  %vm4821_vm4 = vcmp.eq.f32.partialorder %v4693_v32, 0.0  ;;  %vm4822_vm15 = vcmp.eq.f32.partialorder %v4694_v21, 0.0 }
 0x692   :  { %v6104_v5 = vsel %vm15354_vm2, 1.0, %v5698_v59  ;;  %v7127_v26 = vmul.f32 %v6999_v7, %v6103_v51  ;;  %v6361_v6 = vadd.f32 1.0, %v15287_v58  ;;  %v15377_v43 = vsub.f32 0.0, %v330_v63  ;;  %v17644_v51 = vld [vmem:[#allocation101_spill] sm:$0xff] }
 0x693   :  { %v7128_v36 = vmul.f32 %v7000_v45, %v6104_v5  ;;  %v4949_v17 = vsel %vm4821_vm4, 1.0, %v4693_v32  ;;  %v4950_v57 = vsel %vm4822_vm15, 1.0, %v4694_v21  ;;  %v3344_v11 = vadd.f32 %v3195_v34, %v17637_v9  ;;  %v17642_v32 = vld [vmem:[#allocation226_spill] sm:$0xff]  ;;  %v17643_v45 = vld [vmem:[#allocation227_spill] sm:$0xff] }
 0x694   :  { %v7191_v62 = vadd.f32 %v7127_v26, %v17638_v33  ;;  %8411 = vrcp.f32 %v4949_v17  ;;  %v3926_v8 = vadd.f32 1.0, %v3798_v60  ;;  %v3927_v48 = vadd.f32 1.0, %v3799_v49  ;;  %v17645_v26 = vld [vmem:[#allocation42_spill] sm:$0xff] }
 0x695   :  { %v7192_v7 = vadd.f32 %v7128_v36, %v17639_v53  ;;  %v6362_v41 = vadd.f32 1.0, %v15294_v14  ;;  %8413 = vrcp.f32 %v4950_v57  ;;  %v15383_v25 = vsub.f32 0.0, %v331_v61 }
 0x696   :  { %v8408_v15 = vpop.eup %8407  ;;  %v15386_v63 = vadd.f32 %v7191_v62, %v17640_v30  ;;  %v5207_v21 = vsub.f32 1.0, %v17642_v32  ;;  %v5208_v59 = vsub.f32 1.0, %v17643_v45  ;;  %v3345_v5 = vadd.f32 %v3195_v34, %v17644_v51 }
 0x697   :  { %v15392_v60 = vadd.f32 %v7192_v7, %v17645_v26  ;;  %vm5845_vm6 = vcmp.eq.s32.totalorder %v15255_v22, 0  ;;  %v4055_v49 = vadd.f32 %v10176_v19, %v3926_v8  ;;  %v4056_v61 = vadd.f32 %v10176_v19, %v3927_v48 }
 0x698   :  { %17641 = vst [vmem:[#allocation294_spill] sm:$0xff] %v15386_v63  ;;  %vm5846_vm7 = vcmp.eq.s32.totalorder %v15258_v31, 0  ;;  %v6603_v36 = vmul.f32 1.442695, %v15377_v43  ;;  %v4311_v17 = vsub.f32 %v10176_v19, %v3344_v11  ;;  %v4312_v57 = vsub.f32 %v10176_v19, %v3345_v5  ;;  %vm15434_vm5 = vmand %vm5845_vm6, %vm11411_vm1 }
 0x699   :  { %17646 = vst [vmem:[#allocation90_spill] sm:$0xff] %v15392_v60  ;;  %v8410_v9 = vpop.eup %8409  ;;  %vm6873_vm12 = vcmp.lt.s32.totalorder %v15255_v22, 512  ;;  %v4183_v34 = vsub.f32 %v4055_v49, %v3344_v11  ;;  %v4184_v33 = vsub.f32 %v4056_v61, %v3345_v5  ;;  %v3418_v62 = vadd.s32 456, %v9999_v52  ;;  %v17649_v61 = vld [vmem:[#allocation26_spill] sm:$0xff]  ;;  %vm15449_vm3 = vmand %vm5846_vm7, %vm11411_vm1 }
 0x69a   :  { %v6745_v8 = vsel %vm6233_vm9, %v6361_v6, %v8408_v15  ;;  %v6605_v48 = vmul.f32 1.442695, %v15383_v25  ;;  %v5335_v53 = vmul.f32 %v5207_v21, %v4311_v17  ;;  %v5336_v7 = vmul.f32 %v5208_v59, %v4312_v57  ;;  %v17657_v17 = vld [vmem:[#allocation207_spill] sm:$0xff] }
 0x69b   :  { %v7615_v51 = vadd.f32 -1.0, %v4183_v34  ;;  %v7616_v11 = vadd.f32 -1.0, %v4184_v33  ;;  %v5079_v5 = vmul.f32 %v4183_v34, %v17642_v32  ;;  %v5080_v26 = vmul.f32 %v4184_v33, %v17643_v45 }
 0x69c   :  { %v6746_v58 = vsel %vm6234_vm11, %v6362_v41, %v8410_v9  ;;  %vm6874_vm8 = vcmp.lt.s32.totalorder %v15258_v31, 512  ;;  %8415 = vpow2.f32 %v6603_v36  ;;  %v3486_v6 = vmul.u32 256, %v3418_v62 }
 0x69d   :  { %v4567_v15 = vadd.f32 %v7615_v51, %v17642_v32  ;;  %v4568_v46 = vadd.f32 %v7616_v11, %v17643_v45  ;;  %v15421_v21 = vadd.f32 %v5335_v53, %v5079_v5  ;;  %v15423_v59 = vadd.f32 %v5336_v7, %v5080_v26  ;;  %v3200_v51 = vpop.permute.xlu0 %3199 }
 0x69e   :  { %v8412_v49 = vpop.eup %8411  ;;  %v7001_v14 = vsel %vm6873_vm12, %v6745_v8, 0.0  ;;  %v15439_v32 = vadd.s32 %v3486_v6, %v10027_v18  ;;  %v15442_v45 = vadd.s32 %v3486_v6, %v10070_v44  ;;  %8417 = vpow2.f32 %v6605_v48  ;;  %v333_v48 = vld [vmem:[%s16205_s2 + $0x398] sm:$0xff] }
 0x69f   :  { %v8414_v36 = vpop.eup %8413  ;;  %v5700_v57 = vmul.f32 %v8412_v49, %v15324_v40  ;;  %v4695_v22 = vmul.f32 %v4567_v15, %v4183_v34  ;;  %v4696_v62 = vmul.f32 %v4568_v46, %v4184_v33  ;;  %v7002_v8 = vsel %vm6874_vm8, %v6746_v58, 0.0  ;;  %v17654_v6 = vld [vmem:[#allocation103_spill] sm:$0xff]  ;;  %v17655_v46 = vld [vmem:[#allocation201_spill] sm:$0xff] }
 0x6a0   :  { %v5702_v53 = vmul.f32 %v8414_v36, %v15326_v2  ;;  %v3800_v7 = vcvt.s32.f32 %v15439_v32  ;;  %v3801_v40 = vcvt.s32.f32 %v15442_v45  ;;  %vm6235_vm13 = vcmp.gt.f32.partialorder %v15377_v43, 0.0  ;;  %v332_v2 = vld [vmem:[%s16205_s2 + $0x390] sm:$0xff] }
 0x6a1   :  { %v6105_v11 = vsel %vm15434_vm5, 1.0, %v5700_v57  ;;  %vm4823_vm0 = vcmp.eq.f32.partialorder %v4695_v22, 0.0  ;;  %vm4824_vm2 = vcmp.eq.f32.partialorder %v4696_v62, 0.0  ;;  %vm6236_vm9 = vcmp.gt.f32.partialorder %v15383_v25, 0.0  ;;  %v17656_v36 = vld [vmem:[#allocation78_spill] sm:$0xff] }
 0x6a2   :  { %v6106_v34 = vsel %vm15449_vm3, 1.0, %v5702_v53  ;;  %v7129_v33 = vmul.f32 %v7001_v14, %v6105_v11  ;;  %v6363_v31 = vadd.f32 1.0, %v15377_v43  ;;  %v4951_v26 = vsel %vm4823_vm0, 1.0, %v4695_v22  ;;  %v17659_v22 = vld [vmem:[#allocation228_spill] sm:$0xff] }
 0x6a3   :  { %v7130_v5 = vmul.f32 %v7002_v8, %v6106_v34  ;;  %v4952_v58 = vsel %vm4824_vm2, 1.0, %v4696_v62  ;;  %v3346_v15 = vadd.f32 %v3200_v51, %v17654_v6  ;;  %8419 = vrcp.f32 %v4951_v26  ;;  %v17660_v8 = vld [vmem:[#allocation229_spill] sm:$0xff]  ;;  %v17662_v26 = vld [vmem:[#allocation84_spill] sm:$0xff] }
 0x6a4   :  { %v7193_v49 = vadd.f32 %v7129_v33, %v17655_v46  ;;  %v3928_v14 = vadd.f32 1.0, %v3800_v7  ;;  %v3929_v41 = vadd.f32 1.0, %v3801_v40  ;;  %8421 = vrcp.f32 %v4952_v58  ;;  %v17661_v6 = vld [vmem:[#allocation105_spill] sm:$0xff] }
 0x6a5   :  { %v7194_v57 = vadd.f32 %v7130_v5, %v17656_v36  ;;  %v15474_v9 = vsub.f32 0.0, %v332_v2  ;;  %v15476_v53 = vsub.f32 0.0, %v333_v48  ;;  %v5209_v62 = vsub.f32 1.0, %v17659_v22 }
 0x6a6   :  { %v8416_v11 = vpop.eup %8415  ;;  %v15479_v60 = vadd.f32 %v7193_v49, %v17657_v17  ;;  %v5210_v34 = vsub.f32 1.0, %v17660_v8  ;;  %v3347_v33 = vadd.f32 %v3200_v51, %v17661_v6  ;;  %v6364_v40 = vadd.f32 1.0, %v15383_v25 }
 0x6a7   :  { %v15485_v7 = vadd.f32 %v7194_v57, %v17662_v26  ;;  %v4057_v2 = vadd.f32 %v10176_v19, %v3928_v14  ;;  %v4058_v48 = vadd.f32 %v10176_v19, %v3929_v41  ;;  %vm5847_vm10 = vcmp.eq.s32.totalorder %v15344_v39, 0 }
 0x6a8   :  { %17658 = vst [vmem:[#allocation214_spill] sm:$0xff] %v15479_v60  ;;  %vm6875_vm11 = vcmp.lt.s32.totalorder %v15344_v39, 512  ;;  %v4313_v17 = vsub.f32 %v10176_v19, %v3346_v15  ;;  %v4314_v5 = vsub.f32 %v10176_v19, %v3347_v33  ;;  %v8418_v58 = vpop.eup %8417  ;;  %v6607_v51 = vmul.f32 1.442695, %v15474_v9  ;;  %vm15517_vm6 = vmand %vm5847_vm10, %vm11411_vm1 }
 0x6a9   :  { %17663 = vst [vmem:[#allocation286_spill] sm:$0xff] %v15485_v7  ;;  %v4185_v46 = vsub.f32 %v4057_v2, %v3346_v15  ;;  %v4186_v49 = vsub.f32 %v4058_v48, %v3347_v33  ;;  %v3419_v36 = vadd.s32 464, %v9999_v52  ;;  %v6747_v14 = vsel %vm6235_vm13, %v6363_v31, %v8416_v11  ;;  %v334_v48 = vld [vmem:[%s16205_s2 + $0x3a0] sm:$0xff] }
 0x6aa   :  { %v6609_v41 = vmul.f32 1.442695, %v15476_v53  ;;  %v5337_v57 = vmul.f32 %v5209_v62, %v4313_v17  ;;  %v5338_v6 = vmul.f32 %v5210_v34, %v4314_v5  ;;  %vm5848_vm4 = vcmp.eq.s32.totalorder %v15347_v54, 0 }
 0x6ab   :  { %v7617_v26 = vadd.f32 -1.0, %v4185_v46  ;;  %v7618_v7 = vadd.f32 -1.0, %v4186_v49  ;;  %v5081_v60 = vmul.f32 %v4185_v46, %v17659_v22  ;;  %v5082_v63 = vmul.f32 %v4186_v49, %v17660_v8  ;;  %vm15532_vm7 = vmand %vm5848_vm4, %vm11411_vm1 }
 0x6ac   :  { %v6748_v15 = vsel %vm6236_vm9, %v6364_v40, %v8418_v58  ;;  %vm6876_vm15 = vcmp.lt.s32.totalorder %v15347_v54, 512  ;;  %v3487_v33 = vmul.u32 256, %v3419_v36  ;;  %v7003_v2 = vsel %vm6875_vm11, %v6747_v14, 0.0  ;;  %v335_v14 = vld [vmem:[%s16205_s2 + $0x3a8] sm:$0xff] }
 0x6ad   :  { %v4569_v43 = vadd.f32 %v7617_v26, %v17659_v22  ;;  %v4570_v31 = vadd.f32 %v7618_v7, %v17660_v8  ;;  %v15507_v11 = vadd.f32 %v5337_v57, %v5081_v60  ;;  %v15509_v62 = vadd.f32 %v5338_v6, %v5082_v63  ;;  %v8420_v34 = vpop.eup %8419  ;;  %v17668_v57 = vld [vmem:[#allocation182_spill] sm:$0xff] }
 0x6ae   :  { %8423 = vpow2.f32 %v6607_v51  ;;  %v15522_v22 = vadd.s32 %v3487_v33, %v10027_v18  ;;  %v15525_v60 = vadd.s32 %v3487_v33, %v10070_v44  ;;  %v8422_v63 = vpop.eup %8421  ;;  %v5704_v8 = vmul.f32 %v8420_v34, %v15421_v21  ;;  %v3205_v51 = vpop.permute.xlu1 %3204  ;;  %v17669_v33 = vld [vmem:[#allocation107_spill] sm:$0xff] }
 0x6af   :  { %8425 = vpow2.f32 %v6609_v41  ;;  %v4697_v7 = vmul.f32 %v4569_v43, %v4185_v46  ;;  %v4698_v40 = vmul.f32 %v4570_v31, %v4186_v49  ;;  %v7004_v17 = vsel %vm6876_vm15, %v6748_v15, 0.0  ;;  %v17670_v31 = vld [vmem:[#allocation174_spill] sm:$0xff] }
 0x6b0   :  { %v5706_v21 = vmul.f32 %v8422_v63, %v15423_v59  ;;  %v3802_v5 = vcvt.s32.f32 %v15522_v22  ;;  %v3803_v58 = vcvt.s32.f32 %v15525_v60  ;;  %v6107_v36 = vsel %vm15517_vm6, 1.0, %v5704_v8  ;;  %v17671_v63 = vld [vmem:[#allocation148_spill] sm:$0xff] }
 0x6b1   :  { %vm6237_vm12 = vcmp.gt.f32.partialorder %v15474_v9, 0.0  ;;  %vm6238_vm8 = vcmp.gt.f32.partialorder %v15476_v53, 0.0  ;;  %v6365_v46 = vadd.f32 1.0, %v15474_v9  ;;  %vm4825_vm5 = vcmp.eq.f32.partialorder %v4697_v7, 0.0 }
 0x6b2   :  { %vm4826_vm3 = vcmp.eq.f32.partialorder %v4698_v40, 0.0  ;;  %v6108_v54 = vsel %vm15532_vm7, 1.0, %v5706_v21  ;;  %v7131_v59 = vmul.f32 %v7003_v2, %v6107_v36  ;;  %v6366_v49 = vadd.f32 1.0, %v15476_v53  ;;  %v17673_v21 = vld [vmem:[#allocation234_spill] sm:$0xff]  ;;  %v17684_v53 = vld [vmem:[#allocation167_spill] sm:$0xff] }
 0x6b3   :  { %v15555_v41 = vsub.f32 0.0, %v334_v48  ;;  %vm6184_vm13 = vcmp.gt.f32.partialorder %v17668_v57, 0.0  ;;  %v7132_v6 = vmul.f32 %v7004_v17, %v6108_v54  ;;  %vm5849_vm0 = vcmp.eq.s32.totalorder %v15439_v32, 0  ;;  %v17672_v48 = vld [vmem:[#allocation279_spill] sm:$0xff]  ;;  %v17675_v54 = vld [vmem:[#allocation109_spill] sm:$0xff] }
 0x6b4   :  { %v4953_v26 = vsel %vm4825_vm5, 1.0, %v4697_v7  ;;  %v4954_v15 = vsel %vm4826_vm3, 1.0, %v4698_v40  ;;  %v3348_v43 = vadd.f32 %v3205_v51, %v17669_v33  ;;  %v7195_v34 = vadd.f32 %v7131_v59, %v17670_v31  ;;  %v17674_v7 = vld [vmem:[#allocation235_spill] sm:$0xff]  ;;  %vm15607_vm11 = vmand %vm5849_vm0, %vm11411_vm1 }
 0x6b5   :  { %8427 = vrcp.f32 %v4953_v26  ;;  %v3930_v2 = vadd.f32 1.0, %v3802_v5  ;;  %v3931_v25 = vadd.f32 1.0, %v3803_v58  ;;  %v7196_v8 = vadd.f32 %v7132_v6, %v17671_v63 }
 0x6b6   :  { %vm5850_vm2 = vcmp.eq.s32.totalorder %v15442_v45, 0  ;;  %8429 = vrcp.f32 %v4954_v15  ;;  %v15563_v39 = vsub.f32 0.0, %v335_v14  ;;  %v7227_v17 = vadd.f32 %v7195_v34, %v17672_v48 }
 0x6b7   :  { %v5211_v36 = vsub.f32 1.0, %v17673_v21  ;;  %v5212_v40 = vsub.f32 1.0, %v17674_v7  ;;  %v3349_v33 = vadd.f32 %v3205_v51, %v17675_v54  ;;  %v7228_v59 = vadd.f32 %v7196_v8, %v17676_v4  ;;  %vm15625_vm15 = vmand %vm5850_vm2, %vm11411_vm1 }
 0x6b8   :  { %vm6877_vm9 = vcmp.lt.s32.totalorder %v15439_v32, 512  ;;  %v4059_v5 = vadd.f32 %v10176_v19, %v3930_v2  ;;  %v4060_v58 = vadd.f32 %v10176_v19, %v3931_v25  ;;  %v8424_v6 = vpop.eup %8423  ;;  %v15574_v14 = vadd.f32 %v7227_v17, %v14856_v55 }
 0x6b9   :  { %v6611_v26 = vmul.f32 1.442695, %v15555_v41  ;;  %v4315_v15 = vsub.f32 %v10176_v19, %v3348_v43  ;;  %v4316_v31 = vsub.f32 %v10176_v19, %v3349_v33  ;;  %v8426_v34 = vpop.eup %8425  ;;  %v15580_v51 = vadd.f32 %v7228_v59, %v14862_v20 }
 0x6ba   :  { %vm6878_vm10 = vcmp.lt.s32.totalorder %v15442_v45, 512  ;;  %v4187_v4 = vsub.f32 %v4059_v5, %v3348_v43  ;;  %v4188_v2 = vsub.f32 %v4060_v58, %v3349_v33  ;;  %v6613_v25 = vmul.f32 1.442695, %v15563_v39 }
 0x6bb   :  { %v5339_v63 = vmul.f32 %v5211_v36, %v4315_v15  ;;  %v5340_v8 = vmul.f32 %v5212_v40, %v4316_v31  ;;  %v3420_v55 = vadd.s32 472, %v9999_v52  ;;  %v6749_v20 = vsel %vm6237_vm12, %v6365_v46, %v8424_v6  ;;  %v17677_v15 = vld [vmem:[#allocation206_spill] sm:$0xff] }
 0x6bc   :  { %v7619_v48 = vadd.f32 -1.0, %v4187_v4  ;;  %v7620_v17 = vadd.f32 -1.0, %v4188_v2  ;;  %v5083_v54 = vmul.f32 %v4187_v4, %v17673_v21  ;;  %v5084_v35 = vmul.f32 %v4188_v2, %v17674_v7 }
 0x6bd   :  { %v6750_v59 = vsel %vm6238_vm8, %v6366_v49, %v8426_v34  ;;  %8431 = vpow2.f32 %v6611_v26  ;;  %v3488_v43 = vmul.u32 256, %v3420_v55  ;;  %v15601_v9 = vsel %vm6184_vm13, %v17677_v15, %v15039_v37 }
 0x6be   :  { %v4571_v33 = vadd.f32 %v7619_v48, %v17673_v21  ;;  %v4572_v36 = vadd.f32 %v7620_v17, %v17674_v7  ;;  %v15593_v40 = vadd.f32 %v5339_v63, %v5083_v54  ;;  %v15595_v5 = vadd.f32 %v5340_v8, %v5084_v35  ;;  %v337_v48 = vld [vmem:[%s16205_s2 + $0x3b8] sm:$0xff] }
 0x6bf   :  { %v8428_v58 = vpop.eup %8427  ;;  %8433 = vpow2.f32 %v6613_v25  ;;  %v15612_v46 = vadd.s32 %v3488_v43, %v10027_v18  ;;  %v15615_v35 = vadd.s32 %v3488_v43, %v10070_v44  ;;  %vm5794_vm4 = vcmp.eq.s32.totalorder %v12918_v47, 0  ;;  %v17682_v17 = vld [vmem:[#allocation147_spill] sm:$0xff]  ;;  %v3210_v43 = vpop.permute.xlu0 %3209 }
 0x6c0   :  { %v8430_v49 = vpop.eup %8429  ;;  %v7005_v37 = vsel %vm6877_vm9, %v6749_v20, 0.0  ;;  %v5708_v57 = vmul.f32 %v8428_v58, %v15507_v11  ;;  %vm6239_vm6 = vcmp.gt.f32.partialorder %v15555_v41, 0.0  ;;  %v4699_v7 = vmul.f32 %v4571_v33, %v4187_v4  ;;  %v17683_v33 = vld [vmem:[#allocation130_spill] sm:$0xff]  ;;  %vm15679_vm2 = vmand %vm5794_vm4, %vm11411_vm1 }
 0x6c1   :  { %v4700_v6 = vmul.f32 %v4572_v36, %v4188_v2  ;;  %v7006_v26 = vsel %vm6878_vm10, %v6750_v59, 0.0  ;;  %v5710_v32 = vmul.f32 %v8430_v49, %v15509_v62  ;;  %v3804_v31 = vcvt.s32.f32 %v15612_v46  ;;  %v336_v62 = vld [vmem:[%s16205_s2 + $0x3b0] sm:$0xff] }
 0x6c2   :  { %v3805_v11 = vcvt.s32.f32 %v15615_v35  ;;  %v6109_v34 = vsel %vm15607_vm11, 1.0, %v5708_v57  ;;  %vm6240_vm7 = vcmp.gt.f32.partialorder %v15563_v39, 0.0  ;;  %vm4827_vm12 = vcmp.eq.f32.partialorder %v4699_v7, 0.0  ;;  %v17685_v57 = vld [vmem:[#allocation236_spill] sm:$0xff] }
 0x6c3   :  { %vm4828_vm8 = vcmp.eq.f32.partialorder %v4700_v6, 0.0  ;;  %v6110_v4 = vsel %vm15625_vm15, 1.0, %v5710_v32  ;;  %v7133_v2 = vmul.f32 %v7005_v37, %v6109_v34  ;;  %v6367_v45 = vadd.f32 1.0, %v15555_v41  ;;  %v17689_v34 = vld [vmem:[#allocation113_spill] sm:$0xff] }
 0x6c4   :  { %v6368_v25 = vadd.f32 1.0, %v15563_v39  ;;  %v7134_v63 = vmul.f32 %v7006_v26, %v6110_v4  ;;  %vm5851_vm5 = vcmp.eq.s32.totalorder %v15522_v22, 0  ;;  %v4955_v8 = vsel %vm4827_vm12, 1.0, %v4699_v7  ;;  %v17686_v7 = vld [vmem:[#allocation154_spill] sm:$0xff]  ;;  %v17687_v26 = vld [vmem:[#allocation237_spill] sm:$0xff] }
 0x6c5   :  { %v4956_v55 = vsel %vm4828_vm8, 1.0, %v4700_v6  ;;  %v7197_v54 = vadd.f32 %v7133_v2, %v17682_v17  ;;  %8435 = vrcp.f32 %v4955_v8  ;;  %v3932_v20 = vadd.f32 1.0, %v3804_v31  ;;  %v17688_v31 = vld [vmem:[#allocation111_spill] sm:$0xff]  ;;  %vm15700_vm9 = vmand %vm5851_vm5, %vm11411_vm1 }
 0x6c6   :  { %v3933_v59 = vadd.f32 1.0, %v3805_v11  ;;  %v7198_v36 = vadd.f32 %v7134_v63, %v17683_v33  ;;  %vm5852_vm3 = vcmp.eq.s32.totalorder %v15525_v60, 0  ;;  %8437 = vrcp.f32 %v4956_v55 }
 0x6c7   :  { %v15652_v58 = vsub.f32 0.0, %v336_v62  ;;  %v8432_v15 = vpop.eup %8431  ;;  %v7229_v49 = vadd.f32 %v7197_v54, %v17684_v53  ;;  %vm6879_vm13 = vcmp.lt.s32.totalorder %v15522_v22, 512  ;;  %v15656_v37 = vsub.f32 0.0, %v337_v48  ;;  %vm5984_vm10 = vmand %vm5852_vm3, %vm11411_vm1 }
 0x6c8   :  { %v5213_v21 = vsub.f32 1.0, %v17685_v57  ;;  %v7230_v6 = vadd.f32 %v7198_v36, %v17686_v7  ;;  %v5214_v32 = vsub.f32 1.0, %v17687_v26  ;;  %v3350_v11 = vadd.f32 %v3210_v43, %v17688_v31 }
 0x6c9   :  { %v3351_v4 = vadd.f32 %v3210_v43, %v17689_v34  ;;  %v8434_v2 = vpop.eup %8433  ;;  %v15664_v62 = vadd.f32 %v7229_v49, %v14944_v10  ;;  %vm6880_vm0 = vcmp.lt.s32.totalorder %v15525_v60, 512  ;;  %v4061_v63 = vadd.f32 %v10176_v19, %v3932_v20  ;;  %v17692_v34 = vld [vmem:[#allocation175_spill] sm:$0xff] }
 0x6ca   :  { %v4062_v8 = vadd.f32 %v10176_v19, %v3933_v59  ;;  %v15670_v55 = vadd.f32 %v7230_v6, %v14950_v0  ;;  %v6615_v48 = vmul.f32 1.442695, %v15652_v58  ;;  %v4317_v17 = vsub.f32 %v10176_v19, %v3350_v11 }
 0x6cb   :  { %v4318_v54 = vsub.f32 %v10176_v19, %v3351_v4  ;;  %v6751_v20 = vsel %vm6239_vm6, %v6367_v45, %v8432_v15  ;;  %v4189_v59 = vsub.f32 %v4061_v63, %v3350_v11  ;;  %v3421_v43 = vadd.s32 480, %v9999_v52 }
 0x6cc   :  { %v4190_v0 = vsub.f32 %v4062_v8, %v3351_v4  ;;  %v6752_v33 = vsel %vm6240_vm7, %v6368_v25, %v8434_v2  ;;  %v6617_v36 = vmul.f32 1.442695, %v15656_v37  ;;  %v5341_v53 = vmul.f32 %v5213_v21, %v4317_v17 }
 0x6cd   :  { %v5342_v49 = vmul.f32 %v5214_v32, %v4318_v54  ;;  %v7621_v7 = vadd.f32 -1.0, %v4189_v59  ;;  %v5085_v6 = vmul.f32 %v4189_v59, %v17685_v57  ;;  %v6054_v41 = vsel %vm15679_vm2, 1.0, %v17692_v34  ;;  %v17730_v34 = vld [vmem:[#allocation48_spill] sm:$0xff] }
 0x6ce   :  { %v7622_v47 = vadd.f32 -1.0, %v4190_v0  ;;  %v5086_v31 = vmul.f32 %v4190_v0, %v17687_v26  ;;  %v7007_v45 = vsel %vm6879_vm13, %v6751_v20, 0.0  ;;  %8439 = vpow2.f32 %v6615_v48 }
 0x6cf   :  { %v3489_v39 = vmul.u32 256, %v3421_v43  ;;  %v8436_v25 = vpop.eup %8435  ;;  %v4573_v21 = vadd.f32 %v7621_v7, %v17685_v57  ;;  %v15706_v11 = vadd.f32 %v5341_v53, %v5085_v6  ;;  %v7008_v63 = vsel %vm6880_vm0, %v6752_v33, 0.0  ;;  %v338_v7 = vld [vmem:[%s16205_s2 + $0x3c0] sm:$0xff]  ;;  %v3215_v6 = vpop.permute.xlu1 %3214 }
 0x6d0   :  { %v4574_v32 = vadd.f32 %v7622_v47, %v17687_v26  ;;  %v15708_v4 = vadd.f32 %v5342_v49, %v5086_v31  ;;  %v8438_v2 = vpop.eup %8437  ;;  %v5712_v8 = vmul.f32 %v8436_v25, %v15593_v40  ;;  %8441 = vpow2.f32 %v6617_v36  ;;  %v17696_v31 = vld [vmem:[#allocation290_spill] sm:$0xff]  ;;  %v17697_v25 = vld [vmem:[#allocation169_spill] sm:$0xff] }
 0x6d1   :  { %v15718_v22 = vadd.s32 %v3489_v39, %v10027_v18  ;;  %v15721_v57 = vadd.s32 %v3489_v39, %v10070_v44  ;;  %v5714_v26 = vmul.f32 %v8438_v2, %v15595_v5  ;;  %v4701_v48 = vmul.f32 %v4573_v21, %v4189_v59  ;;  %v17695_v59 = vld [vmem:[#allocation28_spill] sm:$0xff]  ;;  %v339_v21 = vld [vmem:[%s16205_s2 + $0x3c8] sm:$0xff]  ;;  %v17698_v2 = vld [vmem:[#allocation38_spill] sm:$0xff] }
 0x6d2   :  { %v4702_v17 = vmul.f32 %v4574_v32, %v4190_v0  ;;  %v6111_v54 = vsel %vm15700_vm9, 1.0, %v5712_v8  ;;  %vm6241_vm11 = vcmp.gt.f32.partialorder %v15652_v58, 0.0  ;;  %vm6242_vm4 = vcmp.gt.f32.partialorder %v15656_v37, 0.0 }
 0x6d3   :  { %v3806_v40 = vcvt.s32.f32 %v15718_v22  ;;  %v3807_v60 = vcvt.s32.f32 %v15721_v57  ;;  %v6112_v20 = vsel %vm5984_vm10, 1.0, %v5714_v26  ;;  %v7135_v43 = vmul.f32 %v7007_v45, %v6111_v54  ;;  %v17699_v26 = vld [vmem:[#allocation243_spill] sm:$0xff] }
 0x6d4   :  { %v6369_v33 = vadd.f32 1.0, %v15652_v58  ;;  %v7136_v53 = vmul.f32 %v7008_v63, %v6112_v20  ;;  %v6370_v5 = vadd.f32 1.0, %v15656_v37  ;;  %vm4829_vm15 = vcmp.eq.f32.partialorder %v4701_v48, 0.0 }
 0x6d5   :  { %vm4830_vm6 = vcmp.eq.f32.partialorder %v4702_v17, 0.0  ;;  %v7199_v0 = vadd.f32 %v7135_v43, %v17695_v59  ;;  %v4957_v36 = vsel %vm4829_vm15, 1.0, %v4701_v48  ;;  %v3934_v47 = vadd.f32 1.0, %v3806_v40  ;;  %v17702_v43 = vld [vmem:[#allocation117_spill] sm:$0xff] }
 0x6d6   :  { %v4958_v49 = vsel %vm4830_vm6, 1.0, %v4702_v17  ;;  %v7200_v45 = vadd.f32 %v7136_v53, %v17696_v31  ;;  %vm5853_vm7 = vcmp.eq.s32.totalorder %v15612_v46, 0  ;;  %8443 = vrcp.f32 %v4957_v36  ;;  %v17700_v17 = vld [vmem:[#allocation115_spill] sm:$0xff] }
 0x6d7   :  { %v3935_v39 = vadd.f32 1.0, %v3807_v60  ;;  %v7231_v15 = vadd.f32 %v7199_v0, %v17697_v25  ;;  %vm5854_vm12 = vcmp.eq.s32.totalorder %v15615_v35, 0  ;;  %vm6881_vm8 = vcmp.lt.s32.totalorder %v15612_v46, 512  ;;  %v17701_v60 = vld [vmem:[#allocation244_spill] sm:$0xff]  ;;  %vm15788_vm3 = vmand %vm5853_vm7, %vm11411_vm1 }
 0x6d8   :  { %8445 = vrcp.f32 %v4958_v49  ;;  %v8440_v32 = vpop.eup %8439  ;;  %v7232_v63 = vadd.f32 %v7200_v45, %v17698_v2  ;;  %v15745_v8 = vsub.f32 0.0, %v338_v7  ;;  %v5215_v48 = vsub.f32 1.0, %v17699_v26  ;;  %vm5986_vm13 = vmand %vm5854_vm12, %vm11411_vm1 }
 0x6d9   :  { %v3352_v54 = vadd.f32 %v3215_v6, %v17700_v17  ;;  %v15750_v40 = vadd.f32 %v7231_v15, %v15028_v13  ;;  %v5216_v20 = vsub.f32 1.0, %v17701_v60  ;;  %v3353_v53 = vadd.f32 %v3215_v6, %v17702_v43 }
 0x6da   :  { %v4063_v59 = vadd.f32 %v10176_v19, %v3934_v47  ;;  %v15756_v0 = vadd.f32 %v7232_v63, %v15034_v1  ;;  %v15758_v36 = vsub.f32 0.0, %v339_v21  ;;  %v4064_v49 = vadd.f32 %v10176_v19, %v3935_v39  ;;  %v8442_v31 = vpop.eup %8441 }
 0x6db   :  { %v4319_v7 = vsub.f32 %v10176_v19, %v3352_v54  ;;  %vm6882_vm5 = vcmp.lt.s32.totalorder %v15615_v35, 512  ;;  %v4320_v45 = vsub.f32 %v10176_v19, %v3353_v53  ;;  %v3422_v25 = vadd.s32 488, %v9999_v52 }
 0x6dc   :  { %v4191_v13 = vsub.f32 %v4063_v59, %v3352_v54  ;;  %v6753_v47 = vsel %vm6241_vm11, %v6369_v33, %v8440_v32  ;;  %v6619_v1 = vmul.f32 1.442695, %v15745_v8  ;;  %v4192_v6 = vsub.f32 %v4064_v49, %v3353_v53 }
 0x6dd   :  { %v5343_v15 = vmul.f32 %v5215_v48, %v4319_v7  ;;  %v5344_v2 = vmul.f32 %v5216_v20, %v4320_v45  ;;  %v3490_v63 = vmul.u32 256, %v3422_v25  ;;  %v6754_v17 = vsel %vm6242_vm4, %v6370_v5, %v8442_v31  ;;  %v17708_v5 = vld [vmem:[#allocation246_spill] sm:$0xff] }
 0x6de   :  { %v7623_v21 = vadd.f32 -1.0, %v4191_v13  ;;  %v5087_v39 = vmul.f32 %v4191_v13, %v17699_v26  ;;  %v6621_v54 = vmul.f32 1.442695, %v15758_v36  ;;  %v7624_v43 = vadd.f32 -1.0, %v4192_v6 }
 0x6df   :  { %v5088_v59 = vmul.f32 %v4192_v6, %v17701_v60  ;;  %v15777_v32 = vadd.s32 %v3490_v63, %v10027_v18  ;;  %v15780_v48 = vadd.s32 %v3490_v63, %v10070_v44  ;;  %v7009_v37 = vsel %vm6881_vm8, %v6753_v47, 0.0 }
 0x6e0   :  { %v4575_v58 = vadd.f32 %v7623_v21, %v17699_v26  ;;  %v15774_v33 = vadd.f32 %v5343_v15, %v5087_v39  ;;  %v8444_v20 = vpop.eup %8443  ;;  %8447 = vpow2.f32 %v6619_v1  ;;  %v4576_v26 = vadd.f32 %v7624_v43, %v17701_v60  ;;  %v3220_v21 = vpop.permute.xlu0 %3219  ;;  %v17706_v39 = vld [vmem:[#allocation52_spill] sm:$0xff] }
 0x6e1   :  { %v15793_v53 = vadd.f32 %v5344_v2, %v5088_v59  ;;  %v7010_v7 = vsel %vm6882_vm5, %v6754_v17, 0.0  ;;  %v5716_v31 = vmul.f32 %v8444_v20, %v15706_v11  ;;  %v3808_v45 = vcvt.s32.f32 %v15777_v32 }
 0x6e2   :  { %v8446_v49 = vpop.eup %8445  ;;  %v4703_v46 = vmul.f32 %v4575_v58, %v4191_v13  ;;  %8449 = vpow2.f32 %v6621_v54  ;;  %v4704_v60 = vmul.f32 %v4576_v26, %v4192_v6  ;;  %v3809_v47 = vcvt.s32.f32 %v15780_v48  ;;  %v17707_v54 = vld [vmem:[#allocation32_spill] sm:$0xff]  ;;  %v341_v58 = vld [vmem:[%s16205_s2 + $0x3d8] sm:$0xff] }
 0x6e3   :  { %v5718_v25 = vmul.f32 %v8446_v49, %v15708_v4  ;;  %v17705_v1 = vsel %vm15410_vm14, 1.0, %v17649_v61  ;;  %v6113_v35 = vsel %vm15788_vm3, 1.0, %v5716_v31  ;;  %vm6243_vm0 = vcmp.gt.f32.partialorder %v15745_v8, 0.0  ;;  %v17709_v49 = vld [vmem:[#allocation119_spill] sm:$0xff]  ;;  %v17710_v31 = vld [vmem:[#allocation10_spill] sm:$0xff] }
 0x6e4   :  { %v15810_v11 = vmul.f32 %v14719_v12, %v17705_v1  ;;  %vm4831_vm9 = vcmp.eq.f32.partialorder %v4703_v46, 0.0  ;;  %v7137_v15 = vmul.f32 %v7009_v37, %v6113_v35  ;;  %vm6244_vm10 = vcmp.gt.f32.partialorder %v15758_v36, 0.0  ;;  %v340_v12 = vld [vmem:[%s16205_s2 + $0x3d0] sm:$0xff] }
 0x6e5   :  { %v6114_v13 = vsel %vm5986_vm13, 1.0, %v5718_v25  ;;  %v6371_v4 = vadd.f32 1.0, %v15745_v8  ;;  %vm4832_vm11 = vcmp.eq.f32.partialorder %v4704_v60, 0.0  ;;  %v4959_v30 = vsel %vm4831_vm9, 1.0, %v4703_v46 }
 0x6e6   :  { %v7138_v6 = vmul.f32 %v7010_v7, %v6114_v13  ;;  %v3936_v61 = vadd.f32 1.0, %v3808_v45  ;;  %v7201_v2 = vadd.f32 %v7137_v15, %v17706_v39  ;;  %v4960_v63 = vsel %vm4832_vm11, 1.0, %v4704_v60  ;;  %v17711_v45 = vld [vmem:[#allocation247_spill] sm:$0xff]  ;;  %v17712_v60 = vld [vmem:[#allocation121_spill] sm:$0xff] }
 0x6e7   :  { %8451 = vrcp.f32 %v4959_v30  ;;  %v3937_v17 = vadd.f32 1.0, %v3809_v47  ;;  %vm5855_vm14 = vcmp.eq.s32.totalorder %v15718_v22, 0  ;;  %v6372_v59 = vadd.f32 1.0, %v15758_v36 }
 0x6e8   :  { %v7202_v43 = vadd.f32 %v7138_v6, %v17707_v54  ;;  %8453 = vrcp.f32 %v4960_v63  ;;  %v7233_v20 = vadd.f32 %v7201_v2, %v14409_v3  ;;  %v15828_v37 = vsub.f32 0.0, %v340_v12  ;;  %vm15867_vm12 = vmand %vm5855_vm14, %vm11411_vm1 }
 0x6e9   :  { %v5217_v26 = vsub.f32 1.0, %v17708_v5  ;;  %v3354_v7 = vadd.f32 %v3220_v21, %v17709_v49  ;;  %vm6824_vm4 = vcmp.lt.s32.totalorder %v17710_v31, 512  ;;  %v5218_v25 = vsub.f32 1.0, %v17711_v45 }
 0x6ea   :  { %v7234_v46 = vadd.f32 %v7202_v43, %v14412_v23  ;;  %v3355_v47 = vadd.f32 %v3220_v21, %v17712_v60  ;;  %v4065_v1 = vadd.f32 %v10176_v19, %v3936_v61  ;;  %v8448_v35 = vpop.eup %8447  ;;  %v15838_v13 = vadd.f32 %v7233_v20, %v15118_v56 }
 0x6eb   :  { %v15840_v3 = vsub.f32 0.0, %v341_v58  ;;  %v4066_v15 = vadd.f32 %v10176_v19, %v3937_v17  ;;  %v4321_v6 = vsub.f32 %v10176_v19, %v3354_v7  ;;  %vm5856_vm15 = vcmp.eq.s32.totalorder %v15721_v57, 0 }
 0x6ec   :  { %v15845_v30 = vadd.f32 %v7234_v46, %v15124_v42  ;;  %v4193_v23 = vsub.f32 %v4065_v1, %v3354_v7  ;;  %v4322_v12 = vsub.f32 %v10176_v19, %v3355_v47  ;;  %v8450_v21 = vpop.eup %8449  ;;  %vm6883_vm6 = vcmp.lt.s32.totalorder %v15718_v22, 512  ;;  %vm15882_vm8 = vmand %vm5856_vm15, %vm11411_vm1 }
 0x6ed   :  { %v6623_v56 = vmul.f32 1.442695, %v15828_v37  ;;  %v4194_v61 = vsub.f32 %v4066_v15, %v3355_v47  ;;  %v5345_v39 = vmul.f32 %v5217_v26, %v4321_v6  ;;  %v6755_v2 = vsel %vm6243_vm0, %v6371_v4, %v8448_v35 }
 0x6ee   :  { %v7625_v63 = vadd.f32 -1.0, %v4193_v23  ;;  %v5089_v17 = vmul.f32 %v4193_v23, %v17708_v5  ;;  %v5346_v42 = vmul.f32 %v5218_v25, %v4322_v12  ;;  %v6625_v54 = vmul.f32 1.442695, %v15840_v3 }
 0x6ef   :  { %v7626_v43 = vadd.f32 -1.0, %v4194_v61  ;;  %v5090_v58 = vmul.f32 %v4194_v61, %v17711_v45  ;;  %v3423_v20 = vadd.s32 496, %v9999_v52  ;;  %v6756_v49 = vsel %vm6244_vm10, %v6372_v59, %v8450_v21 }
 0x6f0   :  { %vm6884_vm7 = vcmp.lt.s32.totalorder %v15721_v57, 512  ;;  %v4577_v26 = vadd.f32 %v7625_v63, %v17708_v5  ;;  %v15861_v8 = vadd.f32 %v5345_v39, %v5089_v17  ;;  %8455 = vpow2.f32 %v6623_v56  ;;  %v342_v39 = vld [vmem:[%s16205_s2 + $0x3e0] sm:$0xff]  ;;  %v343_v17 = vld [vmem:[%s16205_s2 + $0x3e8] sm:$0xff] }
 0x6f1   :  { %v8452_v4 = vpop.eup %8451  ;;  %v4578_v46 = vadd.f32 %v7626_v43, %v17711_v45  ;;  %v15872_v36 = vadd.f32 %v5346_v42, %v5090_v58  ;;  %v3491_v59 = vmul.u32 256, %v3423_v20  ;;  %v6503_v5 = vmul.f32 1.442695, %v15064_v50  ;;  %v3225_v43 = vpop.permute.xlu1 %3224  ;;  %v17717_v58 = vld [vmem:[#allocation177_spill] sm:$0xff] }
 0x6f2   :  { %v8454_v25 = vpop.eup %8453  ;;  %v7011_v60 = vsel %vm6883_vm6, %v6755_v2, 0.0  ;;  %v5720_v47 = vmul.f32 %v8452_v4, %v15774_v33  ;;  %v4705_v45 = vmul.f32 %v4577_v26, %v4193_v23  ;;  %v7012_v35 = vsel %vm6884_vm7, %v6756_v49, 0.0  ;;  %v17718_v26 = vld [vmem:[#allocation208_spill] sm:$0xff] }
 0x6f3   :  { %v5722_v15 = vmul.f32 %v8454_v25, %v15793_v53  ;;  %8457 = vpow2.f32 %v6625_v54  ;;  %v4706_v6 = vmul.f32 %v4578_v46, %v4194_v61  ;;  %v15890_v33 = vadd.s32 %v3491_v59, %v10027_v18 }
 0x6f4   :  { %v6115_v22 = vsel %vm15867_vm12, 1.0, %v5720_v47  ;;  %vm4833_vm5 = vcmp.eq.f32.partialorder %v4705_v45, 0.0  ;;  %v15893_v12 = vadd.s32 %v3491_v59, %v10070_v44  ;;  %v15898_v57 = vsel %vm6824_vm4, %v15601_v9, 0.0 }
 0x6f5   :  { %v6116_v53 = vsel %vm15882_vm8, 1.0, %v5722_v15  ;;  %v7139_v23 = vmul.f32 %v7011_v60, %v6115_v22  ;;  %vm4834_vm3 = vcmp.eq.f32.partialorder %v4706_v6, 0.0  ;;  %8459 = vpow2.f32 %v6503_v5  ;;  %v17719_v60 = vld [vmem:[#allocation122_spill] sm:$0xff] }
 0x6f6   :  { %v6505_v21 = vmul.f32 1.442695, %v15152_v16  ;;  %v7140_v56 = vmul.f32 %v7012_v35, %v6116_v53  ;;  %v4961_v61 = vsel %vm4833_vm5, 1.0, %v4705_v45  ;;  %vm6245_vm13 = vcmp.gt.f32.partialorder %v15828_v37, 0.0  ;;  %v17720_v45 = vld [vmem:[#allocation124_spill] sm:$0xff] }
 0x6f7   :  { %v7203_v2 = vadd.f32 %v7139_v23, %v14544_v28  ;;  %v4962_v9 = vsel %vm4834_vm3, 1.0, %v4706_v6  ;;  %8461 = vrcp.f32 %v4961_v61  ;;  %v3810_v42 = vcvt.s32.f32 %v15890_v33 }
 0x6f8   :  { %v7204_v63 = vadd.f32 %v7140_v56, %v14828_v38  ;;  %8463 = vrcp.f32 %v4962_v9  ;;  %v3811_v54 = vcvt.s32.f32 %v15893_v12  ;;  %vm6246_vm0 = vcmp.gt.f32.partialorder %v15840_v3, 0.0 }
 0x6f9   :  { %v7235_v20 = vadd.f32 %v7203_v2, %v17717_v58  ;;  %v6373_v28 = vadd.f32 1.0, %v15828_v37  ;;  %v15917_v49 = vsub.f32 0.0, %v342_v39  ;;  %v6374_v4 = vadd.f32 1.0, %v15840_v3 }
 0x6fa   :  { %v7236_v38 = vadd.f32 %v7204_v63, %v17718_v26  ;;  %v3938_v7 = vadd.f32 1.0, %v3810_v42  ;;  %v3939_v46 = vadd.f32 1.0, %v3811_v54  ;;  %v8456_v59 = vpop.eup %8455  ;;  %vm5857_vm9 = vcmp.eq.s32.totalorder %v15777_v32, 0 }
 0x6fb   :  { %v7251_v25 = vadd.f32 %v7235_v20, %v15207_v27  ;;  %v15923_v5 = vsub.f32 0.0, %v343_v17  ;;  %v15926_v47 = vadd.f32 %v3225_v43, %v17719_v60  ;;  %v15930_v35 = vadd.f32 %v3225_v43, %v17720_v45  ;;  %v17721_v43 = vld [vmem:[#allocation159_spill] sm:$0xff]  ;;  %vm15978_vm4 = vmand %vm5857_vm9, %vm11411_vm1 }
 0x6fc   :  { %v7252_v1 = vadd.f32 %v7236_v38, %v15213_v29  ;;  %v4067_v15 = vadd.f32 %v10176_v19, %v3938_v7  ;;  %v4068_v6 = vadd.f32 %v10176_v19, %v3939_v46  ;;  %vm5858_vm10 = vcmp.eq.s32.totalorder %v15780_v48, 0 }
 0x6fd   :  { %v8458_v22 = vpop.eup %8457  ;;  %v15935_v53 = vadd.f32 %v7251_v25, %v15574_v14  ;;  %vm6885_vm11 = vcmp.lt.s32.totalorder %v15777_v32, 512  ;;  %v6627_v27 = vmul.f32 1.442695, %v15917_v49  ;;  %v6757_v29 = vsel %vm6245_vm13, %v6373_v28, %v8456_v59  ;;  %v8545_v14 = vld [vmem:[%s16202_s3 + $0x1f0] sm:$0xff]  ;;  %vm15987_vm2 = vmand %vm5858_vm10, %vm11411_vm1 }
 0x6fe   :  { %v15941_v23 = vadd.f32 %v7252_v1, %v15580_v51  ;;  %v15946_v56 = vsub.f32 %v4067_v15, %v15926_v47  ;;  %v15949_v61 = vsub.f32 %v4068_v6, %v15930_v35  ;;  %vm6886_vm14 = vcmp.lt.s32.totalorder %v15780_v48, 512 }
 0x6ff   :  { %v15955_v39 = vunpack.c.l.bf16 %v8545_v14  ;;  %v6629_v51 = vmul.f32 1.442695, %v15923_v5  ;;  %v3424_v2 = vadd.s32 504, %v9999_v52  ;;  %v15959_v37 = vpop.eup %8459  ;;  %v6758_v9 = vsel %vm6246_vm0, %v6374_v4, %v8458_v22 }
 0x700   :  { %v15963_v63 = vunpack.c.h.bf16 %v8545_v14  ;;  %v7627_v17 = vadd.f32 -1.0, %v15946_v56  ;;  %v7628_v42 = vadd.f32 -1.0, %v15949_v61  ;;  %v7078_v58 = vmul.f32 %v17721_v43, %v6054_v41  ;;  %v3230_v43 = vpop.permute.xlu0 %3229 }
 0x701   :  { %v8462_v54 = vpop.eup %8461  ;;  %8465 = vpow2.f32 %v6505_v21  ;;  %v7013_v52 = vsel %vm6885_vm11, %v6757_v29, 0.0  ;;  %v3492_v20 = vmul.u32 256, %v3424_v2  ;;  %v17726_v21 = vld [vmem:[#allocation80_spill] sm:$0xff]  ;;  %v7014_v26 = vsel %vm6886_vm14, %v6758_v9, 0.0  ;;  %v17727_v29 = vld [vmem:[#allocation209_spill] sm:$0xff]  ;;  %v17728_v2 = vld [vmem:[#allocation86_spill] sm:$0xff] }
 0x702   :  { %v8464_v28 = vpop.eup %8463  ;;  %v5724_v10 = vmul.f32 %v8462_v54, %v15861_v8  ;;  %8467 = vpow2.f32 %v6627_v27  ;;  %v4579_v41 = vadd.f32 %v7627_v17, %v15955_v39  ;;  %v4580_v32 = vadd.f32 %v7628_v42, %v15963_v63 }
 0x703   :  { %vm5795_vm15 = vcmp.eq.s32.totalorder %v17726_v21, 0  ;;  %v5726_v8 = vmul.f32 %v8464_v28, %v15872_v36  ;;  %8469 = vpow2.f32 %v6629_v51  ;;  %v15998_v38 = vadd.s32 %v3492_v20, %v10027_v18  ;;  %v345_v51 = vld [vmem:[%s16205_s2 + $0x3f8] sm:$0xff] }
 0x704   :  { %v6117_v4 = vsel %vm15978_vm4, 1.0, %v5724_v10  ;;  %v4707_v7 = vmul.f32 %v4579_v41, %v15946_v56  ;;  %v4708_v46 = vmul.f32 %v4580_v32, %v15949_v61  ;;  %v16005_v59 = vadd.s32 %v3492_v20, %v10070_v44  ;;  %vm16057_vm13 = vmand %vm5795_vm15, %vm11411_vm1 }
 0x705   :  { %vm5796_vm6 = vcmp.eq.s32.totalorder %v17710_v31, 0  ;;  %v6118_v48 = vsel %vm15987_vm2, 1.0, %v5726_v8  ;;  %v7141_v36 = vmul.f32 %v7013_v52, %v6117_v4  ;;  %v5219_v25 = vsub.f32 1.0, %v15955_v39  ;;  %v17729_v52 = vld [vmem:[#allocation46_spill] sm:$0xff]  ;;  %v8546_v31 = vld [vmem:[%s16202_s3 + $0x1f8] sm:$0xff] }
 0x706   :  { %v5220_v18 = vsub.f32 1.0, %v15963_v63  ;;  %v7142_v60 = vmul.f32 %v7014_v26, %v6118_v48  ;;  %v4323_v1 = vsub.f32 %v10176_v19, %v15926_v47  ;;  %vm4835_vm7 = vcmp.eq.f32.partialorder %v4707_v7, 0.0  ;;  %vm16075_vm11 = vmand %vm5796_vm6, %vm11411_vm1 }
 0x707   :  { %vm4836_vm12 = vcmp.eq.f32.partialorder %v4708_v46, 0.0  ;;  %v7205_v45 = vadd.f32 %v7141_v36, %v15810_v11  ;;  %v4963_v44 = vsel %vm4835_vm7, 1.0, %v4707_v7  ;;  %v3812_v6 = vcvt.s32.f32 %v15998_v38  ;;  %v344_v11 = vld [vmem:[%s16205_s2 + $0x3f0] sm:$0xff]  ;;  %v17732_v36 = vld [vmem:[#allocation128_spill] sm:$0xff] }
 0x708   :  { %v4964_v15 = vsel %vm4836_vm12, 1.0, %v4708_v46  ;;  %v7206_v22 = vadd.f32 %v7142_v60, %v7078_v58  ;;  %vm6247_vm8 = vcmp.gt.f32.partialorder %v15917_v49, 0.0  ;;  %8471 = vrcp.f32 %v4963_v44  ;;  %v17731_v46 = vld [vmem:[#allocation126_spill] sm:$0xff] }
 0x709   :  { %v3813_v27 = vcvt.s32.f32 %v16005_v59  ;;  %v7237_v14 = vadd.f32 %v7205_v45, %v17727_v29  ;;  %vm6248_vm5 = vcmp.gt.f32.partialorder %v15923_v5, 0.0  ;;  %v6375_v47 = vadd.f32 1.0, %v15917_v49  ;;  %v17737_v45 = vld [vmem:[#allocation44_spill] sm:$0xff] }
 0x70a   :  { %8473 = vrcp.f32 %v4964_v15  ;;  %v7238_v9 = vadd.f32 %v7206_v22, %v17728_v2  ;;  %v4324_v17 = vsub.f32 %v10176_v19, %v15930_v35  ;;  %v3940_v42 = vadd.f32 1.0, %v3812_v6  ;;  %v17740_v2 = vld [vmem:[#allocation50_spill] sm:$0xff] }
 0x70b   :  { %v3941_v54 = vadd.f32 1.0, %v3813_v27  ;;  %v16030_v58 = vpop.eup %8465  ;;  %v7253_v3 = vadd.f32 %v7237_v14, %v17729_v52  ;;  %vm5859_vm3 = vcmp.eq.s32.totalorder %v15890_v33, 0  ;;  %v6376_v20 = vadd.f32 1.0, %v15923_v5 }
 0x70c   :  { %v5347_v28 = vmul.f32 %v5219_v25, %v4323_v1  ;;  %v8468_v10 = vpop.eup %8467  ;;  %v7254_v41 = vadd.f32 %v7238_v9, %v17730_v34  ;;  %v5091_v32 = vmul.f32 %v15946_v56, %v15955_v39  ;;  %v16038_v26 = vsub.f32 0.0, %v344_v11  ;;  %vm16097_vm14 = vmand %vm5859_vm3, %vm11411_vm1  ;;  %v17742_v56 = vld [vmem:[#allocation88_spill] sm:$0xff] }
 0x70d   :  { %v16040_v35 = vsub.f32 0.0, %v345_v51  ;;  %v8470_v8 = vpop.eup %8469  ;;  %v16043_v4 = vadd.f32 %v7253_v3, %v15664_v62  ;;  %v5092_v7 = vmul.f32 %v15949_v61, %v15963_v63  ;;  %v16048_v48 = vadd.f32 %v3230_v43, %v17731_v46 }
 0x70e   :  { %v16051_v25 = vadd.f32 %v3230_v43, %v17732_v36  ;;  %v16062_v62 = vadd.f32 %v7254_v41, %v15670_v55  ;;  %v5348_v39 = vmul.f32 %v5220_v18, %v4324_v17  ;;  %v4069_v61 = vadd.f32 %v10176_v19, %v3940_v42 }
 0x70f   :  { %v4070_v63 = vadd.f32 %v10176_v19, %v3941_v54  ;;  %vm5860_vm0 = vcmp.eq.s32.totalorder %v15893_v12, 0  ;;  %v6759_v60 = vsel %vm6247_vm8, %v6375_v47, %v8468_v10  ;;  %vm6887_vm9 = vcmp.lt.s32.totalorder %v15890_v33, 512 }
 0x710   :  { %vm6888_vm10 = vcmp.lt.s32.totalorder %v15893_v12, 512  ;;  %v6760_v21 = vsel %vm6248_vm5, %v6376_v20, %v8470_v8  ;;  %v6631_v18 = vmul.f32 1.442695, %v16038_v26  ;;  %v4197_v49 = vsub.f32 %v4069_v61, %v16048_v48  ;;  %vm5992_vm4 = vmand %vm5860_vm0, %vm11411_vm1  ;;  %v17741_v20 = vld [vmem:[#allocation139_spill] sm:$0xff] }
 0x711   :  { %v16084_v1 = vsub.f32 %v4070_v63, %v16051_v25  ;;  %v6055_v44 = vsel %vm16057_vm13, 1.0, %v17737_v45  ;;  %v5475_v15 = vadd.f32 %v5347_v28, %v5091_v32  ;;  %v216_v6 = vunpack.c.l.bf16 %v8546_v31  ;;  %v17743_v63 = vld [vmem:[#allocation34_spill] sm:$0xff] }
 0x712   :  { %v6633_v5 = vmul.f32 1.442695, %v16040_v35  ;;  %v8472_v22 = vpop.eup %8471  ;;  %v5476_v27 = vadd.f32 %v5348_v39, %v5092_v7  ;;  %v217_v14 = vunpack.c.h.bf16 %v8546_v31  ;;  %v7629_v47 = vadd.f32 -1.0, %v4197_v49 }
 0x713   :  { %v7630_v11 = vadd.f32 -1.0, %v16084_v1  ;;  %v6056_v9 = vsel %vm16075_vm11, 1.0, %v17740_v2  ;;  %v7015_v17 = vsel %vm6887_vm9, %v6759_v60, 0.0  ;;  %v7016_v42 = vsel %vm6888_vm10, %v6760_v21, 0.0 }
 0x714   :  { %v8474_v51 = vpop.eup %8473  ;;  %v5728_v54 = vmul.f32 %v8472_v22, %v5475_v15  ;;  %8475 = vpow2.f32 %v6631_v18  ;;  %v4581_v52 = vadd.f32 %v7629_v47, %v216_v6  ;;  %v7079_v28 = vmul.f32 %v17741_v20, %v6055_v44  ;;  %v17745_v15 = vld [vmem:[#allocation146_spill] sm:$0xff]  ;;  %v17747_v47 = vld [vmem:[#allocation12_spill] sm:$0xff] }
 0x715   :  { %v5730_v43 = vmul.f32 %v8474_v51, %v5476_v27  ;;  %v4582_v3 = vadd.f32 %v7630_v11, %v217_v14  ;;  %8477 = vpow2.f32 %v6633_v5  ;;  %v7080_v8 = vmul.f32 %v15898_v57, %v6056_v9  ;;  %v17744_v57 = vld [vmem:[#allocation294_spill] sm:$0xff] }
 0x716   :  { %v6119_v10 = vsel %vm16097_vm14, 1.0, %v5728_v54  ;;  %v4709_v41 = vmul.f32 %v4581_v52, %v4197_v49  ;;  %vm6185_vm6 = vcmp.gt.f32.partialorder %v15064_v50, 0.0  ;;  %v5221_v55 = vsub.f32 1.0, %v216_v6  ;;  %v17746_v22 = vld [vmem:[#allocation90_spill] sm:$0xff] }
 0x717   :  { %v6120_v33 = vsel %vm5992_vm4, 1.0, %v5730_v43  ;;  %v7143_v34 = vmul.f32 %v7015_v17, %v6119_v10  ;;  %v4710_v32 = vmul.f32 %v4582_v3, %v16084_v1  ;;  %v4325_v21 = vsub.f32 %v10176_v19, %v16048_v48  ;;  %v17753_v3 = vld [vmem:[#allocation277_spill] sm:$0xff] }
 0x718   :  { %v7144_v7 = vmul.f32 %v7016_v42, %v6120_v33  ;;  %vm4837_vm2 = vcmp.eq.f32.partialorder %v4709_v41, 0.0  ;;  %vm6186_vm7 = vcmp.gt.f32.partialorder %v15152_v16, 0.0  ;;  %v5222_v45 = vsub.f32 1.0, %v217_v14 }
 0x719   :  { %v7207_v12 = vadd.f32 %v7143_v34, %v7079_v28  ;;  %vm4838_vm15 = vcmp.eq.f32.partialorder %v4710_v32, 0.0  ;;  %v4965_v36 = vsel %vm4837_vm2, 1.0, %v4709_v41  ;;  %v4326_v44 = vsub.f32 %v10176_v19, %v16051_v25 }
 0x71a   :  { %v7208_v46 = vadd.f32 %v7144_v7, %v7080_v8  ;;  %v4966_v61 = vsel %vm4838_vm15, 1.0, %v4710_v32  ;;  %8479 = vrcp.f32 %v4965_v36  ;;  %vm5797_vm12 = vcmp.eq.s32.totalorder %v17745_v15, 0  ;;  %v17755_v36 = vld [vmem:[#allocation40_spill] sm:$0xff] }
 0x71b   :  { %v7239_v39 = vadd.f32 %v7207_v12, %v17742_v56  ;;  %8481 = vrcp.f32 %v4966_v61  ;;  %v6313_v31 = vadd.f32 1.0, %v15064_v50  ;;  %v6314_v5 = vadd.f32 1.0, %v15152_v16  ;;  %vm16151_vm10 = vmand %vm5797_vm12, %vm11411_vm1 }
 0x71c   :  { %v7240_v60 = vadd.f32 %v7208_v46, %v17743_v63  ;;  %vm5798_vm8 = vcmp.eq.s32.totalorder %v17747_v47, 0  ;;  %vm6249_vm5 = vcmp.gt.f32.partialorder %v16038_v26, 0.0  ;;  %v6377_v11 = vadd.f32 1.0, %v16038_v26  ;;  %v17754_v46 = vld [vmem:[#allocation36_spill] sm:$0xff]  ;;  %v17757_v63 = vld [vmem:[#allocation286_spill] sm:$0xff] }
 0x71d   :  { %v7255_v18 = vadd.f32 %v7239_v39, %v17744_v57  ;;  %v6378_v25 = vadd.f32 1.0, %v16040_v35  ;;  %v5093_v2 = vmul.f32 %v4197_v49, %v216_v6  ;;  %v5349_v9 = vmul.f32 %v5221_v55, %v4325_v21  ;;  %vm16166_vm4 = vmand %vm5798_vm8, %vm11411_vm1  ;;  %v17756_v39 = vld [vmem:[#allocation214_spill] sm:$0xff] }
 0x71e   :  { %v7256_v27 = vadd.f32 %v7240_v60, %v17746_v22  ;;  %v8476_v29 = vpop.eup %8475  ;;  %vm6250_vm3 = vcmp.gt.f32.partialorder %v16040_v35, 0.0  ;;  %v5094_v42 = vmul.f32 %v16084_v1, %v217_v14  ;;  %v5350_v54 = vmul.f32 %v5222_v45, %v4326_v44 }
 0x71f   :  { %v7263_v48 = vadd.f32 %v7255_v18, %v15750_v40  ;;  %v8478_v51 = vpop.eup %8477  ;;  %vm6825_vm13 = vcmp.lt.s32.totalorder %v17745_v15, 512  ;;  %vm6826_vm0 = vcmp.lt.s32.totalorder %v17747_v47, 512  ;;  %vm5861_vm9 = vcmp.eq.s32.totalorder %v15998_v38, 0 }
 0x720   :  { %v7264_v19 = vadd.f32 %v7256_v27, %v15756_v0  ;;  %v6697_v0 = vsel %vm6185_vm6, %v6313_v31, %v15959_v37  ;;  %vm5862_vm11 = vcmp.eq.s32.totalorder %v16005_v59, 0  ;;  %v6761_v35 = vsel %vm6249_vm5, %v6377_v11, %v8476_v29  ;;  %vm5993_vm15 = vmand %vm5861_vm9, %vm11411_vm1 }
 0x721   :  { %v7267_v17 = vadd.f32 %v7263_v48, %v15935_v53  ;;  %vm6889_vm14 = vcmp.lt.s32.totalorder %v15998_v38, 512  ;;  %v6698_v50 = vsel %vm6186_vm7, %v6314_v5, %v16030_v58  ;;  %v6762_v37 = vsel %vm6250_vm3, %v6378_v25, %v8478_v51  ;;  %v17752_v58 = vld [vmem:[#allocation30_spill] sm:$0xff]  ;;  %vm5994_vm6 = vmand %vm5862_vm11, %vm11411_vm1 }
 0x722   :  { %v7268_v40 = vadd.f32 %v7264_v19, %v15941_v23  ;;  %vm6890_vm2 = vcmp.lt.s32.totalorder %v16005_v59, 512  ;;  %v5477_v49 = vadd.f32 %v5349_v9, %v5093_v2  ;;  %v5478_v1 = vadd.f32 %v5350_v54, %v5094_v42 }
 0x723   :  { %v6953_v16 = vsel %vm6825_vm13, %v6697_v0, 0.0  ;;  %v6057_v6 = vsel %vm16151_vm10, 1.0, %v17752_v58  ;;  %v7017_v14 = vsel %vm6889_vm14, %v6761_v35, 0.0  ;;  %v6954_v52 = vsel %vm6826_vm0, %v6698_v50, 0.0 }
 0x724   :  { %v8480_v26 = vpop.eup %8479  ;;  %v6058_v20 = vsel %vm16166_vm4, 1.0, %v17753_v3  ;;  %v7018_v28 = vsel %vm6890_vm2, %v6762_v37, 0.0  ;;  %v7081_v34 = vmul.f32 %v6953_v16, %v6057_v6 }
 0x725   :  { %v8482_v38 = vpop.eup %8481  ;;  %v5732_v43 = vmul.f32 %v8480_v26, %v5477_v49  ;;  %v7082_v8 = vmul.f32 %v6954_v52, %v6058_v20 }
 0x726   :  { %v5734_v10 = vmul.f32 %v8482_v38, %v5478_v1 }
 0x727   :  { %v6121_v33 = vsel %vm5993_vm15, 1.0, %v5732_v43 }
 0x728   :  { %v6122_v41 = vsel %vm5994_vm6, 1.0, %v5734_v10  ;;  %v7145_v32 = vmul.f32 %v7017_v14, %v6121_v33 }
 0x729   :  { %v7146_v7 = vmul.f32 %v7018_v28, %v6122_v41 }
 0x72a   :  { %v7209_v12 = vadd.f32 %v7145_v32, %v7081_v34 }
 0x72b   :  { %v7210_v24 = vadd.f32 %v7146_v7, %v7082_v8 }
 0x72c   :  { %v7241_v59 = vadd.f32 %v7209_v12, %v17754_v46 }
 0x72d   :  { %v7242_v56 = vadd.f32 %v7210_v24, %v17755_v36 }
 0x72e   :  { %v7257_v61 = vadd.f32 %v7241_v59, %v17756_v39 }
 0x72f   :  { %v7258_v60 = vadd.f32 %v7242_v56, %v17757_v63 }
 0x730   :  { %v7265_v55 = vadd.f32 %v7257_v61, %v15838_v13 }
 0x731   :  { %v7266_v21 = vadd.f32 %v7258_v60, %v15845_v30 }
 0x732   :  { %v7269_v57 = vadd.f32 %v7265_v55, %v16043_v4 }
 0x733   :  { %v7270_v18 = vadd.f32 %v7266_v21, %v16062_v62 }
 0x734   :  { %v7271_v45 = vadd.f32 %v7269_v57, %v7267_v17 }
 0x735   :  { %v7272_v44 = vadd.f32 %v7270_v18, %v7268_v40 }
 0x736   :  { %7273 = vst [vmem:[%s16207_s6] sm:$0xff] %v7271_v45 }
 0x737   :  { %7274 = vst [vmem:[%s16207_s6 + $0x8] sm:$0xff] %v7272_v44 }

</bundles_post_ra>
